<compile_context>
chip_gen: v6e
topology: v6e:2x2x1
jax: 0.10.0
libtpu: 0.0.40
codegen_flags: <defaults>
</compile_context>

<pallas_src>
import math
import functools

import jax
import jax.numpy as jnp
from jax.experimental import pallas as pl
from jax.experimental.pallas import tpu as pltpu


# ----------------------------------------------------------------------------- utils
def _rup(v, m):
    return (v + m - 1) // m * m


def _cp(*sem):
    return pltpu.CompilerParams(dimension_semantics=tuple(sem),
                                vmem_limit_bytes=48 * 1024 * 1024)


# ----------------------------------------------------------------------------- tiled matmul (MXU, bf16 in / f32 acc)
def _matmul_kernel(a_ref, b_ref, o_ref, acc_ref):
    @pl.when(pl.program_id(2) == 0)
    def _():
        acc_ref[...] = jnp.zeros_like(acc_ref)

    acc_ref[...] += jnp.dot(a_ref[...], b_ref[...],
                            preferred_element_type=jnp.float32)

    @pl.when(pl.program_id(2) == pl.num_programs(2) - 1)
    def _():
        o_ref[...] = acc_ref[...]


def pallas_matmul(a, b, tm=256, tn=256, tk=512):
    """(M,K) @ (K,N) -> (M,N) f32.  bf16 operands, tiled grid, f32 accumulator."""
    M, K = a.shape
    K2, N = b.shape
    assert K == K2
    tm = min(tm, _rup(M, 8))
    tn = min(tn, _rup(N, 128))
    tk = min(tk, _rup(K, 128))
    Mp, Kp, Np = _rup(M, tm), _rup(K, tk), _rup(N, tn)
    ap = jnp.pad(a, ((0, Mp - M), (0, Kp - K))).astype(jnp.bfloat16)
    bp = jnp.pad(b, ((0, Kp - K), (0, Np - N))).astype(jnp.bfloat16)
    out = pl.pallas_call(
        _matmul_kernel,
        out_shape=jax.ShapeDtypeStruct((Mp, Np), jnp.float32),
        grid=(Mp // tm, Np // tn, Kp // tk),
        in_specs=[pl.BlockSpec((tm, tk), lambda i, j, k: (i, k)),
                  pl.BlockSpec((tk, tn), lambda i, j, k: (k, j))],
        out_specs=pl.BlockSpec((tm, tn), lambda i, j, k: (i, j)),
        scratch_shapes=[pltpu.VMEM((tm, tn), jnp.float32)],
        compiler_params=_cp("parallel", "parallel", "arbitrary"),
    )(ap, bp)
    return out[:M, :N]


# ----------------------------------------------------------------------------- GroupNorm stats -> per-channel scale/bias
def _gn_stats_kernel(x_ref, oh_ref, ohT_ref, g_ref, b_ref,
                     scale_ref, bias_ref, *, inv_count, eps):
    x = x_ref[0]                                              # (HW, C) f32
    s = jnp.sum(x, axis=0, keepdims=True)                     # (1, C)
    sq = jnp.sum(x * x, axis=0, keepdims=True)                # (1, C)
    gs = jnp.dot(s, oh_ref[...], preferred_element_type=jnp.float32)    # (1, G)
    gsq = jnp.dot(sq, oh_ref[...], preferred_element_type=jnp.float32)  # (1, G)
    mean_g = gs * inv_count
    var_g = jnp.maximum(gsq * inv_count - mean_g * mean_g, 0.0)          # clamp >= 0
    mean_c = jnp.dot(mean_g, ohT_ref[...], preferred_element_type=jnp.float32)
    var_c = jnp.dot(var_g, ohT_ref[...], preferred_element_type=jnp.float32)
    rstd_c = jax.lax.rsqrt(var_c + eps)
    scale = g_ref[...] * rstd_c
    scale_ref[0] = scale
    bias_ref[0] = b_ref[...] - mean_c * scale


def gn_scale_bias(x_nhwc, gamma, beta, groups=16, eps=1e-5):
    """GroupNorm(x) == scale * x + bias (per sample, per channel)."""
    N, H, W, C = x_nhwc.shape
    HW = H * W
    G = groups
    assert C % G == 0
    cg = C // G
    x2 = x_nhwc.reshape(N, HW, C)
    oh = (jnp.arange(C)[:, None] // cg == jnp.arange(G)[None, :]).astype(jnp.float32)
    ohT = jnp.transpose(oh)
    kernel = functools.partial(_gn_stats_kernel,
                               inv_count=1.0 / float(HW * cg), eps=eps)
    scale, bias = pl.pallas_call(
        kernel,
        out_shape=(jax.ShapeDtypeStruct((N, 1, C), jnp.float32),
                   jax.ShapeDtypeStruct((N, 1, C), jnp.float32)),
        grid=(N,),
        in_specs=[pl.BlockSpec((1, HW, C), lambda n: (n, 0, 0)),
                  pl.BlockSpec((C, G), lambda n: (0, 0)),
                  pl.BlockSpec((G, C), lambda n: (0, 0)),
                  pl.BlockSpec((1, C), lambda n: (0, 0)),
                  pl.BlockSpec((1, C), lambda n: (0, 0))],
        out_specs=(pl.BlockSpec((1, 1, C), lambda n: (n, 0, 0)),
                   pl.BlockSpec((1, 1, C), lambda n: (n, 0, 0))),
        compiler_params=_cp("parallel"),
    )(x2, oh, ohT, gamma.reshape(1, C), beta.reshape(1, C))
    return scale, bias                                        # (N, 1, C) each


# ----------------------------------------------------------------------------- fused GN-affine + ReLU + 3x3 conv (stride 1, pad 1)
def _gnrelu_conv3x3_kernel(x_ref, s_ref, b_ref, w_ref, o_ref, tbuf,
                           *, hw, width, base):
    # 1) build H-padded, GN-normalized, ReLU'd activation in VMEM (bf16)
    tbuf[...] = jnp.zeros_like(tbuf)
    x = x_ref[0]                                              # (HW, Cin) f32
    t = jnp.maximum(x * s_ref[0] + b_ref[0], 0.0).astype(tbuf.dtype)
    tbuf[pl.ds(base, hw), :] = t

    # 2) width-border masks (H padding is handled by the zero rows in tbuf)
    col = jax.lax.broadcasted_iota(jnp.int32, (hw, 1), 0) % width
    not_left = (col != 0).astype(tbuf.dtype)
    not_right = (col != width - 1).astype(tbuf.dtype)

    # 3) accumulate the 9 taps as shifted 2-D matmuls (bf16 in, f32 acc)
    acc = jnp.zeros((hw, o_ref.shape[2]), jnp.float32)
    for di in range(3):
        for dj in range(3):
            off = base + (di - 1) * width + (dj - 1)
            sl = tbuf[pl.ds(off, hw), :]
            if dj == 0:
                sl = sl * not_left
            elif dj == 2:
                sl = sl * not_right
            acc = acc + jnp.dot(sl, w_ref[di * 3 + dj],
                                preferred_element_type=jnp.float32)
    o_ref[0] = acc


def gnrelu_conv3x3(x_nhwc, scale, bias, w_oihw):
    """conv3x3(relu(scale*x+bias)), stride 1, pad 1, bias-free (fused GN+ReLU+conv)."""
    # TODO(synk): for large resolutions this should additionally tile the spatial /
    #             Cout dims instead of holding one full sample plane per grid step.
    N, H, W, Cin = x_nhwc.shape
    Cout = w_oihw.shape[0]
    HW = H * W
    x2 = x_nhwc.reshape(N, HW, Cin)
    w = jnp.transpose(w_oihw, (2, 3, 1, 0)).reshape(9, Cin, Cout).astype(jnp.bfloat16)
    base = _rup(W + 1, 8)
    rows = _rup(base + HW + W + 1, 8)
    kernel = functools.partial(_gnrelu_conv3x3_kernel, hw=HW, width=W, base=base)
    out = pl.pallas_call(
        kernel,
        out_shape=jax.ShapeDtypeStruct((N, HW, Cout), jnp.float32),
        grid=(N,),
        in_specs=[pl.BlockSpec((1, HW, Cin), lambda n: (n, 0, 0)),
                  pl.BlockSpec((1, 1, Cin), lambda n: (n, 0, 0)),
                  pl.BlockSpec((1, 1, Cin), lambda n: (n, 0, 0)),
                  pl.BlockSpec((9, Cin, Cout), lambda n: (0, 0, 0))],
        out_specs=pl.BlockSpec((1, HW, Cout), lambda n: (n, 0, 0)),
        scratch_shapes=[pltpu.VMEM((rows, Cin), jnp.bfloat16)],
        compiler_params=_cp("parallel"),
    )(x2, scale, bias, w)
    return out.reshape(N, H, W, Cout)


# ----------------------------------------------------------------------------- fused cascade (channel add) + 2x2 avg pool
def _cascade_pool_kernel(h_ref, x_ref, o_ref, *, Ci, Co):
    h = h_ref[0]                                  # (Ho, 2, Wo, 2*Co)
    x = x_ref[0]                                  # (Ho, 2, Wo, 2*Ci)
    hu = h[:, 0] + h[:, 1]                        # pool over H pairs
    xu = x[:, 0] + x[:, 1]
    hp = 0.25 * (hu[:, :, :Co] + hu[:, :, Co:])   # pool over W pairs (lane slices)
    xp = 0.25 * (xu[:, :, :Ci] + xu[:, :, Ci:])
    if Co == Ci:
        out = hp + xp
    elif Co > Ci:
        pad = jnp.zeros(xp.shape[:-1] + (Co - Ci,), xp.dtype)
        out = hp + jnp.concatenate([xp, pad], axis=-1)
    else:
        out = hp + xp[..., :Co]                   # not hit in this network
    o_ref[0] = out


def cascade_pool(h_nhwc, x_nhwc):
    """avg_pool2d(cascade(h, x), 2, ceil_mode=True) for even H, W."""
    N, H, W, Co = h_nhwc.shape
    Ci = x_nhwc.shape[-1]
    # TODO(synk): ceil_mode partial windows for odd intermediate sizes not implemented.
    assert H % 2 == 0 and W % 2 == 0
    Ho, Wo = H // 2, W // 2
    h5 = h_nhwc.reshape(N, Ho, 2, Wo, 2 * Co)     # pure (free) reshapes of NHWC
    x5 = x_nhwc.reshape(N, Ho, 2, Wo, 2 * Ci)
    kernel = functools.partial(_cascade_pool_kernel, Ci=Ci, Co=Co)
    out = pl.pallas_call(
        kernel,
        out_shape=jax.ShapeDtypeStruct((N, Ho, Wo, Co), jnp.float32),
        grid=(N,),
        in_specs=[pl.BlockSpec((1, Ho, 2, Wo, 2 * Co), lambda n: (n, 0, 0, 0, 0)),
                  pl.BlockSpec((1, Ho, 2, Wo, 2 * Ci), lambda n: (n, 0, 0, 0, 0))],
        out_specs=pl.BlockSpec((1, Ho, Wo, Co), lambda n: (n, 0, 0, 0)),
        compiler_params=_cp("parallel"),
    )(h5, x5)
    return out


# ----------------------------------------------------------------------------- fused pose head: GN-affine + ReLU + 1x1 conv + spatial mean * 0.01
def _pose_head_kernel(x_ref, s_ref, b_ref, w_ref, o_ref, *, inv_hw):
    x = x_ref[0]                                              # (HW, C) f32
    t = jnp.maximum(x * s_ref[0] + b_ref[0], 0.0).astype(jnp.bfloat16)
    y = jnp.dot(t, w_ref[...], preferred_element_type=jnp.float32)   # (HW, P)
    o_ref[0] = jnp.sum(y, axis=0, keepdims=True) * (0.01 * inv_hw)


def pose_head(x_nhwc, scale, bias, w_oihw):
    N, H, W, C = x_nhwc.shape
    P = w_oihw.shape[0]
    HW = H * W
    x2 = x_nhwc.reshape(N, HW, C)
    w = jnp.transpose(w_oihw, (2, 3, 1, 0)).reshape(C, P).astype(jnp.bfloat16)
    kernel = functools.partial(_pose_head_kernel, inv_hw=1.0 / float(HW))
    out = pl.pallas_call(
        kernel,
        out_shape=jax.ShapeDtypeStruct((N, 1, P), jnp.float32),
        grid=(N,),
        in_specs=[pl.BlockSpec((1, HW, C), lambda n: (n, 0, 0)),
                  pl.BlockSpec((1, 1, C), lambda n: (n, 0, 0)),
                  pl.BlockSpec((1, 1, C), lambda n: (n, 0, 0)),
                  pl.BlockSpec((C, P), lambda n: (0, 0))],
        out_specs=pl.BlockSpec((1, 1, P), lambda n: (n, 0, 0)),
        compiler_params=_cp("parallel"),
    )(x2, scale, bias, w)
    return out.reshape(N, P)


# ----------------------------------------------------------------------------- stem conv (stride 2) via im2col + tiled matmul
def conv2d_im2col(x_nhwc, w_oihw, stride, pad):
    """NHWC conv, bias=False.  Only used for the 9-channel stride-2 stem conv."""
    N, H, W, Cin = x_nhwc.shape
    Cout, Cin2, kh, kw = w_oihw.shape
    assert Cin == Cin2
    xp = jnp.pad(x_nhwc, ((0, 0), (pad, pad), (pad, pad), (0, 0)))
    Hp, Wp = H + 2 * pad, W + 2 * pad
    Ho = (Hp - kh) // stride + 1
    Wo = (Wp - kw) // stride + 1
    cols = []
    for i in range(kh):
        for j in range(kw):
            cols.append(xp[:, i:i + stride * (Ho - 1) + 1:stride,
                           j:j + stride * (Wo - 1) + 1:stride, :])
    patches = jnp.concatenate(cols, axis=-1).reshape(N * Ho * Wo, kh * kw * Cin)
    wflat = jnp.transpose(w_oihw, (2, 3, 1, 0)).reshape(kh * kw * Cin, Cout)
    out = pallas_matmul(patches, wflat)
    return out.reshape(N, Ho, Wo, Cout)


# ----------------------------------------------------------------------------- model definition (mirrors ECN_Pose.__init__)
NB_REF = 2
INIT_PLANES = 16
GROWTH = 16
SCALE = 0.5
FINAL_MAP = 1
NORM_GROUP = 16


def layer_configs(input_size):
    out_planes = INIT_PLANES
    output_size = math.floor(input_size / 2)
    cfgs = []
    while math.floor(output_size * SCALE) >= FINAL_MAP:
        cfgs.append((out_planes, out_planes + GROWTH))
        output_size = math.floor(output_size * SCALE)
        out_planes += GROWTH
    return cfgs, out_planes


def xavier_uniform(key, shape_oihw):
    cout, cin, kh, kw = shape_oihw
    fan_in, fan_out = cin * kh * kw, cout * kh * kw
    a = math.sqrt(6.0 / (fan_in + fan_out))
    return jax.random.uniform(key, shape_oihw, jnp.float32, -a, a)


def init_params(key, input_size):
    cfgs, enc_planes = layer_configs(input_size)
    keys = jax.random.split(key, 2 * len(cfgs) + 2)
    params = {"conv1_w": xavier_uniform(keys[0], (INIT_PLANES, (1 + NB_REF) * 3, 3, 3)),
              "enc": []}
    for li, (cin, cout) in enumerate(cfgs):
        params["enc"].append({
            "gn1_g": jnp.ones((cin,), jnp.float32),
            "gn1_b": jnp.zeros((cin,), jnp.float32),
            "conv1_w": xavier_uniform(keys[1 + 2 * li], (cout, cin, 3, 3)),
            "gn2_g": jnp.ones((cout,), jnp.float32),
            "gn2_b": jnp.zeros((cout,), jnp.float32),
            "conv2_w": xavier_uniform(keys[2 + 2 * li], (cout, cout, 3, 3)),
        })
    params["pose_gn_g"] = jnp.ones((enc_planes,), jnp.float32)
    params["pose_gn_b"] = jnp.zeros((enc_planes,), jnp.float32)
    params["pose_conv_w"] = xavier_uniform(keys[-1], (6 * NB_REF, enc_planes, 1, 1))
    return params


# ----------------------------------------------------------------------------- forward
def ecn_pose_forward(params, target_image, ref_imgs):
    """target_image, ref_imgs[i]: NCHW (like PyTorch).  Returns pose (B, nb_ref, 6)."""
    assert len(ref_imgs) == NB_REF
    x = jnp.concatenate([target_image] + list(ref_imgs), axis=1)   # (N, 9, H, W)
    x = jnp.transpose(x, (0, 2, 3, 1)).astype(jnp.float32)         # NHWC

    # stem conv: stride-2, pad-1, no norm / relu before it
    x = conv2d_im2col(x, params["conv1_w"], stride=2, pad=1)

    # encoding CascadeLayers: (GN+ReLU+conv) x2 -> cascade + 2x2 avg pool (fused)
    for lp in params["enc"]:
        s1, b1 = gn_scale_bias(x, lp["gn1_g"], lp["gn1_b"], groups=NORM_GROUP)
        h = gnrelu_conv3x3(x, s1, b1, lp["conv1_w"])
        s2, b2 = gn_scale_bias(h, lp["gn2_g"], lp["gn2_b"], groups=NORM_GROUP)
        h = gnrelu_conv3x3(h, s2, b2, lp["conv2_w"])
        x = cascade_pool(h, x)

    # pose head: GN + ReLU + 1x1 conv + spatial mean * 0.01 (fused)
    sp, bp = gn_scale_bias(x, params["pose_gn_g"], params["pose_gn_b"], groups=NORM_GROUP)
    pose = pose_head(x, sp, bp, params["pose_conv_w"])             # (N, 6*NB_REF)
    pose = pose.reshape(pose.shape[0], NB_REF, 6)
    # output_exp=False -> exps[0] is None in eval mode; only pose is meaningful.
    return pose


# ----------------------------------------------------------------------------- main
if __name__ == "__main__":
    INPUT_SIZE = 16
    B = 2
    key = jax.random.PRNGKey(0)
    kp, kt, k1, k2 = jax.random.split(key, 4)

    params = init_params(kp, INPUT_SIZE)
    target = jax.random.normal(kt, (B, 3, INPUT_SIZE, INPUT_SIZE), jnp.float32)
    ref_imgs = [
        jax.random.normal(k1, (B, 3, INPUT_SIZE, INPUT_SIZE), jnp.float32),
        jax.random.normal(k2, (B, 3, INPUT_SIZE, INPUT_SIZE), jnp.float32),
    ]

    fwd = jax.jit(ecn_pose_forward)
    pose = fwd(params, target, ref_imgs)
    pose = jax.block_until_ready(pose)
    assert pose.shape == (B, NB_REF, 6) and bool(jnp.all(jnp.isfinite(pose)))
    print("KERNEL_OK")
</pallas_src>

<mosaic_0001>
module attributes {stable_mosaic.version = 11 : i64} {
  func.func @_gn_stats_kernel(%arg0: i32, %arg1: memref<1x64x16xf32, #tpu.memory_space<vmem>>, %arg2: memref<16x16xf32, #tpu.memory_space<vmem>>, %arg3: memref<16x16xf32, #tpu.memory_space<vmem>>, %arg4: memref<1x16xf32, #tpu.memory_space<vmem>>, %arg5: memref<1x16xf32, #tpu.memory_space<vmem>>, %arg6: memref<1x1x16xf32, #tpu.memory_space<vmem>>, %arg7: memref<1x1x16xf32, #tpu.memory_space<vmem>>) attributes {dimension_semantics = [#tpu.dimension_semantics<parallel>], iteration_bounds = array<i64: 2>, scalar_prefetch = 0 : i64, scratch_operands = 0 : i64, tpu.core_type = #tpu.core_type<tc>, window_params = [{transform_indices = @transform_0, window_bounds = array<i64: 1, 64, 16>}, {pipeline_mode = #tpu.pipeline_mode<synchronous>, transform_indices = @transform_1, window_bounds = array<i64: 16, 16>}, {pipeline_mode = #tpu.pipeline_mode<synchronous>, transform_indices = @transform_2, window_bounds = array<i64: 16, 16>}, {pipeline_mode = #tpu.pipeline_mode<synchronous>, transform_indices = @transform_3, window_bounds = array<i64: 1, 16>}, {pipeline_mode = #tpu.pipeline_mode<synchronous>, transform_indices = @transform_4, window_bounds = array<i64: 1, 16>}, {transform_indices = @transform_5, window_bounds = array<i64: 1, 1, 16>}, {transform_indices = @transform_6, window_bounds = array<i64: 1, 1, 16>}]} {
    %c0 = arith.constant 0 : index
    %c0_0 = arith.constant 0 : index
    %c0_1 = arith.constant 0 : index
    %0 = vector.load %arg1[%c0, %c0_0, %c0_1] : memref<1x64x16xf32, #tpu.memory_space<vmem>>, vector<1x64x16xf32>
    %1 = vector.shape_cast %0 : vector<1x64x16xf32> to vector<64x16xf32>
    %cst = arith.constant dense<0.000000e+00> : vector<16xf32>
    %2 = vector.multi_reduction <add>, %1, %cst [0] : vector<64x16xf32> to vector<16xf32>
    %3 = vector.shape_cast %2 : vector<16xf32> to vector<1x16xf32>
    %4 = arith.mulf %1, %1 : vector<64x16xf32>
    %cst_2 = arith.constant dense<0.000000e+00> : vector<16xf32>
    %5 = vector.multi_reduction <add>, %4, %cst_2 [0] : vector<64x16xf32> to vector<16xf32>
    %6 = vector.shape_cast %5 : vector<16xf32> to vector<1x16xf32>
    %c0_3 = arith.constant 0 : index
    %c0_4 = arith.constant 0 : index
    %7 = vector.load %arg2[%c0_3, %c0_4] : memref<16x16xf32, #tpu.memory_space<vmem>>, vector<16x16xf32>
    %cst_5 = arith.constant dense<0.000000e+00> : vector<1x16xf32>
    %8 = tpu.matmul %3, %7, %cst_5 {dimension_numbers = #tpu.dot_dimension_numbers<[1], [0], [0], [1], [0, 0, 1, 1], [], []>} : vector<1x16xf32>, vector<16x16xf32>, vector<1x16xf32> -> vector<1x16xf32>
    %c0_6 = arith.constant 0 : index
    %c0_7 = arith.constant 0 : index
    %9 = vector.load %arg2[%c0_6, %c0_7] : memref<16x16xf32, #tpu.memory_space<vmem>>, vector<16x16xf32>
    %cst_8 = arith.constant dense<0.000000e+00> : vector<1x16xf32>
    %10 = tpu.matmul %6, %9, %cst_8 {dimension_numbers = #tpu.dot_dimension_numbers<[1], [0], [0], [1], [0, 0, 1, 1], [], []>} : vector<1x16xf32>, vector<16x16xf32>, vector<1x16xf32> -> vector<1x16xf32>
    %cst_9 = arith.constant 1.562500e-02 : f32
    %11 = vector.broadcast %cst_9 : f32 to vector<1x16xf32>
    %12 = arith.mulf %8, %11 : vector<1x16xf32>
    %cst_10 = arith.constant 1.562500e-02 : f32
    %13 = vector.broadcast %cst_10 : f32 to vector<1x16xf32>
    %14 = arith.mulf %10, %13 : vector<1x16xf32>
    %15 = arith.mulf %12, %12 : vector<1x16xf32>
    %16 = arith.subf %14, %15 : vector<1x16xf32>
    %cst_11 = arith.constant 0.000000e+00 : f32
    %17 = vector.broadcast %cst_11 : f32 to vector<1x16xf32>
    %18 = arith.maximumf %16, %17 : vector<1x16xf32>
    %c0_12 = arith.constant 0 : index
    %c0_13 = arith.constant 0 : index
    %19 = vector.load %arg3[%c0_12, %c0_13] : memref<16x16xf32, #tpu.memory_space<vmem>>, vector<16x16xf32>
    %cst_14 = arith.constant dense<0.000000e+00> : vector<1x16xf32>
    %20 = tpu.matmul %12, %19, %cst_14 {dimension_numbers = #tpu.dot_dimension_numbers<[1], [0], [0], [1], [0, 0, 1, 1], [], []>} : vector<1x16xf32>, vector<16x16xf32>, vector<1x16xf32> -> vector<1x16xf32>
    %c0_15 = arith.constant 0 : index
    %c0_16 = arith.constant 0 : index
    %21 = vector.load %arg3[%c0_15, %c0_16] : memref<16x16xf32, #tpu.memory_space<vmem>>, vector<16x16xf32>
    %cst_17 = arith.constant dense<0.000000e+00> : vector<1x16xf32>
    %22 = tpu.matmul %18, %21, %cst_17 {dimension_numbers = #tpu.dot_dimension_numbers<[1], [0], [0], [1], [0, 0, 1, 1], [], []>} : vector<1x16xf32>, vector<16x16xf32>, vector<1x16xf32> -> vector<1x16xf32>
    %cst_18 = arith.constant 9.99999974E-6 : f32
    %23 = vector.broadcast %cst_18 : f32 to vector<1x16xf32>
    %24 = arith.addf %22, %23 : vector<1x16xf32>
    %25 = math.rsqrt %24 : vector<1x16xf32>
    %c0_19 = arith.constant 0 : index
    %c0_20 = arith.constant 0 : index
    %26 = vector.load %arg4[%c0_19, %c0_20] : memref<1x16xf32, #tpu.memory_space<vmem>>, vector<1x16xf32>
    %27 = arith.mulf %26, %25 : vector<1x16xf32>
    %c0_21 = arith.constant 0 : index
    %c0_22 = arith.constant 0 : index
    %c0_23 = arith.constant 0 : index
    %28 = vector.load %arg6[%c0_21, %c0_22, %c0_23] : memref<1x1x16xf32, #tpu.memory_space<vmem>>, vector<1x1x16xf32>
    %29 = vector.shape_cast %28 : vector<1x1x16xf32> to vector<1x16xf32>
    %30 = vector.shape_cast %27 : vector<1x16xf32> to vector<1x1x16xf32>
    tpu.vector_store %arg6[%c0_21, %c0_22, %c0_23], %30 {strides = array<i32>} : memref<1x1x16xf32, #tpu.memory_space<vmem>>, vector<1x1x16xf32>,
    %c0_24 = arith.constant 0 : index
    %c0_25 = arith.constant 0 : index
    %31 = vector.load %arg5[%c0_24, %c0_25] : memref<1x16xf32, #tpu.memory_space<vmem>>, vector<1x16xf32>
    %32 = arith.mulf %20, %27 : vector<1x16xf32>
    %33 = arith.subf %31, %32 : vector<1x16xf32>
    %c0_26 = arith.constant 0 : index
    %c0_27 = arith.constant 0 : index
    %c0_28 = arith.constant 0 : index
    %34 = vector.load %arg7[%c0_26, %c0_27, %c0_28] : memref<1x1x16xf32, #tpu.memory_space<vmem>>, vector<1x1x16xf32>
    %35 = vector.shape_cast %34 : vector<1x1x16xf32> to vector<1x16xf32>
    %36 = vector.shape_cast %33 : vector<1x16xf32> to vector<1x1x16xf32>
    tpu.vector_store %arg7[%c0_26, %c0_27, %c0_28], %36 {strides = array<i32>} : memref<1x1x16xf32, #tpu.memory_space<vmem>>, vector<1x1x16xf32>,
    return
  }
  func.func @transform_0(%arg0: i32) -> (i32, i32, i32) {
    %c0_i32 = arith.constant 0 : i32
    %c0_i32_0 = arith.constant 0 : i32
    %c0_i32_1 = arith.constant 0 : i32
    return %arg0, %c0_i32, %c0_i32_0 : i32, i32, i32
  }
  func.func @transform_1(%arg0: i32) -> (i32, i32) {
    %c0_i32 = arith.constant 0 : i32
    %c0_i32_0 = arith.constant 0 : i32
    %c0_i32_1 = arith.constant 0 : i32
    return %c0_i32, %c0_i32_0 : i32, i32
  }
  func.func @transform_2(%arg0: i32) -> (i32, i32) {
    %c0_i32 = arith.constant 0 : i32
    %c0_i32_0 = arith.constant 0 : i32
    %c0_i32_1 = arith.constant 0 : i32
    return %c0_i32, %c0_i32_0 : i32, i32
  }
  func.func @transform_3(%arg0: i32) -> (i32, i32) {
    %c0_i32 = arith.constant 0 : i32
    %c0_i32_0 = arith.constant 0 : i32
    %c0_i32_1 = arith.constant 0 : i32
    return %c0_i32, %c0_i32_0 : i32, i32
  }
  func.func @transform_4(%arg0: i32) -> (i32, i32) {
    %c0_i32 = arith.constant 0 : i32
    %c0_i32_0 = arith.constant 0 : i32
    %c0_i32_1 = arith.constant 0 : i32
    return %c0_i32, %c0_i32_0 : i32, i32
  }
  func.func @transform_5(%arg0: i32) -> (i32, i32, i32) {
    %c0_i32 = arith.constant 0 : i32
    %c0_i32_0 = arith.constant 0 : i32
    %c0_i32_1 = arith.constant 0 : i32
    return %arg0, %c0_i32, %c0_i32_0 : i32, i32, i32
  }
  func.func @transform_6(%arg0: i32) -> (i32, i32, i32) {
    %c0_i32 = arith.constant 0 : i32
    %c0_i32_0 = arith.constant 0 : i32
    %c0_i32_1 = arith.constant 0 : i32
    return %arg0, %c0_i32, %c0_i32_0 : i32, i32, i32
  }
}

module attributes {stable_mosaic.version = 11 : i64} {
  func.func @_matmul_kernel(%arg0: i32, %arg1: i32, %arg2: i32, %arg3: memref<128x128xbf16, #tpu.memory_space<vmem>>, %arg4: memref<128x128xbf16, #tpu.memory_space<vmem>>, %arg5: memref<128x128xf32, #tpu.memory_space<vmem>>, %arg6: memref<128x128xf32, #tpu.memory_space<vmem>>) attributes {dimension_semantics = [#tpu.dimension_semantics<parallel>, #tpu.dimension_semantics<parallel>, #tpu.dimension_semantics<arbitrary>], iteration_bounds = array<i64: 1, 1, 1>, scalar_prefetch = 0 : i64, scratch_operands = 1 : i64, tpu.core_type = #tpu.core_type<tc>, window_params = [{transform_indices = @transform_0, window_bounds = array<i64: 128, 128>}, {transform_indices = @transform_1, window_bounds = array<i64: 128, 128>}, {transform_indices = @transform_2, window_bounds = array<i64: 128, 128>}]} {
    %c0_i32 = arith.constant 0 : i32
    %0 = arith.cmpi eq, %arg2, %c0_i32 : i32
    %1 = arith.extui %0 : i1 to i32
    %c0_i32_0 = arith.constant 0 : i32
    %2 = arith.cmpi ne, %1, %c0_i32_0 : i32
    scf.if %2 {
      %cst_10 = arith.constant 0.000000e+00 : f32
      %12 = vector.broadcast %cst_10 : f32 to vector<128x128xf32>
      %c0_11 = arith.constant 0 : index
      %c0_12 = arith.constant 0 : index
      %13 = vector.load %arg6[%c0_11, %c0_12] : memref<128x128xf32, #tpu.memory_space<vmem>>, vector<128x128xf32>
      tpu.vector_store %arg6[%c0_11, %c0_12], %12 {strides = array<i32>} : memref<128x128xf32, #tpu.memory_space<vmem>>, vector<128x128xf32>,
    } else {
    }
    %c0 = arith.constant 0 : index
    %c0_1 = arith.constant 0 : index
    %3 = vector.load %arg6[%c0, %c0_1] : memref<128x128xf32, #tpu.memory_space<vmem>>, vector<128x128xf32>
    %c0_2 = arith.constant 0 : index
    %c0_3 = arith.constant 0 : index
    %4 = vector.load %arg3[%c0_2, %c0_3] : memref<128x128xbf16, #tpu.memory_space<vmem>>, vector<128x128xbf16>
    %c0_4 = arith.constant 0 : index
    %c0_5 = arith.constant 0 : index
    %5 = vector.load %arg4[%c0_4, %c0_5] : memref<128x128xbf16, #tpu.memory_space<vmem>>, vector<128x128xbf16>
    %cst = arith.constant dense<0.000000e+00> : vector<128x128xf32>
    %6 = tpu.matmul %4, %5, %cst {dimension_numbers = #tpu.dot_dimension_numbers<[1], [0], [0], [1], [0, 0, 1, 1], [], []>} : vector<128x128xbf16>, vector<128x128xbf16>, vector<128x128xf32> -> vector<128x128xf32>
    %7 = arith.addf %3, %6 : vector<128x128xf32>
    %c0_6 = arith.constant 0 : index
    %c0_7 = arith.constant 0 : index
    %8 = vector.load %arg6[%c0_6, %c0_7] : memref<128x128xf32, #tpu.memory_space<vmem>>, vector<128x128xf32>
    tpu.vector_store %arg6[%c0_6, %c0_7], %7 {strides = array<i32>} : memref<128x128xf32, #tpu.memory_space<vmem>>, vector<128x128xf32>,
    %c0_i32_8 = arith.constant 0 : i32
    %9 = arith.cmpi eq, %arg2, %c0_i32_8 : i32
    %10 = arith.extui %9 : i1 to i32
    %c0_i32_9 = arith.constant 0 : i32
    %11 = arith.cmpi ne, %10, %c0_i32_9 : i32
    scf.if %11 {
      %c0_10 = arith.constant 0 : index
      %c0_11 = arith.constant 0 : index
      %12 = vector.load %arg6[%c0_10, %c0_11] : memref<128x128xf32, #tpu.memory_space<vmem>>, vector<128x128xf32>
      %c0_12 = arith.constant 0 : index
      %c0_13 = arith.constant 0 : index
      %13 = vector.load %arg5[%c0_12, %c0_13] : memref<128x128xf32, #tpu.memory_space<vmem>>, vector<128x128xf32>
      tpu.vector_store %arg5[%c0_12, %c0_13], %12 {strides = array<i32>} : memref<128x128xf32, #tpu.memory_space<vmem>>, vector<128x128xf32>,
    } else {
    }
    return
  }
  func.func @transform_0(%arg0: i32, %arg1: i32, %arg2: i32) -> (i32, i32) {
    %c0_i32 = arith.constant 0 : i32
    return %arg0, %arg2 : i32, i32
  }
  func.func @transform_1(%arg0: i32, %arg1: i32, %arg2: i32) -> (i32, i32) {
    %c0_i32 = arith.constant 0 : i32
    return %arg2, %arg1 : i32, i32
  }
  func.func @transform_2(%arg0: i32, %arg1: i32, %arg2: i32) -> (i32, i32) {
    %c0_i32 = arith.constant 0 : i32
    return %arg0, %arg1 : i32, i32
  }
}

module attributes {stable_mosaic.version = 11 : i64} {
  func.func @_gnrelu_conv3x3_kernel(%arg0: i32, %arg1: memref<1x64x16xf32, #tpu.memory_space<vmem>>, %arg2: memref<1x1x16xf32, #tpu.memory_space<vmem>>, %arg3: memref<1x1x16xf32, #tpu.memory_space<vmem>>, %arg4: memref<9x16x32xbf16, #tpu.memory_space<vmem>>, %arg5: memref<1x64x32xf32, #tpu.memory_space<vmem>>, %arg6: memref<96x16xbf16, #tpu.memory_space<vmem>>) attributes {dimension_semantics = [#tpu.dimension_semantics<parallel>], iteration_bounds = array<i64: 2>, scalar_prefetch = 0 : i64, scratch_operands = 1 : i64, tpu.core_type = #tpu.core_type<tc>, window_params = [{transform_indices = @transform_0, window_bounds = array<i64: 1, 64, 16>}, {transform_indices = @transform_1, window_bounds = array<i64: 1, 1, 16>}, {transform_indices = @transform_2, window_bounds = array<i64: 1, 1, 16>}, {pipeline_mode = #tpu.pipeline_mode<synchronous>, transform_indices = @transform_3, window_bounds = array<i64: 9, 16, 32>}, {transform_indices = @transform_4, window_bounds = array<i64: 1, 64, 32>}]} {
    %cst = arith.constant 0.000000e+00 : bf16
    %0 = vector.broadcast %cst : bf16 to vector<96x16xbf16>
    %c0 = arith.constant 0 : index
    %c0_0 = arith.constant 0 : index
    %1 = vector.load %arg6[%c0, %c0_0] : memref<96x16xbf16, #tpu.memory_space<vmem>>, vector<96x16xbf16>
    tpu.vector_store %arg6[%c0, %c0_0], %0 {strides = array<i32>} : memref<96x16xbf16, #tpu.memory_space<vmem>>, vector<96x16xbf16>,
    %c0_1 = arith.constant 0 : index
    %c0_2 = arith.constant 0 : index
    %c0_3 = arith.constant 0 : index
    %2 = vector.load %arg1[%c0_1, %c0_2, %c0_3] : memref<1x64x16xf32, #tpu.memory_space<vmem>>, vector<1x64x16xf32>
    %3 = vector.shape_cast %2 : vector<1x64x16xf32> to vector<64x16xf32>
    %c0_4 = arith.constant 0 : index
    %c0_5 = arith.constant 0 : index
    %c0_6 = arith.constant 0 : index
    %4 = vector.load %arg2[%c0_4, %c0_5, %c0_6] : memref<1x1x16xf32, #tpu.memory_space<vmem>>, vector<1x1x16xf32>
    %5 = vector.shape_cast %4 : vector<1x1x16xf32> to vector<1x16xf32>
    %6 = vector.broadcast %5 : vector<1x16xf32> to vector<64x16xf32>
    %7 = arith.mulf %3, %6 : vector<64x16xf32>
    %c0_7 = arith.constant 0 : index
    %c0_8 = arith.constant 0 : index
    %c0_9 = arith.constant 0 : index
    %8 = vector.load %arg3[%c0_7, %c0_8, %c0_9] : memref<1x1x16xf32, #tpu.memory_space<vmem>>, vector<1x1x16xf32>
    %9 = vector.shape_cast %8 : vector<1x1x16xf32> to vector<1x16xf32>
    %10 = vector.broadcast %9 : vector<1x16xf32> to vector<64x16xf32>
    %11 = arith.addf %7, %10 : vector<64x16xf32>
    %cst_10 = arith.constant 0.000000e+00 : f32
    %12 = vector.broadcast %cst_10 : f32 to vector<64x16xf32>
    %13 = arith.maximumf %11, %12 : vector<64x16xf32>
    %14 = arith.truncf %13 : vector<64x16xf32> to vector<64x16xbf16>
    %c16 = arith.constant 16 : index
    %c0_11 = arith.constant 0 : index
    %15 = vector.load %arg6[%c16, %c0_11] : memref<96x16xbf16, #tpu.memory_space<vmem>>, vector<64x16xbf16>
    tpu.vector_store %arg6[%c16, %c0_11], %14 {strides = array<i32>} : memref<96x16xbf16, #tpu.memory_space<vmem>>, vector<64x16xbf16>,
    %16 = tpu.iota {dimensions = array<i32: 0>} : vector<64x1xi32>
    %c8_i32 = arith.constant 8 : i32
    %c0_i32 = arith.constant 0 : i32
    %17 = arith.cmpi eq, %c8_i32, %c0_i32 : i32
    %c1_i32 = arith.constant 1 : i32
    %18 = arith.select %17, %c1_i32, %c8_i32 : i32
    %19 = vector.broadcast %18 : i32 to vector<64x1xi32>
    %20 = arith.remsi %16, %19 : vector<64x1xi32>
    %c0_i32_12 = arith.constant 0 : i32
    %21 = vector.broadcast %c0_i32_12 : i32 to vector<64x1xi32>
    %22 = arith.cmpi ne, %20, %21 : vector<64x1xi32>
    %c0_i32_13 = arith.constant 0 : i32
    %23 = vector.broadcast %c0_i32_13 : i32 to vector<64x1xi32>
    %24 = arith.cmpi slt, %20, %23 : vector<64x1xi32>
    %c0_i32_14 = arith.constant 0 : i32
    %25 = arith.cmpi slt, %18, %c0_i32_14 : i32
    %26 = vector.broadcast %25 : i1 to vector<64x1xi1>
    %27 = vector.broadcast %26 : vector<64x1xi1> to vector<64x1xi1>
    %28 = arith.xori %24, %27 : vector<64x1xi1>
    %29 = arith.andi %28, %22 : vector<64x1xi1>
    %30 = vector.broadcast %18 : i32 to vector<64x1xi32>
    %31 = arith.addi %20, %30 : vector<64x1xi32>
    %32 = arith.select %29, %31, %20 : vector<64x1xi1>, vector<64x1xi32>
    %c0_i32_15 = arith.constant 0 : i32
    %33 = vector.broadcast %c0_i32_15 : i32 to vector<64x1xi32>
    %34 = arith.cmpi ne, %32, %33 : vector<64x1xi32>
    %35 = arith.extui %34 : vector<64x1xi1> to vector<64x1xi32>
    %36 = arith.sitofp %35 : vector<64x1xi32> to vector<64x1xf32>
    %37 = arith.truncf %36 : vector<64x1xf32> to vector<64x1xbf16>
    %c7_i32 = arith.constant 7 : i32
    %38 = vector.broadcast %c7_i32 : i32 to vector<64x1xi32>
    %39 = arith.cmpi ne, %32, %38 : vector<64x1xi32>
    %40 = arith.extui %39 : vector<64x1xi1> to vector<64x1xi32>
    %41 = arith.sitofp %40 : vector<64x1xi32> to vector<64x1xf32>
    %42 = arith.truncf %41 : vector<64x1xf32> to vector<64x1xbf16>
    %cst_16 = arith.constant 0.000000e+00 : f32
    %43 = vector.broadcast %cst_16 : f32 to vector<64x32xf32>
    %c7 = arith.constant 7 : index
    %c0_17 = arith.constant 0 : index
    %44 = vector.load %arg6[%c7, %c0_17] : memref<96x16xbf16, #tpu.memory_space<vmem>>, vector<64x16xbf16>
    %45 = vector.broadcast %37 : vector<64x1xbf16> to vector<64x16xbf16>
    %46 = arith.mulf %44, %45 : vector<64x16xbf16>
    %c0_18 = arith.constant 0 : index
    %c0_19 = arith.constant 0 : index
    %c0_20 = arith.constant 0 : index
    %47 = vector.load %arg4[%c0_18, %c0_19, %c0_20] : memref<9x16x32xbf16, #tpu.memory_space<vmem>>, vector<1x16x32xbf16>
    %48 = vector.shape_cast %47 : vector<1x16x32xbf16> to vector<16x32xbf16>
    %cst_21 = arith.constant dense<0.000000e+00> : vector<64x32xf32>
    %49 = tpu.matmul %46, %48, %cst_21 {dimension_numbers = #tpu.dot_dimension_numbers<[1], [0], [0], [1], [0, 0, 1, 1], [], []>} : vector<64x16xbf16>, vector<16x32xbf16>, vector<64x32xf32> -> vector<64x32xf32>
    %50 = arith.addf %43, %49 : vector<64x32xf32>
    %c8 = arith.constant 8 : index
    %c0_22 = arith.constant 0 : index
    %51 = vector.load %arg6[%c8, %c0_22] : memref<96x16xbf16, #tpu.memory_space<vmem>>, vector<64x16xbf16>
    %c1 = arith.constant 1 : index
    %c0_23 = arith.constant 0 : index
    %c0_24 = arith.constant 0 : index
    %52 = vector.load %arg4[%c1, %c0_23, %c0_24] : memref<9x16x32xbf16, #tpu.memory_space<vmem>>, vector<1x16x32xbf16>
    %53 = vector.shape_cast %52 : vector<1x16x32xbf16> to vector<16x32xbf16>
    %cst_25 = arith.constant dense<0.000000e+00> : vector<64x32xf32>
    %54 = tpu.matmul %51, %53, %cst_25 {dimension_numbers = #tpu.dot_dimension_numbers<[1], [0], [0], [1], [0, 0, 1, 1], [], []>} : vector<64x16xbf16>, vector<16x32xbf16>, vector<64x32xf32> -> vector<64x32xf32>
    %55 = arith.addf %50, %54 : vector<64x32xf32>
    %c9 = arith.constant 9 : index
    %c0_26 = arith.constant 0 : index
    %56 = vector.load %arg6[%c9, %c0_26] : memref<96x16xbf16, #tpu.memory_space<vmem>>, vector<64x16xbf16>
    %57 = vector.broadcast %42 : vector<64x1xbf16> to vector<64x16xbf16>
    %58 = arith.mulf %56, %57 : vector<64x16xbf16>
    %c2 = arith.constant 2 : index
    %c0_27 = arith.constant 0 : index
    %c0_28 = arith.constant 0 : index
    %59 = vector.load %arg4[%c2, %c0_27, %c0_28] : memref<9x16x32xbf16, #tpu.memory_space<vmem>>, vector<1x16x32xbf16>
    %60 = vector.shape_cast %59 : vector<1x16x32xbf16> to vector<16x32xbf16>
    %cst_29 = arith.constant dense<0.000000e+00> : vector<64x32xf32>
    %61 = tpu.matmul %58, %60, %cst_29 {dimension_numbers = #tpu.dot_dimension_numbers<[1], [0], [0], [1], [0, 0, 1, 1], [], []>} : vector<64x16xbf16>, vector<16x32xbf16>, vector<64x32xf32> -> vector<64x32xf32>
    %62 = arith.addf %55, %61 : vector<64x32xf32>
    %c15 = arith.constant 15 : index
    %c0_30 = arith.constant 0 : index
    %63 = vector.load %arg6[%c15, %c0_30] : memref<96x16xbf16, #tpu.memory_space<vmem>>, vector<64x16xbf16>
    %64 = vector.broadcast %37 : vector<64x1xbf16> to vector<64x16xbf16>
    %65 = arith.mulf %63, %64 : vector<64x16xbf16>
    %c3 = arith.constant 3 : index
    %c0_31 = arith.constant 0 : index
    %c0_32 = arith.constant 0 : index
    %66 = vector.load %arg4[%c3, %c0_31, %c0_32] : memref<9x16x32xbf16, #tpu.memory_space<vmem>>, vector<1x16x32xbf16>
    %67 = vector.shape_cast %66 : vector<1x16x32xbf16> to vector<16x32xbf16>
    %cst_33 = arith.constant dense<0.000000e+00> : vector<64x32xf32>
    %68 = tpu.matmul %65, %67, %cst_33 {dimension_numbers = #tpu.dot_dimension_numbers<[1], [0], [0], [1], [0, 0, 1, 1], [], []>} : vector<64x16xbf16>, vector<16x32xbf16>, vector<64x32xf32> -> vector<64x32xf32>
    %69 = arith.addf %62, %68 : vector<64x32xf32>
    %c16_34 = arith.constant 16 : index
    %c0_35 = arith.constant 0 : index
    %70 = vector.load %arg6[%c16_34, %c0_35] : memref<96x16xbf16, #tpu.memory_space<vmem>>, vector<64x16xbf16>
    %c4 = arith.constant 4 : index
    %c0_36 = arith.constant 0 : index
    %c0_37 = arith.constant 0 : index
    %71 = vector.load %arg4[%c4, %c0_36, %c0_37] : memref<9x16x32xbf16, #tpu.memory_space<vmem>>, vector<1x16x32xbf16>
    %72 = vector.shape_cast %71 : vector<1x16x32xbf16> to vector<16x32xbf16>
    %cst_38 = arith.constant dense<0.000000e+00> : vector<64x32xf32>
    %73 = tpu.matmul %70, %72, %cst_38 {dimension_numbers = #tpu.dot_dimension_numbers<[1], [0], [0], [1], [0, 0, 1, 1], [], []>} : vector<64x16xbf16>, vector<16x32xbf16>, vector<64x32xf32> -> vector<64x32xf32>
    %74 = arith.addf %69, %73 : vector<64x32xf32>
    %c17 = arith.constant 17 : index
    %c0_39 = arith.constant 0 : index
    %75 = vector.load %arg6[%c17, %c0_39] : memref<96x16xbf16, #tpu.memory_space<vmem>>, vector<64x16xbf16>
    %76 = vector.broadcast %42 : vector<64x1xbf16> to vector<64x16xbf16>
    %77 = arith.mulf %75, %76 : vector<64x16xbf16>
    %c5 = arith.constant 5 : index
    %c0_40 = arith.constant 0 : index
    %c0_41 = arith.constant 0 : index
    %78 = vector.load %arg4[%c5, %c0_40, %c0_41] : memref<9x16x32xbf16, #tpu.memory_space<vmem>>, vector<1x16x32xbf16>
    %79 = vector.shape_cast %78 : vector<1x16x32xbf16> to vector<16x32xbf16>
    %cst_42 = arith.constant dense<0.000000e+00> : vector<64x32xf32>
    %80 = tpu.matmul %77, %79, %cst_42 {dimension_numbers = #tpu.dot_dimension_numbers<[1], [0], [0], [1], [0, 0, 1, 1], [], []>} : vector<64x16xbf16>, vector<16x32xbf16>, vector<64x32xf32> -> vector<64x32xf32>
    %81 = arith.addf %74, %80 : vector<64x32xf32>
    %c23 = arith.constant 23 : index
    %c0_43 = arith.constant 0 : index
    %82 = vector.load %arg6[%c23, %c0_43] : memref<96x16xbf16, #tpu.memory_space<vmem>>, vector<64x16xbf16>
    %83 = vector.broadcast %37 : vector<64x1xbf16> to vector<64x16xbf16>
    %84 = arith.mulf %82, %83 : vector<64x16xbf16>
    %c6 = arith.constant 6 : index
    %c0_44 = arith.constant 0 : index
    %c0_45 = arith.constant 0 : index
    %85 = vector.load %arg4[%c6, %c0_44, %c0_45] : memref<9x16x32xbf16, #tpu.memory_space<vmem>>, vector<1x16x32xbf16>
    %86 = vector.shape_cast %85 : vector<1x16x32xbf16> to vector<16x32xbf16>
    %cst_46 = arith.constant dense<0.000000e+00> : vector<64x32xf32>
    %87 = tpu.matmul %84, %86, %cst_46 {dimension_numbers = #tpu.dot_dimension_numbers<[1], [0], [0], [1], [0, 0, 1, 1], [], []>} : vector<64x16xbf16>, vector<16x32xbf16>, vector<64x32xf32> -> vector<64x32xf32>
    %88 = arith.addf %81, %87 : vector<64x32xf32>
    %c24 = arith.constant 24 : index
    %c0_47 = arith.constant 0 : index
    %89 = vector.load %arg6[%c24, %c0_47] : memref<96x16xbf16, #tpu.memory_space<vmem>>, vector<64x16xbf16>
    %c7_48 = arith.constant 7 : index
    %c0_49 = arith.constant 0 : index
    %c0_50 = arith.constant 0 : index
    %90 = vector.load %arg4[%c7_48, %c0_49, %c0_50] : memref<9x16x32xbf16, #tpu.memory_space<vmem>>, vector<1x16x32xbf16>
    %91 = vector.shape_cast %90 : vector<1x16x32xbf16> to vector<16x32xbf16>
    %cst_51 = arith.constant dense<0.000000e+00> : vector<64x32xf32>
    %92 = tpu.matmul %89, %91, %cst_51 {dimension_numbers = #tpu.dot_dimension_numbers<[1], [0], [0], [1], [0, 0, 1, 1], [], []>} : vector<64x16xbf16>, vector<16x32xbf16>, vector<64x32xf32> -> vector<64x32xf32>
    %93 = arith.addf %88, %92 : vector<64x32xf32>
    %c25 = arith.constant 25 : index
    %c0_52 = arith.constant 0 : index
    %94 = vector.load %arg6[%c25, %c0_52] : memref<96x16xbf16, #tpu.memory_space<vmem>>, vector<64x16xbf16>
    %95 = vector.broadcast %42 : vector<64x1xbf16> to vector<64x16xbf16>
    %96 = arith.mulf %94, %95 : vector<64x16xbf16>
    %c8_53 = arith.constant 8 : index
    %c0_54 = arith.constant 0 : index
    %c0_55 = arith.constant 0 : index
    %97 = vector.load %arg4[%c8_53, %c0_54, %c0_55] : memref<9x16x32xbf16, #tpu.memory_space<vmem>>, vector<1x16x32xbf16>
    %98 = vector.shape_cast %97 : vector<1x16x32xbf16> to vector<16x32xbf16>
    %cst_56 = arith.constant dense<0.000000e+00> : vector<64x32xf32>
    %99 = tpu.matmul %96, %98, %cst_56 {dimension_numbers = #tpu.dot_dimension_numbers<[1], [0], [0], [1], [0, 0, 1, 1], [], []>} : vector<64x16xbf16>, vector<16x32xbf16>, vector<64x32xf32> -> vector<64x32xf32>
    %100 = arith.addf %93, %99 : vector<64x32xf32>
    %c0_57 = arith.constant 0 : index
    %c0_58 = arith.constant 0 : index
    %c0_59 = arith.constant 0 : index
    %101 = vector.load %arg5[%c0_57, %c0_58, %c0_59] : memref<1x64x32xf32, #tpu.memory_space<vmem>>, vector<1x64x32xf32>
    %102 = vector.shape_cast %101 : vector<1x64x32xf32> to vector<64x32xf32>
    %103 = vector.shape_cast %100 : vector<64x32xf32> to vector<1x64x32xf32>
    tpu.vector_store %arg5[%c0_57, %c0_58, %c0_59], %103 {strides = array<i32>} : memref<1x64x32xf32, #tpu.memory_space<vmem>>, vector<1x64x32xf32>,
    return
  }
  func.func @transform_0(%arg0: i32) -> (i32, i32, i32) {
    %c0_i32 = arith.constant 0 : i32
    %c0_i32_0 = arith.constant 0 : i32
    %c0_i32_1 = arith.constant 0 : i32
    return %arg0, %c0_i32, %c0_i32_0 : i32, i32, i32
  }
  func.func @transform_1(%arg0: i32) -> (i32, i32, i32) {
    %c0_i32 = arith.constant 0 : i32
    %c0_i32_0 = arith.constant 0 : i32
    %c0_i32_1 = arith.constant 0 : i32
    return %arg0, %c0_i32, %c0_i32_0 : i32, i32, i32
  }
  func.func @transform_2(%arg0: i32) -> (i32, i32, i32) {
    %c0_i32 = arith.constant 0 : i32
    %c0_i32_0 = arith.constant 0 : i32
    %c0_i32_1 = arith.constant 0 : i32
    return %arg0, %c0_i32, %c0_i32_0 : i32, i32, i32
  }
  func.func @transform_3(%arg0: i32) -> (i32, i32, i32) {
    %c0_i32 = arith.constant 0 : i32
    %c0_i32_0 = arith.constant 0 : i32
    %c0_i32_1 = arith.constant 0 : i32
    %c0_i32_2 = arith.constant 0 : i32
    return %c0_i32, %c0_i32_0, %c0_i32_1 : i32, i32, i32
  }
  func.func @transform_4(%arg0: i32) -> (i32, i32, i32) {
    %c0_i32 = arith.constant 0 : i32
    %c0_i32_0 = arith.constant 0 : i32
    %c0_i32_1 = arith.constant 0 : i32
    return %arg0, %c0_i32, %c0_i32_0 : i32, i32, i32
  }
}

module attributes {stable_mosaic.version = 11 : i64} {
  func.func @_gn_stats_kernel(%arg0: i32, %arg1: memref<1x64x32xf32, #tpu.memory_space<vmem>>, %arg2: memref<32x16xf32, #tpu.memory_space<vmem>>, %arg3: memref<16x32xf32, #tpu.memory_space<vmem>>, %arg4: memref<1x32xf32, #tpu.memory_space<vmem>>, %arg5: memref<1x32xf32, #tpu.memory_space<vmem>>, %arg6: memref<1x1x32xf32, #tpu.memory_space<vmem>>, %arg7: memref<1x1x32xf32, #tpu.memory_space<vmem>>) attributes {dimension_semantics = [#tpu.dimension_semantics<parallel>], iteration_bounds = array<i64: 2>, scalar_prefetch = 0 : i64, scratch_operands = 0 : i64, tpu.core_type = #tpu.core_type<tc>, window_params = [{transform_indices = @transform_0, window_bounds = array<i64: 1, 64, 32>}, {pipeline_mode = #tpu.pipeline_mode<synchronous>, transform_indices = @transform_1, window_bounds = array<i64: 32, 16>}, {pipeline_mode = #tpu.pipeline_mode<synchronous>, transform_indices = @transform_2, window_bounds = array<i64: 16, 32>}, {pipeline_mode = #tpu.pipeline_mode<synchronous>, transform_indices = @transform_3, window_bounds = array<i64: 1, 32>}, {pipeline_mode = #tpu.pipeline_mode<synchronous>, transform_indices = @transform_4, window_bounds = array<i64: 1, 32>}, {transform_indices = @transform_5, window_bounds = array<i64: 1, 1, 32>}, {transform_indices = @transform_6, window_bounds = array<i64: 1, 1, 32>}]} {
    %c0 = arith.constant 0 : index
    %c0_0 = arith.constant 0 : index
    %c0_1 = arith.constant 0 : index
    %0 = vector.load %arg1[%c0, %c0_0, %c0_1] : memref<1x64x32xf32, #tpu.memory_space<vmem>>, vector<1x64x32xf32>
    %1 = vector.shape_cast %0 : vector<1x64x32xf32> to vector<64x32xf32>
    %cst = arith.constant dense<0.000000e+00> : vector<32xf32>
    %2 = vector.multi_reduction <add>, %1, %cst [0] : vector<64x32xf32> to vector<32xf32>
    %3 = vector.shape_cast %2 : vector<32xf32> to vector<1x32xf32>
    %4 = arith.mulf %1, %1 : vector<64x32xf32>
    %cst_2 = arith.constant dense<0.000000e+00> : vector<32xf32>
    %5 = vector.multi_reduction <add>, %4, %cst_2 [0] : vector<64x32xf32> to vector<32xf32>
    %6 = vector.shape_cast %5 : vector<32xf32> to vector<1x32xf32>
    %c0_3 = arith.constant 0 : index
    %c0_4 = arith.constant 0 : index
    %7 = vector.load %arg2[%c0_3, %c0_4] : memref<32x16xf32, #tpu.memory_space<vmem>>, vector<32x16xf32>
    %cst_5 = arith.constant dense<0.000000e+00> : vector<1x16xf32>
    %8 = tpu.matmul %3, %7, %cst_5 {dimension_numbers = #tpu.dot_dimension_numbers<[1], [0], [0], [1], [0, 0, 1, 1], [], []>} : vector<1x32xf32>, vector<32x16xf32>, vector<1x16xf32> -> vector<1x16xf32>
    %c0_6 = arith.constant 0 : index
    %c0_7 = arith.constant 0 : index
    %9 = vector.load %arg2[%c0_6, %c0_7] : memref<32x16xf32, #tpu.memory_space<vmem>>, vector<32x16xf32>
    %cst_8 = arith.constant dense<0.000000e+00> : vector<1x16xf32>
    %10 = tpu.matmul %6, %9, %cst_8 {dimension_numbers = #tpu.dot_dimension_numbers<[1], [0], [0], [1], [0, 0, 1, 1], [], []>} : vector<1x32xf32>, vector<32x16xf32>, vector<1x16xf32> -> vector<1x16xf32>
    %cst_9 = arith.constant 7.812500e-03 : f32
    %11 = vector.broadcast %cst_9 : f32 to vector<1x16xf32>
    %12 = arith.mulf %8, %11 : vector<1x16xf32>
    %cst_10 = arith.constant 7.812500e-03 : f32
    %13 = vector.broadcast %cst_10 : f32 to vector<1x16xf32>
    %14 = arith.mulf %10, %13 : vector<1x16xf32>
    %15 = arith.mulf %12, %12 : vector<1x16xf32>
    %16 = arith.subf %14, %15 : vector<1x16xf32>
    %cst_11 = arith.constant 0.000000e+00 : f32
    %17 = vector.broadcast %cst_11 : f32 to vector<1x16xf32>
    %18 = arith.maximumf %16, %17 : vector<1x16xf32>
    %c0_12 = arith.constant 0 : index
    %c0_13 = arith.constant 0 : index
    %19 = vector.load %arg3[%c0_12, %c0_13] : memref<16x32xf32, #tpu.memory_space<vmem>>, vector<16x32xf32>
    %cst_14 = arith.constant dense<0.000000e+00> : vector<1x32xf32>
    %20 = tpu.matmul %12, %19, %cst_14 {dimension_numbers = #tpu.dot_dimension_numbers<[1], [0], [0], [1], [0, 0, 1, 1], [], []>} : vector<1x16xf32>, vector<16x32xf32>, vector<1x32xf32> -> vector<1x32xf32>
    %c0_15 = arith.constant 0 : index
    %c0_16 = arith.constant 0 : index
    %21 = vector.load %arg3[%c0_15, %c0_16] : memref<16x32xf32, #tpu.memory_space<vmem>>, vector<16x32xf32>
    %cst_17 = arith.constant dense<0.000000e+00> : vector<1x32xf32>
    %22 = tpu.matmul %18, %21, %cst_17 {dimension_numbers = #tpu.dot_dimension_numbers<[1], [0], [0], [1], [0, 0, 1, 1], [], []>} : vector<1x16xf32>, vector<16x32xf32>, vector<1x32xf32> -> vector<1x32xf32>
    %cst_18 = arith.constant 9.99999974E-6 : f32
    %23 = vector.broadcast %cst_18 : f32 to vector<1x32xf32>
    %24 = arith.addf %22, %23 : vector<1x32xf32>
    %25 = math.rsqrt %24 : vector<1x32xf32>
    %c0_19 = arith.constant 0 : index
    %c0_20 = arith.constant 0 : index
    %26 = vector.load %arg4[%c0_19, %c0_20] : memref<1x32xf32, #tpu.memory_space<vmem>>, vector<1x32xf32>
    %27 = arith.mulf %26, %25 : vector<1x32xf32>
    %c0_21 = arith.constant 0 : index
    %c0_22 = arith.constant 0 : index
    %c0_23 = arith.constant 0 : index
    %28 = vector.load %arg6[%c0_21, %c0_22, %c0_23] : memref<1x1x32xf32, #tpu.memory_space<vmem>>, vector<1x1x32xf32>
    %29 = vector.shape_cast %28 : vector<1x1x32xf32> to vector<1x32xf32>
    %30 = vector.shape_cast %27 : vector<1x32xf32> to vector<1x1x32xf32>
    tpu.vector_store %arg6[%c0_21, %c0_22, %c0_23], %30 {strides = array<i32>} : memref<1x1x32xf32, #tpu.memory_space<vmem>>, vector<1x1x32xf32>,
    %c0_24 = arith.constant 0 : index
    %c0_25 = arith.constant 0 : index
    %31 = vector.load %arg5[%c0_24, %c0_25] : memref<1x32xf32, #tpu.memory_space<vmem>>, vector<1x32xf32>
    %32 = arith.mulf %20, %27 : vector<1x32xf32>
    %33 = arith.subf %31, %32 : vector<1x32xf32>
    %c0_26 = arith.constant 0 : index
    %c0_27 = arith.constant 0 : index
    %c0_28 = arith.constant 0 : index
    %34 = vector.load %arg7[%c0_26, %c0_27, %c0_28] : memref<1x1x32xf32, #tpu.memory_space<vmem>>, vector<1x1x32xf32>
    %35 = vector.shape_cast %34 : vector<1x1x32xf32> to vector<1x32xf32>
    %36 = vector.shape_cast %33 : vector<1x32xf32> to vector<1x1x32xf32>
    tpu.vector_store %arg7[%c0_26, %c0_27, %c0_28], %36 {strides = array<i32>} : memref<1x1x32xf32, #tpu.memory_space<vmem>>, vector<1x1x32xf32>,
    return
  }
  func.func @transform_0(%arg0: i32) -> (i32, i32, i32) {
    %c0_i32 = arith.constant 0 : i32
    %c0_i32_0 = arith.constant 0 : i32
    %c0_i32_1 = arith.constant 0 : i32
    return %arg0, %c0_i32, %c0_i32_0 : i32, i32, i32
  }
  func.func @transform_1(%arg0: i32) -> (i32, i32) {
    %c0_i32 = arith.constant 0 : i32
    %c0_i32_0 = arith.constant 0 : i32
    %c0_i32_1 = arith.constant 0 : i32
    return %c0_i32, %c0_i32_0 : i32, i32
  }
  func.func @transform_2(%arg0: i32) -> (i32, i32) {
    %c0_i32 = arith.constant 0 : i32
    %c0_i32_0 = arith.constant 0 : i32
    %c0_i32_1 = arith.constant 0 : i32
    return %c0_i32, %c0_i32_0 : i32, i32
  }
  func.func @transform_3(%arg0: i32) -> (i32, i32) {
    %c0_i32 = arith.constant 0 : i32
    %c0_i32_0 = arith.constant 0 : i32
    %c0_i32_1 = arith.constant 0 : i32
    return %c0_i32, %c0_i32_0 : i32, i32
  }
  func.func @transform_4(%arg0: i32) -> (i32, i32) {
    %c0_i32 = arith.constant 0 : i32
    %c0_i32_0 = arith.constant 0 : i32
    %c0_i32_1 = arith.constant 0 : i32
    return %c0_i32, %c0_i32_0 : i32, i32
  }
  func.func @transform_5(%arg0: i32) -> (i32, i32, i32) {
    %c0_i32 = arith.constant 0 : i32
    %c0_i32_0 = arith.constant 0 : i32
    %c0_i32_1 = arith.constant 0 : i32
    return %arg0, %c0_i32, %c0_i32_0 : i32, i32, i32
  }
  func.func @transform_6(%arg0: i32) -> (i32, i32, i32) {
    %c0_i32 = arith.constant 0 : i32
    %c0_i32_0 = arith.constant 0 : i32
    %c0_i32_1 = arith.constant 0 : i32
    return %arg0, %c0_i32, %c0_i32_0 : i32, i32, i32
  }
}

module attributes {stable_mosaic.version = 11 : i64} {
  func.func @_gnrelu_conv3x3_kernel(%arg0: i32, %arg1: memref<1x64x32xf32, #tpu.memory_space<vmem>>, %arg2: memref<1x1x32xf32, #tpu.memory_space<vmem>>, %arg3: memref<1x1x32xf32, #tpu.memory_space<vmem>>, %arg4: memref<9x32x32xbf16, #tpu.memory_space<vmem>>, %arg5: memref<1x64x32xf32, #tpu.memory_space<vmem>>, %arg6: memref<96x32xbf16, #tpu.memory_space<vmem>>) attributes {dimension_semantics = [#tpu.dimension_semantics<parallel>], iteration_bounds = array<i64: 2>, scalar_prefetch = 0 : i64, scratch_operands = 1 : i64, tpu.core_type = #tpu.core_type<tc>, window_params = [{transform_indices = @transform_0, window_bounds = array<i64: 1, 64, 32>}, {transform_indices = @transform_1, window_bounds = array<i64: 1, 1, 32>}, {transform_indices = @transform_2, window_bounds = array<i64: 1, 1, 32>}, {pipeline_mode = #tpu.pipeline_mode<synchronous>, transform_indices = @transform_3, window_bounds = array<i64: 9, 32, 32>}, {transform_indices = @transform_4, window_bounds = array<i64: 1, 64, 32>}]} {
    %cst = arith.constant 0.000000e+00 : bf16
    %0 = vector.broadcast %cst : bf16 to vector<96x32xbf16>
    %c0 = arith.constant 0 : index
    %c0_0 = arith.constant 0 : index
    %1 = vector.load %arg6[%c0, %c0_0] : memref<96x32xbf16, #tpu.memory_space<vmem>>, vector<96x32xbf16>
    tpu.vector_store %arg6[%c0, %c0_0], %0 {strides = array<i32>} : memref<96x32xbf16, #tpu.memory_space<vmem>>, vector<96x32xbf16>,
    %c0_1 = arith.constant 0 : index
    %c0_2 = arith.constant 0 : index
    %c0_3 = arith.constant 0 : index
    %2 = vector.load %arg1[%c0_1, %c0_2, %c0_3] : memref<1x64x32xf32, #tpu.memory_space<vmem>>, vector<1x64x32xf32>
    %3 = vector.shape_cast %2 : vector<1x64x32xf32> to vector<64x32xf32>
    %c0_4 = arith.constant 0 : index
    %c0_5 = arith.constant 0 : index
    %c0_6 = arith.constant 0 : index
    %4 = vector.load %arg2[%c0_4, %c0_5, %c0_6] : memref<1x1x32xf32, #tpu.memory_space<vmem>>, vector<1x1x32xf32>
    %5 = vector.shape_cast %4 : vector<1x1x32xf32> to vector<1x32xf32>
    %6 = vector.broadcast %5 : vector<1x32xf32> to vector<64x32xf32>
    %7 = arith.mulf %3, %6 : vector<64x32xf32>
    %c0_7 = arith.constant 0 : index
    %c0_8 = arith.constant 0 : index
    %c0_9 = arith.constant 0 : index
    %8 = vector.load %arg3[%c0_7, %c0_8, %c0_9] : memref<1x1x32xf32, #tpu.memory_space<vmem>>, vector<1x1x32xf32>
    %9 = vector.shape_cast %8 : vector<1x1x32xf32> to vector<1x32xf32>
    %10 = vector.broadcast %9 : vector<1x32xf32> to vector<64x32xf32>
    %11 = arith.addf %7, %10 : vector<64x32xf32>
    %cst_10 = arith.constant 0.000000e+00 : f32
    %12 = vector.broadcast %cst_10 : f32 to vector<64x32xf32>
    %13 = arith.maximumf %11, %12 : vector<64x32xf32>
    %14 = arith.truncf %13 : vector<64x32xf32> to vector<64x32xbf16>
    %c16 = arith.constant 16 : index
    %c0_11 = arith.constant 0 : index
    %15 = vector.load %arg6[%c16, %c0_11] : memref<96x32xbf16, #tpu.memory_space<vmem>>, vector<64x32xbf16>
    tpu.vector_store %arg6[%c16, %c0_11], %14 {strides = array<i32>} : memref<96x32xbf16, #tpu.memory_space<vmem>>, vector<64x32xbf16>,
    %16 = tpu.iota {dimensions = array<i32: 0>} : vector<64x1xi32>
    %c8_i32 = arith.constant 8 : i32
    %c0_i32 = arith.constant 0 : i32
    %17 = arith.cmpi eq, %c8_i32, %c0_i32 : i32
    %c1_i32 = arith.constant 1 : i32
    %18 = arith.select %17, %c1_i32, %c8_i32 : i32
    %19 = vector.broadcast %18 : i32 to vector<64x1xi32>
    %20 = arith.remsi %16, %19 : vector<64x1xi32>
    %c0_i32_12 = arith.constant 0 : i32
    %21 = vector.broadcast %c0_i32_12 : i32 to vector<64x1xi32>
    %22 = arith.cmpi ne, %20, %21 : vector<64x1xi32>
    %c0_i32_13 = arith.constant 0 : i32
    %23 = vector.broadcast %c0_i32_13 : i32 to vector<64x1xi32>
    %24 = arith.cmpi slt, %20, %23 : vector<64x1xi32>
    %c0_i32_14 = arith.constant 0 : i32
    %25 = arith.cmpi slt, %18, %c0_i32_14 : i32
    %26 = vector.broadcast %25 : i1 to vector<64x1xi1>
    %27 = vector.broadcast %26 : vector<64x1xi1> to vector<64x1xi1>
    %28 = arith.xori %24, %27 : vector<64x1xi1>
    %29 = arith.andi %28, %22 : vector<64x1xi1>
    %30 = vector.broadcast %18 : i32 to vector<64x1xi32>
    %31 = arith.addi %20, %30 : vector<64x1xi32>
    %32 = arith.select %29, %31, %20 : vector<64x1xi1>, vector<64x1xi32>
    %c0_i32_15 = arith.constant 0 : i32
    %33 = vector.broadcast %c0_i32_15 : i32 to vector<64x1xi32>
    %34 = arith.cmpi ne, %32, %33 : vector<64x1xi32>
    %35 = arith.extui %34 : vector<64x1xi1> to vector<64x1xi32>
    %36 = arith.sitofp %35 : vector<64x1xi32> to vector<64x1xf32>
    %37 = arith.truncf %36 : vector<64x1xf32> to vector<64x1xbf16>
    %c7_i32 = arith.constant 7 : i32
    %38 = vector.broadcast %c7_i32 : i32 to vector<64x1xi32>
    %39 = arith.cmpi ne, %32, %38 : vector<64x1xi32>
    %40 = arith.extui %39 : vector<64x1xi1> to vector<64x1xi32>
    %41 = arith.sitofp %40 : vector<64x1xi32> to vector<64x1xf32>
    %42 = arith.truncf %41 : vector<64x1xf32> to vector<64x1xbf16>
    %cst_16 = arith.constant 0.000000e+00 : f32
    %43 = vector.broadcast %cst_16 : f32 to vector<64x32xf32>
    %c7 = arith.constant 7 : index
    %c0_17 = arith.constant 0 : index
    %44 = vector.load %arg6[%c7, %c0_17] : memref<96x32xbf16, #tpu.memory_space<vmem>>, vector<64x32xbf16>
    %45 = vector.broadcast %37 : vector<64x1xbf16> to vector<64x32xbf16>
    %46 = arith.mulf %44, %45 : vector<64x32xbf16>
    %c0_18 = arith.constant 0 : index
    %c0_19 = arith.constant 0 : index
    %c0_20 = arith.constant 0 : index
    %47 = vector.load %arg4[%c0_18, %c0_19, %c0_20] : memref<9x32x32xbf16, #tpu.memory_space<vmem>>, vector<1x32x32xbf16>
    %48 = vector.shape_cast %47 : vector<1x32x32xbf16> to vector<32x32xbf16>
    %cst_21 = arith.constant dense<0.000000e+00> : vector<64x32xf32>
    %49 = tpu.matmul %46, %48, %cst_21 {dimension_numbers = #tpu.dot_dimension_numbers<[1], [0], [0], [1], [0, 0, 1, 1], [], []>} : vector<64x32xbf16>, vector<32x32xbf16>, vector<64x32xf32> -> vector<64x32xf32>
    %50 = arith.addf %43, %49 : vector<64x32xf32>
    %c8 = arith.constant 8 : index
    %c0_22 = arith.constant 0 : index
    %51 = vector.load %arg6[%c8, %c0_22] : memref<96x32xbf16, #tpu.memory_space<vmem>>, vector<64x32xbf16>
    %c1 = arith.constant 1 : index
    %c0_23 = arith.constant 0 : index
    %c0_24 = arith.constant 0 : index
    %52 = vector.load %arg4[%c1, %c0_23, %c0_24] : memref<9x32x32xbf16, #tpu.memory_space<vmem>>, vector<1x32x32xbf16>
    %53 = vector.shape_cast %52 : vector<1x32x32xbf16> to vector<32x32xbf16>
    %cst_25 = arith.constant dense<0.000000e+00> : vector<64x32xf32>
    %54 = tpu.matmul %51, %53, %cst_25 {dimension_numbers = #tpu.dot_dimension_numbers<[1], [0], [0], [1], [0, 0, 1, 1], [], []>} : vector<64x32xbf16>, vector<32x32xbf16>, vector<64x32xf32> -> vector<64x32xf32>
    %55 = arith.addf %50, %54 : vector<64x32xf32>
    %c9 = arith.constant 9 : index
    %c0_26 = arith.constant 0 : index
    %56 = vector.load %arg6[%c9, %c0_26] : memref<96x32xbf16, #tpu.memory_space<vmem>>, vector<64x32xbf16>
    %57 = vector.broadcast %42 : vector<64x1xbf16> to vector<64x32xbf16>
    %58 = arith.mulf %56, %57 : vector<64x32xbf16>
    %c2 = arith.constant 2 : index
    %c0_27 = arith.constant 0 : index
    %c0_28 = arith.constant 0 : index
    %59 = vector.load %arg4[%c2, %c0_27, %c0_28] : memref<9x32x32xbf16, #tpu.memory_space<vmem>>, vector<1x32x32xbf16>
    %60 = vector.shape_cast %59 : vector<1x32x32xbf16> to vector<32x32xbf16>
    %cst_29 = arith.constant dense<0.000000e+00> : vector<64x32xf32>
    %61 = tpu.matmul %58, %60, %cst_29 {dimension_numbers = #tpu.dot_dimension_numbers<[1], [0], [0], [1], [0, 0, 1, 1], [], []>} : vector<64x32xbf16>, vector<32x32xbf16>, vector<64x32xf32> -> vector<64x32xf32>
    %62 = arith.addf %55, %61 : vector<64x32xf32>
    %c15 = arith.constant 15 : index
    %c0_30 = arith.constant 0 : index
    %63 = vector.load %arg6[%c15, %c0_30] : memref<96x32xbf16, #tpu.memory_space<vmem>>, vector<64x32xbf16>
    %64 = vector.broadcast %37 : vector<64x1xbf16> to vector<64x32xbf16>
    %65 = arith.mulf %63, %64 : vector<64x32xbf16>
    %c3 = arith.constant 3 : index
    %c0_31 = arith.constant 0 : index
    %c0_32 = arith.constant 0 : index
    %66 = vector.load %arg4[%c3, %c0_31, %c0_32] : memref<9x32x32xbf16, #tpu.memory_space<vmem>>, vector<1x32x32xbf16>
    %67 = vector.shape_cast %66 : vector<1x32x32xbf16> to vector<32x32xbf16>
    %cst_33 = arith.constant dense<0.000000e+00> : vector<64x32xf32>
    %68 = tpu.matmul %65, %67, %cst_33 {dimension_numbers = #tpu.dot_dimension_numbers<[1], [0], [0], [1], [0, 0, 1, 1], [], []>} : vector<64x32xbf16>, vector<32x32xbf16>, vector<64x32xf32> -> vector<64x32xf32>
    %69 = arith.addf %62, %68 : vector<64x32xf32>
    %c16_34 = arith.constant 16 : index
    %c0_35 = arith.constant 0 : index
    %70 = vector.load %arg6[%c16_34, %c0_35] : memref<96x32xbf16, #tpu.memory_space<vmem>>, vector<64x32xbf16>
    %c4 = arith.constant 4 : index
    %c0_36 = arith.constant 0 : index
    %c0_37 = arith.constant 0 : index
    %71 = vector.load %arg4[%c4, %c0_36, %c0_37] : memref<9x32x32xbf16, #tpu.memory_space<vmem>>, vector<1x32x32xbf16>
    %72 = vector.shape_cast %71 : vector<1x32x32xbf16> to vector<32x32xbf16>
    %cst_38 = arith.constant dense<0.000000e+00> : vector<64x32xf32>
    %73 = tpu.matmul %70, %72, %cst_38 {dimension_numbers = #tpu.dot_dimension_numbers<[1], [0], [0], [1], [0, 0, 1, 1], [], []>} : vector<64x32xbf16>, vector<32x32xbf16>, vector<64x32xf32> -> vector<64x32xf32>
    %74 = arith.addf %69, %73 : vector<64x32xf32>
    %c17 = arith.constant 17 : index
    %c0_39 = arith.constant 0 : index
    %75 = vector.load %arg6[%c17, %c0_39] : memref<96x32xbf16, #tpu.memory_space<vmem>>, vector<64x32xbf16>
    %76 = vector.broadcast %42 : vector<64x1xbf16> to vector<64x32xbf16>
    %77 = arith.mulf %75, %76 : vector<64x32xbf16>
    %c5 = arith.constant 5 : index
    %c0_40 = arith.constant 0 : index
    %c0_41 = arith.constant 0 : index
    %78 = vector.load %arg4[%c5, %c0_40, %c0_41] : memref<9x32x32xbf16, #tpu.memory_space<vmem>>, vector<1x32x32xbf16>
    %79 = vector.shape_cast %78 : vector<1x32x32xbf16> to vector<32x32xbf16>
    %cst_42 = arith.constant dense<0.000000e+00> : vector<64x32xf32>
    %80 = tpu.matmul %77, %79, %cst_42 {dimension_numbers = #tpu.dot_dimension_numbers<[1], [0], [0], [1], [0, 0, 1, 1], [], []>} : vector<64x32xbf16>, vector<32x32xbf16>, vector<64x32xf32> -> vector<64x32xf32>
    %81 = arith.addf %74, %80 : vector<64x32xf32>
    %c23 = arith.constant 23 : index
    %c0_43 = arith.constant 0 : index
    %82 = vector.load %arg6[%c23, %c0_43] : memref<96x32xbf16, #tpu.memory_space<vmem>>, vector<64x32xbf16>
    %83 = vector.broadcast %37 : vector<64x1xbf16> to vector<64x32xbf16>
    %84 = arith.mulf %82, %83 : vector<64x32xbf16>
    %c6 = arith.constant 6 : index
    %c0_44 = arith.constant 0 : index
    %c0_45 = arith.constant 0 : index
    %85 = vector.load %arg4[%c6, %c0_44, %c0_45] : memref<9x32x32xbf16, #tpu.memory_space<vmem>>, vector<1x32x32xbf16>
    %86 = vector.shape_cast %85 : vector<1x32x32xbf16> to vector<32x32xbf16>
    %cst_46 = arith.constant dense<0.000000e+00> : vector<64x32xf32>
    %87 = tpu.matmul %84, %86, %cst_46 {dimension_numbers = #tpu.dot_dimension_numbers<[1], [0], [0], [1], [0, 0, 1, 1], [], []>} : vector<64x32xbf16>, vector<32x32xbf16>, vector<64x32xf32> -> vector<64x32xf32>
    %88 = arith.addf %81, %87 : vector<64x32xf32>
    %c24 = arith.constant 24 : index
    %c0_47 = arith.constant 0 : index
    %89 = vector.load %arg6[%c24, %c0_47] : memref<96x32xbf16, #tpu.memory_space<vmem>>, vector<64x32xbf16>
    %c7_48 = arith.constant 7 : index
    %c0_49 = arith.constant 0 : index
    %c0_50 = arith.constant 0 : index
    %90 = vector.load %arg4[%c7_48, %c0_49, %c0_50] : memref<9x32x32xbf16, #tpu.memory_space<vmem>>, vector<1x32x32xbf16>
    %91 = vector.shape_cast %90 : vector<1x32x32xbf16> to vector<32x32xbf16>
    %cst_51 = arith.constant dense<0.000000e+00> : vector<64x32xf32>
    %92 = tpu.matmul %89, %91, %cst_51 {dimension_numbers = #tpu.dot_dimension_numbers<[1], [0], [0], [1], [0, 0, 1, 1], [], []>} : vector<64x32xbf16>, vector<32x32xbf16>, vector<64x32xf32> -> vector<64x32xf32>
    %93 = arith.addf %88, %92 : vector<64x32xf32>
    %c25 = arith.constant 25 : index
    %c0_52 = arith.constant 0 : index
    %94 = vector.load %arg6[%c25, %c0_52] : memref<96x32xbf16, #tpu.memory_space<vmem>>, vector<64x32xbf16>
    %95 = vector.broadcast %42 : vector<64x1xbf16> to vector<64x32xbf16>
    %96 = arith.mulf %94, %95 : vector<64x32xbf16>
    %c8_53 = arith.constant 8 : index
    %c0_54 = arith.constant 0 : index
    %c0_55 = arith.constant 0 : index
    %97 = vector.load %arg4[%c8_53, %c0_54, %c0_55] : memref<9x32x32xbf16, #tpu.memory_space<vmem>>, vector<1x32x32xbf16>
    %98 = vector.shape_cast %97 : vector<1x32x32xbf16> to vector<32x32xbf16>
    %cst_56 = arith.constant dense<0.000000e+00> : vector<64x32xf32>
    %99 = tpu.matmul %96, %98, %cst_56 {dimension_numbers = #tpu.dot_dimension_numbers<[1], [0], [0], [1], [0, 0, 1, 1], [], []>} : vector<64x32xbf16>, vector<32x32xbf16>, vector<64x32xf32> -> vector<64x32xf32>
    %100 = arith.addf %93, %99 : vector<64x32xf32>
    %c0_57 = arith.constant 0 : index
    %c0_58 = arith.constant 0 : index
    %c0_59 = arith.constant 0 : index
    %101 = vector.load %arg5[%c0_57, %c0_58, %c0_59] : memref<1x64x32xf32, #tpu.memory_space<vmem>>, vector<1x64x32xf32>
    %102 = vector.shape_cast %101 : vector<1x64x32xf32> to vector<64x32xf32>
    %103 = vector.shape_cast %100 : vector<64x32xf32> to vector<1x64x32xf32>
    tpu.vector_store %arg5[%c0_57, %c0_58, %c0_59], %103 {strides = array<i32>} : memref<1x64x32xf32, #tpu.memory_space<vmem>>, vector<1x64x32xf32>,
    return
  }
  func.func @transform_0(%arg0: i32) -> (i32, i32, i32) {
    %c0_i32 = arith.constant 0 : i32
    %c0_i32_0 = arith.constant 0 : i32
    %c0_i32_1 = arith.constant 0 : i32
    return %arg0, %c0_i32, %c0_i32_0 : i32, i32, i32
  }
  func.func @transform_1(%arg0: i32) -> (i32, i32, i32) {
    %c0_i32 = arith.constant 0 : i32
    %c0_i32_0 = arith.constant 0 : i32
    %c0_i32_1 = arith.constant 0 : i32
    return %arg0, %c0_i32, %c0_i32_0 : i32, i32, i32
  }
  func.func @transform_2(%arg0: i32) -> (i32, i32, i32) {
    %c0_i32 = arith.constant 0 : i32
    %c0_i32_0 = arith.constant 0 : i32
    %c0_i32_1 = arith.constant 0 : i32
    return %arg0, %c0_i32, %c0_i32_0 : i32, i32, i32
  }
  func.func @transform_3(%arg0: i32) -> (i32, i32, i32) {
    %c0_i32 = arith.constant 0 : i32
    %c0_i32_0 = arith.constant 0 : i32
    %c0_i32_1 = arith.constant 0 : i32
    %c0_i32_2 = arith.constant 0 : i32
    return %c0_i32, %c0_i32_0, %c0_i32_1 : i32, i32, i32
  }
  func.func @transform_4(%arg0: i32) -> (i32, i32, i32) {
    %c0_i32 = arith.constant 0 : i32
    %c0_i32_0 = arith.constant 0 : i32
    %c0_i32_1 = arith.constant 0 : i32
    return %arg0, %c0_i32, %c0_i32_0 : i32, i32, i32
  }
}

module attributes {stable_mosaic.version = 11 : i64} {
  func.func @_cascade_pool_kernel(%arg0: i32, %arg1: memref<1x4x2x4x64xf32, #tpu.memory_space<vmem>>, %arg2: memref<1x4x2x4x32xf32, #tpu.memory_space<vmem>>, %arg3: memref<1x4x4x32xf32, #tpu.memory_space<vmem>>) attributes {dimension_semantics = [#tpu.dimension_semantics<parallel>], iteration_bounds = array<i64: 2>, scalar_prefetch = 0 : i64, scratch_operands = 0 : i64, tpu.core_type = #tpu.core_type<tc>, window_params = [{transform_indices = @transform_0, window_bounds = array<i64: 1, 4, 2, 4, 64>}, {transform_indices = @transform_1, window_bounds = array<i64: 1, 4, 2, 4, 32>}, {transform_indices = @transform_2, window_bounds = array<i64: 1, 4, 4, 32>}]} {
    %c0 = arith.constant 0 : index
    %c0_0 = arith.constant 0 : index
    %c0_1 = arith.constant 0 : index
    %c0_2 = arith.constant 0 : index
    %c0_3 = arith.constant 0 : index
    %0 = vector.load %arg1[%c0, %c0_0, %c0_1, %c0_2, %c0_3] : memref<1x4x2x4x64xf32, #tpu.memory_space<vmem>>, vector<1x4x2x4x64xf32>
    %1 = vector.shape_cast %0 : vector<1x4x2x4x64xf32> to vector<4x2x4x64xf32>
    %c0_4 = arith.constant 0 : index
    %c0_5 = arith.constant 0 : index
    %c0_6 = arith.constant 0 : index
    %c0_7 = arith.constant 0 : index
    %c0_8 = arith.constant 0 : index
    %2 = vector.load %arg2[%c0_4, %c0_5, %c0_6, %c0_7, %c0_8] : memref<1x4x2x4x32xf32, #tpu.memory_space<vmem>>, vector<1x4x2x4x32xf32>
    %3 = vector.shape_cast %2 : vector<1x4x2x4x32xf32> to vector<4x2x4x32xf32>
    %4 = vector.extract_strided_slice %1 {offsets = [0, 0, 0, 0], sizes = [4, 1, 4, 64], strides = [1, 1, 1, 1]} : vector<4x2x4x64xf32> to vector<4x1x4x64xf32>
    %5 = vector.shape_cast %4 : vector<4x1x4x64xf32> to vector<4x4x64xf32>
    %6 = vector.extract_strided_slice %1 {offsets = [0, 1, 0, 0], sizes = [4, 1, 4, 64], strides = [1, 1, 1, 1]} : vector<4x2x4x64xf32> to vector<4x1x4x64xf32>
    %7 = vector.shape_cast %6 : vector<4x1x4x64xf32> to vector<4x4x64xf32>
    %8 = arith.addf %5, %7 : vector<4x4x64xf32>
    %9 = vector.extract_strided_slice %3 {offsets = [0, 0, 0, 0], sizes = [4, 1, 4, 32], strides = [1, 1, 1, 1]} : vector<4x2x4x32xf32> to vector<4x1x4x32xf32>
    %10 = vector.shape_cast %9 : vector<4x1x4x32xf32> to vector<4x4x32xf32>
    %11 = vector.extract_strided_slice %3 {offsets = [0, 1, 0, 0], sizes = [4, 1, 4, 32], strides = [1, 1, 1, 1]} : vector<4x2x4x32xf32> to vector<4x1x4x32xf32>
    %12 = vector.shape_cast %11 : vector<4x1x4x32xf32> to vector<4x4x32xf32>
    %13 = arith.addf %10, %12 : vector<4x4x32xf32>
    %14 = vector.extract_strided_slice %8 {offsets = [0, 0, 0], sizes = [4, 4, 32], strides = [1, 1, 1]} : vector<4x4x64xf32> to vector<4x4x32xf32>
    %15 = vector.extract_strided_slice %8 {offsets = [0, 0, 32], sizes = [4, 4, 32], strides = [1, 1, 1]} : vector<4x4x64xf32> to vector<4x4x32xf32>
    %16 = arith.addf %14, %15 : vector<4x4x32xf32>
    %cst = arith.constant 2.500000e-01 : f32
    %17 = vector.broadcast %cst : f32 to vector<4x4x32xf32>
    %18 = arith.mulf %17, %16 : vector<4x4x32xf32>
    %19 = vector.extract_strided_slice %13 {offsets = [0, 0, 0], sizes = [4, 4, 16], strides = [1, 1, 1]} : vector<4x4x32xf32> to vector<4x4x16xf32>
    %20 = vector.extract_strided_slice %13 {offsets = [0, 0, 16], sizes = [4, 4, 16], strides = [1, 1, 1]} : vector<4x4x32xf32> to vector<4x4x16xf32>
    %21 = arith.addf %19, %20 : vector<4x4x16xf32>
    %cst_9 = arith.constant 2.500000e-01 : f32
    %22 = vector.broadcast %cst_9 : f32 to vector<4x4x16xf32>
    %23 = arith.mulf %22, %21 : vector<4x4x16xf32>
    %cst_10 = arith.constant 0.000000e+00 : f32
    %24 = vector.broadcast %cst_10 : f32 to vector<4x4x16xf32>
    %25 = tpu.concatenate %23, %24 in 2 : vector<4x4x16xf32>, vector<4x4x16xf32> -> vector<4x4x32xf32>
    %26 = arith.addf %18, %25 : vector<4x4x32xf32>
    %c0_11 = arith.constant 0 : index
    %c0_12 = arith.constant 0 : index
    %c0_13 = arith.constant 0 : index
    %c0_14 = arith.constant 0 : index
    %27 = vector.load %arg3[%c0_11, %c0_12, %c0_13, %c0_14] : memref<1x4x4x32xf32, #tpu.memory_space<vmem>>, vector<1x4x4x32xf32>
    %28 = vector.shape_cast %27 : vector<1x4x4x32xf32> to vector<4x4x32xf32>
    %29 = vector.shape_cast %26 : vector<4x4x32xf32> to vector<1x4x4x32xf32>
    tpu.vector_store %arg3[%c0_11, %c0_12, %c0_13, %c0_14], %29 {strides = array<i32>} : memref<1x4x4x32xf32, #tpu.memory_space<vmem>>, vector<1x4x4x32xf32>,
    return
  }
  func.func @transform_0(%arg0: i32) -> (i32, i32, i32, i32, i32) {
    %c0_i32 = arith.constant 0 : i32
    %c0_i32_0 = arith.constant 0 : i32
    %c0_i32_1 = arith.constant 0 : i32
    %c0_i32_2 = arith.constant 0 : i32
    %c0_i32_3 = arith.constant 0 : i32
    return %arg0, %c0_i32, %c0_i32_0, %c0_i32_1, %c0_i32_2 : i32, i32, i32, i32, i32
  }
  func.func @transform_1(%arg0: i32) -> (i32, i32, i32, i32, i32) {
    %c0_i32 = arith.constant 0 : i32
    %c0_i32_0 = arith.constant 0 : i32
    %c0_i32_1 = arith.constant 0 : i32
    %c0_i32_2 = arith.constant 0 : i32
    %c0_i32_3 = arith.constant 0 : i32
    return %arg0, %c0_i32, %c0_i32_0, %c0_i32_1, %c0_i32_2 : i32, i32, i32, i32, i32
  }
  func.func @transform_2(%arg0: i32) -> (i32, i32, i32, i32) {
    %c0_i32 = arith.constant 0 : i32
    %c0_i32_0 = arith.constant 0 : i32
    %c0_i32_1 = arith.constant 0 : i32
    %c0_i32_2 = arith.constant 0 : i32
    return %arg0, %c0_i32, %c0_i32_0, %c0_i32_1 : i32, i32, i32, i32
  }
}

module attributes {stable_mosaic.version = 11 : i64} {
  func.func @_gn_stats_kernel(%arg0: i32, %arg1: memref<1x16x32xf32, #tpu.memory_space<vmem>>, %arg2: memref<32x16xf32, #tpu.memory_space<vmem>>, %arg3: memref<16x32xf32, #tpu.memory_space<vmem>>, %arg4: memref<1x32xf32, #tpu.memory_space<vmem>>, %arg5: memref<1x32xf32, #tpu.memory_space<vmem>>, %arg6: memref<1x1x32xf32, #tpu.memory_space<vmem>>, %arg7: memref<1x1x32xf32, #tpu.memory_space<vmem>>) attributes {dimension_semantics = [#tpu.dimension_semantics<parallel>], iteration_bounds = array<i64: 2>, scalar_prefetch = 0 : i64, scratch_operands = 0 : i64, tpu.core_type = #tpu.core_type<tc>, window_params = [{transform_indices = @transform_0, window_bounds = array<i64: 1, 16, 32>}, {pipeline_mode = #tpu.pipeline_mode<synchronous>, transform_indices = @transform_1, window_bounds = array<i64: 32, 16>}, {pipeline_mode = #tpu.pipeline_mode<synchronous>, transform_indices = @transform_2, window_bounds = array<i64: 16, 32>}, {pipeline_mode = #tpu.pipeline_mode<synchronous>, transform_indices = @transform_3, window_bounds = array<i64: 1, 32>}, {pipeline_mode = #tpu.pipeline_mode<synchronous>, transform_indices = @transform_4, window_bounds = array<i64: 1, 32>}, {transform_indices = @transform_5, window_bounds = array<i64: 1, 1, 32>}, {transform_indices = @transform_6, window_bounds = array<i64: 1, 1, 32>}]} {
    %c0 = arith.constant 0 : index
    %c0_0 = arith.constant 0 : index
    %c0_1 = arith.constant 0 : index
    %0 = vector.load %arg1[%c0, %c0_0, %c0_1] : memref<1x16x32xf32, #tpu.memory_space<vmem>>, vector<1x16x32xf32>
    %1 = vector.shape_cast %0 : vector<1x16x32xf32> to vector<16x32xf32>
    %cst = arith.constant dense<0.000000e+00> : vector<32xf32>
    %2 = vector.multi_reduction <add>, %1, %cst [0] : vector<16x32xf32> to vector<32xf32>
    %3 = vector.shape_cast %2 : vector<32xf32> to vector<1x32xf32>
    %4 = arith.mulf %1, %1 : vector<16x32xf32>
    %cst_2 = arith.constant dense<0.000000e+00> : vector<32xf32>
    %5 = vector.multi_reduction <add>, %4, %cst_2 [0] : vector<16x32xf32> to vector<32xf32>
    %6 = vector.shape_cast %5 : vector<32xf32> to vector<1x32xf32>
    %c0_3 = arith.constant 0 : index
    %c0_4 = arith.constant 0 : index
    %7 = vector.load %arg2[%c0_3, %c0_4] : memref<32x16xf32, #tpu.memory_space<vmem>>, vector<32x16xf32>
    %cst_5 = arith.constant dense<0.000000e+00> : vector<1x16xf32>
    %8 = tpu.matmul %3, %7, %cst_5 {dimension_numbers = #tpu.dot_dimension_numbers<[1], [0], [0], [1], [0, 0, 1, 1], [], []>} : vector<1x32xf32>, vector<32x16xf32>, vector<1x16xf32> -> vector<1x16xf32>
    %c0_6 = arith.constant 0 : index
    %c0_7 = arith.constant 0 : index
    %9 = vector.load %arg2[%c0_6, %c0_7] : memref<32x16xf32, #tpu.memory_space<vmem>>, vector<32x16xf32>
    %cst_8 = arith.constant dense<0.000000e+00> : vector<1x16xf32>
    %10 = tpu.matmul %6, %9, %cst_8 {dimension_numbers = #tpu.dot_dimension_numbers<[1], [0], [0], [1], [0, 0, 1, 1], [], []>} : vector<1x32xf32>, vector<32x16xf32>, vector<1x16xf32> -> vector<1x16xf32>
    %cst_9 = arith.constant 3.125000e-02 : f32
    %11 = vector.broadcast %cst_9 : f32 to vector<1x16xf32>
    %12 = arith.mulf %8, %11 : vector<1x16xf32>
    %cst_10 = arith.constant 3.125000e-02 : f32
    %13 = vector.broadcast %cst_10 : f32 to vector<1x16xf32>
    %14 = arith.mulf %10, %13 : vector<1x16xf32>
    %15 = arith.mulf %12, %12 : vector<1x16xf32>
    %16 = arith.subf %14, %15 : vector<1x16xf32>
    %cst_11 = arith.constant 0.000000e+00 : f32
    %17 = vector.broadcast %cst_11 : f32 to vector<1x16xf32>
    %18 = arith.maximumf %16, %17 : vector<1x16xf32>
    %c0_12 = arith.constant 0 : index
    %c0_13 = arith.constant 0 : index
    %19 = vector.load %arg3[%c0_12, %c0_13] : memref<16x32xf32, #tpu.memory_space<vmem>>, vector<16x32xf32>
    %cst_14 = arith.constant dense<0.000000e+00> : vector<1x32xf32>
    %20 = tpu.matmul %12, %19, %cst_14 {dimension_numbers = #tpu.dot_dimension_numbers<[1], [0], [0], [1], [0, 0, 1, 1], [], []>} : vector<1x16xf32>, vector<16x32xf32>, vector<1x32xf32> -> vector<1x32xf32>
    %c0_15 = arith.constant 0 : index
    %c0_16 = arith.constant 0 : index
    %21 = vector.load %arg3[%c0_15, %c0_16] : memref<16x32xf32, #tpu.memory_space<vmem>>, vector<16x32xf32>
    %cst_17 = arith.constant dense<0.000000e+00> : vector<1x32xf32>
    %22 = tpu.matmul %18, %21, %cst_17 {dimension_numbers = #tpu.dot_dimension_numbers<[1], [0], [0], [1], [0, 0, 1, 1], [], []>} : vector<1x16xf32>, vector<16x32xf32>, vector<1x32xf32> -> vector<1x32xf32>
    %cst_18 = arith.constant 9.99999974E-6 : f32
    %23 = vector.broadcast %cst_18 : f32 to vector<1x32xf32>
    %24 = arith.addf %22, %23 : vector<1x32xf32>
    %25 = math.rsqrt %24 : vector<1x32xf32>
    %c0_19 = arith.constant 0 : index
    %c0_20 = arith.constant 0 : index
    %26 = vector.load %arg4[%c0_19, %c0_20] : memref<1x32xf32, #tpu.memory_space<vmem>>, vector<1x32xf32>
    %27 = arith.mulf %26, %25 : vector<1x32xf32>
    %c0_21 = arith.constant 0 : index
    %c0_22 = arith.constant 0 : index
    %c0_23 = arith.constant 0 : index
    %28 = vector.load %arg6[%c0_21, %c0_22, %c0_23] : memref<1x1x32xf32, #tpu.memory_space<vmem>>, vector<1x1x32xf32>
    %29 = vector.shape_cast %28 : vector<1x1x32xf32> to vector<1x32xf32>
    %30 = vector.shape_cast %27 : vector<1x32xf32> to vector<1x1x32xf32>
    tpu.vector_store %arg6[%c0_21, %c0_22, %c0_23], %30 {strides = array<i32>} : memref<1x1x32xf32, #tpu.memory_space<vmem>>, vector<1x1x32xf32>,
    %c0_24 = arith.constant 0 : index
    %c0_25 = arith.constant 0 : index
    %31 = vector.load %arg5[%c0_24, %c0_25] : memref<1x32xf32, #tpu.memory_space<vmem>>, vector<1x32xf32>
    %32 = arith.mulf %20, %27 : vector<1x32xf32>
    %33 = arith.subf %31, %32 : vector<1x32xf32>
    %c0_26 = arith.constant 0 : index
    %c0_27 = arith.constant 0 : index
    %c0_28 = arith.constant 0 : index
    %34 = vector.load %arg7[%c0_26, %c0_27, %c0_28] : memref<1x1x32xf32, #tpu.memory_space<vmem>>, vector<1x1x32xf32>
    %35 = vector.shape_cast %34 : vector<1x1x32xf32> to vector<1x32xf32>
    %36 = vector.shape_cast %33 : vector<1x32xf32> to vector<1x1x32xf32>
    tpu.vector_store %arg7[%c0_26, %c0_27, %c0_28], %36 {strides = array<i32>} : memref<1x1x32xf32, #tpu.memory_space<vmem>>, vector<1x1x32xf32>,
    return
  }
  func.func @transform_0(%arg0: i32) -> (i32, i32, i32) {
    %c0_i32 = arith.constant 0 : i32
    %c0_i32_0 = arith.constant 0 : i32
    %c0_i32_1 = arith.constant 0 : i32
    return %arg0, %c0_i32, %c0_i32_0 : i32, i32, i32
  }
  func.func @transform_1(%arg0: i32) -> (i32, i32) {
    %c0_i32 = arith.constant 0 : i32
    %c0_i32_0 = arith.constant 0 : i32
    %c0_i32_1 = arith.constant 0 : i32
    return %c0_i32, %c0_i32_0 : i32, i32
  }
  func.func @transform_2(%arg0: i32) -> (i32, i32) {
    %c0_i32 = arith.constant 0 : i32
    %c0_i32_0 = arith.constant 0 : i32
    %c0_i32_1 = arith.constant 0 : i32
    return %c0_i32, %c0_i32_0 : i32, i32
  }
  func.func @transform_3(%arg0: i32) -> (i32, i32) {
    %c0_i32 = arith.constant 0 : i32
    %c0_i32_0 = arith.constant 0 : i32
    %c0_i32_1 = arith.constant 0 : i32
    return %c0_i32, %c0_i32_0 : i32, i32
  }
  func.func @transform_4(%arg0: i32) -> (i32, i32) {
    %c0_i32 = arith.constant 0 : i32
    %c0_i32_0 = arith.constant 0 : i32
    %c0_i32_1 = arith.constant 0 : i32
    return %c0_i32, %c0_i32_0 : i32, i32
  }
  func.func @transform_5(%arg0: i32) -> (i32, i32, i32) {
    %c0_i32 = arith.constant 0 : i32
    %c0_i32_0 = arith.constant 0 : i32
    %c0_i32_1 = arith.constant 0 : i32
    return %arg0, %c0_i32, %c0_i32_0 : i32, i32, i32
  }
  func.func @transform_6(%arg0: i32) -> (i32, i32, i32) {
    %c0_i32 = arith.constant 0 : i32
    %c0_i32_0 = arith.constant 0 : i32
    %c0_i32_1 = arith.constant 0 : i32
    return %arg0, %c0_i32, %c0_i32_0 : i32, i32, i32
  }
}

module attributes {stable_mosaic.version = 11 : i64} {
  func.func @_gnrelu_conv3x3_kernel(%arg0: i32, %arg1: memref<1x16x32xf32, #tpu.memory_space<vmem>>, %arg2: memref<1x1x32xf32, #tpu.memory_space<vmem>>, %arg3: memref<1x1x32xf32, #tpu.memory_space<vmem>>, %arg4: memref<9x32x48xbf16, #tpu.memory_space<vmem>>, %arg5: memref<1x16x48xf32, #tpu.memory_space<vmem>>, %arg6: memref<32x32xbf16, #tpu.memory_space<vmem>>) attributes {dimension_semantics = [#tpu.dimension_semantics<parallel>], iteration_bounds = array<i64: 2>, scalar_prefetch = 0 : i64, scratch_operands = 1 : i64, tpu.core_type = #tpu.core_type<tc>, window_params = [{transform_indices = @transform_0, window_bounds = array<i64: 1, 16, 32>}, {transform_indices = @transform_1, window_bounds = array<i64: 1, 1, 32>}, {transform_indices = @transform_2, window_bounds = array<i64: 1, 1, 32>}, {pipeline_mode = #tpu.pipeline_mode<synchronous>, transform_indices = @transform_3, window_bounds = array<i64: 9, 32, 48>}, {transform_indices = @transform_4, window_bounds = array<i64: 1, 16, 48>}]} {
    %cst = arith.constant 0.000000e+00 : bf16
    %0 = vector.broadcast %cst : bf16 to vector<32x32xbf16>
    %c0 = arith.constant 0 : index
    %c0_0 = arith.constant 0 : index
    %1 = vector.load %arg6[%c0, %c0_0] : memref<32x32xbf16, #tpu.memory_space<vmem>>, vector<32x32xbf16>
    tpu.vector_store %arg6[%c0, %c0_0], %0 {strides = array<i32>} : memref<32x32xbf16, #tpu.memory_space<vmem>>, vector<32x32xbf16>,
    %c0_1 = arith.constant 0 : index
    %c0_2 = arith.constant 0 : index
    %c0_3 = arith.constant 0 : index
    %2 = vector.load %arg1[%c0_1, %c0_2, %c0_3] : memref<1x16x32xf32, #tpu.memory_space<vmem>>, vector<1x16x32xf32>
    %3 = vector.shape_cast %2 : vector<1x16x32xf32> to vector<16x32xf32>
    %c0_4 = arith.constant 0 : index
    %c0_5 = arith.constant 0 : index
    %c0_6 = arith.constant 0 : index
    %4 = vector.load %arg2[%c0_4, %c0_5, %c0_6] : memref<1x1x32xf32, #tpu.memory_space<vmem>>, vector<1x1x32xf32>
    %5 = vector.shape_cast %4 : vector<1x1x32xf32> to vector<1x32xf32>
    %6 = vector.broadcast %5 : vector<1x32xf32> to vector<16x32xf32>
    %7 = arith.mulf %3, %6 : vector<16x32xf32>
    %c0_7 = arith.constant 0 : index
    %c0_8 = arith.constant 0 : index
    %c0_9 = arith.constant 0 : index
    %8 = vector.load %arg3[%c0_7, %c0_8, %c0_9] : memref<1x1x32xf32, #tpu.memory_space<vmem>>, vector<1x1x32xf32>
    %9 = vector.shape_cast %8 : vector<1x1x32xf32> to vector<1x32xf32>
    %10 = vector.broadcast %9 : vector<1x32xf32> to vector<16x32xf32>
    %11 = arith.addf %7, %10 : vector<16x32xf32>
    %cst_10 = arith.constant 0.000000e+00 : f32
    %12 = vector.broadcast %cst_10 : f32 to vector<16x32xf32>
    %13 = arith.maximumf %11, %12 : vector<16x32xf32>
    %14 = arith.truncf %13 : vector<16x32xf32> to vector<16x32xbf16>
    %c8 = arith.constant 8 : index
    %c0_11 = arith.constant 0 : index
    %15 = vector.load %arg6[%c8, %c0_11] : memref<32x32xbf16, #tpu.memory_space<vmem>>, vector<16x32xbf16>
    tpu.vector_store %arg6[%c8, %c0_11], %14 {strides = array<i32>} : memref<32x32xbf16, #tpu.memory_space<vmem>>, vector<16x32xbf16>,
    %16 = tpu.iota {dimensions = array<i32: 0>} : vector<16x1xi32>
    %c4_i32 = arith.constant 4 : i32
    %c0_i32 = arith.constant 0 : i32
    %17 = arith.cmpi eq, %c4_i32, %c0_i32 : i32
    %c1_i32 = arith.constant 1 : i32
    %18 = arith.select %17, %c1_i32, %c4_i32 : i32
    %19 = vector.broadcast %18 : i32 to vector<16x1xi32>
    %20 = arith.remsi %16, %19 : vector<16x1xi32>
    %c0_i32_12 = arith.constant 0 : i32
    %21 = vector.broadcast %c0_i32_12 : i32 to vector<16x1xi32>
    %22 = arith.cmpi ne, %20, %21 : vector<16x1xi32>
    %c0_i32_13 = arith.constant 0 : i32
    %23 = vector.broadcast %c0_i32_13 : i32 to vector<16x1xi32>
    %24 = arith.cmpi slt, %20, %23 : vector<16x1xi32>
    %c0_i32_14 = arith.constant 0 : i32
    %25 = arith.cmpi slt, %18, %c0_i32_14 : i32
    %26 = vector.broadcast %25 : i1 to vector<16x1xi1>
    %27 = vector.broadcast %26 : vector<16x1xi1> to vector<16x1xi1>
    %28 = arith.xori %24, %27 : vector<16x1xi1>
    %29 = arith.andi %28, %22 : vector<16x1xi1>
    %30 = vector.broadcast %18 : i32 to vector<16x1xi32>
    %31 = arith.addi %20, %30 : vector<16x1xi32>
    %32 = arith.select %29, %31, %20 : vector<16x1xi1>, vector<16x1xi32>
    %c0_i32_15 = arith.constant 0 : i32
    %33 = vector.broadcast %c0_i32_15 : i32 to vector<16x1xi32>
    %34 = arith.cmpi ne, %32, %33 : vector<16x1xi32>
    %35 = arith.extui %34 : vector<16x1xi1> to vector<16x1xi32>
    %36 = arith.sitofp %35 : vector<16x1xi32> to vector<16x1xf32>
    %37 = arith.truncf %36 : vector<16x1xf32> to vector<16x1xbf16>
    %c3_i32 = arith.constant 3 : i32
    %38 = vector.broadcast %c3_i32 : i32 to vector<16x1xi32>
    %39 = arith.cmpi ne, %32, %38 : vector<16x1xi32>
    %40 = arith.extui %39 : vector<16x1xi1> to vector<16x1xi32>
    %41 = arith.sitofp %40 : vector<16x1xi32> to vector<16x1xf32>
    %42 = arith.truncf %41 : vector<16x1xf32> to vector<16x1xbf16>
    %cst_16 = arith.constant 0.000000e+00 : f32
    %43 = vector.broadcast %cst_16 : f32 to vector<16x48xf32>
    %c3 = arith.constant 3 : index
    %c0_17 = arith.constant 0 : index
    %44 = vector.load %arg6[%c3, %c0_17] : memref<32x32xbf16, #tpu.memory_space<vmem>>, vector<16x32xbf16>
    %45 = vector.broadcast %37 : vector<16x1xbf16> to vector<16x32xbf16>
    %46 = arith.mulf %44, %45 : vector<16x32xbf16>
    %c0_18 = arith.constant 0 : index
    %c0_19 = arith.constant 0 : index
    %c0_20 = arith.constant 0 : index
    %47 = vector.load %arg4[%c0_18, %c0_19, %c0_20] : memref<9x32x48xbf16, #tpu.memory_space<vmem>>, vector<1x32x48xbf16>
    %48 = vector.shape_cast %47 : vector<1x32x48xbf16> to vector<32x48xbf16>
    %cst_21 = arith.constant dense<0.000000e+00> : vector<16x48xf32>
    %49 = tpu.matmul %46, %48, %cst_21 {dimension_numbers = #tpu.dot_dimension_numbers<[1], [0], [0], [1], [0, 0, 1, 1], [], []>} : vector<16x32xbf16>, vector<32x48xbf16>, vector<16x48xf32> -> vector<16x48xf32>
    %50 = arith.addf %43, %49 : vector<16x48xf32>
    %c4 = arith.constant 4 : index
    %c0_22 = arith.constant 0 : index
    %51 = vector.load %arg6[%c4, %c0_22] : memref<32x32xbf16, #tpu.memory_space<vmem>>, vector<16x32xbf16>
    %c1 = arith.constant 1 : index
    %c0_23 = arith.constant 0 : index
    %c0_24 = arith.constant 0 : index
    %52 = vector.load %arg4[%c1, %c0_23, %c0_24] : memref<9x32x48xbf16, #tpu.memory_space<vmem>>, vector<1x32x48xbf16>
    %53 = vector.shape_cast %52 : vector<1x32x48xbf16> to vector<32x48xbf16>
    %cst_25 = arith.constant dense<0.000000e+00> : vector<16x48xf32>
    %54 = tpu.matmul %51, %53, %cst_25 {dimension_numbers = #tpu.dot_dimension_numbers<[1], [0], [0], [1], [0, 0, 1, 1], [], []>} : vector<16x32xbf16>, vector<32x48xbf16>, vector<16x48xf32> -> vector<16x48xf32>
    %55 = arith.addf %50, %54 : vector<16x48xf32>
    %c5 = arith.constant 5 : index
    %c0_26 = arith.constant 0 : index
    %56 = vector.load %arg6[%c5, %c0_26] : memref<32x32xbf16, #tpu.memory_space<vmem>>, vector<16x32xbf16>
    %57 = vector.broadcast %42 : vector<16x1xbf16> to vector<16x32xbf16>
    %58 = arith.mulf %56, %57 : vector<16x32xbf16>
    %c2 = arith.constant 2 : index
    %c0_27 = arith.constant 0 : index
    %c0_28 = arith.constant 0 : index
    %59 = vector.load %arg4[%c2, %c0_27, %c0_28] : memref<9x32x48xbf16, #tpu.memory_space<vmem>>, vector<1x32x48xbf16>
    %60 = vector.shape_cast %59 : vector<1x32x48xbf16> to vector<32x48xbf16>
    %cst_29 = arith.constant dense<0.000000e+00> : vector<16x48xf32>
    %61 = tpu.matmul %58, %60, %cst_29 {dimension_numbers = #tpu.dot_dimension_numbers<[1], [0], [0], [1], [0, 0, 1, 1], [], []>} : vector<16x32xbf16>, vector<32x48xbf16>, vector<16x48xf32> -> vector<16x48xf32>
    %62 = arith.addf %55, %61 : vector<16x48xf32>
    %c7 = arith.constant 7 : index
    %c0_30 = arith.constant 0 : index
    %63 = vector.load %arg6[%c7, %c0_30] : memref<32x32xbf16, #tpu.memory_space<vmem>>, vector<16x32xbf16>
    %64 = vector.broadcast %37 : vector<16x1xbf16> to vector<16x32xbf16>
    %65 = arith.mulf %63, %64 : vector<16x32xbf16>
    %c3_31 = arith.constant 3 : index
    %c0_32 = arith.constant 0 : index
    %c0_33 = arith.constant 0 : index
    %66 = vector.load %arg4[%c3_31, %c0_32, %c0_33] : memref<9x32x48xbf16, #tpu.memory_space<vmem>>, vector<1x32x48xbf16>
    %67 = vector.shape_cast %66 : vector<1x32x48xbf16> to vector<32x48xbf16>
    %cst_34 = arith.constant dense<0.000000e+00> : vector<16x48xf32>
    %68 = tpu.matmul %65, %67, %cst_34 {dimension_numbers = #tpu.dot_dimension_numbers<[1], [0], [0], [1], [0, 0, 1, 1], [], []>} : vector<16x32xbf16>, vector<32x48xbf16>, vector<16x48xf32> -> vector<16x48xf32>
    %69 = arith.addf %62, %68 : vector<16x48xf32>
    %c8_35 = arith.constant 8 : index
    %c0_36 = arith.constant 0 : index
    %70 = vector.load %arg6[%c8_35, %c0_36] : memref<32x32xbf16, #tpu.memory_space<vmem>>, vector<16x32xbf16>
    %c4_37 = arith.constant 4 : index
    %c0_38 = arith.constant 0 : index
    %c0_39 = arith.constant 0 : index
    %71 = vector.load %arg4[%c4_37, %c0_38, %c0_39] : memref<9x32x48xbf16, #tpu.memory_space<vmem>>, vector<1x32x48xbf16>
    %72 = vector.shape_cast %71 : vector<1x32x48xbf16> to vector<32x48xbf16>
    %cst_40 = arith.constant dense<0.000000e+00> : vector<16x48xf32>
    %73 = tpu.matmul %70, %72, %cst_40 {dimension_numbers = #tpu.dot_dimension_numbers<[1], [0], [0], [1], [0, 0, 1, 1], [], []>} : vector<16x32xbf16>, vector<32x48xbf16>, vector<16x48xf32> -> vector<16x48xf32>
    %74 = arith.addf %69, %73 : vector<16x48xf32>
    %c9 = arith.constant 9 : index
    %c0_41 = arith.constant 0 : index
    %75 = vector.load %arg6[%c9, %c0_41] : memref<32x32xbf16, #tpu.memory_space<vmem>>, vector<16x32xbf16>
    %76 = vector.broadcast %42 : vector<16x1xbf16> to vector<16x32xbf16>
    %77 = arith.mulf %75, %76 : vector<16x32xbf16>
    %c5_42 = arith.constant 5 : index
    %c0_43 = arith.constant 0 : index
    %c0_44 = arith.constant 0 : index
    %78 = vector.load %arg4[%c5_42, %c0_43, %c0_44] : memref<9x32x48xbf16, #tpu.memory_space<vmem>>, vector<1x32x48xbf16>
    %79 = vector.shape_cast %78 : vector<1x32x48xbf16> to vector<32x48xbf16>
    %cst_45 = arith.constant dense<0.000000e+00> : vector<16x48xf32>
    %80 = tpu.matmul %77, %79, %cst_45 {dimension_numbers = #tpu.dot_dimension_numbers<[1], [0], [0], [1], [0, 0, 1, 1], [], []>} : vector<16x32xbf16>, vector<32x48xbf16>, vector<16x48xf32> -> vector<16x48xf32>
    %81 = arith.addf %74, %80 : vector<16x48xf32>
    %c11 = arith.constant 11 : index
    %c0_46 = arith.constant 0 : index
    %82 = vector.load %arg6[%c11, %c0_46] : memref<32x32xbf16, #tpu.memory_space<vmem>>, vector<16x32xbf16>
    %83 = vector.broadcast %37 : vector<16x1xbf16> to vector<16x32xbf16>
    %84 = arith.mulf %82, %83 : vector<16x32xbf16>
    %c6 = arith.constant 6 : index
    %c0_47 = arith.constant 0 : index
    %c0_48 = arith.constant 0 : index
    %85 = vector.load %arg4[%c6, %c0_47, %c0_48] : memref<9x32x48xbf16, #tpu.memory_space<vmem>>, vector<1x32x48xbf16>
    %86 = vector.shape_cast %85 : vector<1x32x48xbf16> to vector<32x48xbf16>
    %cst_49 = arith.constant dense<0.000000e+00> : vector<16x48xf32>
    %87 = tpu.matmul %84, %86, %cst_49 {dimension_numbers = #tpu.dot_dimension_numbers<[1], [0], [0], [1], [0, 0, 1, 1], [], []>} : vector<16x32xbf16>, vector<32x48xbf16>, vector<16x48xf32> -> vector<16x48xf32>
    %88 = arith.addf %81, %87 : vector<16x48xf32>
    %c12 = arith.constant 12 : index
    %c0_50 = arith.constant 0 : index
    %89 = vector.load %arg6[%c12, %c0_50] : memref<32x32xbf16, #tpu.memory_space<vmem>>, vector<16x32xbf16>
    %c7_51 = arith.constant 7 : index
    %c0_52 = arith.constant 0 : index
    %c0_53 = arith.constant 0 : index
    %90 = vector.load %arg4[%c7_51, %c0_52, %c0_53] : memref<9x32x48xbf16, #tpu.memory_space<vmem>>, vector<1x32x48xbf16>
    %91 = vector.shape_cast %90 : vector<1x32x48xbf16> to vector<32x48xbf16>
    %cst_54 = arith.constant dense<0.000000e+00> : vector<16x48xf32>
    %92 = tpu.matmul %89, %91, %cst_54 {dimension_numbers = #tpu.dot_dimension_numbers<[1], [0], [0], [1], [0, 0, 1, 1], [], []>} : vector<16x32xbf16>, vector<32x48xbf16>, vector<16x48xf32> -> vector<16x48xf32>
    %93 = arith.addf %88, %92 : vector<16x48xf32>
    %c13 = arith.constant 13 : index
    %c0_55 = arith.constant 0 : index
    %94 = vector.load %arg6[%c13, %c0_55] : memref<32x32xbf16, #tpu.memory_space<vmem>>, vector<16x32xbf16>
    %95 = vector.broadcast %42 : vector<16x1xbf16> to vector<16x32xbf16>
    %96 = arith.mulf %94, %95 : vector<16x32xbf16>
    %c8_56 = arith.constant 8 : index
    %c0_57 = arith.constant 0 : index
    %c0_58 = arith.constant 0 : index
    %97 = vector.load %arg4[%c8_56, %c0_57, %c0_58] : memref<9x32x48xbf16, #tpu.memory_space<vmem>>, vector<1x32x48xbf16>
    %98 = vector.shape_cast %97 : vector<1x32x48xbf16> to vector<32x48xbf16>
    %cst_59 = arith.constant dense<0.000000e+00> : vector<16x48xf32>
    %99 = tpu.matmul %96, %98, %cst_59 {dimension_numbers = #tpu.dot_dimension_numbers<[1], [0], [0], [1], [0, 0, 1, 1], [], []>} : vector<16x32xbf16>, vector<32x48xbf16>, vector<16x48xf32> -> vector<16x48xf32>
    %100 = arith.addf %93, %99 : vector<16x48xf32>
    %c0_60 = arith.constant 0 : index
    %c0_61 = arith.constant 0 : index
    %c0_62 = arith.constant 0 : index
    %101 = vector.load %arg5[%c0_60, %c0_61, %c0_62] : memref<1x16x48xf32, #tpu.memory_space<vmem>>, vector<1x16x48xf32>
    %102 = vector.shape_cast %101 : vector<1x16x48xf32> to vector<16x48xf32>
    %103 = vector.shape_cast %100 : vector<16x48xf32> to vector<1x16x48xf32>
    tpu.vector_store %arg5[%c0_60, %c0_61, %c0_62], %103 {strides = array<i32>} : memref<1x16x48xf32, #tpu.memory_space<vmem>>, vector<1x16x48xf32>,
    return
  }
  func.func @transform_0(%arg0: i32) -> (i32, i32, i32) {
    %c0_i32 = arith.constant 0 : i32
    %c0_i32_0 = arith.constant 0 : i32
    %c0_i32_1 = arith.constant 0 : i32
    return %arg0, %c0_i32, %c0_i32_0 : i32, i32, i32
  }
  func.func @transform_1(%arg0: i32) -> (i32, i32, i32) {
    %c0_i32 = arith.constant 0 : i32
    %c0_i32_0 = arith.constant 0 : i32
    %c0_i32_1 = arith.constant 0 : i32
    return %arg0, %c0_i32, %c0_i32_0 : i32, i32, i32
  }
  func.func @transform_2(%arg0: i32) -> (i32, i32, i32) {
    %c0_i32 = arith.constant 0 : i32
    %c0_i32_0 = arith.constant 0 : i32
    %c0_i32_1 = arith.constant 0 : i32
    return %arg0, %c0_i32, %c0_i32_0 : i32, i32, i32
  }
  func.func @transform_3(%arg0: i32) -> (i32, i32, i32) {
    %c0_i32 = arith.constant 0 : i32
    %c0_i32_0 = arith.constant 0 : i32
    %c0_i32_1 = arith.constant 0 : i32
    %c0_i32_2 = arith.constant 0 : i32
    return %c0_i32, %c0_i32_0, %c0_i32_1 : i32, i32, i32
  }
  func.func @transform_4(%arg0: i32) -> (i32, i32, i32) {
    %c0_i32 = arith.constant 0 : i32
    %c0_i32_0 = arith.constant 0 : i32
    %c0_i32_1 = arith.constant 0 : i32
    return %arg0, %c0_i32, %c0_i32_0 : i32, i32, i32
  }
}

module attributes {stable_mosaic.version = 11 : i64} {
  func.func @_gn_stats_kernel(%arg0: i32, %arg1: memref<1x16x48xf32, #tpu.memory_space<vmem>>, %arg2: memref<48x16xf32, #tpu.memory_space<vmem>>, %arg3: memref<16x48xf32, #tpu.memory_space<vmem>>, %arg4: memref<1x48xf32, #tpu.memory_space<vmem>>, %arg5: memref<1x48xf32, #tpu.memory_space<vmem>>, %arg6: memref<1x1x48xf32, #tpu.memory_space<vmem>>, %arg7: memref<1x1x48xf32, #tpu.memory_space<vmem>>) attributes {dimension_semantics = [#tpu.dimension_semantics<parallel>], iteration_bounds = array<i64: 2>, scalar_prefetch = 0 : i64, scratch_operands = 0 : i64, tpu.core_type = #tpu.core_type<tc>, window_params = [{transform_indices = @transform_0, window_bounds = array<i64: 1, 16, 48>}, {pipeline_mode = #tpu.pipeline_mode<synchronous>, transform_indices = @transform_1, window_bounds = array<i64: 48, 16>}, {pipeline_mode = #tpu.pipeline_mode<synchronous>, transform_indices = @transform_2, window_bounds = array<i64: 16, 48>}, {pipeline_mode = #tpu.pipeline_mode<synchronous>, transform_indices = @transform_3, window_bounds = array<i64: 1, 48>}, {pipeline_mode = #tpu.pipeline_mode<synchronous>, transform_indices = @transform_4, window_bounds = array<i64: 1, 48>}, {transform_indices = @transform_5, window_bounds = array<i64: 1, 1, 48>}, {transform_indices = @transform_6, window_bounds = array<i64: 1, 1, 48>}]} {
    %c0 = arith.constant 0 : index
    %c0_0 = arith.constant 0 : index
    %c0_1 = arith.constant 0 : index
    %0 = vector.load %arg1[%c0, %c0_0, %c0_1] : memref<1x16x48xf32, #tpu.memory_space<vmem>>, vector<1x16x48xf32>
    %1 = vector.shape_cast %0 : vector<1x16x48xf32> to vector<16x48xf32>
    %cst = arith.constant dense<0.000000e+00> : vector<48xf32>
    %2 = vector.multi_reduction <add>, %1, %cst [0] : vector<16x48xf32> to vector<48xf32>
    %3 = vector.shape_cast %2 : vector<48xf32> to vector<1x48xf32>
    %4 = arith.mulf %1, %1 : vector<16x48xf32>
    %cst_2 = arith.constant dense<0.000000e+00> : vector<48xf32>
    %5 = vector.multi_reduction <add>, %4, %cst_2 [0] : vector<16x48xf32> to vector<48xf32>
    %6 = vector.shape_cast %5 : vector<48xf32> to vector<1x48xf32>
    %c0_3 = arith.constant 0 : index
    %c0_4 = arith.constant 0 : index
    %7 = vector.load %arg2[%c0_3, %c0_4] : memref<48x16xf32, #tpu.memory_space<vmem>>, vector<48x16xf32>
    %cst_5 = arith.constant dense<0.000000e+00> : vector<1x16xf32>
    %8 = tpu.matmul %3, %7, %cst_5 {dimension_numbers = #tpu.dot_dimension_numbers<[1], [0], [0], [1], [0, 0, 1, 1], [], []>} : vector<1x48xf32>, vector<48x16xf32>, vector<1x16xf32> -> vector<1x16xf32>
    %c0_6 = arith.constant 0 : index
    %c0_7 = arith.constant 0 : index
    %9 = vector.load %arg2[%c0_6, %c0_7] : memref<48x16xf32, #tpu.memory_space<vmem>>, vector<48x16xf32>
    %cst_8 = arith.constant dense<0.000000e+00> : vector<1x16xf32>
    %10 = tpu.matmul %6, %9, %cst_8 {dimension_numbers = #tpu.dot_dimension_numbers<[1], [0], [0], [1], [0, 0, 1, 1], [], []>} : vector<1x48xf32>, vector<48x16xf32>, vector<1x16xf32> -> vector<1x16xf32>
    %cst_9 = arith.constant 0.020833334 : f32
    %11 = vector.broadcast %cst_9 : f32 to vector<1x16xf32>
    %12 = arith.mulf %8, %11 : vector<1x16xf32>
    %cst_10 = arith.constant 0.020833334 : f32
    %13 = vector.broadcast %cst_10 : f32 to vector<1x16xf32>
    %14 = arith.mulf %10, %13 : vector<1x16xf32>
    %15 = arith.mulf %12, %12 : vector<1x16xf32>
    %16 = arith.subf %14, %15 : vector<1x16xf32>
    %cst_11 = arith.constant 0.000000e+00 : f32
    %17 = vector.broadcast %cst_11 : f32 to vector<1x16xf32>
    %18 = arith.maximumf %16, %17 : vector<1x16xf32>
    %c0_12 = arith.constant 0 : index
    %c0_13 = arith.constant 0 : index
    %19 = vector.load %arg3[%c0_12, %c0_13] : memref<16x48xf32, #tpu.memory_space<vmem>>, vector<16x48xf32>
    %cst_14 = arith.constant dense<0.000000e+00> : vector<1x48xf32>
    %20 = tpu.matmul %12, %19, %cst_14 {dimension_numbers = #tpu.dot_dimension_numbers<[1], [0], [0], [1], [0, 0, 1, 1], [], []>} : vector<1x16xf32>, vector<16x48xf32>, vector<1x48xf32> -> vector<1x48xf32>
    %c0_15 = arith.constant 0 : index
    %c0_16 = arith.constant 0 : index
    %21 = vector.load %arg3[%c0_15, %c0_16] : memref<16x48xf32, #tpu.memory_space<vmem>>, vector<16x48xf32>
    %cst_17 = arith.constant dense<0.000000e+00> : vector<1x48xf32>
    %22 = tpu.matmul %18, %21, %cst_17 {dimension_numbers = #tpu.dot_dimension_numbers<[1], [0], [0], [1], [0, 0, 1, 1], [], []>} : vector<1x16xf32>, vector<16x48xf32>, vector<1x48xf32> -> vector<1x48xf32>
    %cst_18 = arith.constant 9.99999974E-6 : f32
    %23 = vector.broadcast %cst_18 : f32 to vector<1x48xf32>
    %24 = arith.addf %22, %23 : vector<1x48xf32>
    %25 = math.rsqrt %24 : vector<1x48xf32>
    %c0_19 = arith.constant 0 : index
    %c0_20 = arith.constant 0 : index
    %26 = vector.load %arg4[%c0_19, %c0_20] : memref<1x48xf32, #tpu.memory_space<vmem>>, vector<1x48xf32>
    %27 = arith.mulf %26, %25 : vector<1x48xf32>
    %c0_21 = arith.constant 0 : index
    %c0_22 = arith.constant 0 : index
    %c0_23 = arith.constant 0 : index
    %28 = vector.load %arg6[%c0_21, %c0_22, %c0_23] : memref<1x1x48xf32, #tpu.memory_space<vmem>>, vector<1x1x48xf32>
    %29 = vector.shape_cast %28 : vector<1x1x48xf32> to vector<1x48xf32>
    %30 = vector.shape_cast %27 : vector<1x48xf32> to vector<1x1x48xf32>
    tpu.vector_store %arg6[%c0_21, %c0_22, %c0_23], %30 {strides = array<i32>} : memref<1x1x48xf32, #tpu.memory_space<vmem>>, vector<1x1x48xf32>,
    %c0_24 = arith.constant 0 : index
    %c0_25 = arith.constant 0 : index
    %31 = vector.load %arg5[%c0_24, %c0_25] : memref<1x48xf32, #tpu.memory_space<vmem>>, vector<1x48xf32>
    %32 = arith.mulf %20, %27 : vector<1x48xf32>
    %33 = arith.subf %31, %32 : vector<1x48xf32>
    %c0_26 = arith.constant 0 : index
    %c0_27 = arith.constant 0 : index
    %c0_28 = arith.constant 0 : index
    %34 = vector.load %arg7[%c0_26, %c0_27, %c0_28] : memref<1x1x48xf32, #tpu.memory_space<vmem>>, vector<1x1x48xf32>
    %35 = vector.shape_cast %34 : vector<1x1x48xf32> to vector<1x48xf32>
    %36 = vector.shape_cast %33 : vector<1x48xf32> to vector<1x1x48xf32>
    tpu.vector_store %arg7[%c0_26, %c0_27, %c0_28], %36 {strides = array<i32>} : memref<1x1x48xf32, #tpu.memory_space<vmem>>, vector<1x1x48xf32>,
    return
  }
  func.func @transform_0(%arg0: i32) -> (i32, i32, i32) {
    %c0_i32 = arith.constant 0 : i32
    %c0_i32_0 = arith.constant 0 : i32
    %c0_i32_1 = arith.constant 0 : i32
    return %arg0, %c0_i32, %c0_i32_0 : i32, i32, i32
  }
  func.func @transform_1(%arg0: i32) -> (i32, i32) {
    %c0_i32 = arith.constant 0 : i32
    %c0_i32_0 = arith.constant 0 : i32
    %c0_i32_1 = arith.constant 0 : i32
    return %c0_i32, %c0_i32_0 : i32, i32
  }
  func.func @transform_2(%arg0: i32) -> (i32, i32) {
    %c0_i32 = arith.constant 0 : i32
    %c0_i32_0 = arith.constant 0 : i32
    %c0_i32_1 = arith.constant 0 : i32
    return %c0_i32, %c0_i32_0 : i32, i32
  }
  func.func @transform_3(%arg0: i32) -> (i32, i32) {
    %c0_i32 = arith.constant 0 : i32
    %c0_i32_0 = arith.constant 0 : i32
    %c0_i32_1 = arith.constant 0 : i32
    return %c0_i32, %c0_i32_0 : i32, i32
  }
  func.func @transform_4(%arg0: i32) -> (i32, i32) {
    %c0_i32 = arith.constant 0 : i32
    %c0_i32_0 = arith.constant 0 : i32
    %c0_i32_1 = arith.constant 0 : i32
    return %c0_i32, %c0_i32_0 : i32, i32
  }
  func.func @transform_5(%arg0: i32) -> (i32, i32, i32) {
    %c0_i32 = arith.constant 0 : i32
    %c0_i32_0 = arith.constant 0 : i32
    %c0_i32_1 = arith.constant 0 : i32
    return %arg0, %c0_i32, %c0_i32_0 : i32, i32, i32
  }
  func.func @transform_6(%arg0: i32) -> (i32, i32, i32) {
    %c0_i32 = arith.constant 0 : i32
    %c0_i32_0 = arith.constant 0 : i32
    %c0_i32_1 = arith.constant 0 : i32
    return %arg0, %c0_i32, %c0_i32_0 : i32, i32, i32
  }
}

module attributes {stable_mosaic.version = 11 : i64} {
  func.func @_gnrelu_conv3x3_kernel(%arg0: i32, %arg1: memref<1x16x48xf32, #tpu.memory_space<vmem>>, %arg2: memref<1x1x48xf32, #tpu.memory_space<vmem>>, %arg3: memref<1x1x48xf32, #tpu.memory_space<vmem>>, %arg4: memref<9x48x48xbf16, #tpu.memory_space<vmem>>, %arg5: memref<1x16x48xf32, #tpu.memory_space<vmem>>, %arg6: memref<32x48xbf16, #tpu.memory_space<vmem>>) attributes {dimension_semantics = [#tpu.dimension_semantics<parallel>], iteration_bounds = array<i64: 2>, scalar_prefetch = 0 : i64, scratch_operands = 1 : i64, tpu.core_type = #tpu.core_type<tc>, window_params = [{transform_indices = @transform_0, window_bounds = array<i64: 1, 16, 48>}, {transform_indices = @transform_1, window_bounds = array<i64: 1, 1, 48>}, {transform_indices = @transform_2, window_bounds = array<i64: 1, 1, 48>}, {pipeline_mode = #tpu.pipeline_mode<synchronous>, transform_indices = @transform_3, window_bounds = array<i64: 9, 48, 48>}, {transform_indices = @transform_4, window_bounds = array<i64: 1, 16, 48>}]} {
    %cst = arith.constant 0.000000e+00 : bf16
    %0 = vector.broadcast %cst : bf16 to vector<32x48xbf16>
    %c0 = arith.constant 0 : index
    %c0_0 = arith.constant 0 : index
    %1 = vector.load %arg6[%c0, %c0_0] : memref<32x48xbf16, #tpu.memory_space<vmem>>, vector<32x48xbf16>
    tpu.vector_store %arg6[%c0, %c0_0], %0 {strides = array<i32>} : memref<32x48xbf16, #tpu.memory_space<vmem>>, vector<32x48xbf16>,
    %c0_1 = arith.constant 0 : index
    %c0_2 = arith.constant 0 : index
    %c0_3 = arith.constant 0 : index
    %2 = vector.load %arg1[%c0_1, %c0_2, %c0_3] : memref<1x16x48xf32, #tpu.memory_space<vmem>>, vector<1x16x48xf32>
    %3 = vector.shape_cast %2 : vector<1x16x48xf32> to vector<16x48xf32>
    %c0_4 = arith.constant 0 : index
    %c0_5 = arith.constant 0 : index
    %c0_6 = arith.constant 0 : index
    %4 = vector.load %arg2[%c0_4, %c0_5, %c0_6] : memref<1x1x48xf32, #tpu.memory_space<vmem>>, vector<1x1x48xf32>
    %5 = vector.shape_cast %4 : vector<1x1x48xf32> to vector<1x48xf32>
    %6 = vector.broadcast %5 : vector<1x48xf32> to vector<16x48xf32>
    %7 = arith.mulf %3, %6 : vector<16x48xf32>
    %c0_7 = arith.constant 0 : index
    %c0_8 = arith.constant 0 : index
    %c0_9 = arith.constant 0 : index
    %8 = vector.load %arg3[%c0_7, %c0_8, %c0_9] : memref<1x1x48xf32, #tpu.memory_space<vmem>>, vector<1x1x48xf32>
    %9 = vector.shape_cast %8 : vector<1x1x48xf32> to vector<1x48xf32>
    %10 = vector.broadcast %9 : vector<1x48xf32> to vector<16x48xf32>
    %11 = arith.addf %7, %10 : vector<16x48xf32>
    %cst_10 = arith.constant 0.000000e+00 : f32
    %12 = vector.broadcast %cst_10 : f32 to vector<16x48xf32>
    %13 = arith.maximumf %11, %12 : vector<16x48xf32>
    %14 = arith.truncf %13 : vector<16x48xf32> to vector<16x48xbf16>
    %c8 = arith.constant 8 : index
    %c0_11 = arith.constant 0 : index
    %15 = vector.load %arg6[%c8, %c0_11] : memref<32x48xbf16, #tpu.memory_space<vmem>>, vector<16x48xbf16>
    tpu.vector_store %arg6[%c8, %c0_11], %14 {strides = array<i32>} : memref<32x48xbf16, #tpu.memory_space<vmem>>, vector<16x48xbf16>,
    %16 = tpu.iota {dimensions = array<i32: 0>} : vector<16x1xi32>
    %c4_i32 = arith.constant 4 : i32
    %c0_i32 = arith.constant 0 : i32
    %17 = arith.cmpi eq, %c4_i32, %c0_i32 : i32
    %c1_i32 = arith.constant 1 : i32
    %18 = arith.select %17, %c1_i32, %c4_i32 : i32
    %19 = vector.broadcast %18 : i32 to vector<16x1xi32>
    %20 = arith.remsi %16, %19 : vector<16x1xi32>
    %c0_i32_12 = arith.constant 0 : i32
    %21 = vector.broadcast %c0_i32_12 : i32 to vector<16x1xi32>
    %22 = arith.cmpi ne, %20, %21 : vector<16x1xi32>
    %c0_i32_13 = arith.constant 0 : i32
    %23 = vector.broadcast %c0_i32_13 : i32 to vector<16x1xi32>
    %24 = arith.cmpi slt, %20, %23 : vector<16x1xi32>
    %c0_i32_14 = arith.constant 0 : i32
    %25 = arith.cmpi slt, %18, %c0_i32_14 : i32
    %26 = vector.broadcast %25 : i1 to vector<16x1xi1>
    %27 = vector.broadcast %26 : vector<16x1xi1> to vector<16x1xi1>
    %28 = arith.xori %24, %27 : vector<16x1xi1>
    %29 = arith.andi %28, %22 : vector<16x1xi1>
    %30 = vector.broadcast %18 : i32 to vector<16x1xi32>
    %31 = arith.addi %20, %30 : vector<16x1xi32>
    %32 = arith.select %29, %31, %20 : vector<16x1xi1>, vector<16x1xi32>
    %c0_i32_15 = arith.constant 0 : i32
    %33 = vector.broadcast %c0_i32_15 : i32 to vector<16x1xi32>
    %34 = arith.cmpi ne, %32, %33 : vector<16x1xi32>
    %35 = arith.extui %34 : vector<16x1xi1> to vector<16x1xi32>
    %36 = arith.sitofp %35 : vector<16x1xi32> to vector<16x1xf32>
    %37 = arith.truncf %36 : vector<16x1xf32> to vector<16x1xbf16>
    %c3_i32 = arith.constant 3 : i32
    %38 = vector.broadcast %c3_i32 : i32 to vector<16x1xi32>
    %39 = arith.cmpi ne, %32, %38 : vector<16x1xi32>
    %40 = arith.extui %39 : vector<16x1xi1> to vector<16x1xi32>
    %41 = arith.sitofp %40 : vector<16x1xi32> to vector<16x1xf32>
    %42 = arith.truncf %41 : vector<16x1xf32> to vector<16x1xbf16>
    %cst_16 = arith.constant 0.000000e+00 : f32
    %43 = vector.broadcast %cst_16 : f32 to vector<16x48xf32>
    %c3 = arith.constant 3 : index
    %c0_17 = arith.constant 0 : index
    %44 = vector.load %arg6[%c3, %c0_17] : memref<32x48xbf16, #tpu.memory_space<vmem>>, vector<16x48xbf16>
    %45 = vector.broadcast %37 : vector<16x1xbf16> to vector<16x48xbf16>
    %46 = arith.mulf %44, %45 : vector<16x48xbf16>
    %c0_18 = arith.constant 0 : index
    %c0_19 = arith.constant 0 : index
    %c0_20 = arith.constant 0 : index
    %47 = vector.load %arg4[%c0_18, %c0_19, %c0_20] : memref<9x48x48xbf16, #tpu.memory_space<vmem>>, vector<1x48x48xbf16>
    %48 = vector.shape_cast %47 : vector<1x48x48xbf16> to vector<48x48xbf16>
    %cst_21 = arith.constant dense<0.000000e+00> : vector<16x48xf32>
    %49 = tpu.matmul %46, %48, %cst_21 {dimension_numbers = #tpu.dot_dimension_numbers<[1], [0], [0], [1], [0, 0, 1, 1], [], []>} : vector<16x48xbf16>, vector<48x48xbf16>, vector<16x48xf32> -> vector<16x48xf32>
    %50 = arith.addf %43, %49 : vector<16x48xf32>
    %c4 = arith.constant 4 : index
    %c0_22 = arith.constant 0 : index
    %51 = vector.load %arg6[%c4, %c0_22] : memref<32x48xbf16, #tpu.memory_space<vmem>>, vector<16x48xbf16>
    %c1 = arith.constant 1 : index
    %c0_23 = arith.constant 0 : index
    %c0_24 = arith.constant 0 : index
    %52 = vector.load %arg4[%c1, %c0_23, %c0_24] : memref<9x48x48xbf16, #tpu.memory_space<vmem>>, vector<1x48x48xbf16>
    %53 = vector.shape_cast %52 : vector<1x48x48xbf16> to vector<48x48xbf16>
    %cst_25 = arith.constant dense<0.000000e+00> : vector<16x48xf32>
    %54 = tpu.matmul %51, %53, %cst_25 {dimension_numbers = #tpu.dot_dimension_numbers<[1], [0], [0], [1], [0, 0, 1, 1], [], []>} : vector<16x48xbf16>, vector<48x48xbf16>, vector<16x48xf32> -> vector<16x48xf32>
    %55 = arith.addf %50, %54 : vector<16x48xf32>
    %c5 = arith.constant 5 : index
    %c0_26 = arith.constant 0 : index
    %56 = vector.load %arg6[%c5, %c0_26] : memref<32x48xbf16, #tpu.memory_space<vmem>>, vector<16x48xbf16>
    %57 = vector.broadcast %42 : vector<16x1xbf16> to vector<16x48xbf16>
    %58 = arith.mulf %56, %57 : vector<16x48xbf16>
    %c2 = arith.constant 2 : index
    %c0_27 = arith.constant 0 : index
    %c0_28 = arith.constant 0 : index
    %59 = vector.load %arg4[%c2, %c0_27, %c0_28] : memref<9x48x48xbf16, #tpu.memory_space<vmem>>, vector<1x48x48xbf16>
    %60 = vector.shape_cast %59 : vector<1x48x48xbf16> to vector<48x48xbf16>
    %cst_29 = arith.constant dense<0.000000e+00> : vector<16x48xf32>
    %61 = tpu.matmul %58, %60, %cst_29 {dimension_numbers = #tpu.dot_dimension_numbers<[1], [0], [0], [1], [0, 0, 1, 1], [], []>} : vector<16x48xbf16>, vector<48x48xbf16>, vector<16x48xf32> -> vector<16x48xf32>
    %62 = arith.addf %55, %61 : vector<16x48xf32>
    %c7 = arith.constant 7 : index
    %c0_30 = arith.constant 0 : index
    %63 = vector.load %arg6[%c7, %c0_30] : memref<32x48xbf16, #tpu.memory_space<vmem>>, vector<16x48xbf16>
    %64 = vector.broadcast %37 : vector<16x1xbf16> to vector<16x48xbf16>
    %65 = arith.mulf %63, %64 : vector<16x48xbf16>
    %c3_31 = arith.constant 3 : index
    %c0_32 = arith.constant 0 : index
    %c0_33 = arith.constant 0 : index
    %66 = vector.load %arg4[%c3_31, %c0_32, %c0_33] : memref<9x48x48xbf16, #tpu.memory_space<vmem>>, vector<1x48x48xbf16>
    %67 = vector.shape_cast %66 : vector<1x48x48xbf16> to vector<48x48xbf16>
    %cst_34 = arith.constant dense<0.000000e+00> : vector<16x48xf32>
    %68 = tpu.matmul %65, %67, %cst_34 {dimension_numbers = #tpu.dot_dimension_numbers<[1], [0], [0], [1], [0, 0, 1, 1], [], []>} : vector<16x48xbf16>, vector<48x48xbf16>, vector<16x48xf32> -> vector<16x48xf32>
    %69 = arith.addf %62, %68 : vector<16x48xf32>
    %c8_35 = arith.constant 8 : index
    %c0_36 = arith.constant 0 : index
    %70 = vector.load %arg6[%c8_35, %c0_36] : memref<32x48xbf16, #tpu.memory_space<vmem>>, vector<16x48xbf16>
    %c4_37 = arith.constant 4 : index
    %c0_38 = arith.constant 0 : index
    %c0_39 = arith.constant 0 : index
    %71 = vector.load %arg4[%c4_37, %c0_38, %c0_39] : memref<9x48x48xbf16, #tpu.memory_space<vmem>>, vector<1x48x48xbf16>
    %72 = vector.shape_cast %71 : vector<1x48x48xbf16> to vector<48x48xbf16>
    %cst_40 = arith.constant dense<0.000000e+00> : vector<16x48xf32>
    %73 = tpu.matmul %70, %72, %cst_40 {dimension_numbers = #tpu.dot_dimension_numbers<[1], [0], [0], [1], [0, 0, 1, 1], [], []>} : vector<16x48xbf16>, vector<48x48xbf16>, vector<16x48xf32> -> vector<16x48xf32>
    %74 = arith.addf %69, %73 : vector<16x48xf32>
    %c9 = arith.constant 9 : index
    %c0_41 = arith.constant 0 : index
    %75 = vector.load %arg6[%c9, %c0_41] : memref<32x48xbf16, #tpu.memory_space<vmem>>, vector<16x48xbf16>
    %76 = vector.broadcast %42 : vector<16x1xbf16> to vector<16x48xbf16>
    %77 = arith.mulf %75, %76 : vector<16x48xbf16>
    %c5_42 = arith.constant 5 : index
    %c0_43 = arith.constant 0 : index
    %c0_44 = arith.constant 0 : index
    %78 = vector.load %arg4[%c5_42, %c0_43, %c0_44] : memref<9x48x48xbf16, #tpu.memory_space<vmem>>, vector<1x48x48xbf16>
    %79 = vector.shape_cast %78 : vector<1x48x48xbf16> to vector<48x48xbf16>
    %cst_45 = arith.constant dense<0.000000e+00> : vector<16x48xf32>
    %80 = tpu.matmul %77, %79, %cst_45 {dimension_numbers = #tpu.dot_dimension_numbers<[1], [0], [0], [1], [0, 0, 1, 1], [], []>} : vector<16x48xbf16>, vector<48x48xbf16>, vector<16x48xf32> -> vector<16x48xf32>
    %81 = arith.addf %74, %80 : vector<16x48xf32>
    %c11 = arith.constant 11 : index
    %c0_46 = arith.constant 0 : index
    %82 = vector.load %arg6[%c11, %c0_46] : memref<32x48xbf16, #tpu.memory_space<vmem>>, vector<16x48xbf16>
    %83 = vector.broadcast %37 : vector<16x1xbf16> to vector<16x48xbf16>
    %84 = arith.mulf %82, %83 : vector<16x48xbf16>
    %c6 = arith.constant 6 : index
    %c0_47 = arith.constant 0 : index
    %c0_48 = arith.constant 0 : index
    %85 = vector.load %arg4[%c6, %c0_47, %c0_48] : memref<9x48x48xbf16, #tpu.memory_space<vmem>>, vector<1x48x48xbf16>
    %86 = vector.shape_cast %85 : vector<1x48x48xbf16> to vector<48x48xbf16>
    %cst_49 = arith.constant dense<0.000000e+00> : vector<16x48xf32>
    %87 = tpu.matmul %84, %86, %cst_49 {dimension_numbers = #tpu.dot_dimension_numbers<[1], [0], [0], [1], [0, 0, 1, 1], [], []>} : vector<16x48xbf16>, vector<48x48xbf16>, vector<16x48xf32> -> vector<16x48xf32>
    %88 = arith.addf %81, %87 : vector<16x48xf32>
    %c12 = arith.constant 12 : index
    %c0_50 = arith.constant 0 : index
    %89 = vector.load %arg6[%c12, %c0_50] : memref<32x48xbf16, #tpu.memory_space<vmem>>, vector<16x48xbf16>
    %c7_51 = arith.constant 7 : index
    %c0_52 = arith.constant 0 : index
    %c0_53 = arith.constant 0 : index
    %90 = vector.load %arg4[%c7_51, %c0_52, %c0_53] : memref<9x48x48xbf16, #tpu.memory_space<vmem>>, vector<1x48x48xbf16>
    %91 = vector.shape_cast %90 : vector<1x48x48xbf16> to vector<48x48xbf16>
    %cst_54 = arith.constant dense<0.000000e+00> : vector<16x48xf32>
    %92 = tpu.matmul %89, %91, %cst_54 {dimension_numbers = #tpu.dot_dimension_numbers<[1], [0], [0], [1], [0, 0, 1, 1], [], []>} : vector<16x48xbf16>, vector<48x48xbf16>, vector<16x48xf32> -> vector<16x48xf32>
    %93 = arith.addf %88, %92 : vector<16x48xf32>
    %c13 = arith.constant 13 : index
    %c0_55 = arith.constant 0 : index
    %94 = vector.load %arg6[%c13, %c0_55] : memref<32x48xbf16, #tpu.memory_space<vmem>>, vector<16x48xbf16>
    %95 = vector.broadcast %42 : vector<16x1xbf16> to vector<16x48xbf16>
    %96 = arith.mulf %94, %95 : vector<16x48xbf16>
    %c8_56 = arith.constant 8 : index
    %c0_57 = arith.constant 0 : index
    %c0_58 = arith.constant 0 : index
    %97 = vector.load %arg4[%c8_56, %c0_57, %c0_58] : memref<9x48x48xbf16, #tpu.memory_space<vmem>>, vector<1x48x48xbf16>
    %98 = vector.shape_cast %97 : vector<1x48x48xbf16> to vector<48x48xbf16>
    %cst_59 = arith.constant dense<0.000000e+00> : vector<16x48xf32>
    %99 = tpu.matmul %96, %98, %cst_59 {dimension_numbers = #tpu.dot_dimension_numbers<[1], [0], [0], [1], [0, 0, 1, 1], [], []>} : vector<16x48xbf16>, vector<48x48xbf16>, vector<16x48xf32> -> vector<16x48xf32>
    %100 = arith.addf %93, %99 : vector<16x48xf32>
    %c0_60 = arith.constant 0 : index
    %c0_61 = arith.constant 0 : index
    %c0_62 = arith.constant 0 : index
    %101 = vector.load %arg5[%c0_60, %c0_61, %c0_62] : memref<1x16x48xf32, #tpu.memory_space<vmem>>, vector<1x16x48xf32>
    %102 = vector.shape_cast %101 : vector<1x16x48xf32> to vector<16x48xf32>
    %103 = vector.shape_cast %100 : vector<16x48xf32> to vector<1x16x48xf32>
    tpu.vector_store %arg5[%c0_60, %c0_61, %c0_62], %103 {strides = array<i32>} : memref<1x16x48xf32, #tpu.memory_space<vmem>>, vector<1x16x48xf32>,
    return
  }
  func.func @transform_0(%arg0: i32) -> (i32, i32, i32) {
    %c0_i32 = arith.constant 0 : i32
    %c0_i32_0 = arith.constant 0 : i32
    %c0_i32_1 = arith.constant 0 : i32
    return %arg0, %c0_i32, %c0_i32_0 : i32, i32, i32
  }
  func.func @transform_1(%arg0: i32) -> (i32, i32, i32) {
    %c0_i32 = arith.constant 0 : i32
    %c0_i32_0 = arith.constant 0 : i32
    %c0_i32_1 = arith.constant 0 : i32
    return %arg0, %c0_i32, %c0_i32_0 : i32, i32, i32
  }
  func.func @transform_2(%arg0: i32) -> (i32, i32, i32) {
    %c0_i32 = arith.constant 0 : i32
    %c0_i32_0 = arith.constant 0 : i32
    %c0_i32_1 = arith.constant 0 : i32
    return %arg0, %c0_i32, %c0_i32_0 : i32, i32, i32
  }
  func.func @transform_3(%arg0: i32) -> (i32, i32, i32) {
    %c0_i32 = arith.constant 0 : i32
    %c0_i32_0 = arith.constant 0 : i32
    %c0_i32_1 = arith.constant 0 : i32
    %c0_i32_2 = arith.constant 0 : i32
    return %c0_i32, %c0_i32_0, %c0_i32_1 : i32, i32, i32
  }
  func.func @transform_4(%arg0: i32) -> (i32, i32, i32) {
    %c0_i32 = arith.constant 0 : i32
    %c0_i32_0 = arith.constant 0 : i32
    %c0_i32_1 = arith.constant 0 : i32
    return %arg0, %c0_i32, %c0_i32_0 : i32, i32, i32
  }
}

module attributes {stable_mosaic.version = 11 : i64} {
  func.func @_cascade_pool_kernel(%arg0: i32, %arg1: memref<1x2x2x2x96xf32, #tpu.memory_space<vmem>>, %arg2: memref<1x2x2x2x64xf32, #tpu.memory_space<vmem>>, %arg3: memref<1x2x2x48xf32, #tpu.memory_space<vmem>>) attributes {dimension_semantics = [#tpu.dimension_semantics<parallel>], iteration_bounds = array<i64: 2>, scalar_prefetch = 0 : i64, scratch_operands = 0 : i64, tpu.core_type = #tpu.core_type<tc>, window_params = [{transform_indices = @transform_0, window_bounds = array<i64: 1, 2, 2, 2, 96>}, {transform_indices = @transform_1, window_bounds = array<i64: 1, 2, 2, 2, 64>}, {transform_indices = @transform_2, window_bounds = array<i64: 1, 2, 2, 48>}]} {
    %c0 = arith.constant 0 : index
    %c0_0 = arith.constant 0 : index
    %c0_1 = arith.constant 0 : index
    %c0_2 = arith.constant 0 : index
    %c0_3 = arith.constant 0 : index
    %0 = vector.load %arg1[%c0, %c0_0, %c0_1, %c0_2, %c0_3] : memref<1x2x2x2x96xf32, #tpu.memory_space<vmem>>, vector<1x2x2x2x96xf32>
    %1 = vector.shape_cast %0 : vector<1x2x2x2x96xf32> to vector<2x2x2x96xf32>
    %c0_4 = arith.constant 0 : index
    %c0_5 = arith.constant 0 : index
    %c0_6 = arith.constant 0 : index
    %c0_7 = arith.constant 0 : index
    %c0_8 = arith.constant 0 : index
    %2 = vector.load %arg2[%c0_4, %c0_5, %c0_6, %c0_7, %c0_8] : memref<1x2x2x2x64xf32, #tpu.memory_space<vmem>>, vector<1x2x2x2x64xf32>
    %3 = vector.shape_cast %2 : vector<1x2x2x2x64xf32> to vector<2x2x2x64xf32>
    %4 = vector.extract_strided_slice %1 {offsets = [0, 0, 0, 0], sizes = [2, 1, 2, 96], strides = [1, 1, 1, 1]} : vector<2x2x2x96xf32> to vector<2x1x2x96xf32>
    %5 = vector.shape_cast %4 : vector<2x1x2x96xf32> to vector<2x2x96xf32>
    %6 = vector.extract_strided_slice %1 {offsets = [0, 1, 0, 0], sizes = [2, 1, 2, 96], strides = [1, 1, 1, 1]} : vector<2x2x2x96xf32> to vector<2x1x2x96xf32>
    %7 = vector.shape_cast %6 : vector<2x1x2x96xf32> to vector<2x2x96xf32>
    %8 = arith.addf %5, %7 : vector<2x2x96xf32>
    %9 = vector.extract_strided_slice %3 {offsets = [0, 0, 0, 0], sizes = [2, 1, 2, 64], strides = [1, 1, 1, 1]} : vector<2x2x2x64xf32> to vector<2x1x2x64xf32>
    %10 = vector.shape_cast %9 : vector<2x1x2x64xf32> to vector<2x2x64xf32>
    %11 = vector.extract_strided_slice %3 {offsets = [0, 1, 0, 0], sizes = [2, 1, 2, 64], strides = [1, 1, 1, 1]} : vector<2x2x2x64xf32> to vector<2x1x2x64xf32>
    %12 = vector.shape_cast %11 : vector<2x1x2x64xf32> to vector<2x2x64xf32>
    %13 = arith.addf %10, %12 : vector<2x2x64xf32>
    %14 = vector.extract_strided_slice %8 {offsets = [0, 0, 0], sizes = [2, 2, 48], strides = [1, 1, 1]} : vector<2x2x96xf32> to vector<2x2x48xf32>
    %15 = vector.extract_strided_slice %8 {offsets = [0, 0, 48], sizes = [2, 2, 48], strides = [1, 1, 1]} : vector<2x2x96xf32> to vector<2x2x48xf32>
    %16 = arith.addf %14, %15 : vector<2x2x48xf32>
    %cst = arith.constant 2.500000e-01 : f32
    %17 = vector.broadcast %cst : f32 to vector<2x2x48xf32>
    %18 = arith.mulf %17, %16 : vector<2x2x48xf32>
    %19 = vector.extract_strided_slice %13 {offsets = [0, 0, 0], sizes = [2, 2, 32], strides = [1, 1, 1]} : vector<2x2x64xf32> to vector<2x2x32xf32>
    %20 = vector.extract_strided_slice %13 {offsets = [0, 0, 32], sizes = [2, 2, 32], strides = [1, 1, 1]} : vector<2x2x64xf32> to vector<2x2x32xf32>
    %21 = arith.addf %19, %20 : vector<2x2x32xf32>
    %cst_9 = arith.constant 2.500000e-01 : f32
    %22 = vector.broadcast %cst_9 : f32 to vector<2x2x32xf32>
    %23 = arith.mulf %22, %21 : vector<2x2x32xf32>
    %cst_10 = arith.constant 0.000000e+00 : f32
    %24 = vector.broadcast %cst_10 : f32 to vector<2x2x16xf32>
    %25 = tpu.concatenate %23, %24 in 2 : vector<2x2x32xf32>, vector<2x2x16xf32> -> vector<2x2x48xf32>
    %26 = arith.addf %18, %25 : vector<2x2x48xf32>
    %c0_11 = arith.constant 0 : index
    %c0_12 = arith.constant 0 : index
    %c0_13 = arith.constant 0 : index
    %c0_14 = arith.constant 0 : index
    %27 = vector.load %arg3[%c0_11, %c0_12, %c0_13, %c0_14] : memref<1x2x2x48xf32, #tpu.memory_space<vmem>>, vector<1x2x2x48xf32>
    %28 = vector.shape_cast %27 : vector<1x2x2x48xf32> to vector<2x2x48xf32>
    %29 = vector.shape_cast %26 : vector<2x2x48xf32> to vector<1x2x2x48xf32>
    tpu.vector_store %arg3[%c0_11, %c0_12, %c0_13, %c0_14], %29 {strides = array<i32>} : memref<1x2x2x48xf32, #tpu.memory_space<vmem>>, vector<1x2x2x48xf32>,
    return
  }
  func.func @transform_0(%arg0: i32) -> (i32, i32, i32, i32, i32) {
    %c0_i32 = arith.constant 0 : i32
    %c0_i32_0 = arith.constant 0 : i32
    %c0_i32_1 = arith.constant 0 : i32
    %c0_i32_2 = arith.constant 0 : i32
    %c0_i32_3 = arith.constant 0 : i32
    return %arg0, %c0_i32, %c0_i32_0, %c0_i32_1, %c0_i32_2 : i32, i32, i32, i32, i32
  }
  func.func @transform_1(%arg0: i32) -> (i32, i32, i32, i32, i32) {
    %c0_i32 = arith.constant 0 : i32
    %c0_i32_0 = arith.constant 0 : i32
    %c0_i32_1 = arith.constant 0 : i32
    %c0_i32_2 = arith.constant 0 : i32
    %c0_i32_3 = arith.constant 0 : i32
    return %arg0, %c0_i32, %c0_i32_0, %c0_i32_1, %c0_i32_2 : i32, i32, i32, i32, i32
  }
  func.func @transform_2(%arg0: i32) -> (i32, i32, i32, i32) {
    %c0_i32 = arith.constant 0 : i32
    %c0_i32_0 = arith.constant 0 : i32
    %c0_i32_1 = arith.constant 0 : i32
    %c0_i32_2 = arith.constant 0 : i32
    return %arg0, %c0_i32, %c0_i32_0, %c0_i32_1 : i32, i32, i32, i32
  }
}

module attributes {stable_mosaic.version = 11 : i64} {
  func.func @_gn_stats_kernel(%arg0: i32, %arg1: memref<1x4x48xf32, #tpu.memory_space<vmem>>, %arg2: memref<48x16xf32, #tpu.memory_space<vmem>>, %arg3: memref<16x48xf32, #tpu.memory_space<vmem>>, %arg4: memref<1x48xf32, #tpu.memory_space<vmem>>, %arg5: memref<1x48xf32, #tpu.memory_space<vmem>>, %arg6: memref<1x1x48xf32, #tpu.memory_space<vmem>>, %arg7: memref<1x1x48xf32, #tpu.memory_space<vmem>>) attributes {dimension_semantics = [#tpu.dimension_semantics<parallel>], iteration_bounds = array<i64: 2>, scalar_prefetch = 0 : i64, scratch_operands = 0 : i64, tpu.core_type = #tpu.core_type<tc>, window_params = [{transform_indices = @transform_0, window_bounds = array<i64: 1, 4, 48>}, {pipeline_mode = #tpu.pipeline_mode<synchronous>, transform_indices = @transform_1, window_bounds = array<i64: 48, 16>}, {pipeline_mode = #tpu.pipeline_mode<synchronous>, transform_indices = @transform_2, window_bounds = array<i64: 16, 48>}, {pipeline_mode = #tpu.pipeline_mode<synchronous>, transform_indices = @transform_3, window_bounds = array<i64: 1, 48>}, {pipeline_mode = #tpu.pipeline_mode<synchronous>, transform_indices = @transform_4, window_bounds = array<i64: 1, 48>}, {transform_indices = @transform_5, window_bounds = array<i64: 1, 1, 48>}, {transform_indices = @transform_6, window_bounds = array<i64: 1, 1, 48>}]} {
    %c0 = arith.constant 0 : index
    %c0_0 = arith.constant 0 : index
    %c0_1 = arith.constant 0 : index
    %0 = vector.load %arg1[%c0, %c0_0, %c0_1] : memref<1x4x48xf32, #tpu.memory_space<vmem>>, vector<1x4x48xf32>
    %1 = vector.shape_cast %0 : vector<1x4x48xf32> to vector<4x48xf32>
    %cst = arith.constant dense<0.000000e+00> : vector<48xf32>
    %2 = vector.multi_reduction <add>, %1, %cst [0] : vector<4x48xf32> to vector<48xf32>
    %3 = vector.shape_cast %2 : vector<48xf32> to vector<1x48xf32>
    %4 = arith.mulf %1, %1 : vector<4x48xf32>
    %cst_2 = arith.constant dense<0.000000e+00> : vector<48xf32>
    %5 = vector.multi_reduction <add>, %4, %cst_2 [0] : vector<4x48xf32> to vector<48xf32>
    %6 = vector.shape_cast %5 : vector<48xf32> to vector<1x48xf32>
    %c0_3 = arith.constant 0 : index
    %c0_4 = arith.constant 0 : index
    %7 = vector.load %arg2[%c0_3, %c0_4] : memref<48x16xf32, #tpu.memory_space<vmem>>, vector<48x16xf32>
    %cst_5 = arith.constant dense<0.000000e+00> : vector<1x16xf32>
    %8 = tpu.matmul %3, %7, %cst_5 {dimension_numbers = #tpu.dot_dimension_numbers<[1], [0], [0], [1], [0, 0, 1, 1], [], []>} : vector<1x48xf32>, vector<48x16xf32>, vector<1x16xf32> -> vector<1x16xf32>
    %c0_6 = arith.constant 0 : index
    %c0_7 = arith.constant 0 : index
    %9 = vector.load %arg2[%c0_6, %c0_7] : memref<48x16xf32, #tpu.memory_space<vmem>>, vector<48x16xf32>
    %cst_8 = arith.constant dense<0.000000e+00> : vector<1x16xf32>
    %10 = tpu.matmul %6, %9, %cst_8 {dimension_numbers = #tpu.dot_dimension_numbers<[1], [0], [0], [1], [0, 0, 1, 1], [], []>} : vector<1x48xf32>, vector<48x16xf32>, vector<1x16xf32> -> vector<1x16xf32>
    %cst_9 = arith.constant 0.0833333358 : f32
    %11 = vector.broadcast %cst_9 : f32 to vector<1x16xf32>
    %12 = arith.mulf %8, %11 : vector<1x16xf32>
    %cst_10 = arith.constant 0.0833333358 : f32
    %13 = vector.broadcast %cst_10 : f32 to vector<1x16xf32>
    %14 = arith.mulf %10, %13 : vector<1x16xf32>
    %15 = arith.mulf %12, %12 : vector<1x16xf32>
    %16 = arith.subf %14, %15 : vector<1x16xf32>
    %cst_11 = arith.constant 0.000000e+00 : f32
    %17 = vector.broadcast %cst_11 : f32 to vector<1x16xf32>
    %18 = arith.maximumf %16, %17 : vector<1x16xf32>
    %c0_12 = arith.constant 0 : index
    %c0_13 = arith.constant 0 : index
    %19 = vector.load %arg3[%c0_12, %c0_13] : memref<16x48xf32, #tpu.memory_space<vmem>>, vector<16x48xf32>
    %cst_14 = arith.constant dense<0.000000e+00> : vector<1x48xf32>
    %20 = tpu.matmul %12, %19, %cst_14 {dimension_numbers = #tpu.dot_dimension_numbers<[1], [0], [0], [1], [0, 0, 1, 1], [], []>} : vector<1x16xf32>, vector<16x48xf32>, vector<1x48xf32> -> vector<1x48xf32>
    %c0_15 = arith.constant 0 : index
    %c0_16 = arith.constant 0 : index
    %21 = vector.load %arg3[%c0_15, %c0_16] : memref<16x48xf32, #tpu.memory_space<vmem>>, vector<16x48xf32>
    %cst_17 = arith.constant dense<0.000000e+00> : vector<1x48xf32>
    %22 = tpu.matmul %18, %21, %cst_17 {dimension_numbers = #tpu.dot_dimension_numbers<[1], [0], [0], [1], [0, 0, 1, 1], [], []>} : vector<1x16xf32>, vector<16x48xf32>, vector<1x48xf32> -> vector<1x48xf32>
    %cst_18 = arith.constant 9.99999974E-6 : f32
    %23 = vector.broadcast %cst_18 : f32 to vector<1x48xf32>
    %24 = arith.addf %22, %23 : vector<1x48xf32>
    %25 = math.rsqrt %24 : vector<1x48xf32>
    %c0_19 = arith.constant 0 : index
    %c0_20 = arith.constant 0 : index
    %26 = vector.load %arg4[%c0_19, %c0_20] : memref<1x48xf32, #tpu.memory_space<vmem>>, vector<1x48xf32>
    %27 = arith.mulf %26, %25 : vector<1x48xf32>
    %c0_21 = arith.constant 0 : index
    %c0_22 = arith.constant 0 : index
    %c0_23 = arith.constant 0 : index
    %28 = vector.load %arg6[%c0_21, %c0_22, %c0_23] : memref<1x1x48xf32, #tpu.memory_space<vmem>>, vector<1x1x48xf32>
    %29 = vector.shape_cast %28 : vector<1x1x48xf32> to vector<1x48xf32>
    %30 = vector.shape_cast %27 : vector<1x48xf32> to vector<1x1x48xf32>
    tpu.vector_store %arg6[%c0_21, %c0_22, %c0_23], %30 {strides = array<i32>} : memref<1x1x48xf32, #tpu.memory_space<vmem>>, vector<1x1x48xf32>,
    %c0_24 = arith.constant 0 : index
    %c0_25 = arith.constant 0 : index
    %31 = vector.load %arg5[%c0_24, %c0_25] : memref<1x48xf32, #tpu.memory_space<vmem>>, vector<1x48xf32>
    %32 = arith.mulf %20, %27 : vector<1x48xf32>
    %33 = arith.subf %31, %32 : vector<1x48xf32>
    %c0_26 = arith.constant 0 : index
    %c0_27 = arith.constant 0 : index
    %c0_28 = arith.constant 0 : index
    %34 = vector.load %arg7[%c0_26, %c0_27, %c0_28] : memref<1x1x48xf32, #tpu.memory_space<vmem>>, vector<1x1x48xf32>
    %35 = vector.shape_cast %34 : vector<1x1x48xf32> to vector<1x48xf32>
    %36 = vector.shape_cast %33 : vector<1x48xf32> to vector<1x1x48xf32>
    tpu.vector_store %arg7[%c0_26, %c0_27, %c0_28], %36 {strides = array<i32>} : memref<1x1x48xf32, #tpu.memory_space<vmem>>, vector<1x1x48xf32>,
    return
  }
  func.func @transform_0(%arg0: i32) -> (i32, i32, i32) {
    %c0_i32 = arith.constant 0 : i32
    %c0_i32_0 = arith.constant 0 : i32
    %c0_i32_1 = arith.constant 0 : i32
    return %arg0, %c0_i32, %c0_i32_0 : i32, i32, i32
  }
  func.func @transform_1(%arg0: i32) -> (i32, i32) {
    %c0_i32 = arith.constant 0 : i32
    %c0_i32_0 = arith.constant 0 : i32
    %c0_i32_1 = arith.constant 0 : i32
    return %c0_i32, %c0_i32_0 : i32, i32
  }
  func.func @transform_2(%arg0: i32) -> (i32, i32) {
    %c0_i32 = arith.constant 0 : i32
    %c0_i32_0 = arith.constant 0 : i32
    %c0_i32_1 = arith.constant 0 : i32
    return %c0_i32, %c0_i32_0 : i32, i32
  }
  func.func @transform_3(%arg0: i32) -> (i32, i32) {
    %c0_i32 = arith.constant 0 : i32
    %c0_i32_0 = arith.constant 0 : i32
    %c0_i32_1 = arith.constant 0 : i32
    return %c0_i32, %c0_i32_0 : i32, i32
  }
  func.func @transform_4(%arg0: i32) -> (i32, i32) {
    %c0_i32 = arith.constant 0 : i32
    %c0_i32_0 = arith.constant 0 : i32
    %c0_i32_1 = arith.constant 0 : i32
    return %c0_i32, %c0_i32_0 : i32, i32
  }
  func.func @transform_5(%arg0: i32) -> (i32, i32, i32) {
    %c0_i32 = arith.constant 0 : i32
    %c0_i32_0 = arith.constant 0 : i32
    %c0_i32_1 = arith.constant 0 : i32
    return %arg0, %c0_i32, %c0_i32_0 : i32, i32, i32
  }
  func.func @transform_6(%arg0: i32) -> (i32, i32, i32) {
    %c0_i32 = arith.constant 0 : i32
    %c0_i32_0 = arith.constant 0 : i32
    %c0_i32_1 = arith.constant 0 : i32
    return %arg0, %c0_i32, %c0_i32_0 : i32, i32, i32
  }
}

module attributes {stable_mosaic.version = 11 : i64} {
  func.func @_gnrelu_conv3x3_kernel(%arg0: i32, %arg1: memref<1x4x48xf32, #tpu.memory_space<vmem>>, %arg2: memref<1x1x48xf32, #tpu.memory_space<vmem>>, %arg3: memref<1x1x48xf32, #tpu.memory_space<vmem>>, %arg4: memref<9x48x64xbf16, #tpu.memory_space<vmem>>, %arg5: memref<1x4x64xf32, #tpu.memory_space<vmem>>, %arg6: memref<16x48xbf16, #tpu.memory_space<vmem>>) attributes {dimension_semantics = [#tpu.dimension_semantics<parallel>], iteration_bounds = array<i64: 2>, scalar_prefetch = 0 : i64, scratch_operands = 1 : i64, tpu.core_type = #tpu.core_type<tc>, window_params = [{transform_indices = @transform_0, window_bounds = array<i64: 1, 4, 48>}, {transform_indices = @transform_1, window_bounds = array<i64: 1, 1, 48>}, {transform_indices = @transform_2, window_bounds = array<i64: 1, 1, 48>}, {pipeline_mode = #tpu.pipeline_mode<synchronous>, transform_indices = @transform_3, window_bounds = array<i64: 9, 48, 64>}, {transform_indices = @transform_4, window_bounds = array<i64: 1, 4, 64>}]} {
    %cst = arith.constant 0.000000e+00 : bf16
    %0 = vector.broadcast %cst : bf16 to vector<16x48xbf16>
    %c0 = arith.constant 0 : index
    %c0_0 = arith.constant 0 : index
    %1 = vector.load %arg6[%c0, %c0_0] : memref<16x48xbf16, #tpu.memory_space<vmem>>, vector<16x48xbf16>
    tpu.vector_store %arg6[%c0, %c0_0], %0 {strides = array<i32>} : memref<16x48xbf16, #tpu.memory_space<vmem>>, vector<16x48xbf16>,
    %c0_1 = arith.constant 0 : index
    %c0_2 = arith.constant 0 : index
    %c0_3 = arith.constant 0 : index
    %2 = vector.load %arg1[%c0_1, %c0_2, %c0_3] : memref<1x4x48xf32, #tpu.memory_space<vmem>>, vector<1x4x48xf32>
    %3 = vector.shape_cast %2 : vector<1x4x48xf32> to vector<4x48xf32>
    %c0_4 = arith.constant 0 : index
    %c0_5 = arith.constant 0 : index
    %c0_6 = arith.constant 0 : index
    %4 = vector.load %arg2[%c0_4, %c0_5, %c0_6] : memref<1x1x48xf32, #tpu.memory_space<vmem>>, vector<1x1x48xf32>
    %5 = vector.shape_cast %4 : vector<1x1x48xf32> to vector<1x48xf32>
    %6 = vector.broadcast %5 : vector<1x48xf32> to vector<4x48xf32>
    %7 = arith.mulf %3, %6 : vector<4x48xf32>
    %c0_7 = arith.constant 0 : index
    %c0_8 = arith.constant 0 : index
    %c0_9 = arith.constant 0 : index
    %8 = vector.load %arg3[%c0_7, %c0_8, %c0_9] : memref<1x1x48xf32, #tpu.memory_space<vmem>>, vector<1x1x48xf32>
    %9 = vector.shape_cast %8 : vector<1x1x48xf32> to vector<1x48xf32>
    %10 = vector.broadcast %9 : vector<1x48xf32> to vector<4x48xf32>
    %11 = arith.addf %7, %10 : vector<4x48xf32>
    %cst_10 = arith.constant 0.000000e+00 : f32
    %12 = vector.broadcast %cst_10 : f32 to vector<4x48xf32>
    %13 = arith.maximumf %11, %12 : vector<4x48xf32>
    %14 = arith.truncf %13 : vector<4x48xf32> to vector<4x48xbf16>
    %c8 = arith.constant 8 : index
    %c0_11 = arith.constant 0 : index
    %15 = vector.load %arg6[%c8, %c0_11] : memref<16x48xbf16, #tpu.memory_space<vmem>>, vector<4x48xbf16>
    tpu.vector_store %arg6[%c8, %c0_11], %14 {strides = array<i32>} : memref<16x48xbf16, #tpu.memory_space<vmem>>, vector<4x48xbf16>,
    %16 = tpu.iota {dimensions = array<i32: 0>} : vector<4x1xi32>
    %c2_i32 = arith.constant 2 : i32
    %c0_i32 = arith.constant 0 : i32
    %17 = arith.cmpi eq, %c2_i32, %c0_i32 : i32
    %c1_i32 = arith.constant 1 : i32
    %18 = arith.select %17, %c1_i32, %c2_i32 : i32
    %19 = vector.broadcast %18 : i32 to vector<4x1xi32>
    %20 = arith.remsi %16, %19 : vector<4x1xi32>
    %c0_i32_12 = arith.constant 0 : i32
    %21 = vector.broadcast %c0_i32_12 : i32 to vector<4x1xi32>
    %22 = arith.cmpi ne, %20, %21 : vector<4x1xi32>
    %c0_i32_13 = arith.constant 0 : i32
    %23 = vector.broadcast %c0_i32_13 : i32 to vector<4x1xi32>
    %24 = arith.cmpi slt, %20, %23 : vector<4x1xi32>
    %c0_i32_14 = arith.constant 0 : i32
    %25 = arith.cmpi slt, %18, %c0_i32_14 : i32
    %26 = vector.broadcast %25 : i1 to vector<4x1xi1>
    %27 = vector.broadcast %26 : vector<4x1xi1> to vector<4x1xi1>
    %28 = arith.xori %24, %27 : vector<4x1xi1>
    %29 = arith.andi %28, %22 : vector<4x1xi1>
    %30 = vector.broadcast %18 : i32 to vector<4x1xi32>
    %31 = arith.addi %20, %30 : vector<4x1xi32>
    %32 = arith.select %29, %31, %20 : vector<4x1xi1>, vector<4x1xi32>
    %c0_i32_15 = arith.constant 0 : i32
    %33 = vector.broadcast %c0_i32_15 : i32 to vector<4x1xi32>
    %34 = arith.cmpi ne, %32, %33 : vector<4x1xi32>
    %35 = arith.extui %34 : vector<4x1xi1> to vector<4x1xi32>
    %36 = arith.sitofp %35 : vector<4x1xi32> to vector<4x1xf32>
    %37 = arith.truncf %36 : vector<4x1xf32> to vector<4x1xbf16>
    %c1_i32_16 = arith.constant 1 : i32
    %38 = vector.broadcast %c1_i32_16 : i32 to vector<4x1xi32>
    %39 = arith.cmpi ne, %32, %38 : vector<4x1xi32>
    %40 = arith.extui %39 : vector<4x1xi1> to vector<4x1xi32>
    %41 = arith.sitofp %40 : vector<4x1xi32> to vector<4x1xf32>
    %42 = arith.truncf %41 : vector<4x1xf32> to vector<4x1xbf16>
    %cst_17 = arith.constant 0.000000e+00 : f32
    %43 = vector.broadcast %cst_17 : f32 to vector<4x64xf32>
    %c5 = arith.constant 5 : index
    %c0_18 = arith.constant 0 : index
    %44 = vector.load %arg6[%c5, %c0_18] : memref<16x48xbf16, #tpu.memory_space<vmem>>, vector<4x48xbf16>
    %45 = vector.broadcast %37 : vector<4x1xbf16> to vector<4x48xbf16>
    %46 = arith.mulf %44, %45 : vector<4x48xbf16>
    %c0_19 = arith.constant 0 : index
    %c0_20 = arith.constant 0 : index
    %c0_21 = arith.constant 0 : index
    %47 = vector.load %arg4[%c0_19, %c0_20, %c0_21] : memref<9x48x64xbf16, #tpu.memory_space<vmem>>, vector<1x48x64xbf16>
    %48 = vector.shape_cast %47 : vector<1x48x64xbf16> to vector<48x64xbf16>
    %cst_22 = arith.constant dense<0.000000e+00> : vector<4x64xf32>
    %49 = tpu.matmul %46, %48, %cst_22 {dimension_numbers = #tpu.dot_dimension_numbers<[1], [0], [0], [1], [0, 0, 1, 1], [], []>} : vector<4x48xbf16>, vector<48x64xbf16>, vector<4x64xf32> -> vector<4x64xf32>
    %50 = arith.addf %43, %49 : vector<4x64xf32>
    %c6 = arith.constant 6 : index
    %c0_23 = arith.constant 0 : index
    %51 = vector.load %arg6[%c6, %c0_23] : memref<16x48xbf16, #tpu.memory_space<vmem>>, vector<4x48xbf16>
    %c1 = arith.constant 1 : index
    %c0_24 = arith.constant 0 : index
    %c0_25 = arith.constant 0 : index
    %52 = vector.load %arg4[%c1, %c0_24, %c0_25] : memref<9x48x64xbf16, #tpu.memory_space<vmem>>, vector<1x48x64xbf16>
    %53 = vector.shape_cast %52 : vector<1x48x64xbf16> to vector<48x64xbf16>
    %cst_26 = arith.constant dense<0.000000e+00> : vector<4x64xf32>
    %54 = tpu.matmul %51, %53, %cst_26 {dimension_numbers = #tpu.dot_dimension_numbers<[1], [0], [0], [1], [0, 0, 1, 1], [], []>} : vector<4x48xbf16>, vector<48x64xbf16>, vector<4x64xf32> -> vector<4x64xf32>
    %55 = arith.addf %50, %54 : vector<4x64xf32>
    %c7 = arith.constant 7 : index
    %c0_27 = arith.constant 0 : index
    %56 = vector.load %arg6[%c7, %c0_27] : memref<16x48xbf16, #tpu.memory_space<vmem>>, vector<4x48xbf16>
    %57 = vector.broadcast %42 : vector<4x1xbf16> to vector<4x48xbf16>
    %58 = arith.mulf %56, %57 : vector<4x48xbf16>
    %c2 = arith.constant 2 : index
    %c0_28 = arith.constant 0 : index
    %c0_29 = arith.constant 0 : index
    %59 = vector.load %arg4[%c2, %c0_28, %c0_29] : memref<9x48x64xbf16, #tpu.memory_space<vmem>>, vector<1x48x64xbf16>
    %60 = vector.shape_cast %59 : vector<1x48x64xbf16> to vector<48x64xbf16>
    %cst_30 = arith.constant dense<0.000000e+00> : vector<4x64xf32>
    %61 = tpu.matmul %58, %60, %cst_30 {dimension_numbers = #tpu.dot_dimension_numbers<[1], [0], [0], [1], [0, 0, 1, 1], [], []>} : vector<4x48xbf16>, vector<48x64xbf16>, vector<4x64xf32> -> vector<4x64xf32>
    %62 = arith.addf %55, %61 : vector<4x64xf32>
    %c7_31 = arith.constant 7 : index
    %c0_32 = arith.constant 0 : index
    %63 = vector.load %arg6[%c7_31, %c0_32] : memref<16x48xbf16, #tpu.memory_space<vmem>>, vector<4x48xbf16>
    %64 = vector.broadcast %37 : vector<4x1xbf16> to vector<4x48xbf16>
    %65 = arith.mulf %63, %64 : vector<4x48xbf16>
    %c3 = arith.constant 3 : index
    %c0_33 = arith.constant 0 : index
    %c0_34 = arith.constant 0 : index
    %66 = vector.load %arg4[%c3, %c0_33, %c0_34] : memref<9x48x64xbf16, #tpu.memory_space<vmem>>, vector<1x48x64xbf16>
    %67 = vector.shape_cast %66 : vector<1x48x64xbf16> to vector<48x64xbf16>
    %cst_35 = arith.constant dense<0.000000e+00> : vector<4x64xf32>
    %68 = tpu.matmul %65, %67, %cst_35 {dimension_numbers = #tpu.dot_dimension_numbers<[1], [0], [0], [1], [0, 0, 1, 1], [], []>} : vector<4x48xbf16>, vector<48x64xbf16>, vector<4x64xf32> -> vector<4x64xf32>
    %69 = arith.addf %62, %68 : vector<4x64xf32>
    %c8_36 = arith.constant 8 : index
    %c0_37 = arith.constant 0 : index
    %70 = vector.load %arg6[%c8_36, %c0_37] : memref<16x48xbf16, #tpu.memory_space<vmem>>, vector<4x48xbf16>
    %c4 = arith.constant 4 : index
    %c0_38 = arith.constant 0 : index
    %c0_39 = arith.constant 0 : index
    %71 = vector.load %arg4[%c4, %c0_38, %c0_39] : memref<9x48x64xbf16, #tpu.memory_space<vmem>>, vector<1x48x64xbf16>
    %72 = vector.shape_cast %71 : vector<1x48x64xbf16> to vector<48x64xbf16>
    %cst_40 = arith.constant dense<0.000000e+00> : vector<4x64xf32>
    %73 = tpu.matmul %70, %72, %cst_40 {dimension_numbers = #tpu.dot_dimension_numbers<[1], [0], [0], [1], [0, 0, 1, 1], [], []>} : vector<4x48xbf16>, vector<48x64xbf16>, vector<4x64xf32> -> vector<4x64xf32>
    %74 = arith.addf %69, %73 : vector<4x64xf32>
    %c9 = arith.constant 9 : index
    %c0_41 = arith.constant 0 : index
    %75 = vector.load %arg6[%c9, %c0_41] : memref<16x48xbf16, #tpu.memory_space<vmem>>, vector<4x48xbf16>
    %76 = vector.broadcast %42 : vector<4x1xbf16> to vector<4x48xbf16>
    %77 = arith.mulf %75, %76 : vector<4x48xbf16>
    %c5_42 = arith.constant 5 : index
    %c0_43 = arith.constant 0 : index
    %c0_44 = arith.constant 0 : index
    %78 = vector.load %arg4[%c5_42, %c0_43, %c0_44] : memref<9x48x64xbf16, #tpu.memory_space<vmem>>, vector<1x48x64xbf16>
    %79 = vector.shape_cast %78 : vector<1x48x64xbf16> to vector<48x64xbf16>
    %cst_45 = arith.constant dense<0.000000e+00> : vector<4x64xf32>
    %80 = tpu.matmul %77, %79, %cst_45 {dimension_numbers = #tpu.dot_dimension_numbers<[1], [0], [0], [1], [0, 0, 1, 1], [], []>} : vector<4x48xbf16>, vector<48x64xbf16>, vector<4x64xf32> -> vector<4x64xf32>
    %81 = arith.addf %74, %80 : vector<4x64xf32>
    %c9_46 = arith.constant 9 : index
    %c0_47 = arith.constant 0 : index
    %82 = vector.load %arg6[%c9_46, %c0_47] : memref<16x48xbf16, #tpu.memory_space<vmem>>, vector<4x48xbf16>
    %83 = vector.broadcast %37 : vector<4x1xbf16> to vector<4x48xbf16>
    %84 = arith.mulf %82, %83 : vector<4x48xbf16>
    %c6_48 = arith.constant 6 : index
    %c0_49 = arith.constant 0 : index
    %c0_50 = arith.constant 0 : index
    %85 = vector.load %arg4[%c6_48, %c0_49, %c0_50] : memref<9x48x64xbf16, #tpu.memory_space<vmem>>, vector<1x48x64xbf16>
    %86 = vector.shape_cast %85 : vector<1x48x64xbf16> to vector<48x64xbf16>
    %cst_51 = arith.constant dense<0.000000e+00> : vector<4x64xf32>
    %87 = tpu.matmul %84, %86, %cst_51 {dimension_numbers = #tpu.dot_dimension_numbers<[1], [0], [0], [1], [0, 0, 1, 1], [], []>} : vector<4x48xbf16>, vector<48x64xbf16>, vector<4x64xf32> -> vector<4x64xf32>
    %88 = arith.addf %81, %87 : vector<4x64xf32>
    %c10 = arith.constant 10 : index
    %c0_52 = arith.constant 0 : index
    %89 = vector.load %arg6[%c10, %c0_52] : memref<16x48xbf16, #tpu.memory_space<vmem>>, vector<4x48xbf16>
    %c7_53 = arith.constant 7 : index
    %c0_54 = arith.constant 0 : index
    %c0_55 = arith.constant 0 : index
    %90 = vector.load %arg4[%c7_53, %c0_54, %c0_55] : memref<9x48x64xbf16, #tpu.memory_space<vmem>>, vector<1x48x64xbf16>
    %91 = vector.shape_cast %90 : vector<1x48x64xbf16> to vector<48x64xbf16>
    %cst_56 = arith.constant dense<0.000000e+00> : vector<4x64xf32>
    %92 = tpu.matmul %89, %91, %cst_56 {dimension_numbers = #tpu.dot_dimension_numbers<[1], [0], [0], [1], [0, 0, 1, 1], [], []>} : vector<4x48xbf16>, vector<48x64xbf16>, vector<4x64xf32> -> vector<4x64xf32>
    %93 = arith.addf %88, %92 : vector<4x64xf32>
    %c11 = arith.constant 11 : index
    %c0_57 = arith.constant 0 : index
    %94 = vector.load %arg6[%c11, %c0_57] : memref<16x48xbf16, #tpu.memory_space<vmem>>, vector<4x48xbf16>
    %95 = vector.broadcast %42 : vector<4x1xbf16> to vector<4x48xbf16>
    %96 = arith.mulf %94, %95 : vector<4x48xbf16>
    %c8_58 = arith.constant 8 : index
    %c0_59 = arith.constant 0 : index
    %c0_60 = arith.constant 0 : index
    %97 = vector.load %arg4[%c8_58, %c0_59, %c0_60] : memref<9x48x64xbf16, #tpu.memory_space<vmem>>, vector<1x48x64xbf16>
    %98 = vector.shape_cast %97 : vector<1x48x64xbf16> to vector<48x64xbf16>
    %cst_61 = arith.constant dense<0.000000e+00> : vector<4x64xf32>
    %99 = tpu.matmul %96, %98, %cst_61 {dimension_numbers = #tpu.dot_dimension_numbers<[1], [0], [0], [1], [0, 0, 1, 1], [], []>} : vector<4x48xbf16>, vector<48x64xbf16>, vector<4x64xf32> -> vector<4x64xf32>
    %100 = arith.addf %93, %99 : vector<4x64xf32>
    %c0_62 = arith.constant 0 : index
    %c0_63 = arith.constant 0 : index
    %c0_64 = arith.constant 0 : index
    %101 = vector.load %arg5[%c0_62, %c0_63, %c0_64] : memref<1x4x64xf32, #tpu.memory_space<vmem>>, vector<1x4x64xf32>
    %102 = vector.shape_cast %101 : vector<1x4x64xf32> to vector<4x64xf32>
    %103 = vector.shape_cast %100 : vector<4x64xf32> to vector<1x4x64xf32>
    tpu.vector_store %arg5[%c0_62, %c0_63, %c0_64], %103 {strides = array<i32>} : memref<1x4x64xf32, #tpu.memory_space<vmem>>, vector<1x4x64xf32>,
    return
  }
  func.func @transform_0(%arg0: i32) -> (i32, i32, i32) {
    %c0_i32 = arith.constant 0 : i32
    %c0_i32_0 = arith.constant 0 : i32
    %c0_i32_1 = arith.constant 0 : i32
    return %arg0, %c0_i32, %c0_i32_0 : i32, i32, i32
  }
  func.func @transform_1(%arg0: i32) -> (i32, i32, i32) {
    %c0_i32 = arith.constant 0 : i32
    %c0_i32_0 = arith.constant 0 : i32
    %c0_i32_1 = arith.constant 0 : i32
    return %arg0, %c0_i32, %c0_i32_0 : i32, i32, i32
  }
  func.func @transform_2(%arg0: i32) -> (i32, i32, i32) {
    %c0_i32 = arith.constant 0 : i32
    %c0_i32_0 = arith.constant 0 : i32
    %c0_i32_1 = arith.constant 0 : i32
    return %arg0, %c0_i32, %c0_i32_0 : i32, i32, i32
  }
  func.func @transform_3(%arg0: i32) -> (i32, i32, i32) {
    %c0_i32 = arith.constant 0 : i32
    %c0_i32_0 = arith.constant 0 : i32
    %c0_i32_1 = arith.constant 0 : i32
    %c0_i32_2 = arith.constant 0 : i32
    return %c0_i32, %c0_i32_0, %c0_i32_1 : i32, i32, i32
  }
  func.func @transform_4(%arg0: i32) -> (i32, i32, i32) {
    %c0_i32 = arith.constant 0 : i32
    %c0_i32_0 = arith.constant 0 : i32
    %c0_i32_1 = arith.constant 0 : i32
    return %arg0, %c0_i32, %c0_i32_0 : i32, i32, i32
  }
}

module attributes {stable_mosaic.version = 11 : i64} {
  func.func @_gn_stats_kernel(%arg0: i32, %arg1: memref<1x4x64xf32, #tpu.memory_space<vmem>>, %arg2: memref<64x16xf32, #tpu.memory_space<vmem>>, %arg3: memref<16x64xf32, #tpu.memory_space<vmem>>, %arg4: memref<1x64xf32, #tpu.memory_space<vmem>>, %arg5: memref<1x64xf32, #tpu.memory_space<vmem>>, %arg6: memref<1x1x64xf32, #tpu.memory_space<vmem>>, %arg7: memref<1x1x64xf32, #tpu.memory_space<vmem>>) attributes {dimension_semantics = [#tpu.dimension_semantics<parallel>], iteration_bounds = array<i64: 2>, scalar_prefetch = 0 : i64, scratch_operands = 0 : i64, tpu.core_type = #tpu.core_type<tc>, window_params = [{transform_indices = @transform_0, window_bounds = array<i64: 1, 4, 64>}, {pipeline_mode = #tpu.pipeline_mode<synchronous>, transform_indices = @transform_1, window_bounds = array<i64: 64, 16>}, {pipeline_mode = #tpu.pipeline_mode<synchronous>, transform_indices = @transform_2, window_bounds = array<i64: 16, 64>}, {pipeline_mode = #tpu.pipeline_mode<synchronous>, transform_indices = @transform_3, window_bounds = array<i64: 1, 64>}, {pipeline_mode = #tpu.pipeline_mode<synchronous>, transform_indices = @transform_4, window_bounds = array<i64: 1, 64>}, {transform_indices = @transform_5, window_bounds = array<i64: 1, 1, 64>}, {transform_indices = @transform_6, window_bounds = array<i64: 1, 1, 64>}]} {
    %c0 = arith.constant 0 : index
    %c0_0 = arith.constant 0 : index
    %c0_1 = arith.constant 0 : index
    %0 = vector.load %arg1[%c0, %c0_0, %c0_1] : memref<1x4x64xf32, #tpu.memory_space<vmem>>, vector<1x4x64xf32>
    %1 = vector.shape_cast %0 : vector<1x4x64xf32> to vector<4x64xf32>
    %cst = arith.constant dense<0.000000e+00> : vector<64xf32>
    %2 = vector.multi_reduction <add>, %1, %cst [0] : vector<4x64xf32> to vector<64xf32>
    %3 = vector.shape_cast %2 : vector<64xf32> to vector<1x64xf32>
    %4 = arith.mulf %1, %1 : vector<4x64xf32>
    %cst_2 = arith.constant dense<0.000000e+00> : vector<64xf32>
    %5 = vector.multi_reduction <add>, %4, %cst_2 [0] : vector<4x64xf32> to vector<64xf32>
    %6 = vector.shape_cast %5 : vector<64xf32> to vector<1x64xf32>
    %c0_3 = arith.constant 0 : index
    %c0_4 = arith.constant 0 : index
    %7 = vector.load %arg2[%c0_3, %c0_4] : memref<64x16xf32, #tpu.memory_space<vmem>>, vector<64x16xf32>
    %cst_5 = arith.constant dense<0.000000e+00> : vector<1x16xf32>
    %8 = tpu.matmul %3, %7, %cst_5 {dimension_numbers = #tpu.dot_dimension_numbers<[1], [0], [0], [1], [0, 0, 1, 1], [], []>} : vector<1x64xf32>, vector<64x16xf32>, vector<1x16xf32> -> vector<1x16xf32>
    %c0_6 = arith.constant 0 : index
    %c0_7 = arith.constant 0 : index
    %9 = vector.load %arg2[%c0_6, %c0_7] : memref<64x16xf32, #tpu.memory_space<vmem>>, vector<64x16xf32>
    %cst_8 = arith.constant dense<0.000000e+00> : vector<1x16xf32>
    %10 = tpu.matmul %6, %9, %cst_8 {dimension_numbers = #tpu.dot_dimension_numbers<[1], [0], [0], [1], [0, 0, 1, 1], [], []>} : vector<1x64xf32>, vector<64x16xf32>, vector<1x16xf32> -> vector<1x16xf32>
    %cst_9 = arith.constant 6.250000e-02 : f32
    %11 = vector.broadcast %cst_9 : f32 to vector<1x16xf32>
    %12 = arith.mulf %8, %11 : vector<1x16xf32>
    %cst_10 = arith.constant 6.250000e-02 : f32
    %13 = vector.broadcast %cst_10 : f32 to vector<1x16xf32>
    %14 = arith.mulf %10, %13 : vector<1x16xf32>
    %15 = arith.mulf %12, %12 : vector<1x16xf32>
    %16 = arith.subf %14, %15 : vector<1x16xf32>
    %cst_11 = arith.constant 0.000000e+00 : f32
    %17 = vector.broadcast %cst_11 : f32 to vector<1x16xf32>
    %18 = arith.maximumf %16, %17 : vector<1x16xf32>
    %c0_12 = arith.constant 0 : index
    %c0_13 = arith.constant 0 : index
    %19 = vector.load %arg3[%c0_12, %c0_13] : memref<16x64xf32, #tpu.memory_space<vmem>>, vector<16x64xf32>
    %cst_14 = arith.constant dense<0.000000e+00> : vector<1x64xf32>
    %20 = tpu.matmul %12, %19, %cst_14 {dimension_numbers = #tpu.dot_dimension_numbers<[1], [0], [0], [1], [0, 0, 1, 1], [], []>} : vector<1x16xf32>, vector<16x64xf32>, vector<1x64xf32> -> vector<1x64xf32>
    %c0_15 = arith.constant 0 : index
    %c0_16 = arith.constant 0 : index
    %21 = vector.load %arg3[%c0_15, %c0_16] : memref<16x64xf32, #tpu.memory_space<vmem>>, vector<16x64xf32>
    %cst_17 = arith.constant dense<0.000000e+00> : vector<1x64xf32>
    %22 = tpu.matmul %18, %21, %cst_17 {dimension_numbers = #tpu.dot_dimension_numbers<[1], [0], [0], [1], [0, 0, 1, 1], [], []>} : vector<1x16xf32>, vector<16x64xf32>, vector<1x64xf32> -> vector<1x64xf32>
    %cst_18 = arith.constant 9.99999974E-6 : f32
    %23 = vector.broadcast %cst_18 : f32 to vector<1x64xf32>
    %24 = arith.addf %22, %23 : vector<1x64xf32>
    %25 = math.rsqrt %24 : vector<1x64xf32>
    %c0_19 = arith.constant 0 : index
    %c0_20 = arith.constant 0 : index
    %26 = vector.load %arg4[%c0_19, %c0_20] : memref<1x64xf32, #tpu.memory_space<vmem>>, vector<1x64xf32>
    %27 = arith.mulf %26, %25 : vector<1x64xf32>
    %c0_21 = arith.constant 0 : index
    %c0_22 = arith.constant 0 : index
    %c0_23 = arith.constant 0 : index
    %28 = vector.load %arg6[%c0_21, %c0_22, %c0_23] : memref<1x1x64xf32, #tpu.memory_space<vmem>>, vector<1x1x64xf32>
    %29 = vector.shape_cast %28 : vector<1x1x64xf32> to vector<1x64xf32>
    %30 = vector.shape_cast %27 : vector<1x64xf32> to vector<1x1x64xf32>
    tpu.vector_store %arg6[%c0_21, %c0_22, %c0_23], %30 {strides = array<i32>} : memref<1x1x64xf32, #tpu.memory_space<vmem>>, vector<1x1x64xf32>,
    %c0_24 = arith.constant 0 : index
    %c0_25 = arith.constant 0 : index
    %31 = vector.load %arg5[%c0_24, %c0_25] : memref<1x64xf32, #tpu.memory_space<vmem>>, vector<1x64xf32>
    %32 = arith.mulf %20, %27 : vector<1x64xf32>
    %33 = arith.subf %31, %32 : vector<1x64xf32>
    %c0_26 = arith.constant 0 : index
    %c0_27 = arith.constant 0 : index
    %c0_28 = arith.constant 0 : index
    %34 = vector.load %arg7[%c0_26, %c0_27, %c0_28] : memref<1x1x64xf32, #tpu.memory_space<vmem>>, vector<1x1x64xf32>
    %35 = vector.shape_cast %34 : vector<1x1x64xf32> to vector<1x64xf32>
    %36 = vector.shape_cast %33 : vector<1x64xf32> to vector<1x1x64xf32>
    tpu.vector_store %arg7[%c0_26, %c0_27, %c0_28], %36 {strides = array<i32>} : memref<1x1x64xf32, #tpu.memory_space<vmem>>, vector<1x1x64xf32>,
    return
  }
  func.func @transform_0(%arg0: i32) -> (i32, i32, i32) {
    %c0_i32 = arith.constant 0 : i32
    %c0_i32_0 = arith.constant 0 : i32
    %c0_i32_1 = arith.constant 0 : i32
    return %arg0, %c0_i32, %c0_i32_0 : i32, i32, i32
  }
  func.func @transform_1(%arg0: i32) -> (i32, i32) {
    %c0_i32 = arith.constant 0 : i32
    %c0_i32_0 = arith.constant 0 : i32
    %c0_i32_1 = arith.constant 0 : i32
    return %c0_i32, %c0_i32_0 : i32, i32
  }
  func.func @transform_2(%arg0: i32) -> (i32, i32) {
    %c0_i32 = arith.constant 0 : i32
    %c0_i32_0 = arith.constant 0 : i32
    %c0_i32_1 = arith.constant 0 : i32
    return %c0_i32, %c0_i32_0 : i32, i32
  }
  func.func @transform_3(%arg0: i32) -> (i32, i32) {
    %c0_i32 = arith.constant 0 : i32
    %c0_i32_0 = arith.constant 0 : i32
    %c0_i32_1 = arith.constant 0 : i32
    return %c0_i32, %c0_i32_0 : i32, i32
  }
  func.func @transform_4(%arg0: i32) -> (i32, i32) {
    %c0_i32 = arith.constant 0 : i32
    %c0_i32_0 = arith.constant 0 : i32
    %c0_i32_1 = arith.constant 0 : i32
    return %c0_i32, %c0_i32_0 : i32, i32
  }
  func.func @transform_5(%arg0: i32) -> (i32, i32, i32) {
    %c0_i32 = arith.constant 0 : i32
    %c0_i32_0 = arith.constant 0 : i32
    %c0_i32_1 = arith.constant 0 : i32
    return %arg0, %c0_i32, %c0_i32_0 : i32, i32, i32
  }
  func.func @transform_6(%arg0: i32) -> (i32, i32, i32) {
    %c0_i32 = arith.constant 0 : i32
    %c0_i32_0 = arith.constant 0 : i32
    %c0_i32_1 = arith.constant 0 : i32
    return %arg0, %c0_i32, %c0_i32_0 : i32, i32, i32
  }
}

module attributes {stable_mosaic.version = 11 : i64} {
  func.func @_gnrelu_conv3x3_kernel(%arg0: i32, %arg1: memref<1x4x64xf32, #tpu.memory_space<vmem>>, %arg2: memref<1x1x64xf32, #tpu.memory_space<vmem>>, %arg3: memref<1x1x64xf32, #tpu.memory_space<vmem>>, %arg4: memref<9x64x64xbf16, #tpu.memory_space<vmem>>, %arg5: memref<1x4x64xf32, #tpu.memory_space<vmem>>, %arg6: memref<16x64xbf16, #tpu.memory_space<vmem>>) attributes {dimension_semantics = [#tpu.dimension_semantics<parallel>], iteration_bounds = array<i64: 2>, scalar_prefetch = 0 : i64, scratch_operands = 1 : i64, tpu.core_type = #tpu.core_type<tc>, window_params = [{transform_indices = @transform_0, window_bounds = array<i64: 1, 4, 64>}, {transform_indices = @transform_1, window_bounds = array<i64: 1, 1, 64>}, {transform_indices = @transform_2, window_bounds = array<i64: 1, 1, 64>}, {pipeline_mode = #tpu.pipeline_mode<synchronous>, transform_indices = @transform_3, window_bounds = array<i64: 9, 64, 64>}, {transform_indices = @transform_4, window_bounds = array<i64: 1, 4, 64>}]} {
    %cst = arith.constant 0.000000e+00 : bf16
    %0 = vector.broadcast %cst : bf16 to vector<16x64xbf16>
    %c0 = arith.constant 0 : index
    %c0_0 = arith.constant 0 : index
    %1 = vector.load %arg6[%c0, %c0_0] : memref<16x64xbf16, #tpu.memory_space<vmem>>, vector<16x64xbf16>
    tpu.vector_store %arg6[%c0, %c0_0], %0 {strides = array<i32>} : memref<16x64xbf16, #tpu.memory_space<vmem>>, vector<16x64xbf16>,
    %c0_1 = arith.constant 0 : index
    %c0_2 = arith.constant 0 : index
    %c0_3 = arith.constant 0 : index
    %2 = vector.load %arg1[%c0_1, %c0_2, %c0_3] : memref<1x4x64xf32, #tpu.memory_space<vmem>>, vector<1x4x64xf32>
    %3 = vector.shape_cast %2 : vector<1x4x64xf32> to vector<4x64xf32>
    %c0_4 = arith.constant 0 : index
    %c0_5 = arith.constant 0 : index
    %c0_6 = arith.constant 0 : index
    %4 = vector.load %arg2[%c0_4, %c0_5, %c0_6] : memref<1x1x64xf32, #tpu.memory_space<vmem>>, vector<1x1x64xf32>
    %5 = vector.shape_cast %4 : vector<1x1x64xf32> to vector<1x64xf32>
    %6 = vector.broadcast %5 : vector<1x64xf32> to vector<4x64xf32>
    %7 = arith.mulf %3, %6 : vector<4x64xf32>
    %c0_7 = arith.constant 0 : index
    %c0_8 = arith.constant 0 : index
    %c0_9 = arith.constant 0 : index
    %8 = vector.load %arg3[%c0_7, %c0_8, %c0_9] : memref<1x1x64xf32, #tpu.memory_space<vmem>>, vector<1x1x64xf32>
    %9 = vector.shape_cast %8 : vector<1x1x64xf32> to vector<1x64xf32>
    %10 = vector.broadcast %9 : vector<1x64xf32> to vector<4x64xf32>
    %11 = arith.addf %7, %10 : vector<4x64xf32>
    %cst_10 = arith.constant 0.000000e+00 : f32
    %12 = vector.broadcast %cst_10 : f32 to vector<4x64xf32>
    %13 = arith.maximumf %11, %12 : vector<4x64xf32>
    %14 = arith.truncf %13 : vector<4x64xf32> to vector<4x64xbf16>
    %c8 = arith.constant 8 : index
    %c0_11 = arith.constant 0 : index
    %15 = vector.load %arg6[%c8, %c0_11] : memref<16x64xbf16, #tpu.memory_space<vmem>>, vector<4x64xbf16>
    tpu.vector_store %arg6[%c8, %c0_11], %14 {strides = array<i32>} : memref<16x64xbf16, #tpu.memory_space<vmem>>, vector<4x64xbf16>,
    %16 = tpu.iota {dimensions = array<i32: 0>} : vector<4x1xi32>
    %c2_i32 = arith.constant 2 : i32
    %c0_i32 = arith.constant 0 : i32
    %17 = arith.cmpi eq, %c2_i32, %c0_i32 : i32
    %c1_i32 = arith.constant 1 : i32
    %18 = arith.select %17, %c1_i32, %c2_i32 : i32
    %19 = vector.broadcast %18 : i32 to vector<4x1xi32>
    %20 = arith.remsi %16, %19 : vector<4x1xi32>
    %c0_i32_12 = arith.constant 0 : i32
    %21 = vector.broadcast %c0_i32_12 : i32 to vector<4x1xi32>
    %22 = arith.cmpi ne, %20, %21 : vector<4x1xi32>
    %c0_i32_13 = arith.constant 0 : i32
    %23 = vector.broadcast %c0_i32_13 : i32 to vector<4x1xi32>
    %24 = arith.cmpi slt, %20, %23 : vector<4x1xi32>
    %c0_i32_14 = arith.constant 0 : i32
    %25 = arith.cmpi slt, %18, %c0_i32_14 : i32
    %26 = vector.broadcast %25 : i1 to vector<4x1xi1>
    %27 = vector.broadcast %26 : vector<4x1xi1> to vector<4x1xi1>
    %28 = arith.xori %24, %27 : vector<4x1xi1>
    %29 = arith.andi %28, %22 : vector<4x1xi1>
    %30 = vector.broadcast %18 : i32 to vector<4x1xi32>
    %31 = arith.addi %20, %30 : vector<4x1xi32>
    %32 = arith.select %29, %31, %20 : vector<4x1xi1>, vector<4x1xi32>
    %c0_i32_15 = arith.constant 0 : i32
    %33 = vector.broadcast %c0_i32_15 : i32 to vector<4x1xi32>
    %34 = arith.cmpi ne, %32, %33 : vector<4x1xi32>
    %35 = arith.extui %34 : vector<4x1xi1> to vector<4x1xi32>
    %36 = arith.sitofp %35 : vector<4x1xi32> to vector<4x1xf32>
    %37 = arith.truncf %36 : vector<4x1xf32> to vector<4x1xbf16>
    %c1_i32_16 = arith.constant 1 : i32
    %38 = vector.broadcast %c1_i32_16 : i32 to vector<4x1xi32>
    %39 = arith.cmpi ne, %32, %38 : vector<4x1xi32>
    %40 = arith.extui %39 : vector<4x1xi1> to vector<4x1xi32>
    %41 = arith.sitofp %40 : vector<4x1xi32> to vector<4x1xf32>
    %42 = arith.truncf %41 : vector<4x1xf32> to vector<4x1xbf16>
    %cst_17 = arith.constant 0.000000e+00 : f32
    %43 = vector.broadcast %cst_17 : f32 to vector<4x64xf32>
    %c5 = arith.constant 5 : index
    %c0_18 = arith.constant 0 : index
    %44 = vector.load %arg6[%c5, %c0_18] : memref<16x64xbf16, #tpu.memory_space<vmem>>, vector<4x64xbf16>
    %45 = vector.broadcast %37 : vector<4x1xbf16> to vector<4x64xbf16>
    %46 = arith.mulf %44, %45 : vector<4x64xbf16>
    %c0_19 = arith.constant 0 : index
    %c0_20 = arith.constant 0 : index
    %c0_21 = arith.constant 0 : index
    %47 = vector.load %arg4[%c0_19, %c0_20, %c0_21] : memref<9x64x64xbf16, #tpu.memory_space<vmem>>, vector<1x64x64xbf16>
    %48 = vector.shape_cast %47 : vector<1x64x64xbf16> to vector<64x64xbf16>
    %cst_22 = arith.constant dense<0.000000e+00> : vector<4x64xf32>
    %49 = tpu.matmul %46, %48, %cst_22 {dimension_numbers = #tpu.dot_dimension_numbers<[1], [0], [0], [1], [0, 0, 1, 1], [], []>} : vector<4x64xbf16>, vector<64x64xbf16>, vector<4x64xf32> -> vector<4x64xf32>
    %50 = arith.addf %43, %49 : vector<4x64xf32>
    %c6 = arith.constant 6 : index
    %c0_23 = arith.constant 0 : index
    %51 = vector.load %arg6[%c6, %c0_23] : memref<16x64xbf16, #tpu.memory_space<vmem>>, vector<4x64xbf16>
    %c1 = arith.constant 1 : index
    %c0_24 = arith.constant 0 : index
    %c0_25 = arith.constant 0 : index
    %52 = vector.load %arg4[%c1, %c0_24, %c0_25] : memref<9x64x64xbf16, #tpu.memory_space<vmem>>, vector<1x64x64xbf16>
    %53 = vector.shape_cast %52 : vector<1x64x64xbf16> to vector<64x64xbf16>
    %cst_26 = arith.constant dense<0.000000e+00> : vector<4x64xf32>
    %54 = tpu.matmul %51, %53, %cst_26 {dimension_numbers = #tpu.dot_dimension_numbers<[1], [0], [0], [1], [0, 0, 1, 1], [], []>} : vector<4x64xbf16>, vector<64x64xbf16>, vector<4x64xf32> -> vector<4x64xf32>
    %55 = arith.addf %50, %54 : vector<4x64xf32>
    %c7 = arith.constant 7 : index
    %c0_27 = arith.constant 0 : index
    %56 = vector.load %arg6[%c7, %c0_27] : memref<16x64xbf16, #tpu.memory_space<vmem>>, vector<4x64xbf16>
    %57 = vector.broadcast %42 : vector<4x1xbf16> to vector<4x64xbf16>
    %58 = arith.mulf %56, %57 : vector<4x64xbf16>
    %c2 = arith.constant 2 : index
    %c0_28 = arith.constant 0 : index
    %c0_29 = arith.constant 0 : index
    %59 = vector.load %arg4[%c2, %c0_28, %c0_29] : memref<9x64x64xbf16, #tpu.memory_space<vmem>>, vector<1x64x64xbf16>
    %60 = vector.shape_cast %59 : vector<1x64x64xbf16> to vector<64x64xbf16>
    %cst_30 = arith.constant dense<0.000000e+00> : vector<4x64xf32>
    %61 = tpu.matmul %58, %60, %cst_30 {dimension_numbers = #tpu.dot_dimension_numbers<[1], [0], [0], [1], [0, 0, 1, 1], [], []>} : vector<4x64xbf16>, vector<64x64xbf16>, vector<4x64xf32> -> vector<4x64xf32>
    %62 = arith.addf %55, %61 : vector<4x64xf32>
    %c7_31 = arith.constant 7 : index
    %c0_32 = arith.constant 0 : index
    %63 = vector.load %arg6[%c7_31, %c0_32] : memref<16x64xbf16, #tpu.memory_space<vmem>>, vector<4x64xbf16>
    %64 = vector.broadcast %37 : vector<4x1xbf16> to vector<4x64xbf16>
    %65 = arith.mulf %63, %64 : vector<4x64xbf16>
    %c3 = arith.constant 3 : index
    %c0_33 = arith.constant 0 : index
    %c0_34 = arith.constant 0 : index
    %66 = vector.load %arg4[%c3, %c0_33, %c0_34] : memref<9x64x64xbf16, #tpu.memory_space<vmem>>, vector<1x64x64xbf16>
    %67 = vector.shape_cast %66 : vector<1x64x64xbf16> to vector<64x64xbf16>
    %cst_35 = arith.constant dense<0.000000e+00> : vector<4x64xf32>
    %68 = tpu.matmul %65, %67, %cst_35 {dimension_numbers = #tpu.dot_dimension_numbers<[1], [0], [0], [1], [0, 0, 1, 1], [], []>} : vector<4x64xbf16>, vector<64x64xbf16>, vector<4x64xf32> -> vector<4x64xf32>
    %69 = arith.addf %62, %68 : vector<4x64xf32>
    %c8_36 = arith.constant 8 : index
    %c0_37 = arith.constant 0 : index
    %70 = vector.load %arg6[%c8_36, %c0_37] : memref<16x64xbf16, #tpu.memory_space<vmem>>, vector<4x64xbf16>
    %c4 = arith.constant 4 : index
    %c0_38 = arith.constant 0 : index
    %c0_39 = arith.constant 0 : index
    %71 = vector.load %arg4[%c4, %c0_38, %c0_39] : memref<9x64x64xbf16, #tpu.memory_space<vmem>>, vector<1x64x64xbf16>
    %72 = vector.shape_cast %71 : vector<1x64x64xbf16> to vector<64x64xbf16>
    %cst_40 = arith.constant dense<0.000000e+00> : vector<4x64xf32>
    %73 = tpu.matmul %70, %72, %cst_40 {dimension_numbers = #tpu.dot_dimension_numbers<[1], [0], [0], [1], [0, 0, 1, 1], [], []>} : vector<4x64xbf16>, vector<64x64xbf16>, vector<4x64xf32> -> vector<4x64xf32>
    %74 = arith.addf %69, %73 : vector<4x64xf32>
    %c9 = arith.constant 9 : index
    %c0_41 = arith.constant 0 : index
    %75 = vector.load %arg6[%c9, %c0_41] : memref<16x64xbf16, #tpu.memory_space<vmem>>, vector<4x64xbf16>
    %76 = vector.broadcast %42 : vector<4x1xbf16> to vector<4x64xbf16>
    %77 = arith.mulf %75, %76 : vector<4x64xbf16>
    %c5_42 = arith.constant 5 : index
    %c0_43 = arith.constant 0 : index
    %c0_44 = arith.constant 0 : index
    %78 = vector.load %arg4[%c5_42, %c0_43, %c0_44] : memref<9x64x64xbf16, #tpu.memory_space<vmem>>, vector<1x64x64xbf16>
    %79 = vector.shape_cast %78 : vector<1x64x64xbf16> to vector<64x64xbf16>
    %cst_45 = arith.constant dense<0.000000e+00> : vector<4x64xf32>
    %80 = tpu.matmul %77, %79, %cst_45 {dimension_numbers = #tpu.dot_dimension_numbers<[1], [0], [0], [1], [0, 0, 1, 1], [], []>} : vector<4x64xbf16>, vector<64x64xbf16>, vector<4x64xf32> -> vector<4x64xf32>
    %81 = arith.addf %74, %80 : vector<4x64xf32>
    %c9_46 = arith.constant 9 : index
    %c0_47 = arith.constant 0 : index
    %82 = vector.load %arg6[%c9_46, %c0_47] : memref<16x64xbf16, #tpu.memory_space<vmem>>, vector<4x64xbf16>
    %83 = vector.broadcast %37 : vector<4x1xbf16> to vector<4x64xbf16>
    %84 = arith.mulf %82, %83 : vector<4x64xbf16>
    %c6_48 = arith.constant 6 : index
    %c0_49 = arith.constant 0 : index
    %c0_50 = arith.constant 0 : index
    %85 = vector.load %arg4[%c6_48, %c0_49, %c0_50] : memref<9x64x64xbf16, #tpu.memory_space<vmem>>, vector<1x64x64xbf16>
    %86 = vector.shape_cast %85 : vector<1x64x64xbf16> to vector<64x64xbf16>
    %cst_51 = arith.constant dense<0.000000e+00> : vector<4x64xf32>
    %87 = tpu.matmul %84, %86, %cst_51 {dimension_numbers = #tpu.dot_dimension_numbers<[1], [0], [0], [1], [0, 0, 1, 1], [], []>} : vector<4x64xbf16>, vector<64x64xbf16>, vector<4x64xf32> -> vector<4x64xf32>
    %88 = arith.addf %81, %87 : vector<4x64xf32>
    %c10 = arith.constant 10 : index
    %c0_52 = arith.constant 0 : index
    %89 = vector.load %arg6[%c10, %c0_52] : memref<16x64xbf16, #tpu.memory_space<vmem>>, vector<4x64xbf16>
    %c7_53 = arith.constant 7 : index
    %c0_54 = arith.constant 0 : index
    %c0_55 = arith.constant 0 : index
    %90 = vector.load %arg4[%c7_53, %c0_54, %c0_55] : memref<9x64x64xbf16, #tpu.memory_space<vmem>>, vector<1x64x64xbf16>
    %91 = vector.shape_cast %90 : vector<1x64x64xbf16> to vector<64x64xbf16>
    %cst_56 = arith.constant dense<0.000000e+00> : vector<4x64xf32>
    %92 = tpu.matmul %89, %91, %cst_56 {dimension_numbers = #tpu.dot_dimension_numbers<[1], [0], [0], [1], [0, 0, 1, 1], [], []>} : vector<4x64xbf16>, vector<64x64xbf16>, vector<4x64xf32> -> vector<4x64xf32>
    %93 = arith.addf %88, %92 : vector<4x64xf32>
    %c11 = arith.constant 11 : index
    %c0_57 = arith.constant 0 : index
    %94 = vector.load %arg6[%c11, %c0_57] : memref<16x64xbf16, #tpu.memory_space<vmem>>, vector<4x64xbf16>
    %95 = vector.broadcast %42 : vector<4x1xbf16> to vector<4x64xbf16>
    %96 = arith.mulf %94, %95 : vector<4x64xbf16>
    %c8_58 = arith.constant 8 : index
    %c0_59 = arith.constant 0 : index
    %c0_60 = arith.constant 0 : index
    %97 = vector.load %arg4[%c8_58, %c0_59, %c0_60] : memref<9x64x64xbf16, #tpu.memory_space<vmem>>, vector<1x64x64xbf16>
    %98 = vector.shape_cast %97 : vector<1x64x64xbf16> to vector<64x64xbf16>
    %cst_61 = arith.constant dense<0.000000e+00> : vector<4x64xf32>
    %99 = tpu.matmul %96, %98, %cst_61 {dimension_numbers = #tpu.dot_dimension_numbers<[1], [0], [0], [1], [0, 0, 1, 1], [], []>} : vector<4x64xbf16>, vector<64x64xbf16>, vector<4x64xf32> -> vector<4x64xf32>
    %100 = arith.addf %93, %99 : vector<4x64xf32>
    %c0_62 = arith.constant 0 : index
    %c0_63 = arith.constant 0 : index
    %c0_64 = arith.constant 0 : index
    %101 = vector.load %arg5[%c0_62, %c0_63, %c0_64] : memref<1x4x64xf32, #tpu.memory_space<vmem>>, vector<1x4x64xf32>
    %102 = vector.shape_cast %101 : vector<1x4x64xf32> to vector<4x64xf32>
    %103 = vector.shape_cast %100 : vector<4x64xf32> to vector<1x4x64xf32>
    tpu.vector_store %arg5[%c0_62, %c0_63, %c0_64], %103 {strides = array<i32>} : memref<1x4x64xf32, #tpu.memory_space<vmem>>, vector<1x4x64xf32>,
    return
  }
  func.func @transform_0(%arg0: i32) -> (i32, i32, i32) {
    %c0_i32 = arith.constant 0 : i32
    %c0_i32_0 = arith.constant 0 : i32
    %c0_i32_1 = arith.constant 0 : i32
    return %arg0, %c0_i32, %c0_i32_0 : i32, i32, i32
  }
  func.func @transform_1(%arg0: i32) -> (i32, i32, i32) {
    %c0_i32 = arith.constant 0 : i32
    %c0_i32_0 = arith.constant 0 : i32
    %c0_i32_1 = arith.constant 0 : i32
    return %arg0, %c0_i32, %c0_i32_0 : i32, i32, i32
  }
  func.func @transform_2(%arg0: i32) -> (i32, i32, i32) {
    %c0_i32 = arith.constant 0 : i32
    %c0_i32_0 = arith.constant 0 : i32
    %c0_i32_1 = arith.constant 0 : i32
    return %arg0, %c0_i32, %c0_i32_0 : i32, i32, i32
  }
  func.func @transform_3(%arg0: i32) -> (i32, i32, i32) {
    %c0_i32 = arith.constant 0 : i32
    %c0_i32_0 = arith.constant 0 : i32
    %c0_i32_1 = arith.constant 0 : i32
    %c0_i32_2 = arith.constant 0 : i32
    return %c0_i32, %c0_i32_0, %c0_i32_1 : i32, i32, i32
  }
  func.func @transform_4(%arg0: i32) -> (i32, i32, i32) {
    %c0_i32 = arith.constant 0 : i32
    %c0_i32_0 = arith.constant 0 : i32
    %c0_i32_1 = arith.constant 0 : i32
    return %arg0, %c0_i32, %c0_i32_0 : i32, i32, i32
  }
}

module attributes {stable_mosaic.version = 11 : i64} {
  func.func @_cascade_pool_kernel(%arg0: i32, %arg1: memref<1x1x2x1x128xf32, #tpu.memory_space<vmem>>, %arg2: memref<1x1x2x1x96xf32, #tpu.memory_space<vmem>>, %arg3: memref<1x1x1x64xf32, #tpu.memory_space<vmem>>) attributes {dimension_semantics = [#tpu.dimension_semantics<parallel>], iteration_bounds = array<i64: 2>, scalar_prefetch = 0 : i64, scratch_operands = 0 : i64, tpu.core_type = #tpu.core_type<tc>, window_params = [{transform_indices = @transform_0, window_bounds = array<i64: 1, 1, 2, 1, 128>}, {transform_indices = @transform_1, window_bounds = array<i64: 1, 1, 2, 1, 96>}, {transform_indices = @transform_2, window_bounds = array<i64: 1, 1, 1, 64>}]} {
    %c0 = arith.constant 0 : index
    %c0_0 = arith.constant 0 : index
    %c0_1 = arith.constant 0 : index
    %c0_2 = arith.constant 0 : index
    %c0_3 = arith.constant 0 : index
    %0 = vector.load %arg1[%c0, %c0_0, %c0_1, %c0_2, %c0_3] : memref<1x1x2x1x128xf32, #tpu.memory_space<vmem>>, vector<1x1x2x1x128xf32>
    %1 = vector.shape_cast %0 : vector<1x1x2x1x128xf32> to vector<1x2x1x128xf32>
    %c0_4 = arith.constant 0 : index
    %c0_5 = arith.constant 0 : index
    %c0_6 = arith.constant 0 : index
    %c0_7 = arith.constant 0 : index
    %c0_8 = arith.constant 0 : index
    %2 = vector.load %arg2[%c0_4, %c0_5, %c0_6, %c0_7, %c0_8] : memref<1x1x2x1x96xf32, #tpu.memory_space<vmem>>, vector<1x1x2x1x96xf32>
    %3 = vector.shape_cast %2 : vector<1x1x2x1x96xf32> to vector<1x2x1x96xf32>
    %4 = vector.extract_strided_slice %1 {offsets = [0, 0, 0, 0], sizes = [1, 1, 1, 128], strides = [1, 1, 1, 1]} : vector<1x2x1x128xf32> to vector<1x1x1x128xf32>
    %5 = vector.shape_cast %4 : vector<1x1x1x128xf32> to vector<1x1x128xf32>
    %6 = vector.extract_strided_slice %1 {offsets = [0, 1, 0, 0], sizes = [1, 1, 1, 128], strides = [1, 1, 1, 1]} : vector<1x2x1x128xf32> to vector<1x1x1x128xf32>
    %7 = vector.shape_cast %6 : vector<1x1x1x128xf32> to vector<1x1x128xf32>
    %8 = arith.addf %5, %7 : vector<1x1x128xf32>
    %9 = vector.extract_strided_slice %3 {offsets = [0, 0, 0, 0], sizes = [1, 1, 1, 96], strides = [1, 1, 1, 1]} : vector<1x2x1x96xf32> to vector<1x1x1x96xf32>
    %10 = vector.shape_cast %9 : vector<1x1x1x96xf32> to vector<1x1x96xf32>
    %11 = vector.extract_strided_slice %3 {offsets = [0, 1, 0, 0], sizes = [1, 1, 1, 96], strides = [1, 1, 1, 1]} : vector<1x2x1x96xf32> to vector<1x1x1x96xf32>
    %12 = vector.shape_cast %11 : vector<1x1x1x96xf32> to vector<1x1x96xf32>
    %13 = arith.addf %10, %12 : vector<1x1x96xf32>
    %14 = vector.extract_strided_slice %8 {offsets = [0, 0, 0], sizes = [1, 1, 64], strides = [1, 1, 1]} : vector<1x1x128xf32> to vector<1x1x64xf32>
    %15 = vector.extract_strided_slice %8 {offsets = [0, 0, 64], sizes = [1, 1, 64], strides = [1, 1, 1]} : vector<1x1x128xf32> to vector<1x1x64xf32>
    %16 = arith.addf %14, %15 : vector<1x1x64xf32>
    %cst = arith.constant 2.500000e-01 : f32
    %17 = vector.broadcast %cst : f32 to vector<1x1x64xf32>
    %18 = arith.mulf %17, %16 : vector<1x1x64xf32>
    %19 = vector.extract_strided_slice %13 {offsets = [0, 0, 0], sizes = [1, 1, 48], strides = [1, 1, 1]} : vector<1x1x96xf32> to vector<1x1x48xf32>
    %20 = vector.extract_strided_slice %13 {offsets = [0, 0, 48], sizes = [1, 1, 48], strides = [1, 1, 1]} : vector<1x1x96xf32> to vector<1x1x48xf32>
    %21 = arith.addf %19, %20 : vector<1x1x48xf32>
    %cst_9 = arith.constant 2.500000e-01 : f32
    %22 = vector.broadcast %cst_9 : f32 to vector<1x1x48xf32>
    %23 = arith.mulf %22, %21 : vector<1x1x48xf32>
    %cst_10 = arith.constant 0.000000e+00 : f32
    %24 = vector.broadcast %cst_10 : f32 to vector<1x1x16xf32>
    %25 = tpu.concatenate %23, %24 in 2 : vector<1x1x48xf32>, vector<1x1x16xf32> -> vector<1x1x64xf32>
    %26 = arith.addf %18, %25 : vector<1x1x64xf32>
    %c0_11 = arith.constant 0 : index
    %c0_12 = arith.constant 0 : index
    %c0_13 = arith.constant 0 : index
    %c0_14 = arith.constant 0 : index
    %27 = vector.load %arg3[%c0_11, %c0_12, %c0_13, %c0_14] : memref<1x1x1x64xf32, #tpu.memory_space<vmem>>, vector<1x1x1x64xf32>
    %28 = vector.shape_cast %27 : vector<1x1x1x64xf32> to vector<1x1x64xf32>
    %29 = vector.shape_cast %26 : vector<1x1x64xf32> to vector<1x1x1x64xf32>
    tpu.vector_store %arg3[%c0_11, %c0_12, %c0_13, %c0_14], %29 {strides = array<i32>} : memref<1x1x1x64xf32, #tpu.memory_space<vmem>>, vector<1x1x1x64xf32>,
    return
  }
  func.func @transform_0(%arg0: i32) -> (i32, i32, i32, i32, i32) {
    %c0_i32 = arith.constant 0 : i32
    %c0_i32_0 = arith.constant 0 : i32
    %c0_i32_1 = arith.constant 0 : i32
    %c0_i32_2 = arith.constant 0 : i32
    %c0_i32_3 = arith.constant 0 : i32
    return %arg0, %c0_i32, %c0_i32_0, %c0_i32_1, %c0_i32_2 : i32, i32, i32, i32, i32
  }
  func.func @transform_1(%arg0: i32) -> (i32, i32, i32, i32, i32) {
    %c0_i32 = arith.constant 0 : i32
    %c0_i32_0 = arith.constant 0 : i32
    %c0_i32_1 = arith.constant 0 : i32
    %c0_i32_2 = arith.constant 0 : i32
    %c0_i32_3 = arith.constant 0 : i32
    return %arg0, %c0_i32, %c0_i32_0, %c0_i32_1, %c0_i32_2 : i32, i32, i32, i32, i32
  }
  func.func @transform_2(%arg0: i32) -> (i32, i32, i32, i32) {
    %c0_i32 = arith.constant 0 : i32
    %c0_i32_0 = arith.constant 0 : i32
    %c0_i32_1 = arith.constant 0 : i32
    %c0_i32_2 = arith.constant 0 : i32
    return %arg0, %c0_i32, %c0_i32_0, %c0_i32_1 : i32, i32, i32, i32
  }
}

module attributes {stable_mosaic.version = 11 : i64} {
  func.func @_gn_stats_kernel(%arg0: i32, %arg1: memref<1x1x64xf32, #tpu.memory_space<vmem>>, %arg2: memref<64x16xf32, #tpu.memory_space<vmem>>, %arg3: memref<16x64xf32, #tpu.memory_space<vmem>>, %arg4: memref<1x64xf32, #tpu.memory_space<vmem>>, %arg5: memref<1x64xf32, #tpu.memory_space<vmem>>, %arg6: memref<1x1x64xf32, #tpu.memory_space<vmem>>, %arg7: memref<1x1x64xf32, #tpu.memory_space<vmem>>) attributes {dimension_semantics = [#tpu.dimension_semantics<parallel>], iteration_bounds = array<i64: 2>, scalar_prefetch = 0 : i64, scratch_operands = 0 : i64, tpu.core_type = #tpu.core_type<tc>, window_params = [{transform_indices = @transform_0, window_bounds = array<i64: 1, 1, 64>}, {pipeline_mode = #tpu.pipeline_mode<synchronous>, transform_indices = @transform_1, window_bounds = array<i64: 64, 16>}, {pipeline_mode = #tpu.pipeline_mode<synchronous>, transform_indices = @transform_2, window_bounds = array<i64: 16, 64>}, {pipeline_mode = #tpu.pipeline_mode<synchronous>, transform_indices = @transform_3, window_bounds = array<i64: 1, 64>}, {pipeline_mode = #tpu.pipeline_mode<synchronous>, transform_indices = @transform_4, window_bounds = array<i64: 1, 64>}, {transform_indices = @transform_5, window_bounds = array<i64: 1, 1, 64>}, {transform_indices = @transform_6, window_bounds = array<i64: 1, 1, 64>}]} {
    %c0 = arith.constant 0 : index
    %c0_0 = arith.constant 0 : index
    %c0_1 = arith.constant 0 : index
    %0 = vector.load %arg1[%c0, %c0_0, %c0_1] : memref<1x1x64xf32, #tpu.memory_space<vmem>>, vector<1x1x64xf32>
    %1 = vector.shape_cast %0 : vector<1x1x64xf32> to vector<1x64xf32>
    %cst = arith.constant dense<0.000000e+00> : vector<64xf32>
    %2 = vector.multi_reduction <add>, %1, %cst [0] : vector<1x64xf32> to vector<64xf32>
    %3 = vector.shape_cast %2 : vector<64xf32> to vector<1x64xf32>
    %4 = arith.mulf %1, %1 : vector<1x64xf32>
    %cst_2 = arith.constant dense<0.000000e+00> : vector<64xf32>
    %5 = vector.multi_reduction <add>, %4, %cst_2 [0] : vector<1x64xf32> to vector<64xf32>
    %6 = vector.shape_cast %5 : vector<64xf32> to vector<1x64xf32>
    %c0_3 = arith.constant 0 : index
    %c0_4 = arith.constant 0 : index
    %7 = vector.load %arg2[%c0_3, %c0_4] : memref<64x16xf32, #tpu.memory_space<vmem>>, vector<64x16xf32>
    %cst_5 = arith.constant dense<0.000000e+00> : vector<1x16xf32>
    %8 = tpu.matmul %3, %7, %cst_5 {dimension_numbers = #tpu.dot_dimension_numbers<[1], [0], [0], [1], [0, 0, 1, 1], [], []>} : vector<1x64xf32>, vector<64x16xf32>, vector<1x16xf32> -> vector<1x16xf32>
    %c0_6 = arith.constant 0 : index
    %c0_7 = arith.constant 0 : index
    %9 = vector.load %arg2[%c0_6, %c0_7] : memref<64x16xf32, #tpu.memory_space<vmem>>, vector<64x16xf32>
    %cst_8 = arith.constant dense<0.000000e+00> : vector<1x16xf32>
    %10 = tpu.matmul %6, %9, %cst_8 {dimension_numbers = #tpu.dot_dimension_numbers<[1], [0], [0], [1], [0, 0, 1, 1], [], []>} : vector<1x64xf32>, vector<64x16xf32>, vector<1x16xf32> -> vector<1x16xf32>
    %cst_9 = arith.constant 2.500000e-01 : f32
    %11 = vector.broadcast %cst_9 : f32 to vector<1x16xf32>
    %12 = arith.mulf %8, %11 : vector<1x16xf32>
    %cst_10 = arith.constant 2.500000e-01 : f32
    %13 = vector.broadcast %cst_10 : f32 to vector<1x16xf32>
    %14 = arith.mulf %10, %13 : vector<1x16xf32>
    %15 = arith.mulf %12, %12 : vector<1x16xf32>
    %16 = arith.subf %14, %15 : vector<1x16xf32>
    %cst_11 = arith.constant 0.000000e+00 : f32
    %17 = vector.broadcast %cst_11 : f32 to vector<1x16xf32>
    %18 = arith.maximumf %16, %17 : vector<1x16xf32>
    %c0_12 = arith.constant 0 : index
    %c0_13 = arith.constant 0 : index
    %19 = vector.load %arg3[%c0_12, %c0_13] : memref<16x64xf32, #tpu.memory_space<vmem>>, vector<16x64xf32>
    %cst_14 = arith.constant dense<0.000000e+00> : vector<1x64xf32>
    %20 = tpu.matmul %12, %19, %cst_14 {dimension_numbers = #tpu.dot_dimension_numbers<[1], [0], [0], [1], [0, 0, 1, 1], [], []>} : vector<1x16xf32>, vector<16x64xf32>, vector<1x64xf32> -> vector<1x64xf32>
    %c0_15 = arith.constant 0 : index
    %c0_16 = arith.constant 0 : index
    %21 = vector.load %arg3[%c0_15, %c0_16] : memref<16x64xf32, #tpu.memory_space<vmem>>, vector<16x64xf32>
    %cst_17 = arith.constant dense<0.000000e+00> : vector<1x64xf32>
    %22 = tpu.matmul %18, %21, %cst_17 {dimension_numbers = #tpu.dot_dimension_numbers<[1], [0], [0], [1], [0, 0, 1, 1], [], []>} : vector<1x16xf32>, vector<16x64xf32>, vector<1x64xf32> -> vector<1x64xf32>
    %cst_18 = arith.constant 9.99999974E-6 : f32
    %23 = vector.broadcast %cst_18 : f32 to vector<1x64xf32>
    %24 = arith.addf %22, %23 : vector<1x64xf32>
    %25 = math.rsqrt %24 : vector<1x64xf32>
    %c0_19 = arith.constant 0 : index
    %c0_20 = arith.constant 0 : index
    %26 = vector.load %arg4[%c0_19, %c0_20] : memref<1x64xf32, #tpu.memory_space<vmem>>, vector<1x64xf32>
    %27 = arith.mulf %26, %25 : vector<1x64xf32>
    %c0_21 = arith.constant 0 : index
    %c0_22 = arith.constant 0 : index
    %c0_23 = arith.constant 0 : index
    %28 = vector.load %arg6[%c0_21, %c0_22, %c0_23] : memref<1x1x64xf32, #tpu.memory_space<vmem>>, vector<1x1x64xf32>
    %29 = vector.shape_cast %28 : vector<1x1x64xf32> to vector<1x64xf32>
    %30 = vector.shape_cast %27 : vector<1x64xf32> to vector<1x1x64xf32>
    tpu.vector_store %arg6[%c0_21, %c0_22, %c0_23], %30 {strides = array<i32>} : memref<1x1x64xf32, #tpu.memory_space<vmem>>, vector<1x1x64xf32>,
    %c0_24 = arith.constant 0 : index
    %c0_25 = arith.constant 0 : index
    %31 = vector.load %arg5[%c0_24, %c0_25] : memref<1x64xf32, #tpu.memory_space<vmem>>, vector<1x64xf32>
    %32 = arith.mulf %20, %27 : vector<1x64xf32>
    %33 = arith.subf %31, %32 : vector<1x64xf32>
    %c0_26 = arith.constant 0 : index
    %c0_27 = arith.constant 0 : index
    %c0_28 = arith.constant 0 : index
    %34 = vector.load %arg7[%c0_26, %c0_27, %c0_28] : memref<1x1x64xf32, #tpu.memory_space<vmem>>, vector<1x1x64xf32>
    %35 = vector.shape_cast %34 : vector<1x1x64xf32> to vector<1x64xf32>
    %36 = vector.shape_cast %33 : vector<1x64xf32> to vector<1x1x64xf32>
    tpu.vector_store %arg7[%c0_26, %c0_27, %c0_28], %36 {strides = array<i32>} : memref<1x1x64xf32, #tpu.memory_space<vmem>>, vector<1x1x64xf32>,
    return
  }
  func.func @transform_0(%arg0: i32) -> (i32, i32, i32) {
    %c0_i32 = arith.constant 0 : i32
    %c0_i32_0 = arith.constant 0 : i32
    %c0_i32_1 = arith.constant 0 : i32
    return %arg0, %c0_i32, %c0_i32_0 : i32, i32, i32
  }
  func.func @transform_1(%arg0: i32) -> (i32, i32) {
    %c0_i32 = arith.constant 0 : i32
    %c0_i32_0 = arith.constant 0 : i32
    %c0_i32_1 = arith.constant 0 : i32
    return %c0_i32, %c0_i32_0 : i32, i32
  }
  func.func @transform_2(%arg0: i32) -> (i32, i32) {
    %c0_i32 = arith.constant 0 : i32
    %c0_i32_0 = arith.constant 0 : i32
    %c0_i32_1 = arith.constant 0 : i32
    return %c0_i32, %c0_i32_0 : i32, i32
  }
  func.func @transform_3(%arg0: i32) -> (i32, i32) {
    %c0_i32 = arith.constant 0 : i32
    %c0_i32_0 = arith.constant 0 : i32
    %c0_i32_1 = arith.constant 0 : i32
    return %c0_i32, %c0_i32_0 : i32, i32
  }
  func.func @transform_4(%arg0: i32) -> (i32, i32) {
    %c0_i32 = arith.constant 0 : i32
    %c0_i32_0 = arith.constant 0 : i32
    %c0_i32_1 = arith.constant 0 : i32
    return %c0_i32, %c0_i32_0 : i32, i32
  }
  func.func @transform_5(%arg0: i32) -> (i32, i32, i32) {
    %c0_i32 = arith.constant 0 : i32
    %c0_i32_0 = arith.constant 0 : i32
    %c0_i32_1 = arith.constant 0 : i32
    return %arg0, %c0_i32, %c0_i32_0 : i32, i32, i32
  }
  func.func @transform_6(%arg0: i32) -> (i32, i32, i32) {
    %c0_i32 = arith.constant 0 : i32
    %c0_i32_0 = arith.constant 0 : i32
    %c0_i32_1 = arith.constant 0 : i32
    return %arg0, %c0_i32, %c0_i32_0 : i32, i32, i32
  }
}

module attributes {stable_mosaic.version = 11 : i64} {
  func.func @_pose_head_kernel(%arg0: i32, %arg1: memref<1x1x64xf32, #tpu.memory_space<vmem>>, %arg2: memref<1x1x64xf32, #tpu.memory_space<vmem>>, %arg3: memref<1x1x64xf32, #tpu.memory_space<vmem>>, %arg4: memref<64x12xbf16, #tpu.memory_space<vmem>>, %arg5: memref<1x1x12xf32, #tpu.memory_space<vmem>>) attributes {dimension_semantics = [#tpu.dimension_semantics<parallel>], iteration_bounds = array<i64: 2>, scalar_prefetch = 0 : i64, scratch_operands = 0 : i64, tpu.core_type = #tpu.core_type<tc>, window_params = [{transform_indices = @transform_0, window_bounds = array<i64: 1, 1, 64>}, {transform_indices = @transform_1, window_bounds = array<i64: 1, 1, 64>}, {transform_indices = @transform_2, window_bounds = array<i64: 1, 1, 64>}, {pipeline_mode = #tpu.pipeline_mode<synchronous>, transform_indices = @transform_3, window_bounds = array<i64: 64, 12>}, {transform_indices = @transform_4, window_bounds = array<i64: 1, 1, 12>}]} {
    %c0 = arith.constant 0 : index
    %c0_0 = arith.constant 0 : index
    %c0_1 = arith.constant 0 : index
    %0 = vector.load %arg1[%c0, %c0_0, %c0_1] : memref<1x1x64xf32, #tpu.memory_space<vmem>>, vector<1x1x64xf32>
    %1 = vector.shape_cast %0 : vector<1x1x64xf32> to vector<1x64xf32>
    %c0_2 = arith.constant 0 : index
    %c0_3 = arith.constant 0 : index
    %c0_4 = arith.constant 0 : index
    %2 = vector.load %arg2[%c0_2, %c0_3, %c0_4] : memref<1x1x64xf32, #tpu.memory_space<vmem>>, vector<1x1x64xf32>
    %3 = vector.shape_cast %2 : vector<1x1x64xf32> to vector<1x64xf32>
    %4 = arith.mulf %1, %3 : vector<1x64xf32>
    %c0_5 = arith.constant 0 : index
    %c0_6 = arith.constant 0 : index
    %c0_7 = arith.constant 0 : index
    %5 = vector.load %arg3[%c0_5, %c0_6, %c0_7] : memref<1x1x64xf32, #tpu.memory_space<vmem>>, vector<1x1x64xf32>
    %6 = vector.shape_cast %5 : vector<1x1x64xf32> to vector<1x64xf32>
    %7 = arith.addf %4, %6 : vector<1x64xf32>
    %cst = arith.constant 0.000000e+00 : f32
    %8 = vector.broadcast %cst : f32 to vector<1x64xf32>
    %9 = arith.maximumf %7, %8 : vector<1x64xf32>
    %10 = arith.truncf %9 : vector<1x64xf32> to vector<1x64xbf16>
    %c0_8 = arith.constant 0 : index
    %c0_9 = arith.constant 0 : index
    %11 = vector.load %arg4[%c0_8, %c0_9] : memref<64x12xbf16, #tpu.memory_space<vmem>>, vector<64x12xbf16>
    %cst_10 = arith.constant dense<0.000000e+00> : vector<1x12xf32>
    %12 = tpu.matmul %10, %11, %cst_10 {dimension_numbers = #tpu.dot_dimension_numbers<[1], [0], [0], [1], [0, 0, 1, 1], [], []>} : vector<1x64xbf16>, vector<64x12xbf16>, vector<1x12xf32> -> vector<1x12xf32>
    %cst_11 = arith.constant dense<0.000000e+00> : vector<12xf32>
    %13 = vector.multi_reduction <add>, %12, %cst_11 [0] : vector<1x12xf32> to vector<12xf32>
    %14 = vector.shape_cast %13 : vector<12xf32> to vector<1x12xf32>
    %cst_12 = arith.constant 0.00999999977 : f32
    %15 = vector.broadcast %cst_12 : f32 to vector<1x12xf32>
    %16 = arith.mulf %14, %15 : vector<1x12xf32>
    %c0_13 = arith.constant 0 : index
    %c0_14 = arith.constant 0 : index
    %c0_15 = arith.constant 0 : index
    %17 = vector.load %arg5[%c0_13, %c0_14, %c0_15] : memref<1x1x12xf32, #tpu.memory_space<vmem>>, vector<1x1x12xf32>
    %18 = vector.shape_cast %17 : vector<1x1x12xf32> to vector<1x12xf32>
    %19 = vector.shape_cast %16 : vector<1x12xf32> to vector<1x1x12xf32>
    tpu.vector_store %arg5[%c0_13, %c0_14, %c0_15], %19 {strides = array<i32>} : memref<1x1x12xf32, #tpu.memory_space<vmem>>, vector<1x1x12xf32>,
    return
  }
  func.func @transform_0(%arg0: i32) -> (i32, i32, i32) {
    %c0_i32 = arith.constant 0 : i32
    %c0_i32_0 = arith.constant 0 : i32
    %c0_i32_1 = arith.constant 0 : i32
    return %arg0, %c0_i32, %c0_i32_0 : i32, i32, i32
  }
  func.func @transform_1(%arg0: i32) -> (i32, i32, i32) {
    %c0_i32 = arith.constant 0 : i32
    %c0_i32_0 = arith.constant 0 : i32
    %c0_i32_1 = arith.constant 0 : i32
    return %arg0, %c0_i32, %c0_i32_0 : i32, i32, i32
  }
  func.func @transform_2(%arg0: i32) -> (i32, i32, i32) {
    %c0_i32 = arith.constant 0 : i32
    %c0_i32_0 = arith.constant 0 : i32
    %c0_i32_1 = arith.constant 0 : i32
    return %arg0, %c0_i32, %c0_i32_0 : i32, i32, i32
  }
  func.func @transform_3(%arg0: i32) -> (i32, i32) {
    %c0_i32 = arith.constant 0 : i32
    %c0_i32_0 = arith.constant 0 : i32
    %c0_i32_1 = arith.constant 0 : i32
    return %c0_i32, %c0_i32_0 : i32, i32
  }
  func.func @transform_4(%arg0: i32) -> (i32, i32, i32) {
    %c0_i32 = arith.constant 0 : i32
    %c0_i32_0 = arith.constant 0 : i32
    %c0_i32_1 = arith.constant 0 : i32
    return %arg0, %c0_i32, %c0_i32_0 : i32, i32, i32
  }
}

</mosaic_0001>

<bundles_post_ra>
// kernel: ecn_pose_forward.19
= control target key start
LH: loop header
LB: loop body
LE: loop exit
PB: predicated region body
PF: predicated region fallthrough
CT: control target
= control target key end

     0   :  { %s809_s21 = smov 0   ;;  %s898_s0 = inlined_call_operand.vmem [shape: f32[2,64,16], index: 0, kind: input, shape index: {}]   ;;  %s899_s1 = inlined_call_operand.vmem [shape: f32[16,16], index: 1, kind: input, shape index: {}]   ;;  %s900_s2 = inlined_call_operand.vmem [shape: f32[16,16], index: 2, kind: input, shape index: {}]   ;;  %s901_s3 = inlined_call_operand.vmem [shape: f32[1,16], index: 3, kind: input, shape index: {}]   ;;  %s902_s4 = inlined_call_operand.vmem [shape: f32[1,16], index: 4, kind: input, shape index: {}]   ;;  %s903_s5 = inlined_call_operand.vmem [shape: f32[2,1,16], index: 5, kind: output, shape index: {0}]   ;;  %s904_s6 = inlined_call_operand.vmem [shape: f32[2,1,16], index: 6, kind: output, shape index: {1}]  }
   0x1 LB: > { %s698_s22 = sadd.s32 4294967295, %s770_s21   ;;  %p702_p0 = scmp.ge.s32.totalorder %s770_s21, 1  ;;  %s770_s21 = sphi %s809_s21, %s17_s21  }
   0x2   : > { %p215_p1 = scmp.lt.s32.totalorder %s770_s21, 3 }
   0x4   : > { %p216_p2 = pnand %p702_p0, %p215_p1 }
   0x5   : > { %p246_p3 = scmp.lt.s32.totalorder (!%p216_p2), %s698_s22, 1 }
   0x6   : > { %219 = sbr.rel (%p216_p2) target bundleno = 460 (0x1cc), region = 40 }
   0xb   : > { %v317_v0 = vld [vmem:[%s899_s1 + $0x8] sm:$0xff]  ;;  %v772_v1 = vmov 0.0   ;;  %v316_v2 = vld [vmem:[%s899_s1] sm:$0xff]  ;;  %vm773_vm0 = vmmov 0   ;;  %s906_s22 = smov (!%p246_p3, %s698_s22), 1  ;;  %vm265_vm1 = vcmask 130048  }
   0xc   : > { %724 = vmatprep.subr.mxu0 %v772_v1  ;;  %731 = vmatprep.subr.mxu1 %v772_v1  ;;  %s711_s27 = sshll.u32 %s906_s22, 6  ;;  %v470_v61 = vld [vmem:[%s900_s2 + $0x8] sm:$0xff]  ;;  %v469_v62 = vld [vmem:[%s900_s2] sm:$0xff]  ;;  %s253_s15 = scalar_lea.vmem %s903_s5, %s906_s22  ;;  %vm620_vm2 = vcmask 122880  }
   0xd   : > { %725 = vmatpush3.msra.mxu0 %v317_v0  ;;  %728 = vmatprep.mubr.msk.f32.mxu0 %vm773_vm0, %v772_v1  ;;  %s835_s30 = scalar_lea.vmem %s898_s0, %s711_s27  ;;  %s256_s20 = scalar_lea.vmem %s904_s6, %s906_s22 }
   0xe   : > { %726 = vmatprep.subr.mxu0 %v772_v1  ;;  %732 = vmatpush3.msra.mxu1 %v317_v0  ;;  %v257_v3 = vld [vmem:[%s835_s30] sm:$0xff]  ;;  %v258_v4 = vld [vmem:[%s835_s30 + $0x8] sm:$0xff]  ;;  %v259_v5 = vld [vmem:[%s835_s30 + $0x10] sm:$0xff] }
   0xf   : > { %727 = vmatpush3.msra.mxu0 %v316_v2  ;;  %733 = vmatprep.subr.mxu1 %v772_v1  ;;  %v260_v6 = vld [vmem:[%s835_s30 + $0x18] sm:$0xff]  ;;  %v266_v7 = vsel %vm265_vm1, %v257_v3, 0.0  ;;  %v267_v8 = vsel %vm265_vm1, %v258_v4, 0.0  ;;  %v269_v9 = vsel %vm265_vm1, %v259_v5, 0.0  ;;  %v287_v10 = vmul.f32 %v257_v3, %v257_v3  ;;  %v261_v11 = vld [vmem:[%s835_s30 + $0x20] sm:$0xff]  ;;  %v262_v16 = vld [vmem:[%s835_s30 + $0x28] sm:$0xff] }
  0x10   : > { %734 = vmatpush3.msra.mxu1 %v316_v2  ;;  %735 = vmatprep.mubr.msk.f32.mxu1 %vm773_vm0, %v772_v1  ;;  %v268_v12 = vadd.f32 %v267_v8, %v266_v7  ;;  %v271_v13 = vsel %vm265_vm1, %v260_v6, 0.0  ;;  %v288_v14 = vmul.f32 %v258_v4, %v258_v4  ;;  %v289_v15 = vmul.f32 %v259_v5, %v259_v5  ;;  %v263_v23 = vld [vmem:[%s835_s30 + $0x30] sm:$0xff]  ;;  %v264_v30 = vld [vmem:[%s835_s30 + $0x38] sm:$0xff] }
  0x11   : > { %738 = vmatprep.subr.mxu0 %v772_v1  ;;  %745 = vmatprep.subr.mxu1 %v772_v1  ;;  %v290_v18 = vmul.f32 %v260_v6, %v260_v6  ;;  %v273_v19 = vsel %vm265_vm1, %v261_v11, 0.0  ;;  %v291_v20 = vmul.f32 %v261_v11, %v261_v11  ;;  %v295_v21 = vsel %vm265_vm1, %v287_v10, 0.0 }
  0x12   : > { %v270_v17 = vadd.f32 %v269_v9, %v268_v12  ;;  %v296_v22 = vsel %vm265_vm1, %v288_v14, 0.0  ;;  %v298_v26 = vsel %vm265_vm1, %v289_v15, 0.0  ;;  %v275_v27 = vsel %vm265_vm1, %v262_v16, 0.0 }
  0x13   : > { %v297_v25 = vadd.f32 %v296_v22, %v295_v21  ;;  %v292_v28 = vmul.f32 %v262_v16, %v262_v16  ;;  %v300_v29 = vsel %vm265_vm1, %v290_v18, 0.0  ;;  %v277_v33 = vsel %vm265_vm1, %v263_v23, 0.0  ;;  %v622_v16 = vld [vmem:[%s902_s4] sm:$0x1] }
  0x14   : > { %v272_v24 = vadd.f32 %v271_v13, %v270_v17  ;;  %v293_v34 = vmul.f32 %v263_v23, %v263_v23  ;;  %v302_v35 = vsel %vm265_vm1, %v291_v20, 0.0  ;;  %v279_v38 = vsel %vm265_vm1, %v264_v30, 0.0  ;;  %v618_v13 = vld [vmem:[%s901_s3] sm:$0x1] }
  0x15   : > { %v299_v32 = vadd.f32 %v298_v26, %v297_v25  ;;  %v294_v39 = vmul.f32 %v264_v30, %v264_v30  ;;  %v304_v40 = vsel %vm265_vm1, %v292_v28, 0.0 }
  0x16   : > { %v274_v31 = vadd.f32 %v273_v19, %v272_v24  ;;  %v306_v43 = vsel %vm265_vm1, %v293_v34, 0.0 }
  0x17   : > { %v301_v37 = vadd.f32 %v300_v29, %v299_v32  ;;  %v308_v46 = vsel %vm265_vm1, %v294_v39, 0.0 }
  0x18   : > { %v276_v36 = vadd.f32 %v275_v27, %v274_v31 }
  0x19   : > { %v303_v42 = vadd.f32 %v302_v35, %v301_v37 }
  0x1a   : > { %v278_v41 = vadd.f32 %v277_v33, %v276_v36 }
  0x1b   : > { %v305_v45 = vadd.f32 %v304_v40, %v303_v42 }
  0x1c   : > { %v280_v44 = vadd.f32 %v279_v38, %v278_v41 }
  0x1d   : > { %v307_v48 = vadd.f32 %v306_v43, %v305_v45 }
  0x1e   : > { %v281_v47 = vrot.slane %v280_v44, 4 }
  0x1f   : > { %v309_v50 = vadd.f32 %v308_v46, %v307_v48 }
  0x20   : > { %v282_v49 = vadd.f32 %v281_v47, %v280_v44 }
  0x21   : > { %v310_v52 = vrot.slane %v309_v50, 4 }
  0x22   : > { %v283_v51 = vrot.slane %v282_v49, 2 }
  0x23   : > { %v311_v54 = vadd.f32 %v310_v52, %v309_v50 }
  0x24   : > { %v284_v53 = vadd.f32 %v283_v51, %v282_v49 }
  0x25   : > { %v312_v56 = vrot.slane %v311_v54, 2 }
  0x26   : > { %v285_v55 = vrot.slane %v284_v53, 1 }
  0x27   : > { %v313_v58 = vadd.f32 %v312_v56, %v311_v54 }
  0x28   : > { %v286_v57 = vadd.f32 %v285_v55, %v284_v53 }
  0x29   : > { %v314_v59 = vrot.slane %v313_v58, 1 }
  0x2a   : > { %729 = vmatmul.mubr.msk.f32.vlgmr.msra.gmra.mxu0 %vm265_vm1, %v286_v57 }
  0x2b   : > { %742 = vmatprep.mubr.msk.f32.mxu0 %vm773_vm0, %v772_v1  ;;  %v315_v60 = vadd.f32 %v314_v59, %v313_v58  ;;  %739 = vmatpush3.msra.mxu0 %v470_v61 }
  0x2c   : > { %740 = vmatprep.subr.mxu0 %v772_v1 }
  0x2d   : > { %736 = vmatmul.mubr.msk.f32.vlgmr.msra.gmra.mxu1 %vm265_vm1, %v315_v60  ;;  %741 = vmatpush3.msra.mxu0 %v469_v62 }
  0x2e   : > { %749 = vmatprep.mubr.msk.f32.mxu1 %vm773_vm0, %v772_v1  ;;  %746 = vmatpush3.msra.mxu1 %v470_v61 }
  0x2f   : > { %747 = vmatprep.subr.mxu1 %v772_v1 }
  0x30   : > { %748 = vmatpush3.msra.mxu1 %v469_v62 }
  0xea   : > { %v387_v63 = vpop.f32.mrf.mxu0 }
  0xeb   : > { %v464_v0 = vmul.f32 0.015625, %v387_v63 }
  0xec   : > { %v730_v2 = vpop.f32.mrf.mxu0 }
  0xed   : > { %v466_v3 = vmul.f32 %v464_v0, %v464_v0  ;;  %743 = vmatmul.mubr.msk.f32.vlgmr.msra.gmra.mxu0 %vm265_vm1, %v464_v0  ;;  %v460_v4 = vpop.f32.mrf.mxu1 }
  0xee   : > { %v465_v5 = vmul.f32 0.015625, %v460_v4 }
  0xef   : > { %v737_v6 = vpop.f32.mrf.mxu1 }
  0xf0   : > { %v467_v7 = vsub.f32 %v465_v5, %v466_v3 }
  0xf2   : > { %v468_v8 = vmax.f32 %v467_v7, 0.0 }
  0xf4   : > { %750 = vmatmul.mubr.msk.f32.vlgmr.msra.gmra.mxu1 %vm265_vm1, %v468_v8 }
 0x1ad   : > { %v540_v9 = vpop.f32.mrf.mxu0 }
 0x1af   : > { %v744_v10 = vpop.f32.mrf.mxu0 }
 0x1b4   : > { %v613_v1 = vpop.f32.mrf.mxu1 }
 0x1b5   : > { %v614_v11 = vadd.f32 1e-05, %v613_v1 }
 0x1b6   : > { %v751_v12 = vpop.f32.mrf.mxu1 }
 0x1b7   : > { %762 = vrsqrt.f32 %v614_v11 }
 0x1c4   : > { %v763_v14 = vpop.eup %762 }
 0x1c5   : > { %v619_v15 = vmul.f32 %v763_v14, %v618_v13 }
 0x1c7   : > { %621 = vst.msk [vmem:[%s253_s15] sm:$0x1] %vm620_vm2, %v619_v15  ;;  %v623_v17 = vmul.f32 %v619_v15, %v540_v9 }
 0x1c9   : > { %v624_v18 = vsub.f32 %v622_v16, %v623_v17 }
 0x1cb   : > { %625 = vst.msk [vmem:[%s256_s20] sm:$0x1] %vm620_vm2, %v624_v18 }
 0x1cc PF: > { %s17_s21 = sadd.s32 1, %s770_s21  }
 0x1cd   : > { %p14_p4 = scmp.ge.s32.totalorder %s17_s21, 4  }
 0x1cf   :  { %16 = sbr.rel (!%p14_p4) target bundleno = 1 (0x1), region = 82 }

// kernel: ecn_pose_forward.18
= control target key start
LH: loop header
LB: loop body
LE: loop exit
PB: predicated region body
PF: predicated region fallthrough
CT: control target
= control target key end

     0   :  { %s551_s1 = inlined_call_operand.vmem [shape: bf16[128,128], index: 1, kind: input, shape index: {}]   ;;  %s552_s0 = inlined_call_operand.vmem [shape: bf16[128,128], index: 0, kind: input, shape index: {}]   ;;  %s553_s2 = inlined_call_operand.vmem [shape: f32[128,128], index: 2, kind: output, shape index: {}]  }
   0x1   :  { %v424_v0 = vld [vmem:[%s551_s1 + $0x38] sm:$0xff]   ;;  %v425_v1 = vld [vmem:[%s551_s1 + $0x30] sm:$0xff]   ;;  %v426_v2 = vld [vmem:[%s551_s1 + $0x28] sm:$0xff]  }
   0x2   :  { %376 = vmatprep.subr.bf16.mxu0 %v424_v0  ;;  %408 = vmatprep.subr.bf16.mxu1 %v424_v0  ;;  %v427_v3 = vld [vmem:[%s551_s1 + $0x20] sm:$0xff]   ;;  %v428_v6 = vld [vmem:[%s551_s1 + $0x18] sm:$0xff]   ;;  %v429_v7 = vld [vmem:[%s551_s1 + $0x10] sm:$0xff]  }
   0x3   :  { %377 = vmatpush3.bf16.msra.mxu0 %v424_v0  ;;  %416 = vmatpush3.bf16.msra.mxu1 %v424_v0  ;;  %v432_v4 = vld [vmem:[%s552_s0] sm:$0xff]   ;;  %v430_v8 = vld [vmem:[%s551_s1 + $0x8] sm:$0xff]   ;;  %v436_v12 = vld [vmem:[%s552_s0 + $0x10] sm:$0xff]  }
   0x4   :  { %378 = vmatprep.subr.bf16.mxu0 %v425_v1  ;;  %409 = vmatprep.subr.bf16.mxu1 %v425_v1  ;;  %v433_v5 = vld [vmem:[%s552_s0 + $0x20] sm:$0xff]   ;;  %v434_v10 = vld [vmem:[%s552_s0 + $0x8] sm:$0xff]   ;;  %v437_v13 = vld [vmem:[%s552_s0 + $0x30] sm:$0xff]  }
   0x5   :  { %392 = vmatprep.mubr.bf16.mxu0 %v432_v4  ;;  %400 = vmatprep.mubr.bf16.mxu1 %v433_v5  ;;  %v431_v9 = vld [vmem:[%s551_s1] sm:$0xff]   ;;  %v435_v11 = vld [vmem:[%s552_s0 + $0x28] sm:$0xff]   ;;  %v438_v14 = vld [vmem:[%s552_s0 + $0x18] sm:$0xff]  }
   0x6   :  { %v439_v15 = vld [vmem:[%s552_s0 + $0x38] sm:$0xff]  }
   0x7   :  { %379 = vmatpush3.bf16.msra.mxu0 %v425_v1  ;;  %417 = vmatpush3.bf16.msra.mxu1 %v425_v1 }
   0x8   :  { %380 = vmatprep.subr.bf16.mxu0 %v426_v2  ;;  %410 = vmatprep.subr.bf16.mxu1 %v426_v2 }
   0xb   :  { %381 = vmatpush3.bf16.msra.mxu0 %v426_v2  ;;  %418 = vmatpush3.bf16.msra.mxu1 %v426_v2 }
   0xc   :  { %382 = vmatprep.subr.bf16.mxu0 %v427_v3  ;;  %411 = vmatprep.subr.bf16.mxu1 %v427_v3 }
   0xf   :  { %383 = vmatpush3.bf16.msra.mxu0 %v427_v3  ;;  %419 = vmatpush3.bf16.msra.mxu1 %v427_v3 }
  0x10   :  { %384 = vmatprep.subr.bf16.mxu0 %v428_v6  ;;  %412 = vmatprep.subr.bf16.mxu1 %v428_v6 }
  0x13   :  { %385 = vmatpush3.bf16.msra.mxu0 %v428_v6  ;;  %420 = vmatpush3.bf16.msra.mxu1 %v428_v6 }
  0x14   :  { %386 = vmatprep.subr.bf16.mxu0 %v429_v7  ;;  %413 = vmatprep.subr.bf16.mxu1 %v429_v7 }
  0x17   :  { %387 = vmatpush3.bf16.msra.mxu0 %v429_v7  ;;  %421 = vmatpush3.bf16.msra.mxu1 %v429_v7 }
  0x18   :  { %388 = vmatprep.subr.bf16.mxu0 %v430_v8  ;;  %414 = vmatprep.subr.bf16.mxu1 %v430_v8 }
  0x1b   :  { %389 = vmatpush3.bf16.msra.mxu0 %v430_v8  ;;  %422 = vmatpush3.bf16.msra.mxu1 %v430_v8 }
  0x1c   :  { %390 = vmatprep.subr.bf16.mxu0 %v431_v9  ;;  %415 = vmatprep.subr.bf16.mxu1 %v431_v9 }
  0x1f   :  { %391 = vmatpush3.bf16.msra.mxu0 %v431_v9  ;;  %423 = vmatpush3.bf16.msra.mxu1 %v431_v9 }
  0x22   :  { %393 = vmatmul.mubr.bf16.vlgmr.msra.gmra.mxu0 %v434_v10  ;;  %401 = vmatmul.mubr.bf16.vlgmr.msra.gmra.mxu1 %v435_v11 }
  0x23   :  { %396 = vmatprep.mubr.bf16.mxu0 %v436_v12  ;;  %404 = vmatprep.mubr.bf16.mxu1 %v437_v13 }
  0x2a   :  { %397 = vmatmul.mubr.bf16.gmra.mxu0 %v438_v14  ;;  %405 = vmatmul.mubr.bf16.gmra.mxu1 %v439_v15 }
  0xe2   :  { %v394_v16 = vpop.f32.mrf.mxu0  ;;  %v402_v17 = vpop.f32.mrf.mxu1 }
  0xe3   :  { %326 = vst [vmem:[%s553_s2 + $0x10] sm:$0xff] %v394_v16  ;;  %334 = vst [vmem:[%s553_s2 + $0x50] sm:$0xff] %v402_v17 }
  0xe4   :  { %v210_v18 = vpop.f32.mrf.mxu0  ;;  %v242_v19 = vpop.f32.mrf.mxu1 }
  0xe5   :  { %324 = vst [vmem:[%s553_s2] sm:$0xff] %v210_v18  ;;  %332 = vst [vmem:[%s553_s2 + $0x40] sm:$0xff] %v242_v19 }
  0xe6   :  { %v395_v20 = vpop.f32.mrf.mxu0  ;;  %v403_v21 = vpop.f32.mrf.mxu1 }
  0xe7   :  { %327 = vst [vmem:[%s553_s2 + $0x18] sm:$0xff] %v395_v20  ;;  %335 = vst [vmem:[%s553_s2 + $0x58] sm:$0xff] %v403_v21 }
  0xe8   :  { %v213_v22 = vpop.f32.mrf.mxu0  ;;  %v245_v23 = vpop.f32.mrf.mxu1 }
  0xe9   :  { %325 = vst [vmem:[%s553_s2 + $0x8] sm:$0xff] %v213_v22  ;;  %333 = vst [vmem:[%s553_s2 + $0x48] sm:$0xff] %v245_v23 }
  0xea   :  { %v398_v24 = vpop.f32.mrf.mxu0  ;;  %v406_v25 = vpop.f32.mrf.mxu1 }
  0xeb   :  { %330 = vst [vmem:[%s553_s2 + $0x30] sm:$0xff] %v398_v24  ;;  %338 = vst [vmem:[%s553_s2 + $0x70] sm:$0xff] %v406_v25 }
  0xec   :  { %v226_v26 = vpop.f32.mrf.mxu0  ;;  %v258_v27 = vpop.f32.mrf.mxu1 }
  0xed   :  { %328 = vst [vmem:[%s553_s2 + $0x20] sm:$0xff] %v226_v26  ;;  %336 = vst [vmem:[%s553_s2 + $0x60] sm:$0xff] %v258_v27 }
  0xee   :  { %v399_v28 = vpop.f32.mrf.mxu0  ;;  %v407_v29 = vpop.f32.mrf.mxu1 }
  0xef   :  { %331 = vst [vmem:[%s553_s2 + $0x38] sm:$0xff] %v399_v28  ;;  %339 = vst [vmem:[%s553_s2 + $0x78] sm:$0xff] %v407_v29 }
  0xf0   :  { %v229_v30 = vpop.f32.mrf.mxu0  ;;  %v261_v31 = vpop.f32.mrf.mxu1 }
  0xf1   :  { %329 = vst [vmem:[%s553_s2 + $0x28] sm:$0xff] %v229_v30  ;;  %337 = vst [vmem:[%s553_s2 + $0x68] sm:$0xff] %v261_v31 }

// kernel: ecn_pose_forward.21
= control target key start
LH: loop header
LB: loop body
LE: loop exit
PB: predicated region body
PF: predicated region fallthrough
CT: control target
= control target key end

     0   :  { %s824_s21 = smov 0   ;;  %s921_s0 = inlined_call_operand.vmem [shape: f32[2,64,32], index: 0, kind: input, shape index: {}]   ;;  %s922_s1 = inlined_call_operand.vmem [shape: f32[32,16], index: 1, kind: input, shape index: {}]   ;;  %s923_s2 = inlined_call_operand.vmem [shape: f32[16,32], index: 2, kind: input, shape index: {}]   ;;  %s924_s3 = inlined_call_operand.vmem [shape: f32[1,32], index: 3, kind: input, shape index: {}]   ;;  %s925_s4 = inlined_call_operand.vmem [shape: f32[1,32], index: 4, kind: input, shape index: {}]   ;;  %s926_s5 = inlined_call_operand.vmem [shape: f32[2,1,32], index: 5, kind: output, shape index: {0}]   ;;  %s927_s6 = inlined_call_operand.vmem [shape: f32[2,1,32], index: 6, kind: output, shape index: {1}]  }
   0x1 LB: > { %s701_s22 = sadd.s32 4294967295, %s785_s21   ;;  %p705_p0 = scmp.ge.s32.totalorder %s785_s21, 1  ;;  %s785_s21 = sphi %s824_s21, %s17_s21  }
   0x2   : > { %p215_p1 = scmp.lt.s32.totalorder %s785_s21, 3 }
   0x4   : > { %p216_p2 = pnand %p705_p0, %p215_p1 }
   0x5   : > { %p246_p3 = scmp.lt.s32.totalorder (!%p216_p2), %s701_s22, 1 }
   0x6   : > { %219 = sbr.rel (%p216_p2) target bundleno = 460 (0x1cc), region = 40 }
   0xb   : > { %v319_v0 = vld [vmem:[%s922_s1 + $0x18] sm:$0xff]  ;;  %v787_v1 = vmov 0.0   ;;  %v318_v2 = vld [vmem:[%s922_s1 + $0x10] sm:$0xff]  ;;  %s929_s22 = smov (!%p246_p3, %s701_s22), 1  ;;  %v317_v3 = vld [vmem:[%s922_s1 + $0x8] sm:$0xff]  ;;  %vm265_vm0 = vcmask 261120  }
   0xc   : > { %731 = vmatprep.subr.mxu0 %v787_v1  ;;  %742 = vmatprep.subr.mxu1 %v787_v1  ;;  %s714_s29 = sshll.u32 %s929_s22, 6  ;;  %v316_v4 = vld [vmem:[%s922_s1] sm:$0xff]  ;;  %vm788_vm1 = vmmov 0   ;;  %v472_v63 = vld [vmem:[%s923_s2 + $0x8] sm:$0xff]  ;;  %vm473_vm2 = vcmask 130048   ;;  %s253_s19 = scalar_lea.vmem %s926_s5, %s929_s22  ;;  %vm623_vm3 = vcmask 253952  }
   0xd   : > { %732 = vmatpush3.msra.mxu0 %v319_v0  ;;  %743 = vmatpush3.msra.mxu1 %v319_v0  ;;  %s856_s10 = scalar_lea.vmem %s921_s0, %s714_s29  ;;  %v471_v0 = vld [vmem:[%s923_s2] sm:$0xff]  ;;  %s256_s26 = scalar_lea.vmem %s927_s6, %s929_s22 }
   0xe   : > { %733 = vmatprep.subr.mxu0 %v787_v1  ;;  %744 = vmatprep.subr.mxu1 %v787_v1  ;;  %v257_v5 = vld [vmem:[%s856_s10] sm:$0xff]  ;;  %v258_v6 = vld [vmem:[%s856_s10 + $0x8] sm:$0xff]  ;;  %v259_v7 = vld [vmem:[%s856_s10 + $0x10] sm:$0xff] }
   0xf   : > { %734 = vmatpush3.msra.mxu0 %v318_v2  ;;  %745 = vmatpush3.msra.mxu1 %v318_v2  ;;  %v260_v8 = vld [vmem:[%s856_s10 + $0x18] sm:$0xff]  ;;  %v266_v9 = vsel %vm265_vm0, %v257_v5, 0.0  ;;  %v267_v10 = vsel %vm265_vm0, %v258_v6, 0.0  ;;  %v269_v11 = vsel %vm265_vm0, %v259_v7, 0.0  ;;  %v287_v12 = vmul.f32 %v257_v5, %v257_v5  ;;  %v261_v13 = vld [vmem:[%s856_s10 + $0x20] sm:$0xff]  ;;  %v262_v18 = vld [vmem:[%s856_s10 + $0x28] sm:$0xff] }
  0x10   : > { %735 = vmatprep.subr.mxu0 %v787_v1  ;;  %746 = vmatprep.subr.mxu1 %v787_v1  ;;  %v268_v14 = vadd.f32 %v267_v10, %v266_v9  ;;  %v271_v15 = vsel %vm265_vm0, %v260_v8, 0.0  ;;  %v288_v16 = vmul.f32 %v258_v6, %v258_v6  ;;  %v289_v17 = vmul.f32 %v259_v7, %v259_v7  ;;  %v263_v25 = vld [vmem:[%s856_s10 + $0x30] sm:$0xff]  ;;  %v264_v32 = vld [vmem:[%s856_s10 + $0x38] sm:$0xff] }
  0x11   : > { %736 = vmatpush3.msra.mxu0 %v317_v3  ;;  %739 = vmatprep.mubr.msk.f32.mxu0 %vm788_vm1, %v787_v1  ;;  %v290_v20 = vmul.f32 %v260_v8, %v260_v8  ;;  %v273_v21 = vsel %vm265_vm0, %v261_v13, 0.0  ;;  %v291_v22 = vmul.f32 %v261_v13, %v261_v13  ;;  %v295_v23 = vsel %vm265_vm0, %v287_v12, 0.0 }
  0x12   : > { %737 = vmatprep.subr.mxu0 %v787_v1  ;;  %747 = vmatpush3.msra.mxu1 %v317_v3  ;;  %v270_v19 = vadd.f32 %v269_v11, %v268_v14  ;;  %v296_v24 = vsel %vm265_vm0, %v288_v16, 0.0  ;;  %v298_v28 = vsel %vm265_vm0, %v289_v17, 0.0  ;;  %v275_v29 = vsel %vm265_vm0, %v262_v18, 0.0 }
  0x13   : > { %738 = vmatpush3.msra.mxu0 %v316_v4  ;;  %748 = vmatprep.subr.mxu1 %v787_v1  ;;  %v297_v27 = vadd.f32 %v296_v24, %v295_v23  ;;  %v292_v30 = vmul.f32 %v262_v18, %v262_v18  ;;  %v300_v31 = vsel %vm265_vm0, %v290_v20, 0.0  ;;  %v277_v35 = vsel %vm265_vm0, %v263_v25, 0.0  ;;  %v625_v18 = vld [vmem:[%s925_s4] sm:$0x1] }
  0x14   : > { %749 = vmatpush3.msra.mxu1 %v316_v4  ;;  %750 = vmatprep.mubr.msk.f32.mxu1 %vm788_vm1, %v787_v1  ;;  %v272_v26 = vadd.f32 %v271_v15, %v270_v19  ;;  %v293_v36 = vmul.f32 %v263_v25, %v263_v25  ;;  %v302_v37 = vsel %vm265_vm0, %v291_v22, 0.0  ;;  %v279_v40 = vsel %vm265_vm0, %v264_v32, 0.0  ;;  %v621_v15 = vld [vmem:[%s924_s3] sm:$0x1] }
  0x15   : > { %753 = vmatprep.subr.mxu0 %v787_v1  ;;  %760 = vmatprep.subr.mxu1 %v787_v1  ;;  %v299_v34 = vadd.f32 %v298_v28, %v297_v27  ;;  %v294_v41 = vmul.f32 %v264_v32, %v264_v32  ;;  %v304_v42 = vsel %vm265_vm0, %v292_v30, 0.0 }
  0x16   : > { %v274_v33 = vadd.f32 %v273_v21, %v272_v26  ;;  %v306_v45 = vsel %vm265_vm0, %v293_v36, 0.0 }
  0x17   : > { %v301_v39 = vadd.f32 %v300_v31, %v299_v34  ;;  %v308_v48 = vsel %vm265_vm0, %v294_v41, 0.0 }
  0x18   : > { %v276_v38 = vadd.f32 %v275_v29, %v274_v33 }
  0x19   : > { %v303_v44 = vadd.f32 %v302_v37, %v301_v39 }
  0x1a   : > { %v278_v43 = vadd.f32 %v277_v35, %v276_v38 }
  0x1b   : > { %v305_v47 = vadd.f32 %v304_v42, %v303_v44 }
  0x1c   : > { %v280_v46 = vadd.f32 %v279_v40, %v278_v43 }
  0x1d   : > { %v307_v50 = vadd.f32 %v306_v45, %v305_v47 }
  0x1e   : > { %v281_v49 = vrot.slane %v280_v46, 4 }
  0x1f   : > { %v309_v52 = vadd.f32 %v308_v48, %v307_v50 }
  0x20   : > { %v282_v51 = vadd.f32 %v281_v49, %v280_v46 }
  0x21   : > { %v310_v54 = vrot.slane %v309_v52, 4 }
  0x22   : > { %v283_v53 = vrot.slane %v282_v51, 2 }
  0x23   : > { %v311_v56 = vadd.f32 %v310_v54, %v309_v52 }
  0x24   : > { %v284_v55 = vadd.f32 %v283_v53, %v282_v51 }
  0x25   : > { %v312_v58 = vrot.slane %v311_v56, 2 }
  0x26   : > { %v285_v57 = vrot.slane %v284_v55, 1 }
  0x27   : > { %v313_v60 = vadd.f32 %v312_v58, %v311_v56 }
  0x28   : > { %v286_v59 = vadd.f32 %v285_v57, %v284_v55 }
  0x29   : > { %v314_v61 = vrot.slane %v313_v60, 1 }
  0x2a   : > { %740 = vmatmul.mubr.msk.f32.vlgmr.msra.gmra.mxu0 %vm265_vm0, %v286_v59 }
  0x2b   : > { %757 = vmatprep.mubr.msk.f32.mxu0 %vm788_vm1, %v787_v1  ;;  %v315_v62 = vadd.f32 %v314_v61, %v313_v60  ;;  %754 = vmatpush3.msra.mxu0 %v472_v63 }
  0x2c   : > { %755 = vmatprep.subr.mxu0 %v787_v1 }
  0x2d   : > { %751 = vmatmul.mubr.msk.f32.vlgmr.msra.gmra.mxu1 %vm265_vm0, %v315_v62  ;;  %756 = vmatpush3.msra.mxu0 %v471_v0 }
  0x2e   : > { %764 = vmatprep.mubr.msk.f32.mxu1 %vm788_vm1, %v787_v1  ;;  %761 = vmatpush3.msra.mxu1 %v472_v63 }
  0x2f   : > { %762 = vmatprep.subr.mxu1 %v787_v1 }
  0x30   : > { %763 = vmatpush3.msra.mxu1 %v471_v0 }
  0xea   : > { %v389_v2 = vpop.f32.mrf.mxu0 }
  0xeb   : > { %v466_v3 = vmul.f32 0.0078125, %v389_v2 }
  0xec   : > { %v741_v4 = vpop.f32.mrf.mxu0 }
  0xed   : > { %v468_v5 = vmul.f32 %v466_v3, %v466_v3  ;;  %758 = vmatmul.mubr.msk.f32.vlgmr.msra.gmra.mxu0 %vm473_vm2, %v466_v3  ;;  %v462_v6 = vpop.f32.mrf.mxu1 }
  0xee   : > { %v467_v7 = vmul.f32 0.0078125, %v462_v6 }
  0xef   : > { %v752_v8 = vpop.f32.mrf.mxu1 }
  0xf0   : > { %v469_v9 = vsub.f32 %v467_v7, %v468_v5 }
  0xf2   : > { %v470_v10 = vmax.f32 %v469_v9, 0.0 }
  0xf4   : > { %765 = vmatmul.mubr.msk.f32.vlgmr.msra.gmra.mxu1 %vm473_vm2, %v470_v10 }
 0x1ad   : > { %v543_v11 = vpop.f32.mrf.mxu0 }
 0x1af   : > { %v759_v12 = vpop.f32.mrf.mxu0 }
 0x1b4   : > { %v616_v13 = vpop.f32.mrf.mxu1 }
 0x1b5   : > { %v617_v1 = vadd.f32 1e-05, %v616_v13 }
 0x1b6   : > { %v766_v14 = vpop.f32.mrf.mxu1 }
 0x1b7   : > { %777 = vrsqrt.f32 %v617_v1 }
 0x1c4   : > { %v778_v16 = vpop.eup %777 }
 0x1c5   : > { %v622_v17 = vmul.f32 %v778_v16, %v621_v15 }
 0x1c7   : > { %624 = vst.msk [vmem:[%s253_s19] sm:$0x1] %vm623_vm3, %v622_v17  ;;  %v626_v19 = vmul.f32 %v622_v17, %v543_v11 }
 0x1c9   : > { %v627_v20 = vsub.f32 %v625_v18, %v626_v19 }
 0x1cb   : > { %628 = vst.msk [vmem:[%s256_s26] sm:$0x1] %vm623_vm3, %v627_v20 }
 0x1cc PF: > { %s17_s21 = sadd.s32 1, %s785_s21  }
 0x1cd   : > { %p14_p4 = scmp.ge.s32.totalorder %s17_s21, 4  }
 0x1cf   :  { %16 = sbr.rel (!%p14_p4) target bundleno = 1 (0x1), region = 82 }

// kernel: ecn_pose_forward.20
= control target key start
LH: loop header
LB: loop body
LE: loop exit
PB: predicated region body
PF: predicated region fallthrough
CT: control target
= control target key end

     0   :  { %s2579_s15 = smov 0   ;;  %s3228_s0 = inlined_call_operand.vmem [shape: f32[2,64,16], index: 0, kind: input, shape index: {}]   ;;  %s3229_s1 = inlined_call_operand.vmem [shape: f32[2,1,16], index: 1, kind: input, shape index: {}]   ;;  %s3230_s2 = inlined_call_operand.vmem [shape: f32[2,1,16], index: 2, kind: input, shape index: {}]   ;;  %s3231_s3 = inlined_call_operand.vmem [shape: bf16[9,16,32], index: 3, kind: input, shape index: {}]   ;;  %s3232_s4 = inlined_call_operand.vmem [shape: f32[2,64,32], index: 4, kind: output, shape index: {}]  }
   0x1 LB: > { %s2227_s16 = sadd.s32 4294967295, %s2548_s15   ;;  %p2231_p0 = scmp.ge.s32.totalorder %s2548_s15, 1  ;;  %s2548_s15 = sphi %s2579_s15, %s14_s15  }
   0x2   : > { %p178_p1 = scmp.lt.s32.totalorder %s2548_s15, 3 }
   0x4   : > { %p179_p2 = pnand %p2231_p0, %p178_p1 }
   0x6   : > { %182 = sbr.rel (%p179_p2) target bundleno = 357 (0x165), region = 36 }
   0xb   : > { %v2526_v0 = vld [vmem:[%s3231_s3 + $0x8] sm:$0xff]   ;;  %p210_p3 = scmp.lt.s32.totalorder %s2227_s16, 1  ;;  %v326_v1 = vlaneseq  ;;  %vm227_vm0 = vcmask 125952   ;;  %v2593_v2 = vld [vmem:[%s3231_s3] sm:$0xff]   ;;  %v2550_v3 = vmov 0   ;;  %v2616_v7 = vld [vmem:[%s3231_s3 + $0x10] sm:$0xff]  }
   0xc   : > { %2422 = vmatprep.subr.bf16.mxu0 %v2526_v0  ;;  %2512 = vmatprep.subr.bf16.mxu1 %v2526_v0  ;;  %228 = vst.msk [vmem:[#allocation2] sm:$0xf] %vm227_vm0, %v2550_v3  ;;  %229 = vst.msk [vmem:[#allocation2 + $0x4] sm:$0xf] %vm227_vm0, %v2550_v3  ;;  %v2551_v5 = vmov 839922192  }
   0xd   : > { %s3254_s16 = smov (!%p210_p3, %s2227_s16), 1  ;;  %230 = vst.msk [vmem:[#allocation2 + $0x8] sm:$0xf] %vm227_vm0, %v2550_v3  ;;  %231 = vst.msk [vmem:[#allocation2 + $0xc] sm:$0xf] %vm227_vm0, %v2550_v3  ;;  %v2603_v4 = vshrl.u32 %v326_v1, 7  ;;  %v2605_v6 = vunpack.c.l.s4 %v2551_v5  ;;  %2423 = vmatpush3.bf16.msra.mxu0 %v2526_v0  ;;  %2513 = vmatpush3.bf16.msra.mxu1 %v2526_v0 }
   0xe   : > { %232 = vst.msk [vmem:[#allocation2 + $0x10] sm:$0xf] %vm227_vm0, %v2550_v3  ;;  %233 = vst.msk [vmem:[#allocation2 + $0x14] sm:$0xf] %vm227_vm0, %v2550_v3  ;;  %s2367_s23 = sshll.u32 %s3254_s16, 6  ;;  %s217_s26 = scalar_lea.vmem %s3229_s1, %s3254_s16  ;;  %2432 = vmatprep.subr.bf16.mxu1 %v2593_v2  ;;  %2442 = vmatprep.subr.bf16.mxu0 %v2616_v7  ;;  %v2553_v31 = vmov 0.0  }
   0xf   : > { %234 = vst.msk [vmem:[#allocation2 + $0x18] sm:$0xf] %vm227_vm0, %v2550_v3  ;;  %235 = vst.msk [vmem:[#allocation2 + $0x1c] sm:$0xf] %vm227_vm0, %v2550_v3  ;;  %v328_v8 = vadd.s32 8, %v2603_v4  ;;  %v329_v9 = vadd.s32 16, %v2603_v4  ;;  %s2635_s29 = scalar_lea.vmem %s3228_s0, %s2367_s23  ;;  %s220_s6 = scalar_lea.vmem %s3230_s2, %s3254_s16  ;;  %v502_v21 = vunpack.c.0.s8 %v2605_v6 }
  0x10   : > { %236 = vst.msk [vmem:[#allocation2 + $0x20] sm:$0xf] %vm227_vm0, %v2550_v3  ;;  %237 = vst.msk [vmem:[#allocation2 + $0x24] sm:$0xf] %vm227_vm0, %v2550_v3  ;;  %v2626_v10 = vadd.s32 24, %v2603_v4  ;;  %v339_v11 = vand.u32 7, %v2603_v4  ;;  %s3206_s24 = scalar_lea.vmem %s3232_s4, %s2367_s23 }
  0x11   : > { %238 = vst.msk [vmem:[#allocation2 + $0x28] sm:$0xf] %vm227_vm0, %v2550_v3  ;;  %239 = vst.msk [vmem:[#allocation2 + $0x2c] sm:$0xf] %vm227_vm0, %v2550_v3  ;;  %v2641_v12 = vld [vmem:[%s217_s26] ss:$0 sm:$0xff]  ;;  %v2676_v52 = vsub.s32 %v502_v21, %v2603_v4 }
  0x12   : > { %v2552_v13 = vmov 1985246804   ;;  %v240_v15 = vld [vmem:[%s2635_s29] sm:$0xff]  ;;  %v241_v16 = vld [vmem:[%s2635_s29 + $0x8] sm:$0xff]  ;;  %v242_v17 = vld [vmem:[%s2635_s29 + $0x10] sm:$0xff]  ;;  %v346_v18 = vand.u32 7, %v328_v8 }
  0x13   : > { %v508_v14 = vunpack.c.l.s4 %v2552_v13  ;;  %v353_v19 = vand.u32 7, %v329_v9  ;;  %v360_v20 = vand.u32 7, %v2626_v10  ;;  %v243_v22 = vld [vmem:[%s2635_s29 + $0x18] sm:$0xff]  ;;  %v255_v23 = vmul.f32 %v2641_v12, %v240_v15  ;;  %v2653_v26 = vld [vmem:[%s220_s6] ss:$0 sm:$0xff] }
  0x14   : > { %v256_v24 = vmul.f32 %v2641_v12, %v241_v16  ;;  %v257_v25 = vmul.f32 %v2641_v12, %v242_v17  ;;  %vm431_vm1 = vcmp.ne.s32.totalorder %v339_v11, 0  ;;  %v258_v27 = vmul.f32 %v2641_v12, %v243_v22  ;;  %v244_v6 = vld [vmem:[%s2635_s29 + $0x20] sm:$0xff] }
  0x15   : > { %vm432_vm2 = vcmp.ne.s32.totalorder %v346_v18, 0  ;;  %vm433_vm3 = vcmp.ne.s32.totalorder %v353_v19, 0  ;;  %vm434_vm4 = vcmp.ne.s32.totalorder %v360_v20, 0  ;;  %v270_v28 = vadd.f32 %v2653_v26, %v255_v23  ;;  %v488_v8 = vld [vmem:[#allocation2 + $0x4] sm:$0xf]  ;;  %v245_v23 = vld [vmem:[%s2635_s29 + $0x28] sm:$0xff] }
  0x16   : > { %v271_v29 = vadd.f32 %v2653_v26, %v256_v24  ;;  %v272_v30 = vadd.f32 %v2653_v26, %v257_v25  ;;  %v2246_v32 = vsel %vm431_vm1, 1.0, %v2553_v31  ;;  %v273_v33 = vadd.f32 %v2653_v26, %v258_v27 }
  0x17   : > { %v2247_v34 = vsel %vm432_vm2, 1.0, %v2553_v31  ;;  %v2248_v35 = vsel %vm433_vm3, 1.0, %v2553_v31  ;;  %v2249_v36 = vsel %vm434_vm4, 1.0, %v2553_v31  ;;  %v278_v37 = vmax.f32 %v270_v28, 0.0 }
  0x18   : > { %v279_v38 = vmax.f32 %v271_v29, 0.0  ;;  %v280_v39 = vmax.f32 %v272_v30, 0.0  ;;  %v509_v40 = vunpack.c.0.s8 %v508_v14  ;;  %v281_v41 = vmax.f32 %v273_v33, 0.0  ;;  %v246_v29 = vld [vmem:[%s2635_s29 + $0x30] sm:$0xff] }
  0x19   : > { %v455_v42 = vpack.c.bf16 %v2247_v34, %v2246_v32  ;;  %vm459_vm5 = vcmp.ne.s32.totalorder %v339_v11, 7  ;;  %vm460_vm6 = vcmp.ne.s32.totalorder %v346_v18, 7  ;;  %v2369_v43 = vpack.c.bf16 %v278_v37, %v278_v37  ;;  %v487_v37 = vld [vmem:[#allocation2] sm:$0x8] }
  0x1a   : > { %v2370_v44 = vpack.c.bf16 %v279_v38, %v279_v38  ;;  %v2371_v45 = vpack.c.bf16 %v280_v39, %v280_v39  ;;  %v456_v46 = vpack.c.bf16 %v2249_v36, %v2248_v35  ;;  %vm556_vm7 = vsmask.f32 3328  ;;  %v247_v35 = vld [vmem:[%s2635_s29 + $0x38] sm:$0xff] }
  0x1b   : > { %v2372_v47 = vpack.c.bf16 %v281_v41, %v281_v41  ;;  %v2254_v48 = vsel %vm459_vm5, 1.0, %v2553_v31  ;;  %v2255_v49 = vsel %vm460_vm6, 1.0, %v2553_v31  ;;  %vm557_vm8 = vsmask.f32 7440  ;;  %318 = vst.msk [vmem:[#allocation2 + $0x8] sm:$0xf] %vm227_vm0, %v2369_v43 }
  0x1c   : > { %319 = vst.msk [vmem:[#allocation2 + $0xc] sm:$0xf] %vm227_vm0, %v2370_v44  ;;  %320 = vst.msk [vmem:[#allocation2 + $0x10] sm:$0xf] %vm227_vm0, %v2371_v45  ;;  %vm2671_vm9 = vcmp.ne.s32.totalorder %v353_v19, 7  ;;  %v483_v51 = vpack.c.bf16 %v2255_v49, %v2254_v48  ;;  %v2680_v53 = vsub.s32 %v509_v40, %v2603_v4  ;;  %v506_v54 = vrot.slane %v455_v42, %v2676_v52 }
  0x1d   : > { %321 = vst.msk [vmem:[#allocation2 + $0x14] sm:$0xf] %vm227_vm0, %v2372_v47  ;;  %v520_v55 = vrot.slane %v456_v46, %v2676_v52  ;;  %vm985_vm10 = vsmask.f32 256  ;;  %vm986_vm11 = vsmask.f32 4368  ;;  %v259_v10 = vmul.f32 %v2641_v12, %v244_v6  ;;  %vm2711_vm14 = vmor %vm556_vm7, %vm557_vm8 }
  0x1e   : > { %v2685_v56 = vrot.slane %v483_v51, %v2676_v52  ;;  %v513_v57 = vrot.slane %v455_v42, %v2680_v53  ;;  %v2689_v58 = vrot.slane %v456_v46, %v2680_v53  ;;  %v942_v59 = vrot.slane %v483_v51, %v2680_v53  ;;  %v1231_v44 = vld [vmem:[#allocation2 + $0x4] sm:$0x8]  ;;  %vm2755_vm15 = vmor %vm985_vm10, %vm986_vm11 }
  0x1f   : > { %v560_v60 = vshll.u32 %v506_v54, 16  ;;  %v563_v61 = vshrl.u32 %v506_v54, 16  ;;  %v579_v62 = vshll.u32 %v520_v55, 16  ;;  %v583_v63 = vshrl.u32 %v520_v55, 16 }
  0x20   : > { %v569_v0 = vshll.u32 %v513_v57, 16  ;;  %v573_v1 = vshrl.u32 %v513_v57, 16  ;;  %v589_v3 = vshll.u32 %v2689_v58, 16  ;;  %v989_v5 = vshrl.u32 %v2685_v56, 16 }
  0x21   : > { %v2695_v9 = vrot.slane %v560_v60, 5  ;;  %v565_v11 = vrot.slane %v563_v61, 4  ;;  %v581_v13 = vrot.slane %v579_v62, 5  ;;  %v585_v14 = vrot.slane %v583_v63, 4 }
  0x22   : > { %vm2699_vm12 = vcmp.ne.s32.totalorder %v360_v20, 7  ;;  %v489_v16 = vld [vmem:[#allocation2 + $0x8] sm:$0xf]  ;;  %v571_v17 = vrot.slane %v569_v0, 5  ;;  %v575_v18 = vrot.slane %v573_v1, 4  ;;  %vm687_vm13 = vcmask 130048  }
  0x23   : > { %v2256_v19 = vsel %vm2671_vm9, 1.0, %v2553_v31  ;;  %v566_v21 = vor.u32 %v565_v11, %v2695_v9  ;;  %v586_v22 = vor.u32 %v585_v14, %v581_v13  ;;  %v2264_v25 = vcombine.low %v488_v8, %v489_v16  ;;  %v2728_v41 = vld [vmem:[#allocation2 + $0xc] sm:$0xf]  ;;  %v2751_v55 = vld [vmem:[#allocation2 + $0x8] sm:$0xf] }
  0x24   : > { %v576_v24 = vor.u32 %v575_v18, %v571_v17  ;;  %v2715_v27 = vrot.slane %v989_v5, 7  ;;  %v997_v28 = vshrl.u32 %v942_v59, 16  ;;  %v2718_v33 = vrot.slane %v589_v3, 5  ;;  %v2763_v61 = vld [vmem:[#allocation2 + $0xc] sm:$0xf] }
  0x25   : > { %v567_v30 = vrot.slane %v566_v21, 4  ;;  %v587_v32 = vrot.slane %v586_v22, 4  ;;  %v1000_v34 = vshll.u32 %v942_v59, 16  ;;  %v2257_v36 = vsel %vm2699_vm12, 1.0, %v2553_v31  ;;  %2424 = vmatprep.mubr.msk.bf16.mxu0 %vm687_vm13, %v2264_v25  ;;  %v2765_v62 = vld [vmem:[#allocation2 + $0x10] sm:$0xf] }
  0x26   : > { %v577_v38 = vrot.slane %v576_v24, 4  ;;  %v2725_v39 = vrot.slane %v997_v28, 7  ;;  %v260_v40 = vmul.f32 %v2641_v12, %v245_v23  ;;  %v261_v45 = vmul.f32 %v2641_v12, %v246_v29  ;;  %v2768_v0 = vld [vmem:[#allocation2 + $0x8] sm:$0x8] }
  0x27   : > { %v2732_v42 = vsel %vm2711_vm14, %v567_v30, %v571_v17  ;;  %v2737_v43 = vsel %vm2711_vm14, %v587_v32, %v2718_v33  ;;  %v995_v47 = vrot.slane %v2715_v27, 4  ;;  %v262_v49 = vmul.f32 %v2641_v12, %v247_v35 }
  0x28   : > { %v2742_v46 = vsel %vm2711_vm14, %v577_v38, %v581_v13  ;;  %v1002_v48 = vor.u32 %v1000_v34, %v2725_v39  ;;  %v2747_v50 = vpack.c.bf16 %v2257_v36, %v2256_v19  ;;  %v647_v51 = vmul.bf16 %v2695_v9, %v487_v37 }
  0x29   : > { %v648_v54 = vmul.bf16 %v2732_v42, %v488_v8  ;;  %v274_v59 = vadd.f32 %v2653_v26, %v259_v10  ;;  %v649_v60 = vmul.bf16 %v2742_v46, %v489_v16  ;;  %v650_v12 = vmul.bf16 %v2737_v43, %v2728_v41  ;;  %v2777_v8 = vld [vmem:[#allocation2 + $0xc] sm:$0xf] }
  0x2a   : > { %v1233_v63 = vmul.bf16 %v1231_v44, %v2695_v9  ;;  %v275_v1 = vadd.f32 %v2653_v26, %v260_v40  ;;  %v1234_v3 = vmul.bf16 %v2751_v55, %v2732_v42  ;;  %v1235_v5 = vmul.bf16 %v2763_v61, %v2742_v46 }
  0x2b   : > { %v1236_v6 = vmul.bf16 %v2765_v62, %v2737_v43  ;;  %v276_v11 = vadd.f32 %v2653_v26, %v261_v45  ;;  %v2782_v13 = vsel %vm2755_vm15, %v995_v47, %v1002_v48  ;;  %v277_v14 = vadd.f32 %v2653_v26, %v262_v49  ;;  %v2812_v49 = vld [vmem:[#allocation2 + $0x10] sm:$0xf] }
  0x2c   : > { %v2785_v15 = vcombine.low %v647_v51, %v648_v54  ;;  %v2789_v16 = vrot.slane %v2747_v50, %v2680_v53  ;;  %v1690_v17 = vmul.bf16 %v2768_v0, %v2695_v9  ;;  %v331_v18 = vadd.s32 32, %v2603_v4 }
  0x2d   : > { %v2794_v19 = vcombine.low %v649_v60, %v650_v12  ;;  %v1691_v21 = vmul.bf16 %v2777_v8, %v2732_v42  ;;  %v282_v22 = vmax.f32 %v274_v59, 0.0  ;;  %v283_v23 = vmax.f32 %v275_v1, 0.0 }
  0x2e   : > { %v2800_v10 = vcombine.low %v1233_v63, %v1234_v3  ;;  %v2802_v24 = vcombine.low %v1235_v5, %v1236_v6  ;;  %v284_v25 = vmax.f32 %v276_v11, 0.0  ;;  %v285_v28 = vmax.f32 %v277_v14, 0.0 }
  0x2f   : > { %v2373_v29 = vpack.c.bf16 %v282_v22, %v282_v22  ;;  %v2374_v30 = vpack.c.bf16 %v283_v23, %v283_v23  ;;  %v332_v32 = vadd.s32 40, %v2603_v4  ;;  %v333_v35 = vadd.s32 48, %v2603_v4 }
  0x30   : > { %v2375_v34 = vpack.c.bf16 %v284_v25, %v284_v25  ;;  %v334_v36 = vadd.s32 56, %v2603_v4  ;;  %v367_v37 = vand.u32 7, %v331_v18  ;;  %v790_v38 = vshrl.u32 %v2785_v15, 16 }
  0x31   : > { %v793_v40 = vshll.u32 %v2785_v15, 16  ;;  %v2376_v44 = vpack.c.bf16 %v285_v28, %v285_v28  ;;  %322 = vst.msk [vmem:[#allocation2 + $0x18] sm:$0xf] %vm227_vm0, %v2373_v29  ;;  %323 = vst.msk [vmem:[#allocation2 + $0x1c] sm:$0xf] %vm227_vm0, %v2374_v30  ;;  %v374_v45 = vand.u32 7, %v332_v32  ;;  %v2907_v30 = vcombine.low %v1690_v17, %v1691_v21 }
  0x32   : > { %324 = vst.msk [vmem:[#allocation2 + $0x20] sm:$0xf] %vm227_vm0, %v2375_v34  ;;  %v381_v47 = vand.u32 7, %v333_v35  ;;  %v388_v48 = vand.u32 7, %v334_v36  ;;  %vm435_vm1 = vcmp.ne.s32.totalorder %v367_v37, 0  ;;  %vm463_vm2 = vcmp.ne.s32.totalorder %v367_v37, 7 }
  0x33   : > { %325 = vst.msk [vmem:[#allocation2 + $0x24] sm:$0xf] %vm227_vm0, %v2376_v44  ;;  %vm436_vm3 = vcmp.ne.s32.totalorder %v374_v45, 0  ;;  %v2250_v51 = vsel %vm435_vm1, 1.0, %v2553_v31  ;;  %vm464_vm4 = vcmp.ne.s32.totalorder %v374_v45, 7  ;;  %v593_v59 = vshrl.u32 %v2689_v58, 16 }
  0x34   : > { %vm437_vm5 = vcmp.ne.s32.totalorder %v381_v47, 0  ;;  %vm438_vm6 = vcmp.ne.s32.totalorder %v388_v48, 0  ;;  %v2251_v54 = vsel %vm436_vm3, 1.0, %v2553_v31  ;;  %v2258_v1 = vsel %vm463_vm2, 1.0, %v2553_v31  ;;  %v492_v32 = vld [vmem:[#allocation2 + $0x14] sm:$0xf] }
  0x35   : > { %v2252_v60 = vsel %vm437_vm5, 1.0, %v2553_v31  ;;  %v2253_v12 = vsel %vm438_vm6, 1.0, %v2553_v31  ;;  %v457_v63 = vpack.c.bf16 %v2251_v54, %v2250_v51  ;;  %v2259_v11 = vsel %vm464_vm4, 1.0, %v2553_v31 }
  0x36   : > { %v458_v6 = vpack.c.bf16 %v2253_v12, %v2252_v60  ;;  %v1015_v22 = vshrl.u32 %v2789_v16, 16  ;;  %v485_v23 = vpack.c.bf16 %v2259_v11, %v2258_v1  ;;  %v595_v29 = vrot.slane %v593_v59, 4 }
  0x37   : > { %v534_v18 = vrot.slane %v457_v63, %v2676_v52  ;;  %v541_v58 = vrot.slane %v457_v63, %v2680_v53  ;;  %vm2835_vm0 = vcmp.ne.s32.totalorder %v381_v47, 7  ;;  %vm2841_vm7 = vcmp.ne.s32.totalorder %v388_v48, 7 }
  0x38   : > { %v548_v25 = vrot.slane %v458_v6, %v2676_v52  ;;  %v2833_v28 = vrot.slane %v458_v6, %v2680_v53  ;;  %v493_v44 = vld [vmem:[#allocation2 + $0x18] sm:$0xf]  ;;  %v596_v45 = vor.u32 %v595_v29, %v2718_v33  ;;  %v2845_v6 = vld [vmem:[#allocation2 + $0x10] sm:$0xf]  ;;  %v970_v48 = vrot.slane %v485_v23, %v2680_v53  ;;  %v2909_v3 = vld [vmem:[#allocation2 + $0x1c] sm:$0xf] }
  0x39   : > { %v599_v34 = vshll.u32 %v534_v18, 16  ;;  %v603_v35 = vshrl.u32 %v534_v18, 16  ;;  %v609_v36 = vshll.u32 %v541_v58, 16  ;;  %v613_v37 = vshrl.u32 %v541_v58, 16 }
  0x3a   : > { %v619_v51 = vshll.u32 %v548_v25, 16  ;;  %v623_v54 = vshrl.u32 %v548_v25, 16  ;;  %v629_v60 = vshll.u32 %v2833_v28, 16  ;;  %v597_v11 = vrot.slane %v596_v45, 4 }
  0x3b   : > { %v601_v12 = vrot.slane %v599_v34, 5  ;;  %v605_v63 = vrot.slane %v603_v35, 4  ;;  %v611_v1 = vrot.slane %v609_v36, 5  ;;  %v615_v59 = vrot.slane %v613_v37, 4  ;;  %v2855_v36 = vld [vmem:[#allocation2 + $0x14] sm:$0xf] }
  0x3c   : > { %v621_v18 = vrot.slane %v619_v51, 5  ;;  %v625_v58 = vrot.slane %v623_v54, 4  ;;  %v2266_v33 = vcombine.low %v492_v32, %v493_v44  ;;  %v963_v25 = vrot.slane %v485_v23, %v2676_v52 }
  0x3d   : > { %v606_v4 = vor.u32 %v605_v63, %v601_v12  ;;  %v616_v26 = vor.u32 %v615_v59, %v611_v1  ;;  %v2850_v29 = vsel %vm2711_vm14, %v597_v11, %v601_v12  ;;  %v2852_v35 = vrot.slane %v629_v60, 5  ;;  %v2860_v59 = vld [vmem:[#allocation2 + $0x14] sm:$0xf] }
  0x3e   : > { %v626_v34 = vor.u32 %v625_v58, %v621_v18  ;;  %v651_v51 = vmul.bf16 %v2850_v29, %v2845_v6  ;;  %2428 = vmatprep.mubr.msk.bf16.mxu1 %vm687_vm13, %v2266_v33  ;;  %v1024_v54 = vshrl.u32 %v963_v25, 16  ;;  %v1027_v12 = vshll.u32 %v963_v25, 16  ;;  %v2872_v33 = vld [vmem:[#allocation2 + $0x1c] sm:$0xf] }
  0x3f   : > { %v607_v37 = vrot.slane %v606_v4, 4  ;;  %v617_v45 = vrot.slane %v616_v26, 4  ;;  %v1033_v11 = vshrl.u32 %v970_v48, 16  ;;  %v1036_v58 = vshll.u32 %v970_v48, 16  ;;  %v2881_v48 = vld [vmem:[#allocation2 + $0x18] sm:$0xf] }
  0x40   : > { %v627_v63 = vrot.slane %v626_v34, 4  ;;  %v1026_v26 = vrot.slane %v1024_v54, 7  ;;  %v1237_v23 = vmul.bf16 %v2860_v59, %v2850_v29  ;;  %v2889_v54 = vrot.slane %v1015_v22, 7 }
  0x41   : > { %v2864_v60 = vsel %vm2711_vm14, %v607_v37, %v611_v1  ;;  %v2868_v4 = vsel %vm2711_vm14, %v617_v45, %v621_v18  ;;  %v2883_v37 = vrot.slane %v1033_v11, 7  ;;  %v1693_v18 = vmul.bf16 %v2855_v36, %v2737_v43 }
  0x42   : > { %v2877_v25 = vsel %vm2711_vm14, %v627_v63, %v2852_v35  ;;  %v652_v34 = vmul.bf16 %v2864_v60, %v492_v32  ;;  %v653_v1 = vmul.bf16 %v2868_v4, %v493_v44  ;;  %v1238_v20 = vmul.bf16 %v2881_v48, %v2864_v60 }
  0x43   : > { %3246 = vst [vmem:[#allocation3_spill] sm:$0xff] %v2877_v25  ;;  %v654_v45 = vmul.bf16 %v2877_v25, %v2872_v33  ;;  %v2260_v32 = vsel %vm2835_vm0, 1.0, %v2553_v31  ;;  %v1031_v63 = vrot.slane %v1026_v26, 4  ;;  %v1038_v11 = vor.u32 %v1036_v58, %v2883_v37  ;;  %v2911_v58 = vld [vmem:[#allocation2 + $0x20] sm:$0xf] }
  0x44   : > { %v2275_v44 = vcombine.low %v651_v51, %v652_v34  ;;  %v2261_v43 = vsel %vm2841_vm7, 1.0, %v2553_v31  ;;  %v1022_v14 = vrot.slane %v2889_v54, 4  ;;  %v1029_v22 = vor.u32 %v1027_v12, %v1026_v26 }
  0x45   : > { %v2276_v5 = vcombine.low %v653_v1, %v654_v45  ;;  %v2299_v47 = vcombine.low %v1237_v23, %v1238_v20  ;;  %v792_v31 = vrot.slane %v790_v38, 3  ;;  %v795_v12 = vrot.slane %v793_v40, 4 }
  0x46   : > { %v807_v51 = vshrl.u32 %v2275_v44, 16  ;;  %v810_v34 = vshll.u32 %v2275_v44, 16  ;;  %v1239_v42 = vmul.bf16 %v2909_v3, %v2868_v4  ;;  %v1240_v9 = vmul.bf16 %v2911_v58, %v2877_v25  ;;  %v2938_v44 = vld [vmem:[#allocation2 + $0x18] sm:$0xf] }
  0x47   : > { %v3247_v0 = vshrl.u32 %v2794_v19, 16  ;;  %v816_v21 = vshrl.u32 %v2276_v5, 16  ;;  %v819_v26 = vshll.u32 %v2276_v5, 16  ;;  %v2925_v23 = vsel %vm2755_vm15, %v1031_v63, %v1038_v11 }
  0x48   : > { %v3248_v38 = vshll.u32 %v2794_v19, 16  ;;  %v3249_v15 = vmul.bf16 %v2812_v49, %v2742_v46  ;;  %v486_v45 = vpack.c.bf16 %v2261_v43, %v2260_v32  ;;  %v2936_v20 = vsel %vm2755_vm15, %v1022_v14, %v1029_v22  ;;  %v495_v19 = vld [vmem:[#allocation2 + $0x20] sm:$0xf]  ;;  %v2948_v22 = vld [vmem:[#allocation2 + $0x1c] sm:$0xf] }
  0x49   : > { %v800_v17 = vrot.slane %v3247_v0, 3  ;;  %v809_v5 = vrot.slane %v807_v51, 3  ;;  %v812_v0 = vrot.slane %v810_v34, 4  ;;  %v1286_v25 = vshrl.u32 %v2299_v47, 16 }
  0x4a   : > { %v803_v1 = vrot.slane %v3248_v38, 4  ;;  %v2932_v40 = vcombine.low %v3249_v15, %v1693_v18  ;;  %v2310_v63 = vcombine.low %v2765_v62, %v2860_v59  ;;  %v1073_v11 = vmul.bf16 %v2925_v23, %v2881_v48  ;;  %v2956_v38 = vld [vmem:[%s3231_s3 + $0x20] sm:$0xff]  }
  0x4b   : > { %v2944_v46 = vcombine.low %v1239_v42, %v1240_v9  ;;  %v1289_v18 = vshll.u32 %v2299_v47, 16  ;;  %v1530_v32 = vmul.bf16 %v2938_v44, %v2936_v20  ;;  %v818_v14 = vrot.slane %v816_v21, 3  ;;  %v2532_v21 = vld [vmem:[%s3231_s3 + $0x18] sm:$0xff]  }
  0x4c   : > { %v821_v43 = vrot.slane %v819_v26, 4  ;;  %v2265_v51 = vcombine.low %v2728_v41, %v2845_v6  ;;  %v633_v34 = vshrl.u32 %v2833_v28, 16  ;;  %v1531_v47 = vmul.bf16 %v2948_v22, %v2925_v23 }
  0x4d   : > { %v2267_v42 = vcombine.low %v2872_v33, %v495_v19  ;;  %vm788_vm8 = vsmask.f32 4352  ;;  %v796_v9 = vor.u32 %v795_v12, %v792_v31  ;;  %v813_v26 = vor.u32 %v812_v0, %v809_v5  ;;  %v916_v0 = vld [vmem:[#allocation2 + $0x4] sm:$0xf] }
  0x4e   : > { %v2964_v41 = vrot.slane %v1286_v25, 3  ;;  %2425 = vmatmul.mubr.msk.bf16.vlgmr.msra.gmra.mxu0 %vm687_vm13, %v2265_v51  ;;  %v635_v28 = vrot.slane %v633_v34, 4  ;;  %v804_v6 = vor.u32 %v803_v1, %v800_v17  ;;  %v1694_v15 = vmul.bf16 %v2938_v44, %v2850_v29 }
  0x4f   : > { %2429 = vmatmul.mubr.msk.bf16.vlgmr.msra.gmra.mxu1 %vm687_vm13, %v2267_v42  ;;  %2443 = vmatpush3.bf16.msra.mxu0 %v2616_v7  ;;  %v949_v33 = vrot.slane %v2747_v50, %v2676_v52  ;;  %v992_v31 = vshll.u32 %v2685_v56, 16  ;;  %v1018_v12 = vshll.u32 %v2789_v16, 16  ;;  %v2975_v25 = vrot.slane %v1289_v18, 4 }
  0x50   : > { %v1695_v5 = vmul.bf16 %v2948_v22, %v2864_v60  ;;  %v636_v17 = vor.u32 %v635_v28, %v2852_v35  ;;  %2433 = vmatpush3.bf16.msra.mxu1 %v2593_v2  ;;  %v805_v1 = vsel %vm788_vm8, %v796_v9, %v804_v6  ;;  %2462 = vmatprep.subr.bf16.mxu0 %v2956_v38  ;;  %v1004_v35 = vrot.slane %v2725_v39, 4 }
  0x51   : > { %v2983_v7 = vcombine.low %v1530_v32, %v1531_v47  ;;  %2434 = vmatprep.mubr.msk.bf16.mxu1 %vm687_vm13, %v805_v1  ;;  %v2987_v56 = vor.u32 %v992_v31, %v2715_v27  ;;  %v1006_v50 = vshrl.u32 %v949_v33, 16  ;;  %v1009_v16 = vshll.u32 %v949_v33, 16  ;;  %2452 = vmatprep.subr.bf16.mxu1 %v2532_v21 }
  0x52   : > { %v2989_v18 = vrot.slane %v636_v17, 4  ;;  %v1020_v2 = vor.u32 %v1018_v12, %v2889_v54  ;;  %v1072_v51 = vmul.bf16 %v2936_v20, %v2860_v59  ;;  %v2996_v47 = vor.u32 %v821_v43, %v818_v14  ;;  %v1976_v59 = vld [vmem:[#allocation2 + $0x14] sm:$0xf] }
  0x53   : > { %v1008_v34 = vrot.slane %v1006_v50, 7  ;;  %v1068_v32 = vmul.bf16 %v2987_v56, %v916_v0  ;;  %v977_v27 = vrot.slane %v486_v45, %v2676_v52  ;;  %v814_v9 = vsel %vm788_vm8, %v804_v6, %v813_v26  ;;  %v3012_v52 = vld [vmem:[%s3231_s3 + $0x28] sm:$0xff]  }
  0x54   : > { %v655_v42 = vmul.bf16 %v2989_v18, %v495_v19  ;;  %v3001_v28 = vcombine.low %v1072_v51, %v1073_v11  ;;  %v984_v39 = vrot.slane %v486_v45, %v2680_v53  ;;  %v3250_v31 = vmul.bf16 %v2782_v13, %v2751_v55 }
  0x55   : > { %v1011_v33 = vor.u32 %v1009_v16, %v1008_v34  ;;  %v1013_v54 = vrot.slane %v1008_v34, 4  ;;  %vm1103_vm9 = vsmask.f32 7424  ;;  %v823_v14 = vsel %vm788_vm8, %v813_v26, %v2996_v47 }
  0x56   : > { %v2285_v12 = vcombine.low %v1068_v32, %v3250_v31  ;;  %v2277_v19 = vcombine.low %v655_v42, %v655_v42  ;;  %v1120_v11 = vshll.u32 %v3001_v28, 16  ;;  %v1042_v43 = vshrl.u32 %v977_v27, 16 }
  0x57   : > { %v1045_v53 = vshll.u32 %v977_v27, 16  ;;  %v3017_v45 = vsel %vm2755_vm15, %v1004_v35, %v1011_v33  ;;  %v3021_v6 = vsel %vm2755_vm15, %v1013_v54, %v1020_v2  ;;  %2435 = vmatmul.mubr.msk.bf16.vlgmr.msra.gmra.mxu1 %vm687_vm13, %v814_v9  ;;  %v1040_v50 = vrot.slane %v2883_v37, 4 }
  0x58   : > { %v1105_v17 = vshrl.u32 %v2285_v12, 16  ;;  %v1107_v26 = vshll.u32 %v2285_v12, 16  ;;  %v1070_v1 = vmul.bf16 %v3017_v45, %v2763_v61  ;;  %v1071_v0 = vmul.bf16 %v3021_v6, %v2765_v62  ;;  %2453 = vmatpush3.bf16.msra.mxu1 %v2532_v21  ;;  %2438 = vmatprep.mubr.msk.bf16.mxu1 %vm687_vm13, %v823_v14 }
  0x59   : > { %v1044_v16 = vrot.slane %v1042_v43, 7  ;;  %v1122_v51 = vrot.slane %v1120_v11, 1  ;;  %v1051_v2 = vshrl.u32 %v984_v39, 16  ;;  %v1054_v34 = vshll.u32 %v984_v39, 16  ;;  %2472 = vmatprep.subr.bf16.mxu1 %v3012_v52  ;;  %v924_v43 = vld [vmem:[#allocation2 + $0x24] sm:$0x1] }
  0x5a   : > { %v1109_v35 = vrot.slane %v1107_v26, 1  ;;  %v2286_v32 = vcombine.low %v1070_v1, %v1071_v0  ;;  %v1124_v42 = vshrl.u32 %v3001_v28, 16  ;;  %v825_v9 = vshrl.u32 %v2277_v19, 16 }
  0x5b   : > { %v1047_v27 = vor.u32 %v1045_v53, %v1044_v16  ;;  %v1049_v54 = vrot.slane %v1044_v16, 4  ;;  %v1053_v31 = vrot.slane %v1051_v2, 7  ;;  %v828_v21 = vshll.u32 %v2277_v19, 16 }
  0x5c   : > { %v1110_v33 = vor.u32 %v1109_v35, %v1105_v17  ;;  %v1112_v12 = vshll.u32 %v2286_v32, 16  ;;  %v1116_v14 = vshrl.u32 %v2286_v32, 16  ;;  %v827_v11 = vrot.slane %v825_v9, 3 }
  0x5d   : > { %v3034_v37 = vsel %vm2755_vm15, %v1040_v50, %v1047_v27  ;;  %v1056_v39 = vor.u32 %v1054_v34, %v1053_v31  ;;  %v830_v53 = vrot.slane %v828_v21, 4  ;;  %v3038_v1 = vrot.slane %v1053_v31, 4  ;;  %v3058_v21 = vld [vmem:[%s3231_s3 + $0x30] sm:$0xff]  }
  0x5e   : > { %v1074_v26 = vmul.bf16 %v3034_v37, %v2909_v3  ;;  %v1114_v28 = vrot.slane %v1112_v12, 1  ;;  %v1269_v17 = vshrl.u32 %v2800_v10, 16  ;;  %v1272_v19 = vshll.u32 %v2800_v10, 16 }
  0x5f   : > { %v1277_v0 = vshrl.u32 %v2802_v24, 16  ;;  %v3045_v50 = vsel %vm2755_vm15, %v1049_v54, %v1056_v39  ;;  %v831_v16 = vor.u32 %v830_v53, %v827_v11  ;;  %v1076_v35 = vmul.bf16 %v3038_v1, %v924_v43  ;;  %v3064_v43 = vld [vmem:[#allocation2 + $0x24] sm:$0xf] }
  0x60   : > { %v1280_v2 = vshll.u32 %v2802_v24, 16  ;;  %v1115_v34 = vsel %vm1103_vm9, %v1110_v33, %v1114_v28  ;;  %v1118_v32 = vor.u32 %v1116_v14, %v1114_v28  ;;  %v1075_v27 = vmul.bf16 %v3045_v50, %v2911_v58  ;;  %v3060_v24 = vld [vmem:[#allocation2 + $0x20] sm:$0xf] }
  0x61   : > { %v1271_v9 = vrot.slane %v1269_v17, 3  ;;  %2444 = vmatprep.mubr.msk.bf16.mxu0 %vm687_vm13, %v1115_v34  ;;  %v832_v10 = vsel %vm788_vm8, %v2996_v47, %v831_v16  ;;  %v2289_v57 = vcombine.low %v1076_v35, %v1076_v35  ;;  %v1274_v54 = vrot.slane %v1272_v19, 4 }
  0x62   : > { %v1279_v31 = vrot.slane %v1277_v0, 3  ;;  %v1123_v33 = vsel %vm1103_vm9, %v1118_v32, %v1122_v51  ;;  %v2288_v12 = vcombine.low %v1074_v26, %v1075_v27  ;;  %v1126_v14 = vor.u32 %v1124_v42, %v1122_v51  ;;  %2439 = vmatmul.mubr.msk.bf16.gmra.mxu1 %vm687_vm13, %v832_v10  ;;  %v1517_v42 = vld [vmem:[#allocation2 + $0x8] sm:$0xf] }
  0x63   : > { %v1282_v11 = vrot.slane %v1280_v2, 4  ;;  %2445 = vmatmul.mubr.msk.bf16.vlgmr.msra.gmra.mxu0 %vm687_vm13, %v1123_v33  ;;  %v1136_v47 = vshll.u32 %v2289_v57, 16  ;;  %v1275_v39 = vor.u32 %v1274_v54, %v1271_v9  ;;  %v1292_v53 = vor.u32 %v2975_v25, %v2964_v41  ;;  %v3088_v57 = vld [vmem:[#allocation2 + $0x24] sm:$0xf] }
  0x64   : > { %v1295_v28 = vshrl.u32 %v2944_v46, 16  ;;  %2463 = vmatpush3.bf16.msra.mxu0 %v2956_v38  ;;  %v1128_v17 = vshll.u32 %v2288_v12, 16  ;;  %v1132_v19 = vshrl.u32 %v2288_v12, 16  ;;  %v1298_v51 = vshll.u32 %v2944_v46, 16 }
  0x65   : > { %v1283_v26 = vor.u32 %v1282_v11, %v1279_v31  ;;  %v1696_v0 = vmul.bf16 %v3060_v24, %v2868_v4  ;;  %v2309_v16 = vcombine.low %v2751_v55, %v2763_v61  ;;  %2482 = vmatprep.subr.bf16.mxu0 %v3058_v21  ;;  %v1241_v41 = vmul.bf16 %v3064_v43, %v2989_v18 }
  0x66   : > { %v1297_v35 = vrot.slane %v1295_v28, 3  ;;  %v1130_v25 = vrot.slane %v1128_v17, 1  ;;  %v1138_v38 = vrot.slane %v1136_v47, 1  ;;  %v1300_v34 = vrot.slane %v1298_v51, 4 }
  0x67   : > { %v1284_v2 = vsel %vm788_vm8, %v1275_v39, %v1283_v26  ;;  %v1293_v46 = vsel %vm788_vm8, %v1283_v26, %v1292_v53  ;;  %v2301_v32 = vcombine.low %v1241_v41, %v1241_v41  ;;  %v1526_v4 = vmul.bf16 %v1517_v42, %v2987_v56 }
  0x68   : > { %2454 = vmatprep.mubr.msk.bf16.mxu1 %vm687_vm13, %v1284_v2  ;;  %v1528_v55 = vmul.bf16 %v2812_v49, %v3017_v45  ;;  %v1131_v61 = vsel %vm1103_vm9, %v1126_v14, %v1130_v25  ;;  %v1134_v27 = vor.u32 %v1132_v19, %v1130_v25  ;;  %v1301_v9 = vor.u32 %v1300_v34, %v1297_v35  ;;  %v3098_v14 = vld [vmem:[%s3231_s3 + $0x38] sm:$0xff]   ;;  %v3252_v35 = vld [vmem:[#allocation3_spill] sm:$0xff] }
  0x69   : > { %v1529_v10 = vmul.bf16 %v2855_v36, %v3021_v6  ;;  %2448 = vmatprep.mubr.msk.bf16.mxu0 %vm687_vm13, %v1131_v61  ;;  %v1304_v54 = vshrl.u32 %v2301_v32, 16  ;;  %v1307_v31 = vshll.u32 %v2301_v32, 16  ;;  %v3251_v33 = vmul.bf16 %v2777_v8, %v2782_v13 }
  0x6a   : > { %v1726_v11 = vshrl.u32 %v2907_v30, 16  ;;  %v1139_v47 = vsel %vm1103_vm9, %v1134_v27, %v1138_v38  ;;  %2455 = vmatmul.mubr.msk.bf16.vlgmr.msra.gmra.mxu1 %vm687_vm13, %v1293_v46  ;;  %v1302_v39 = vsel %vm788_vm8, %v1292_v53, %v1301_v9  ;;  %v1729_v17 = vshll.u32 %v2907_v30, 16 }
  0x6b   : > { %v2320_v12 = vcombine.low %v1526_v4, %v3251_v33  ;;  %v2321_v28 = vcombine.low %v1528_v55, %v1529_v10  ;;  %2449 = vmatmul.mubr.msk.bf16.gmra.mxu0 %vm687_vm13, %v1139_v47  ;;  %2473 = vmatpush3.bf16.msra.mxu1 %v3012_v52  ;;  %v1306_v19 = vrot.slane %v1304_v54, 3  ;;  %v1309_v26 = vrot.slane %v1307_v31, 4  ;;  %v1525_v55 = vld [vmem:[#allocation2 + $0x28] sm:$0x1]  ;;  %v1975_v47 = vld [vmem:[#allocation2 + $0x10] sm:$0xf] }
  0x6c   : > { %v1697_v41 = vmul.bf16 %v3088_v57, %v3252_v35  ;;  %v2334_v53 = vcombine.low %v1694_v15, %v1695_v5  ;;  %2464 = vmatprep.mubr.msk.bf16.mxu0 %vm687_vm13, %v2309_v16  ;;  %2458 = vmatprep.mubr.msk.bf16.mxu1 %vm687_vm13, %v1302_v39  ;;  %v1734_v2 = vshrl.u32 %v2932_v40, 16  ;;  %v1737_v34 = vshll.u32 %v2932_v40, 16  ;;  %v3134_v33 = vld [vmem:[#allocation2 + $0x28] sm:$0xf] }
  0x6d   : > { %v1562_v51 = vshrl.u32 %v2320_v12, 16  ;;  %v1564_v42 = vshll.u32 %v2320_v12, 16  ;;  %v1569_v30 = vshll.u32 %v2321_v28, 16  ;;  %v1573_v52 = vshrl.u32 %v2321_v28, 16  ;;  %2492 = vmatprep.subr.bf16.mxu1 %v3098_v14 }
  0x6e   : > { %v1310_v25 = vor.u32 %v1309_v26, %v1306_v19  ;;  %v1728_v60 = vrot.slane %v1726_v11, 3  ;;  %v1731_v32 = vrot.slane %v1729_v17, 4  ;;  %v1577_v29 = vshll.u32 %v2983_v7, 16  ;;  %v1974_v11 = vld [vmem:[#allocation2 + $0xc] sm:$0xf] }
  0x6f   : > { %v1566_v38 = vrot.slane %v1564_v42, 1  ;;  %v1571_v46 = vrot.slane %v1569_v30, 1  ;;  %v1736_v16 = vrot.slane %v1734_v2, 3  ;;  %v1739_v4 = vrot.slane %v1737_v34, 4 }
  0x70   : > { %v1311_v15 = vsel %vm788_vm8, %v1301_v9, %v1310_v25  ;;  %v2335_v61 = vcombine.low %v1696_v0, %v1697_v41  ;;  %v2311_v27 = vcombine.low %v2881_v48, %v2909_v3  ;;  %v1532_v40 = vmul.bf16 %v3060_v24, %v3034_v37  ;;  %v3131_v9 = vld [vmem:[%s3231_s3 + $0x40] sm:$0xff]  }
  0x71   : > { %v1567_v5 = vor.u32 %v1566_v38, %v1562_v51  ;;  %v1533_v10 = vmul.bf16 %v3088_v57, %v3045_v50  ;;  %v1581_v31 = vshrl.u32 %v2983_v7, 16  ;;  %v1743_v0 = vshrl.u32 %v2334_v53, 16 }
  0x72   : > { %v1746_v12 = vshll.u32 %v2334_v53, 16  ;;  %2459 = vmatmul.mubr.msk.bf16.gmra.mxu1 %vm687_vm13, %v1311_v15  ;;  %v1534_v48 = vmul.bf16 %v1525_v55, %v3038_v1  ;;  %v1575_v39 = vor.u32 %v1573_v52, %v1571_v46  ;;  %v1732_v7 = vor.u32 %v1731_v32, %v1728_v60  ;;  %v1977_v52 = vld [vmem:[#allocation2 + $0x18] sm:$0xf] }
  0x73   : > { %v1572_v54 = vsel %vm1103_vm9, %v1567_v5, %v1571_v46  ;;  %v2323_v3 = vcombine.low %v1532_v40, %v1533_v10  ;;  %2465 = vmatmul.mubr.msk.bf16.vlgmr.msra.gmra.mxu0 %vm687_vm13, %v2310_v63  ;;  %v1740_v28 = vor.u32 %v1739_v4, %v1736_v16  ;;  %v1579_v17 = vrot.slane %v1577_v29, 1  ;;  %v1979_v5 = vld [vmem:[#allocation2 + $0x20] sm:$0xf]  ;;  %v1980_v10 = vld [vmem:[#allocation2 + $0x24] sm:$0xf] }
  0x74   : > { %2474 = vmatprep.mubr.msk.bf16.mxu1 %vm687_vm13, %v1572_v54  ;;  %2483 = vmatpush3.bf16.msra.mxu0 %v3058_v21  ;;  %v1752_v26 = vshrl.u32 %v2335_v61, 16  ;;  %v1755_v51 = vshll.u32 %v2335_v61, 16  ;;  %v2324_v42 = vcombine.low %v1534_v48, %v1534_v48  ;;  %v1698_v62 = vmul.bf16 %v3134_v33, %v2989_v18  ;;  %v1978_v61 = vld [vmem:[#allocation2 + $0x1c] sm:$0xf]  ;;  %v1981_v54 = vld [vmem:[#allocation2 + $0x28] sm:$0xf] }
  0x75   : > { %2468 = vmatprep.mubr.msk.bf16.mxu0 %vm687_vm13, %v2311_v27  ;;  %v1585_v19 = vshll.u32 %v2323_v3, 16  ;;  %2502 = vmatprep.subr.bf16.mxu0 %v3131_v9  ;;  %v1583_v35 = vor.u32 %v1581_v31, %v1579_v17  ;;  %v1983_v63 = vmul.bf16 %v1974_v11, %v2987_v56  ;;  %v1984_v41 = vmul.bf16 %v1975_v47, %v2782_v13 }
  0x76   : > { %v1745_v53 = vrot.slane %v1743_v0, 3  ;;  %v1748_v30 = vrot.slane %v1746_v12, 4  ;;  %v2312_v25 = vcombine.low %v2911_v58, %v3064_v43  ;;  %v1580_v38 = vsel %vm1103_vm9, %v1575_v39, %v1579_v17 }
  0x77   : > { %v1587_v21 = vrot.slane %v1585_v19, 1  ;;  %v1589_v2 = vshrl.u32 %v2323_v3, 16  ;;  %v1593_v34 = vshll.u32 %v2324_v42, 16  ;;  %v1741_v46 = vsel %vm788_vm8, %v1732_v7, %v1740_v28 }
  0x78   : > { %v1754_v60 = vrot.slane %v1752_v26, 3  ;;  %v1757_v18 = vrot.slane %v1755_v51, 4  ;;  %v2336_v32 = vcombine.low %v1698_v62, %v1698_v62  ;;  %v1985_v13 = vmul.bf16 %v1976_v59, %v3017_v45  ;;  %v1982_v26 = vld [vmem:[#allocation2 + $0x2c] sm:$0x1] }
  0x79   : > { %v1588_v56 = vsel %vm1103_vm9, %v1583_v35, %v1587_v21  ;;  %v1986_v29 = vmul.bf16 %v1977_v52, %v3021_v6  ;;  %v2355_v15 = vcombine.low %v1983_v63, %v1984_v41  ;;  %v1749_v58 = vor.u32 %v1748_v30, %v1745_v53 }
  0x7a   : > { %2475 = vmatmul.mubr.msk.bf16.vlgmr.msra.gmra.mxu1 %vm687_vm13, %v1580_v38  ;;  %v1591_v43 = vor.u32 %v1589_v2, %v1587_v21  ;;  %v1595_v16 = vrot.slane %v1593_v34, 1  ;;  %v1758_v4 = vor.u32 %v1757_v18, %v1754_v60  ;;  %v1761_v55 = vshrl.u32 %v2336_v32, 16 }
  0x7b   : > { %2469 = vmatmul.mubr.msk.bf16.gmra.mxu0 %vm687_vm13, %v2312_v25  ;;  %2493 = vmatpush3.bf16.msra.mxu1 %v3098_v14  ;;  %v1764_v45 = vshll.u32 %v2336_v32, 16  ;;  %v2356_v6 = vcombine.low %v1985_v13, %v1986_v29  ;;  %v2021_v27 = vshll.u32 %v2355_v15, 16  ;;  %v1988_v40 = vmul.bf16 %v1979_v5, %v2925_v23 }
  0x7c   : > { %2484 = vmatprep.mubr.msk.bf16.mxu0 %vm687_vm13, %v1741_v46  ;;  %2478 = vmatprep.mubr.msk.bf16.mxu1 %vm687_vm13, %v1588_v56  ;;  %v1750_v31 = vsel %vm788_vm8, %v1740_v28, %v1749_v58  ;;  %v1596_v14 = vsel %vm1103_vm9, %v1591_v43, %v1595_v16  ;;  %v2344_v0 = vcombine.low %v2777_v8, %v2812_v49  ;;  %v1763_v48 = vrot.slane %v1761_v55, 3 }
  0x7d   : > { %v1987_v12 = vmul.bf16 %v1978_v61, %v2936_v20  ;;  %v1759_v3 = vsel %vm788_vm8, %v1749_v58, %v1758_v4  ;;  %v1766_v11 = vrot.slane %v1764_v45, 4  ;;  %v2019_v47 = vshrl.u32 %v2355_v15, 16 }
  0x7e   : > { %v2023_v39 = vrot.slane %v2021_v27, 1  ;;  %v2026_v7 = vshll.u32 %v2356_v6, 16  ;;  %v1989_v23 = vmul.bf16 %v1980_v10, %v3034_v37  ;;  %v1990_v17 = vmul.bf16 %v1981_v54, %v3045_v50 }
  0x7f   : > { %v2357_v8 = vcombine.low %v1987_v12, %v1988_v40  ;;  %v1767_v49 = vor.u32 %v1766_v11, %v1763_v48  ;;  %v2345_v37 = vcombine.low %v2855_v36, %v2938_v44  ;;  %v2346_v51 = vcombine.low %v2948_v22, %v3060_v24 }
  0x80   : > { %v2024_v20 = vor.u32 %v2023_v39, %v2019_v47  ;;  %v2028_v28 = vrot.slane %v2026_v7, 1  ;;  %v2358_v19 = vcombine.low %v1989_v23, %v1990_v17  ;;  %v2030_v35 = vshrl.u32 %v2356_v6, 16 }
  0x81   : > { %v2034_v50 = vshll.u32 %v2357_v8, 16  ;;  %v1768_v42 = vsel %vm788_vm8, %v1758_v4, %v1767_v49  ;;  %v1991_v62 = vmul.bf16 %v1982_v26, %v3038_v1  ;;  %v2038_v59 = vshrl.u32 %v2357_v8, 16 }
  0x82   : > { %2479 = vmatmul.mubr.msk.bf16.gmra.mxu1 %vm687_vm13, %v1596_v14  ;;  %v2042_v63 = vshll.u32 %v2358_v19, 16  ;;  %v2032_v36 = vor.u32 %v2030_v35, %v2028_v28  ;;  %v2347_v1 = vcombine.low %v3088_v57, %v3134_v33  ;;  %v2046_v30 = vshrl.u32 %v2358_v19, 16 }
  0x83   : > { %2485 = vmatmul.mubr.msk.bf16.vlgmr.msra.gmra.mxu0 %vm687_vm13, %v1750_v31  ;;  %2494 = vmatprep.mubr.msk.bf16.mxu1 %vm687_vm13, %v2344_v0  ;;  %v2036_v41 = vrot.slane %v2034_v50, 1  ;;  %v2359_v44 = vcombine.low %v1991_v62, %v1991_v62  ;;  %vm2145_vm10 = vcmask 261120  }
  0x84   : > { %2503 = vmatpush3.bf16.msra.mxu0 %v3131_v9  ;;  %2488 = vmatprep.mubr.msk.bf16.mxu0 %vm687_vm13, %v1759_v3  ;;  %v2029_v9 = vsel %vm1103_vm9, %v2024_v20, %v2028_v28  ;;  %v2044_v24 = vrot.slane %v2042_v63, 1 }
  0x85   : > { %v2040_v22 = vor.u32 %v2038_v59, %v2036_v41  ;;  %v2037_v53 = vsel %vm1103_vm9, %v2032_v36, %v2036_v41  ;;  %v2050_v21 = vshll.u32 %v2359_v44, 16 }
  0x86   : > { %v2048_v25 = vor.u32 %v2046_v30, %v2044_v24 }
  0x87   : > { %v2045_v52 = vsel %vm1103_vm9, %v2040_v22, %v2044_v24  ;;  %v2052_v38 = vrot.slane %v2050_v21, 1 }
  0x89   : > { %v2053_v2 = vsel %vm1103_vm9, %v2048_v25, %v2052_v38 }
  0x8a   : > { %2495 = vmatmul.mubr.msk.bf16.vlgmr.msra.gmra.mxu1 %vm687_vm13, %v2345_v37 }
  0x8b   : > { %2489 = vmatmul.mubr.msk.bf16.gmra.mxu0 %vm687_vm13, %v1768_v42  ;;  %2498 = vmatprep.mubr.msk.bf16.mxu1 %vm687_vm13, %v2346_v51 }
  0x8c   : > { %2504 = vmatprep.mubr.msk.bf16.mxu0 %vm687_vm13, %v2029_v9 }
  0x92   : > { %2499 = vmatmul.mubr.msk.bf16.gmra.mxu1 %vm687_vm13, %v2347_v1 }
  0x93   : > { %2505 = vmatmul.mubr.msk.bf16.vlgmr.msra.gmra.mxu0 %vm687_vm13, %v2037_v53 }
  0x94   : > { %2508 = vmatprep.mubr.msk.bf16.mxu0 %vm687_vm13, %v2045_v52 }
  0x9b   : > { %2509 = vmatmul.mubr.msk.bf16.gmra.mxu0 %vm687_vm13, %v2053_v2 }
 0x10e   : > { %v2426_v33 = vpop.f32.mrf.mxu0 }
 0x10f   : > { %v2430_v34 = vpop.f32.mrf.mxu1 }
 0x110   : > { %v734_v18 = vpop.f32.mrf.mxu0 }
 0x111   : > { %v750_v57 = vpop.f32.mrf.mxu1 }
 0x112   : > { %v2427_v13 = vpop.f32.mrf.mxu0 }
 0x113   : > { %v2431_v46 = vpop.f32.mrf.mxu1 }
 0x114   : > { %v737_v5 = vpop.f32.mrf.mxu0 }
 0x115   : > { %v3196_v60 = vpop.f32.mrf.mxu1 }
 0x117   : > { %v2436_v32 = vpop.f32.mrf.mxu1 }
 0x118   : > { %v894_v19 = vadd.f32 %v2436_v32, %v2426_v33 }
 0x119   : > { %v885_v56 = vpop.f32.mrf.mxu1 }
 0x11a   : > { %v886_v50 = vadd.f32 %v885_v56, %v734_v18 }
 0x11b   : > { %v2437_v29 = vpop.f32.mrf.mxu1 }
 0x11c   : > { %v897_v62 = vadd.f32 %v2437_v29, %v2427_v13 }
 0x11d   : > { %v888_v15 = vpop.f32.mrf.mxu1 }
 0x11e   : > { %v889_v41 = vadd.f32 %v888_v15, %v737_v5 }
 0x122   : > { %v2440_v58 = vpop.f32.mrf.mxu1 }
 0x123   : > { %v2446_v43 = vpop.f32.mrf.mxu0  ;;  %v910_v1 = vadd.f32 %v2440_v58, %v2430_v34 }
 0x124   : > { %v901_v16 = vpop.f32.mrf.mxu1  ;;  %v1225_v35 = vadd.f32 %v2446_v43, %v894_v19 }
 0x125   : > { %v1192_v4 = vpop.f32.mrf.mxu0  ;;  %v902_v25 = vadd.f32 %v901_v16, %v750_v57 }
 0x126   : > { %v2441_v55 = vpop.f32.mrf.mxu1  ;;  %v1223_v63 = vadd.f32 %v1192_v4, %v886_v50 }
 0x127   : > { %v2447_v45 = vpop.f32.mrf.mxu0  ;;  %v913_v18 = vadd.f32 %v2441_v55, %v2431_v46 }
 0x128   : > { %v904_v61 = vpop.f32.mrf.mxu1  ;;  %v1226_v24 = vadd.f32 %v2447_v45, %v897_v62 }
 0x129   : > { %v1195_v6 = vpop.f32.mrf.mxu0  ;;  %v905_v5 = vadd.f32 %v904_v61, %v3196_v60 }
 0x12a   : > { %v2456_v27 = vpop.f32.mrf.mxu1  ;;  %v1224_v52 = vadd.f32 %v1195_v6, %v889_v41 }
 0x12b   : > { %v2450_v40 = vpop.f32.mrf.mxu0  ;;  %v1397_v36 = vadd.f32 %v2456_v27, %v1225_v35 }
 0x12c   : > { %v1364_v10 = vpop.f32.mrf.mxu1  ;;  %v1229_v56 = vadd.f32 %v2450_v40, %v910_v1 }
 0x12d   : > { %v1208_v54 = vpop.f32.mrf.mxu0  ;;  %v1395_v53 = vadd.f32 %v1364_v10, %v1223_v63 }
 0x12e   : > { %v2457_v31 = vpop.f32.mrf.mxu1  ;;  %v1227_v45 = vadd.f32 %v1208_v54, %v902_v25 }
 0x12f   : > { %v2451_v14 = vpop.f32.mrf.mxu0  ;;  %v1398_v2 = vadd.f32 %v2457_v31, %v1226_v24 }
 0x130   : > { %v1367_v0 = vpop.f32.mrf.mxu1  ;;  %v1230_v6 = vadd.f32 %v2451_v14, %v913_v18 }
 0x131   : > { %v1211_v12 = vpop.f32.mrf.mxu0  ;;  %v1396_v29 = vadd.f32 %v1367_v0, %v1224_v52 }
 0x132   : > { %v2460_v3 = vpop.f32.mrf.mxu1  ;;  %v1228_v40 = vadd.f32 %v1211_v12, %v905_v5 }
 0x133   : > { %v2466_v48 = vpop.f32.mrf.mxu0  ;;  %v1401_v58 = vadd.f32 %v2460_v3, %v1229_v56 }
 0x134   : > { %v1380_v11 = vpop.f32.mrf.mxu1  ;;  %v1511_v38 = vadd.f32 %v2466_v48, %v1397_v36 }
 0x135   : > { %v1478_v47 = vpop.f32.mrf.mxu0  ;;  %v1399_v31 = vadd.f32 %v1380_v11, %v1227_v45 }
 0x136   : > { %v2461_v39 = vpop.f32.mrf.mxu1  ;;  %v1509_v13 = vadd.f32 %v1478_v47, %v1395_v53 }
 0x137   : > { %v2467_v7 = vpop.f32.mrf.mxu0  ;;  %v1402_v0 = vadd.f32 %v2461_v39, %v1230_v6 }
 0x138   : > { %v1383_v23 = vpop.f32.mrf.mxu1  ;;  %v1512_v34 = vadd.f32 %v2467_v7, %v1398_v2 }
 0x139   : > { %v1481_v17 = vpop.f32.mrf.mxu0  ;;  %v1400_v7 = vadd.f32 %v1383_v23, %v1228_v40 }
 0x13a   : > { %v2476_v8 = vpop.f32.mrf.mxu1  ;;  %v1510_v16 = vadd.f32 %v1481_v17, %v1396_v29 }
 0x13b   : > { %v2470_v49 = vpop.f32.mrf.mxu0  ;;  %v1682_v43 = vadd.f32 %v2476_v8, %v1511_v38 }
 0x13c   : > { %v1649_v20 = vpop.f32.mrf.mxu1  ;;  %v1515_v8 = vadd.f32 %v2470_v49, %v1401_v58 }
 0x13d   : > { %v1494_v28 = vpop.f32.mrf.mxu0  ;;  %v1680_v27 = vadd.f32 %v1649_v20, %v1509_v13 }
 0x13e   : > { %v2477_v26 = vpop.f32.mrf.mxu1  ;;  %v1513_v20 = vadd.f32 %v1494_v28, %v1399_v31 }
 0x13f   : > { %v2471_v37 = vpop.f32.mrf.mxu0  ;;  %v1683_v46 = vadd.f32 %v2477_v26, %v1512_v34 }
 0x140   : > { %v1652_v51 = vpop.f32.mrf.mxu1  ;;  %v1516_v11 = vadd.f32 %v2471_v37, %v1402_v0 }
 0x141   : > { %v3198_v42 = vpop.f32.mrf.mxu0  ;;  %v1681_v60 = vadd.f32 %v1652_v51, %v1510_v16 }
 0x142   : > { %v2480_v9 = vpop.f32.mrf.mxu1  ;;  %v1514_v51 = vadd.f32 %v3198_v42, %v1400_v7 }
 0x143   : > { %v2486_v59 = vpop.f32.mrf.mxu0  ;;  %v1686_v14 = vadd.f32 %v2480_v9, %v1515_v8 }
 0x144   : > { %v1665_v44 = vpop.f32.mrf.mxu1  ;;  %v1854_v48 = vadd.f32 %v2486_v59, %v1682_v43 }
 0x145   : > { %v1821_v22 = vpop.f32.mrf.mxu0  ;;  %v1684_v49 = vadd.f32 %v1665_v44, %v1513_v20 }
 0x146   : > { %v2481_v30 = vpop.f32.mrf.mxu1  ;;  %v1852_v19 = vadd.f32 %v1821_v22, %v1680_v27 }
 0x147   : > { %v2487_v21 = vpop.f32.mrf.mxu0  ;;  %v1687_v9 = vadd.f32 %v2481_v30, %v1516_v11 }
 0x148   : > { %v1668_v33 = vpop.f32.mrf.mxu1  ;;  %v1855_v50 = vadd.f32 %v2487_v21, %v1683_v46 }
 0x149   : > { %v1824_v32 = vpop.f32.mrf.mxu0  ;;  %v1685_v24 = vadd.f32 %v1668_v33, %v1514_v51 }
 0x14a   : > { %v2496_v15 = vpop.f32.mrf.mxu1  ;;  %v1853_v39 = vadd.f32 %v1824_v32, %v1681_v60 }
 0x14b   : > { %v2490_v4 = vpop.f32.mrf.mxu0  ;;  %v1968_v61 = vadd.f32 %v2496_v15, %v1854_v48 }
 0x14c   : > { %v1935_v10 = vpop.f32.mrf.mxu1  ;;  %v1858_v37 = vadd.f32 %v2490_v4, %v1686_v14 }
 0x14d   : > { %v1837_v57 = vpop.f32.mrf.mxu0  ;;  %v1966_v35 = vadd.f32 %v1935_v10, %v1852_v19 }
 0x14e   : > { %v2497_v55 = vpop.f32.mrf.mxu1  ;;  %v1856_v22 = vadd.f32 %v1837_v57, %v1684_v49 }
 0x14f   : > { %v2491_v47 = vpop.f32.mrf.mxu0  ;;  %v1969_v26 = vadd.f32 %v2497_v55, %v1855_v50 }
 0x150   : > { %v1938_v54 = vpop.f32.mrf.mxu1  ;;  %v1859_v42 = vadd.f32 %v2491_v47, %v1687_v9 }
 0x151   : > { %v1840_v3 = vpop.f32.mrf.mxu0  ;;  %v1967_v63 = vadd.f32 %v1938_v54, %v1853_v39 }
 0x152   : > { %v2500_v17 = vpop.f32.mrf.mxu1  ;;  %v1857_v38 = vadd.f32 %v1840_v3, %v1685_v24 }
 0x153   : > { %v2506_v12 = vpop.f32.mrf.mxu0  ;;  %v1972_v1 = vadd.f32 %v2500_v17, %v1858_v37 }
 0x154   : > { %v2139_v23 = vadd.f32 %v2506_v12, %v1968_v61  ;;  %v1951_v28 = vpop.f32.mrf.mxu1 }
 0x155   : > { %v2106_v62 = vpop.f32.mrf.mxu0  ;;  %v1970_v21 = vadd.f32 %v1951_v28, %v1856_v22 }
 0x156   : > { %2148 = vst.msk [vmem:[%s3206_s24 + $0x10] sm:$0xff] %vm2145_vm10, %v2139_v23  ;;  %v2137_v59 = vadd.f32 %v2106_v62, %v1966_v35  ;;  %v2501_v36 = vpop.f32.mrf.mxu1 }
 0x157   : > { %v2507_v41 = vpop.f32.mrf.mxu0  ;;  %v1973_v33 = vadd.f32 %v2501_v36, %v1859_v42 }
 0x158   : > { %2146 = vst.msk [vmem:[%s3206_s24] sm:$0xff] %vm2145_vm10, %v2137_v59  ;;  %v2140_v44 = vadd.f32 %v2507_v41, %v1969_v26  ;;  %v1954_v25 = vpop.f32.mrf.mxu1 }
 0x159   : > { %v2109_v53 = vpop.f32.mrf.mxu0  ;;  %v1971_v56 = vadd.f32 %v1954_v25, %v1857_v38 }
 0x15a   : > { %2149 = vst.msk [vmem:[%s3206_s24 + $0x18] sm:$0xff] %vm2145_vm10, %v2140_v44  ;;  %v2138_v30 = vadd.f32 %v2109_v53, %v1967_v63 }
 0x15b   : > { %v2510_v52 = vpop.f32.mrf.mxu0 }
 0x15c   : > { %2147 = vst.msk [vmem:[%s3206_s24 + $0x8] sm:$0xff] %vm2145_vm10, %v2138_v30  ;;  %v2143_v2 = vadd.f32 %v2510_v52, %v1972_v1 }
 0x15d   : > { %v2122_v18 = vpop.f32.mrf.mxu0 }
 0x15e   : > { %2152 = vst.msk [vmem:[%s3206_s24 + $0x30] sm:$0xff] %vm2145_vm10, %v2143_v2  ;;  %v2141_v32 = vadd.f32 %v2122_v18, %v1970_v21 }
 0x15f   : > { %v2511_v13 = vpop.f32.mrf.mxu0 }
 0x160   : > { %2150 = vst.msk [vmem:[%s3206_s24 + $0x20] sm:$0xff] %vm2145_vm10, %v2141_v32  ;;  %v2144_v29 = vadd.f32 %v2511_v13, %v1973_v33 }
 0x161   : > { %v2125_v43 = vpop.f32.mrf.mxu0 }
 0x162   : > { %2153 = vst.msk [vmem:[%s3206_s24 + $0x38] sm:$0xff] %vm2145_vm10, %v2144_v29  ;;  %v2142_v15 = vadd.f32 %v2125_v43, %v1971_v56 }
 0x164   : > { %2151 = vst.msk [vmem:[%s3206_s24 + $0x28] sm:$0xff] %vm2145_vm10, %v2142_v15 }
 0x165 PF: > { %s14_s15 = sadd.s32 1, %s2548_s15  }
 0x166   : > { %p11_p4 = scmp.ge.s32.totalorder %s14_s15, 4  }
 0x168   :  { %13 = sbr.rel (!%p11_p4) target bundleno = 1 (0x1), region = 80 }

// kernel: ecn_pose_forward.23
= control target key start
LH: loop header
LB: loop body
LE: loop exit
PB: predicated region body
PF: predicated region fallthrough
CT: control target
= control target key end

     0   :  { %s368_s9 = smov 0   ;;  %s400_s0 = inlined_call_operand.vmem [shape: f32[2,4,2,4,64], index: 0, kind: input, shape index: {}]   ;;  %s401_s1 = inlined_call_operand.vmem [shape: f32[2,4,2,4,32], index: 1, kind: input, shape index: {}]   ;;  %s402_s2 = inlined_call_operand.vmem [shape: f32[2,4,4,32], index: 2, kind: output, shape index: {}]  }
   0x1 LB: > { %s317_s10 = sadd.s32 4294967295, %s349_s9   ;;  %p321_p0 = scmp.ge.s32.totalorder %s349_s9, 1  ;;  %s349_s9 = sphi %s368_s9, %s12_s9  }
   0x2   : > { %p122_p1 = scmp.lt.s32.totalorder %s349_s9, 3 }
   0x4   : > { %p123_p2 = pnand %p321_p0, %p122_p1 }
   0x5   : > { %p149_p3 = scmp.lt.s32.totalorder (!%p123_p2), %s317_s10, 1  ;;  %s351_s18 = smov (!%p123_p2), 112  }
   0x6   : > { %126 = sbr.rel (%p123_p2) target bundleno = 152 (0x98), region = 28  ;;  %s352_s19 = smov (!%p123_p2), 96  }
   0xb   : > { %s404_s10 = smov (!%p149_p3, %s317_s10), 1  ;;  %vm236_vm0 = vcmask 130048   ;;  %vm245_vm1 = vcmask 257024  }
   0xc   : > { %s330_s11 = sshll.u32 %s404_s10, 5  ;;  %s332_s20 = sshll.u32 %s404_s10, 4 }
   0xd   : > { %s158_s14 = scalar_lea.vmem %s401_s1, %s330_s11  ;;  %s153_s17 = scalar_lea.vmem %s400_s0, %s330_s11 }
   0xe   : > { %v176_v0 = vld [vmem:[%s158_s14 + $0x10] sm:$0xf]  ;;  %v177_v1 = vld [vmem:[%s158_s14 + $0x14] sm:$0xf]  ;;  %v172_v2 = vld [vmem:[%s158_s14] sm:$0xf]  ;;  %s163_s23 = scalar_lea.vmem %s402_s2, %s332_s20 }
   0xf   : > { %v186_v3 = vadd.f32 %v177_v1, %v176_v0  ;;  %v173_v4 = vld [vmem:[%s158_s14 + $0x4] sm:$0xf]  ;;  %v178_v5 = vld [vmem:[%s158_s14 + $0x18] sm:$0xf]  ;;  %v179_v6 = vld [vmem:[%s158_s14 + $0x1c] sm:$0xf] }
  0x10   : > { %v184_v7 = vadd.f32 %v173_v4, %v172_v2  ;;  %v174_v8 = vld [vmem:[%s158_s14 + $0x8] sm:$0xf]  ;;  %v175_v9 = vld [vmem:[%s158_s14 + $0xc] sm:$0xf]  ;;  %v187_v10 = vadd.f32 %v179_v6, %v178_v5  ;;  %v164_v14 = vld [vmem:[%s153_s17] sm:$0xf] }
  0x11   : > { %220 = vrot.lane.b32.xlu1 %v186_v3, %s351_s18  ;;  %v185_v11 = vadd.f32 %v175_v9, %v174_v8  ;;  %v166_v12 = vld [vmem:[%s153_s17 + $0x8] sm:$0xf]  ;;  %v167_v13 = vld [vmem:[%s153_s17 + $0xc] sm:$0xf]  ;;  %v165_v15 = vld [vmem:[%s153_s17 + $0x4] sm:$0xf] }
  0x12   : > { %216 = vrot.lane.b32.xlu0 %v184_v7, %s351_s18  ;;  %v181_v16 = vadd.f32 %v167_v13, %v166_v12  ;;  %v180_v17 = vadd.f32 %v165_v15, %v164_v14  ;;  %v170_v18 = vld [vmem:[%s153_s17 + $0x18] sm:$0xf]  ;;  %v171_v19 = vld [vmem:[%s153_s17 + $0x1c] sm:$0xf]  ;;  %v168_v20 = vld [vmem:[%s153_s17 + $0x10] sm:$0xf] }
  0x13   : > { %v169_v21 = vld [vmem:[%s153_s17 + $0x14] sm:$0xf]  ;;  %v183_v22 = vadd.f32 %v171_v19, %v170_v18 }
  0x14   : > { %v182_v23 = vadd.f32 %v169_v21, %v168_v20 }
  0x15   : > { %222 = vrot.lane.b32.xlu1 %v187_v10, %s351_s18 }
  0x16   : > { %218 = vrot.lane.b32.xlu0 %v185_v11, %s351_s18 }
  0x19   : > { %194 = vrot.lane.b32.xlu1 %v181_v16, %s352_s19 }
  0x1a   : > { %192 = vrot.lane.b32.xlu0 %v180_v17, %s352_s19 }
  0x1d   : > { %198 = vrot.lane.b32.xlu1 %v183_v22, %s352_s19 }
  0x1e   : > { %196 = vrot.lane.b32.xlu0 %v182_v23, %s352_s19 }
  0x83   : > { %v221_v24 = vpop.permute.xlu1 %220 }
  0x84   : > { %v217_v25 = vpop.permute.xlu0 %216  ;;  %v230_v33 = vadd.f32 %v221_v24, %v186_v3 }
  0x85   : > { %v228_v27 = vadd.f32 %v217_v25, %v184_v7 }
  0x86   : > { %v234_v43 = vmul.f32 0.25, %v230_v33 }
  0x87   : > { %v223_v26 = vpop.permute.xlu1 %222  ;;  %v232_v34 = vmul.f32 0.25, %v228_v27 }
  0x88   : > { %v219_v28 = vpop.permute.xlu0 %218  ;;  %v231_v30 = vadd.f32 %v223_v26, %v187_v10  ;;  %v239_v53 = vsel %vm236_vm0, %v234_v43, 0.0 }
  0x89   : > { %v229_v29 = vadd.f32 %v219_v28, %v185_v11  ;;  %v237_v44 = vsel %vm236_vm0, %v232_v34, 0.0 }
  0x8a   : > { %v235_v39 = vmul.f32 0.25, %v231_v30 }
  0x8b   : > { %v233_v31 = vmul.f32 0.25, %v229_v29  ;;  %v195_v32 = vpop.permute.xlu1 %194 }
  0x8c   : > { %v205_v35 = vadd.f32 %v195_v32, %v181_v16  ;;  %v193_v36 = vpop.permute.xlu0 %192  ;;  %v240_v51 = vsel %vm236_vm0, %v235_v39, 0.0 }
  0x8d   : > { %v204_v37 = vadd.f32 %v193_v36, %v180_v17  ;;  %v238_v40 = vsel %vm236_vm0, %v233_v31, 0.0 }
  0x8e   : > { %v209_v38 = vmul.f32 0.25, %v205_v35 }
  0x8f   : > { %v208_v41 = vmul.f32 0.25, %v204_v37  ;;  %v199_v42 = vpop.permute.xlu1 %198 }
  0x90   : > { %v242_v45 = vadd.f32 %v238_v40, %v209_v38  ;;  %v207_v46 = vadd.f32 %v199_v42, %v183_v22  ;;  %v197_v47 = vpop.permute.xlu0 %196 }
  0x91   : > { %v241_v48 = vadd.f32 %v237_v44, %v208_v41  ;;  %v206_v49 = vadd.f32 %v197_v47, %v182_v23 }
  0x92   : > { %247 = vst.msk [vmem:[%s163_s23 + $0x4] sm:$0xf] %vm245_vm1, %v242_v45  ;;  %v211_v50 = vmul.f32 0.25, %v207_v46 }
  0x93   : > { %246 = vst.msk [vmem:[%s163_s23] sm:$0xf] %vm245_vm1, %v241_v48  ;;  %v210_v52 = vmul.f32 0.25, %v206_v49 }
  0x94   : > { %v244_v54 = vadd.f32 %v240_v51, %v211_v50 }
  0x95   : > { %v243_v55 = vadd.f32 %v239_v53, %v210_v52 }
  0x96   : > { %249 = vst.msk [vmem:[%s163_s23 + $0xc] sm:$0xf] %vm245_vm1, %v244_v54 }
  0x97   : > { %248 = vst.msk [vmem:[%s163_s23 + $0x8] sm:$0xf] %vm245_vm1, %v243_v55 }
  0x98 PF: > { %s12_s9 = sadd.s32 1, %s349_s9  }
  0x99   : > { %p9_p4 = scmp.ge.s32.totalorder %s12_s9, 4  }
  0x9b   :  { %11 = sbr.rel (!%p9_p4) target bundleno = 1 (0x1), region = 61 }

// kernel: ecn_pose_forward.24
= control target key start
LH: loop header
LB: loop body
LE: loop exit
PB: predicated region body
PF: predicated region fallthrough
CT: control target
= control target key end

     0   :  { %s788_s21 = smov 0   ;;  %s847_s0 = inlined_call_operand.vmem [shape: f32[2,16,32], index: 0, kind: input, shape index: {}]   ;;  %s848_s1 = inlined_call_operand.vmem [shape: f32[32,16], index: 1, kind: input, shape index: {}]   ;;  %s849_s2 = inlined_call_operand.vmem [shape: f32[16,32], index: 2, kind: input, shape index: {}]   ;;  %s850_s3 = inlined_call_operand.vmem [shape: f32[1,32], index: 3, kind: input, shape index: {}]   ;;  %s851_s4 = inlined_call_operand.vmem [shape: f32[1,32], index: 4, kind: input, shape index: {}]   ;;  %s852_s5 = inlined_call_operand.vmem [shape: f32[2,1,32], index: 5, kind: output, shape index: {0}]   ;;  %s853_s6 = inlined_call_operand.vmem [shape: f32[2,1,32], index: 6, kind: output, shape index: {1}]  }
   0x1 LB: > { %s665_s22 = sadd.s32 4294967295, %s749_s21   ;;  %p669_p0 = scmp.ge.s32.totalorder %s749_s21, 1  ;;  %s749_s21 = sphi %s788_s21, %s17_s21  }
   0x2   : > { %p215_p1 = scmp.lt.s32.totalorder %s749_s21, 3 }
   0x4   : > { %p216_p2 = pnand %p669_p0, %p215_p1 }
   0x5   : > { %p246_p3 = scmp.lt.s32.totalorder (!%p216_p2), %s665_s22, 1 }
   0x6   : > { %219 = sbr.rel (%p216_p2) target bundleno = 447 (0x1bf), region = 40 }
   0xb   : > { %v283_v0 = vld [vmem:[%s848_s1 + $0x18] sm:$0xff]  ;;  %v751_v1 = vmov 0.0   ;;  %v282_v2 = vld [vmem:[%s848_s1 + $0x10] sm:$0xff]  ;;  %s855_s22 = smov (!%p246_p3, %s665_s22), 1  ;;  %v281_v3 = vld [vmem:[%s848_s1 + $0x8] sm:$0xff]  ;;  %vm259_vm0 = vcmask 261120  }
   0xc   : > { %695 = vmatprep.subr.mxu0 %v751_v1  ;;  %706 = vmatprep.subr.mxu1 %v751_v1  ;;  %s678_s29 = sshll.u32 %s855_s22, 4  ;;  %v280_v4 = vld [vmem:[%s848_s1] sm:$0xff]  ;;  %vm752_vm1 = vmmov 0   ;;  %v436_v27 = vld [vmem:[%s849_s2 + $0x8] sm:$0xff]  ;;  %vm437_vm2 = vcmask 130048   ;;  %s253_s19 = scalar_lea.vmem %s852_s5, %s855_s22  ;;  %vm587_vm3 = vcmask 253952  }
   0xd   : > { %696 = vmatpush3.msra.mxu0 %v283_v0  ;;  %707 = vmatpush3.msra.mxu1 %v283_v0  ;;  %s250_s10 = scalar_lea.vmem %s847_s0, %s678_s29  ;;  %v435_v28 = vld [vmem:[%s849_s2] sm:$0xff]  ;;  %s256_s26 = scalar_lea.vmem %s853_s6, %s855_s22 }
   0xe   : > { %697 = vmatprep.subr.mxu0 %v751_v1  ;;  %708 = vmatprep.subr.mxu1 %v751_v1  ;;  %v257_v5 = vld [vmem:[%s250_s10] sm:$0xff]  ;;  %v258_v6 = vld [vmem:[%s250_s10 + $0x8] sm:$0xff] }
   0xf   : > { %698 = vmatpush3.msra.mxu0 %v282_v2  ;;  %709 = vmatpush3.msra.mxu1 %v282_v2  ;;  %v260_v7 = vsel %vm259_vm0, %v257_v5, 0.0  ;;  %v261_v8 = vsel %vm259_vm0, %v258_v6, 0.0  ;;  %v269_v9 = vmul.f32 %v257_v5, %v257_v5  ;;  %v270_v10 = vmul.f32 %v258_v6, %v258_v6  ;;  %v585_v43 = vld [vmem:[%s850_s3] sm:$0x1] }
  0x10   : > { %699 = vmatprep.subr.mxu0 %v751_v1  ;;  %710 = vmatprep.subr.mxu1 %v751_v1  ;;  %v262_v11 = vadd.f32 %v261_v8, %v260_v7  ;;  %v589_v46 = vld [vmem:[%s851_s4] sm:$0x1] }
  0x11   : > { %700 = vmatpush3.msra.mxu0 %v281_v3  ;;  %703 = vmatprep.mubr.msk.f32.mxu0 %vm752_vm1, %v751_v1  ;;  %v271_v12 = vsel %vm259_vm0, %v269_v9, 0.0  ;;  %v272_v13 = vsel %vm259_vm0, %v270_v10, 0.0 }
  0x12   : > { %701 = vmatprep.subr.mxu0 %v751_v1  ;;  %711 = vmatpush3.msra.mxu1 %v281_v3  ;;  %v263_v14 = vrot.slane %v262_v11, 4  ;;  %v273_v15 = vadd.f32 %v272_v13, %v271_v12 }
  0x13   : > { %702 = vmatpush3.msra.mxu0 %v280_v4  ;;  %712 = vmatprep.subr.mxu1 %v751_v1 }
  0x14   : > { %713 = vmatpush3.msra.mxu1 %v280_v4  ;;  %714 = vmatprep.mubr.msk.f32.mxu1 %vm752_vm1, %v751_v1  ;;  %v264_v16 = vadd.f32 %v263_v14, %v262_v11  ;;  %v274_v17 = vrot.slane %v273_v15, 4 }
  0x15   : > { %717 = vmatprep.subr.mxu0 %v751_v1  ;;  %724 = vmatprep.subr.mxu1 %v751_v1 }
  0x16   : > { %v265_v18 = vrot.slane %v264_v16, 2  ;;  %v275_v19 = vadd.f32 %v274_v17, %v273_v15 }
  0x18   : > { %v266_v20 = vadd.f32 %v265_v18, %v264_v16  ;;  %v276_v21 = vrot.slane %v275_v19, 2 }
  0x1a   : > { %v267_v22 = vrot.slane %v266_v20, 1  ;;  %v277_v23 = vadd.f32 %v276_v21, %v275_v19 }
  0x1c   : > { %v268_v24 = vadd.f32 %v267_v22, %v266_v20  ;;  %v278_v25 = vrot.slane %v277_v23, 1 }
  0x1e   : > { %704 = vmatmul.mubr.msk.f32.vlgmr.msra.gmra.mxu0 %vm259_vm0, %v268_v24  ;;  %v279_v26 = vadd.f32 %v278_v25, %v277_v23 }
  0x1f   : > { %721 = vmatprep.mubr.msk.f32.mxu0 %vm752_vm1, %v751_v1  ;;  %718 = vmatpush3.msra.mxu0 %v436_v27 }
  0x20   : > { %715 = vmatmul.mubr.msk.f32.vlgmr.msra.gmra.mxu1 %vm259_vm0, %v279_v26  ;;  %719 = vmatprep.subr.mxu0 %v751_v1 }
  0x21   : > { %728 = vmatprep.mubr.msk.f32.mxu1 %vm752_vm1, %v751_v1  ;;  %725 = vmatpush3.msra.mxu1 %v436_v27 }
  0x22   : > { %726 = vmatprep.subr.mxu1 %v751_v1  ;;  %720 = vmatpush3.msra.mxu0 %v435_v28 }
  0x23   : > { %727 = vmatpush3.msra.mxu1 %v435_v28 }
  0xde   : > { %v353_v29 = vpop.f32.mrf.mxu0 }
  0xdf   : > { %v430_v30 = vmul.f32 0.03125, %v353_v29 }
  0xe0   : > { %v705_v31 = vpop.f32.mrf.mxu0  ;;  %v426_v32 = vpop.f32.mrf.mxu1 }
  0xe1   : > { %v432_v33 = vmul.f32 %v430_v30, %v430_v30  ;;  %v431_v34 = vmul.f32 0.03125, %v426_v32  ;;  %722 = vmatmul.mubr.msk.f32.vlgmr.msra.gmra.mxu0 %vm437_vm2, %v430_v30 }
  0xe2   : > { %v716_v35 = vpop.f32.mrf.mxu1 }
  0xe3   : > { %v433_v36 = vsub.f32 %v431_v34, %v432_v33 }
  0xe5   : > { %v434_v37 = vmax.f32 %v433_v36, 0.0 }
  0xe7   : > { %729 = vmatmul.mubr.msk.f32.vlgmr.msra.gmra.mxu1 %vm437_vm2, %v434_v37 }
 0x1a1   : > { %v507_v38 = vpop.f32.mrf.mxu0 }
 0x1a3   : > { %v723_v39 = vpop.f32.mrf.mxu0 }
 0x1a7   : > { %v580_v40 = vpop.f32.mrf.mxu1 }
 0x1a8   : > { %v581_v41 = vadd.f32 1e-05, %v580_v40 }
 0x1a9   : > { %v730_v42 = vpop.f32.mrf.mxu1 }
 0x1aa   : > { %741 = vrsqrt.f32 %v581_v41 }
 0x1b7   : > { %v742_v44 = vpop.eup %741 }
 0x1b8   : > { %v586_v45 = vmul.f32 %v742_v44, %v585_v43 }
 0x1ba   : > { %588 = vst.msk [vmem:[%s253_s19] sm:$0x1] %vm587_vm3, %v586_v45  ;;  %v590_v47 = vmul.f32 %v586_v45, %v507_v38 }
 0x1bc   : > { %v591_v48 = vsub.f32 %v589_v46, %v590_v47 }
 0x1be   : > { %592 = vst.msk [vmem:[%s256_s26] sm:$0x1] %vm587_vm3, %v591_v48 }
 0x1bf PF: > { %s17_s21 = sadd.s32 1, %s749_s21  }
 0x1c0   : > { %p14_p4 = scmp.ge.s32.totalorder %s17_s21, 4  }
 0x1c2   :  { %16 = sbr.rel (!%p14_p4) target bundleno = 1 (0x1), region = 82 }

// kernel: ecn_pose_forward.26
= control target key start
LH: loop header
LB: loop body
LE: loop exit
PB: predicated region body
PF: predicated region fallthrough
CT: control target
= control target key end

     0   :  { %s802_s21 = smov 0   ;;  %s887_s0 = inlined_call_operand.vmem [shape: f32[2,16,48], index: 0, kind: input, shape index: {}]   ;;  %s888_s1 = inlined_call_operand.vmem [shape: f32[48,16], index: 1, kind: input, shape index: {}]   ;;  %s889_s2 = inlined_call_operand.vmem [shape: f32[16,48], index: 2, kind: input, shape index: {}]   ;;  %s890_s3 = inlined_call_operand.vmem [shape: f32[1,48], index: 3, kind: input, shape index: {}]   ;;  %s891_s4 = inlined_call_operand.vmem [shape: f32[1,48], index: 4, kind: input, shape index: {}]   ;;  %s892_s5 = inlined_call_operand.vmem [shape: f32[2,1,48], index: 5, kind: output, shape index: {0}]   ;;  %s893_s6 = inlined_call_operand.vmem [shape: f32[2,1,48], index: 6, kind: output, shape index: {1}]  }
   0x1 LB: > { %s667_s22 = sadd.s32 4294967295, %s763_s21   ;;  %p671_p0 = scmp.ge.s32.totalorder %s763_s21, 1  ;;  %s763_s21 = sphi %s802_s21, %s17_s21  }
   0x2   : > { %p215_p1 = scmp.lt.s32.totalorder %s763_s21, 3 }
   0x4   : > { %p216_p2 = pnand %p671_p0, %p215_p1 }
   0x5   : > { %p246_p3 = scmp.lt.s32.totalorder (!%p216_p2), %s667_s22, 1 }
   0x6   : > { %219 = sbr.rel (%p216_p2) target bundleno = 447 (0x1bf), region = 40 }
   0xb   : > { %v285_v0 = vld [vmem:[%s888_s1 + $0x28] sm:$0xff]  ;;  %v765_v1 = vmov 0.0   ;;  %v284_v2 = vld [vmem:[%s888_s1 + $0x20] sm:$0xff]  ;;  %s895_s22 = smov (!%p246_p3, %s667_s22), 1  ;;  %v283_v3 = vld [vmem:[%s888_s1 + $0x18] sm:$0xff]  ;;  %vm259_vm0 = vcmask 392192  }
   0xc   : > { %701 = vmatprep.subr.mxu0 %v765_v1  ;;  %716 = vmatprep.subr.mxu1 %v765_v1  ;;  %s680_s29 = sshll.u32 %s895_s22, 4  ;;  %v282_v4 = vld [vmem:[%s888_s1 + $0x10] sm:$0xff]  ;;  %v281_v7 = vld [vmem:[%s888_s1 + $0x8] sm:$0xff]  ;;  %v280_v13 = vld [vmem:[%s888_s1] sm:$0xff]  ;;  %vm766_vm1 = vmmov 0   ;;  %vm439_vm2 = vcmask 130048   ;;  %s253_s25 = scalar_lea.vmem %s892_s5, %s895_s22 }
   0xd   : > { %702 = vmatpush3.msra.mxu0 %v285_v0  ;;  %717 = vmatpush3.msra.mxu1 %v285_v0  ;;  %s250_s10 = scalar_lea.vmem %s887_s0, %s680_s29  ;;  %v438_v29 = vld [vmem:[%s889_s2 + $0x8] sm:$0xff]  ;;  %v437_v30 = vld [vmem:[%s889_s2] sm:$0xff]  ;;  %vm589_vm3 = vcmask 385024   ;;  %s256_s30 = scalar_lea.vmem %s893_s6, %s895_s22 }
   0xe   : > { %703 = vmatprep.subr.mxu0 %v765_v1  ;;  %718 = vmatprep.subr.mxu1 %v765_v1  ;;  %v257_v5 = vld [vmem:[%s250_s10] sm:$0xff]  ;;  %v258_v6 = vld [vmem:[%s250_s10 + $0x8] sm:$0xff] }
   0xf   : > { %704 = vmatpush3.msra.mxu0 %v284_v2  ;;  %719 = vmatpush3.msra.mxu1 %v284_v2  ;;  %v260_v8 = vsel %vm259_vm0, %v257_v5, 0.0  ;;  %v261_v9 = vsel %vm259_vm0, %v258_v6, 0.0  ;;  %v269_v10 = vmul.f32 %v257_v5, %v257_v5  ;;  %v270_v11 = vmul.f32 %v258_v6, %v258_v6  ;;  %v587_v45 = vld [vmem:[%s890_s3] sm:$0x1] }
  0x10   : > { %705 = vmatprep.subr.mxu0 %v765_v1  ;;  %720 = vmatprep.subr.mxu1 %v765_v1  ;;  %v262_v12 = vadd.f32 %v261_v9, %v260_v8  ;;  %v591_v48 = vld [vmem:[%s891_s4] sm:$0x1] }
  0x11   : > { %706 = vmatpush3.msra.mxu0 %v283_v3  ;;  %721 = vmatpush3.msra.mxu1 %v283_v3  ;;  %v271_v14 = vsel %vm259_vm0, %v269_v10, 0.0  ;;  %v272_v15 = vsel %vm259_vm0, %v270_v11, 0.0 }
  0x12   : > { %707 = vmatprep.subr.mxu0 %v765_v1  ;;  %722 = vmatprep.subr.mxu1 %v765_v1  ;;  %v263_v16 = vrot.slane %v262_v12, 4  ;;  %v273_v17 = vadd.f32 %v272_v15, %v271_v14 }
  0x13   : > { %708 = vmatpush3.msra.mxu0 %v282_v4  ;;  %723 = vmatpush3.msra.mxu1 %v282_v4 }
  0x14   : > { %709 = vmatprep.subr.mxu0 %v765_v1  ;;  %724 = vmatprep.subr.mxu1 %v765_v1  ;;  %v264_v18 = vadd.f32 %v263_v16, %v262_v12  ;;  %v274_v19 = vrot.slane %v273_v17, 4 }
  0x15   : > { %710 = vmatpush3.msra.mxu0 %v281_v7  ;;  %713 = vmatprep.mubr.msk.f32.mxu0 %vm766_vm1, %v765_v1 }
  0x16   : > { %711 = vmatprep.subr.mxu0 %v765_v1  ;;  %725 = vmatpush3.msra.mxu1 %v281_v7  ;;  %v265_v20 = vrot.slane %v264_v18, 2  ;;  %v275_v21 = vadd.f32 %v274_v19, %v273_v17 }
  0x17   : > { %712 = vmatpush3.msra.mxu0 %v280_v13  ;;  %726 = vmatprep.subr.mxu1 %v765_v1 }
  0x18   : > { %727 = vmatpush3.msra.mxu1 %v280_v13  ;;  %728 = vmatprep.mubr.msk.f32.mxu1 %vm766_vm1, %v765_v1  ;;  %v266_v22 = vadd.f32 %v265_v20, %v264_v18  ;;  %v276_v23 = vrot.slane %v275_v21, 2 }
  0x19   : > { %731 = vmatprep.subr.mxu0 %v765_v1  ;;  %738 = vmatprep.subr.mxu1 %v765_v1 }
  0x1a   : > { %v267_v24 = vrot.slane %v266_v22, 1  ;;  %v277_v25 = vadd.f32 %v276_v23, %v275_v21 }
  0x1c   : > { %v268_v26 = vadd.f32 %v267_v24, %v266_v22  ;;  %v278_v27 = vrot.slane %v277_v25, 1 }
  0x1e   : > { %714 = vmatmul.mubr.msk.f32.vlgmr.msra.gmra.mxu0 %vm259_vm0, %v268_v26  ;;  %v279_v28 = vadd.f32 %v278_v27, %v277_v25 }
  0x1f   : > { %735 = vmatprep.mubr.msk.f32.mxu0 %vm766_vm1, %v765_v1  ;;  %732 = vmatpush3.msra.mxu0 %v438_v29 }
  0x20   : > { %729 = vmatmul.mubr.msk.f32.vlgmr.msra.gmra.mxu1 %vm259_vm0, %v279_v28  ;;  %733 = vmatprep.subr.mxu0 %v765_v1 }
  0x21   : > { %742 = vmatprep.mubr.msk.f32.mxu1 %vm766_vm1, %v765_v1  ;;  %739 = vmatpush3.msra.mxu1 %v438_v29 }
  0x22   : > { %740 = vmatprep.subr.mxu1 %v765_v1  ;;  %734 = vmatpush3.msra.mxu0 %v437_v30 }
  0x23   : > { %741 = vmatpush3.msra.mxu1 %v437_v30 }
  0xde   : > { %v355_v31 = vpop.f32.mrf.mxu0 }
  0xdf   : > { %v432_v32 = vmul.f32 0.020833334, %v355_v31 }
  0xe0   : > { %v715_v33 = vpop.f32.mrf.mxu0  ;;  %v428_v34 = vpop.f32.mrf.mxu1 }
  0xe1   : > { %v434_v35 = vmul.f32 %v432_v32, %v432_v32  ;;  %v433_v36 = vmul.f32 0.020833334, %v428_v34  ;;  %736 = vmatmul.mubr.msk.f32.vlgmr.msra.gmra.mxu0 %vm439_vm2, %v432_v32 }
  0xe2   : > { %v730_v37 = vpop.f32.mrf.mxu1 }
  0xe3   : > { %v435_v38 = vsub.f32 %v433_v36, %v434_v35 }
  0xe5   : > { %v436_v39 = vmax.f32 %v435_v38, 0.0 }
  0xe7   : > { %743 = vmatmul.mubr.msk.f32.vlgmr.msra.gmra.mxu1 %vm439_vm2, %v436_v39 }
 0x1a1   : > { %v509_v40 = vpop.f32.mrf.mxu0 }
 0x1a3   : > { %v737_v41 = vpop.f32.mrf.mxu0 }
 0x1a7   : > { %v582_v42 = vpop.f32.mrf.mxu1 }
 0x1a8   : > { %v583_v43 = vadd.f32 1e-05, %v582_v42 }
 0x1a9   : > { %v744_v44 = vpop.f32.mrf.mxu1 }
 0x1aa   : > { %755 = vrsqrt.f32 %v583_v43 }
 0x1b7   : > { %v756_v46 = vpop.eup %755 }
 0x1b8   : > { %v588_v47 = vmul.f32 %v756_v46, %v587_v45 }
 0x1ba   : > { %590 = vst.msk [vmem:[%s253_s25] sm:$0x1] %vm589_vm3, %v588_v47  ;;  %v592_v49 = vmul.f32 %v588_v47, %v509_v40 }
 0x1bc   : > { %v593_v50 = vsub.f32 %v591_v48, %v592_v49 }
 0x1be   : > { %594 = vst.msk [vmem:[%s256_s30] sm:$0x1] %vm589_vm3, %v593_v50 }
 0x1bf PF: > { %s17_s21 = sadd.s32 1, %s763_s21  }
 0x1c0   : > { %p14_p4 = scmp.ge.s32.totalorder %s17_s21, 4  }
 0x1c2   :  { %16 = sbr.rel (!%p14_p4) target bundleno = 1 (0x1), region = 82 }

// kernel: ecn_pose_forward.25
= control target key start
LH: loop header
LB: loop body
LE: loop exit
PB: predicated region body
PF: predicated region fallthrough
CT: control target
= control target key end

     0   :  { %s1531_s15 = smov 0   ;;  %s1780_s0 = inlined_call_operand.vmem [shape: f32[2,16,32], index: 0, kind: input, shape index: {}]   ;;  %s1781_s1 = inlined_call_operand.vmem [shape: f32[2,1,32], index: 1, kind: input, shape index: {}]   ;;  %s1782_s2 = inlined_call_operand.vmem [shape: f32[2,1,32], index: 2, kind: input, shape index: {}]   ;;  %s1783_s3 = inlined_call_operand.vmem [shape: bf16[9,32,48], index: 3, kind: input, shape index: {}]   ;;  %s1784_s4 = inlined_call_operand.vmem [shape: f32[2,16,48], index: 4, kind: output, shape index: {}]  }
   0x1 LB: > { %s1259_s16 = sadd.s32 4294967295, %s1499_s15   ;;  %p1263_p0 = scmp.ge.s32.totalorder %s1499_s15, 1  ;;  %s1499_s15 = sphi %s1531_s15, %s14_s15  }
   0x2   : > { %p178_p1 = scmp.lt.s32.totalorder %s1499_s15, 3 }
   0x4   : > { %p179_p2 = pnand %p1263_p0, %p178_p1 }
   0x5   : > { %p210_p3 = scmp.lt.s32.totalorder (!%p179_p2), %s1259_s16, 1 }
   0x6   : > { %182 = sbr.rel (%p179_p2) target bundleno = 274 (0x112), region = 36 }
   0xb   : > { %v1470_v0 = vld [vmem:[%s1783_s3 + $0x18] sm:$0xff]   ;;  %v264_v1 = vlaneseq  ;;  %v1501_v2 = vmov 0.0   ;;  %v1471_v3 = vld [vmem:[%s1783_s3 + $0x10] sm:$0xff]   ;;  %v1472_v4 = vld [vmem:[%s1783_s3 + $0x8] sm:$0xff]   ;;  %vm1502_vm0 = vmmov 0   ;;  %vm227_vm1 = vcmask 257024  }
   0xc   : > { %1385 = vmatprep.subr.bf16.mxu0 %v1501_v2  ;;  %1393 = vmatprep.subr.bf16.mxu1 %v1501_v2  ;;  %s1788_s16 = smov (!%p210_p3, %s1259_s16), 1  ;;  %v1503_v6 = vmov 0   ;;  %v1504_v7 = vmov 839922192   ;;  %v1476_v9 = vld [vmem:[%s1783_s3] sm:$0xff]   ;;  %vm369_vm9 = vcmask 1045504  }
   0xd   : > { %1386 = vmatpush3.bf16.msra.mxu0 %v1470_v0  ;;  %1389 = vmatprep.mubr.msk.bf16.mxu0 %vm1502_vm0, %v1501_v2  ;;  %v265_v5 = vshrl.u32 %v264_v1, 7  ;;  %228 = vst.msk [vmem:[#allocation2] sm:$0xf] %vm227_vm1, %v1503_v6  ;;  %229 = vst.msk [vmem:[#allocation2 + $0x4] sm:$0xf] %vm227_vm1, %v1503_v6  ;;  %v310_v8 = vunpack.c.l.s4 %v1504_v7  ;;  %s1354_s25 = sshll.u32 %s1788_s16, 4  ;;  %s217_s28 = scalar_lea.vmem %s1781_s1, %s1788_s16 }
   0xe   : > { %1387 = vmatprep.subr.bf16.mxu0 %v1501_v2  ;;  %1397 = vmatprep.mubr.msk.bf16.mxu1 %vm1502_vm0, %v1501_v2  ;;  %230 = vst.msk [vmem:[#allocation2 + $0x8] sm:$0xf] %vm227_vm1, %v1503_v6  ;;  %231 = vst.msk [vmem:[#allocation2 + $0xc] sm:$0xf] %vm227_vm1, %v1503_v6  ;;  %v1505_v12 = vmov 1985246804   ;;  %s214_s5 = scalar_lea.vmem %s1780_s0, %s1354_s25  ;;  %s220_s8 = scalar_lea.vmem %s1782_s2, %s1788_s16 }
   0xf   : > { %1394 = vmatpush3.bf16.msra.mxu1 %v1472_v4  ;;  %v266_v10 = vadd.s32 8, %v265_v5  ;;  %v271_v11 = vand.u32 3, %v265_v5  ;;  %v317_v13 = vunpack.c.l.s4 %v1505_v12  ;;  %v311_v14 = vunpack.c.0.s8 %v310_v8  ;;  %v1268_v15 = vld [vmem:[%s217_s28] ss:$0 sm:$0xff]  ;;  %v233_v19 = vld [vmem:[%s214_s5 + $0x8] sm:$0xff]  ;;  %s225_s18 = scalar_lea.vmem %s1784_s4, %s1354_s25 }
  0x10   : > { %1395 = vmatprep.subr.bf16.mxu1 %v1501_v2  ;;  %v232_v18 = vld [vmem:[%s214_s5] sm:$0xff]  ;;  %v242_v25 = vmul.f32 %v1268_v15, %v233_v19  ;;  %vm528_vm6 = vsmask.f32 2304  ;;  %vm529_vm7 = vsmask.f32 6416  ;;  %vm385_vm14 = vcmask 261120  }
  0x11   : > { %1388 = vmatpush3.bf16.msra.mxu0 %v1471_v3  ;;  %v278_v16 = vand.u32 3, %v266_v10  ;;  %vm291_vm2 = vcmp.ne.s32.totalorder %v271_v11, 0  ;;  %vm298_vm3 = vcmp.ne.s32.totalorder %v271_v11, 3  ;;  %v318_v17 = vunpack.c.0.s8 %v317_v13  ;;  %v1269_v20 = vld [vmem:[%s220_s8] ss:$0 sm:$0xff]  ;;  %vm530_vm12 = vmor %vm528_vm6, %vm529_vm7 }
  0x12   : > { %1401 = vmatprep.subr.bf16.mxu0 %v1501_v2  ;;  %v1272_v21 = vsel %vm291_vm2, 1.0, %v1501_v2  ;;  %v1274_v22 = vsel %vm298_vm3, 1.0, %v1501_v2  ;;  %v314_v23 = vsub.s32 %v311_v14, %v265_v5  ;;  %v241_v24 = vmul.f32 %v1268_v15, %v232_v18 }
  0x13   : > { %1396 = vmatpush3.bf16.msra.mxu1 %v1476_v9  ;;  %vm292_vm4 = vcmp.ne.s32.totalorder %v278_v16, 0  ;;  %vm299_vm5 = vcmp.ne.s32.totalorder %v278_v16, 3  ;;  %v321_v28 = vsub.s32 %v318_v17, %v265_v5  ;;  %v251_v30 = vadd.f32 %v1269_v20, %v242_v25 }
  0x14   : > { %1409 = vmatprep.subr.bf16.mxu1 %v1501_v2  ;;  %v1273_v26 = vsel %vm292_vm4, 1.0, %v1501_v2  ;;  %v1275_v27 = vsel %vm299_vm5, 1.0, %v1501_v2  ;;  %v250_v29 = vadd.f32 %v1269_v20, %v241_v24  ;;  %vm323_vm8 = vsmask.f32 1280  ;;  %v305_v56 = vld [vmem:[#allocation2] sm:$0xe] }
  0x15   : > { %v297_v31 = vpack.c.bf16 %v1273_v26, %v1272_v21  ;;  %v304_v32 = vpack.c.bf16 %v1275_v27, %v1274_v22  ;;  %v253_v34 = vmax.f32 %v251_v30, 0.0  ;;  %v355_v60 = vld [vmem:[#allocation2] sm:$0xc]  ;;  %vm324_vm10 = vsmask.f32 5392 }
  0x16   : > { %v252_v33 = vmax.f32 %v250_v29, 0.0  ;;  %vm647_vm11 = vsmask.f32 3328  ;;  %vm648_vm13 = vsmask.f32 7440  ;;  %vm325_vm15 = vmor %vm323_vm8, %vm324_vm10  ;;  %v1475_v29 = vld [vmem:[%s1783_s3 + $0x28] sm:$0xff]  }
  0x17   : > { %v315_v35 = vrot.slane %v297_v31, %v314_v23  ;;  %v322_v36 = vrot.slane %v297_v31, %v321_v28  ;;  %v1585_v37 = vrot.slane %v304_v32, %v314_v23  ;;  %v1587_v38 = vrot.slane %v304_v32, %v321_v28  ;;  %v645_v14 = vld [vmem:[#allocation2] sm:$0x8]  ;;  %v1647_v30 = vld [vmem:[#allocation2 + $0xc] sm:$0x3] }
  0x18   : > { %v1356_v39 = vpack.c.bf16 %v252_v33, %v252_v33  ;;  %v1357_v40 = vpack.c.bf16 %v253_v34, %v253_v34  ;;  %vm569_vm2 = vsmask.f32 5376  ;;  %vm438_vm3 = vsmask.f32 6400 }
  0x19   : > { %v336_v41 = vshrl.u32 %v322_v36, 16  ;;  %v339_v42 = vshll.u32 %v322_v36, 16  ;;  %v532_v43 = vshrl.u32 %v1585_v37, 16  ;;  %v535_v44 = vshll.u32 %v1585_v37, 16  ;;  %v1480_v37 = vld [vmem:[%s1783_s3 + $0x30] sm:$0xff]  }
  0x1a   : > { %v541_v45 = vshrl.u32 %v1587_v38, 16  ;;  %v544_v46 = vshll.u32 %v1587_v38, 16  ;;  %262 = vst.msk [vmem:[#allocation2 + $0x4] sm:$0xf] %vm227_vm1, %v1356_v39  ;;  %263 = vst.msk [vmem:[#allocation2 + $0x8] sm:$0xf] %vm227_vm1, %v1357_v40 }
  0x1b   : > { %v338_v47 = vrot.slane %v336_v41, 6  ;;  %v341_v48 = vrot.slane %v339_v42, 7  ;;  %v327_v49 = vshrl.u32 %v315_v35, 16  ;;  %v330_v50 = vshll.u32 %v315_v35, 16  ;;  %vm1635_vm1 = vmor %vm647_vm11, %vm648_vm13 }
  0x1c   : > { %v534_v51 = vrot.slane %v532_v43, 5  ;;  %v537_v52 = vrot.slane %v535_v44, 6  ;;  %v543_v53 = vrot.slane %v541_v45, 5  ;;  %v546_v54 = vrot.slane %v544_v46, 6 }
  0x1d   : > { %v1603_v55 = vor.u32 %v341_v48, %v338_v47  ;;  %v329_v57 = vrot.slane %v327_v49, 6  ;;  %v332_v58 = vrot.slane %v330_v50, 7  ;;  %v1605_v59 = vrot.slane %v330_v50, 5 }
  0x1e   : > { %v1607_v61 = vor.u32 %v537_v52, %v534_v51  ;;  %v1609_v62 = vor.u32 %v546_v54, %v543_v53  ;;  %v651_v1 = vrot.slane %v327_v49, 4  ;;  %v654_v5 = vrot.slane %v339_v42, 5  ;;  %v1477_v42 = vld [vmem:[%s1783_s3 + $0x20] sm:$0xff]  }
  0x1f   : > { %v344_v63 = vrot.slane %v1603_v55, 4  ;;  %v1614_v0 = vor.u32 %v332_v58, %v329_v57  ;;  %v656_v6 = vrot.slane %v336_v41, 4  ;;  %v662_v34 = vmul.bf16 %v1605_v59, %v645_v14 }
  0x20   : > { %v539_v3 = vrot.slane %v1607_v61, 4  ;;  %v549_v4 = vrot.slane %v1609_v62, 4  ;;  %v553_v7 = vmul.bf16 %v1607_v61, %v355_v60  ;;  %v652_v9 = vor.u32 %v651_v1, %v1605_v59 }
  0x21   : > { %v334_v8 = vrot.slane %v1614_v0, 4  ;;  %v1622_v10 = vld [vmem:[#allocation2 + $0x4] sm:$0xf]  ;;  %v307_v11 = vld [vmem:[#allocation2 + $0x8] sm:$0x3]  ;;  %v348_v13 = vmul.bf16 %v1614_v0, %v305_v56  ;;  %v657_v24 = vor.u32 %v656_v6, %v654_v5 }
  0x22   : > { %v1625_v12 = vsel %vm530_vm12, %v539_v3, %v1609_v62  ;;  %v350_v15 = vmul.bf16 %v344_v63, %v307_v11  ;;  %v1280_v16 = vcombine.low %v355_v60, %v1622_v10  ;;  %v1281_v17 = vcombine.low %v307_v11, %v307_v11  ;;  %v512_v19 = vld [vmem:[#allocation2 + $0x8] sm:$0x7] }
  0x23   : > { %v554_v18 = vmul.bf16 %v1625_v12, %v1622_v10  ;;  %v1640_v21 = vsel %vm325_vm15, %v334_v8, %v1603_v55  ;;  %v555_v22 = vmul.bf16 %v549_v4, %v512_v19  ;;  %v653_v23 = vrot.slane %v652_v9, 4  ;;  %v1655_v41 = vld [vmem:[#allocation2 + $0x8] sm:$0xf] }
  0x24   : > { %v370_v25 = vrot.slane %v1280_v16, 2  ;;  %v371_v26 = vrot.slane %v1281_v17, 2  ;;  %v1286_v27 = vcombine.low %v350_v15, %v350_v15  ;;  %v349_v31 = vmul.bf16 %v1640_v21, %v1622_v10  ;;  %v1669_v6 = vld [vmem:[#allocation2 + $0x8] sm:$0xf]  ;;  %v1478_v17 = vld [vmem:[%s1783_s3 + $0x38] sm:$0xff]  }
  0x25   : > { %v1294_v28 = vcombine.low %v553_v7, %v554_v18  ;;  %v1295_v32 = vcombine.low %v555_v22, %v555_v22  ;;  %v655_v33 = vsel %vm1635_vm1, %v653_v23, %v654_v5  ;;  %v658_v54 = vrot.slane %v657_v24, 4  ;;  %v1479_v55 = vld [vmem:[%s1783_s3 + $0x48] sm:$0xff]   ;;  %v923_v23 = vld [vmem:[#allocation2 + $0x4] sm:$0xe] }
  0x26   : > { %v372_v35 = vsel %vm369_vm9, %v370_v25, %v371_v26  ;;  %v448_v36 = vshrl.u32 %v1286_v27, 16  ;;  %v451_v39 = vshll.u32 %v1286_v27, 16  ;;  %v1285_v47 = vcombine.low %v348_v13, %v349_v31  ;;  %v1481_v25 = vld [vmem:[%s1783_s3 + $0x40] sm:$0xff]  }
  0x27   : > { %v571_v40 = vshrl.u32 %v1294_v28, 16  ;;  %1390 = vmatmul.mubr.msk.bf16.vlgmr.msra.gmra.mxu0 %vm385_vm14, %v372_v35  ;;  %v574_v48 = vshll.u32 %v1294_v28, 16  ;;  %v579_v49 = vshrl.u32 %v1295_v32, 16  ;;  %v582_v50 = vshll.u32 %v1295_v32, 16  ;;  %v820_v32 = vld [vmem:[#allocation2 + $0x4] sm:$0xf] }
  0x28   : > { %1402 = vmatpush3.bf16.msra.mxu0 %v1475_v29  ;;  %v450_v51 = vrot.slane %v448_v36, 1  ;;  %v453_v52 = vrot.slane %v451_v39, 2  ;;  %1405 = vmatprep.mubr.msk.bf16.mxu0 %vm1502_vm0, %v1501_v2  ;;  %v440_v56 = vshrl.u32 %v1285_v47, 16  ;;  %v443_v57 = vshll.u32 %v1285_v47, 16  ;;  %v822_v35 = vld [vmem:[#allocation2 + $0xc] sm:$0x1] }
  0x29   : > { %v573_v53 = vrot.slane %v571_v40, 2  ;;  %1403 = vmatprep.subr.bf16.mxu0 %v1501_v2  ;;  %v576_v58 = vrot.slane %v574_v48, 3  ;;  %v581_v59 = vrot.slane %v579_v49, 2  ;;  %v927_v60 = vmul.bf16 %v1647_v30, %v344_v63  ;;  %v1484_v49 = vld [vmem:[%s1783_s3 + $0x68] sm:$0xff]  }
  0x2a   : > { %v584_v1 = vrot.slane %v582_v50, 3  ;;  %v663_v3 = vmul.bf16 %v655_v33, %v1622_v10  ;;  %v664_v5 = vmul.bf16 %v658_v54, %v1655_v41  ;;  %v442_v7 = vrot.slane %v440_v56, 1 }
  0x2b   : > { %v445_v8 = vrot.slane %v443_v57, 2  ;;  %v454_v9 = vor.u32 %v453_v52, %v450_v51  ;;  %v577_v11 = vor.u32 %v576_v58, %v573_v53  ;;  %v926_v13 = vmul.bf16 %v1669_v6, %v1640_v21  ;;  %v1714_v52 = vld [vmem:[#allocation2 + $0x4] sm:$0xc]  ;;  %v1091_v57 = vld [vmem:[#allocation2 + $0xc] sm:$0x7] }
  0x2c   : > { %1404 = vmatpush3.bf16.msra.mxu0 %v1477_v42  ;;  %v585_v14 = vor.u32 %v584_v1, %v581_v59  ;;  %v1303_v63 = vcombine.low %v662_v34, %v663_v3  ;;  %v1304_v15 = vcombine.low %v664_v5, %v664_v5  ;;  %vm823_vm4 = vsmask.f32 256 }
  0x2d   : > { %v446_v16 = vor.u32 %v445_v8, %v442_v7  ;;  %1417 = vmatprep.subr.bf16.mxu0 %v1501_v2  ;;  %vm824_vm5 = vsmask.f32 4368  ;;  %v826_v18 = vrot.slane %v532_v43, 7  ;;  %v829_v33 = vrot.slane %v541_v45, 7  ;;  %v1486_v8 = vld [vmem:[%s1783_s3 + $0x60] sm:$0xff]  }
  0x2e   : > { %v586_v19 = vsel %vm569_vm2, %v577_v11, %v585_v14  ;;  %v680_v20 = vshrl.u32 %v1303_v63, 16  ;;  %v683_v21 = vshll.u32 %v1303_v63, 16  ;;  %v688_v22 = vshrl.u32 %v1304_v15, 16  ;;  %vm825_vm7 = vmor %vm823_vm4, %vm824_vm5  ;;  %v1485_v14 = vld [vmem:[%s1783_s3 + $0x50] sm:$0xff]  }
  0x2f   : > { %v455_v24 = vsel %vm438_vm3, %v446_v16, %v454_v9  ;;  %1406 = vmatmul.mubr.msk.bf16.vlgmr.msra.gmra.mxu0 %vm385_vm14, %v586_v19  ;;  %v691_v26 = vshll.u32 %v1304_v15, 16  ;;  %v827_v27 = vor.u32 %v826_v18, %v535_v44  ;;  %v828_v28 = vrot.slane %v826_v18, 4 }
  0x30   : > { %1398 = vmatmul.mubr.msk.bf16.vlgmr.msra.gmra.mxu1 %vm385_vm14, %v455_v24  ;;  %1418 = vmatpush3.bf16.msra.mxu0 %v1479_v55  ;;  %v682_v43 = vrot.slane %v680_v20, 3  ;;  %v685_v29 = vrot.slane %v683_v21, 4  ;;  %v690_v31 = vrot.slane %v688_v22, 3  ;;  %v1093_v34 = vmul.bf16 %v1669_v6, %v1625_v12  ;;  %v1488_v21 = vld [vmem:[%s1783_s3 + $0x88] sm:$0xff]   ;;  %v1487_v24 = vld [vmem:[%s1783_s3 + $0x78] sm:$0xff]  }
  0x31   : > { %1410 = vmatpush3.bf16.msra.mxu1 %v1478_v17  ;;  %1419 = vmatprep.subr.bf16.mxu0 %v1501_v2  ;;  %vm678_vm6 = vsmask.f32 4352  ;;  %v693_v44 = vrot.slane %v691_v26, 4  ;;  %v925_v36 = vmul.bf16 %v923_v23, %v1614_v0  ;;  %v830_v12 = vor.u32 %v829_v33, %v544_v46 }
  0x32   : > { %1411 = vmatprep.subr.bf16.mxu1 %v1501_v2  ;;  %1413 = vmatprep.mubr.msk.bf16.mxu1 %vm1502_vm0, %v1501_v2  ;;  %v686_v45 = vor.u32 %v685_v29, %v682_v43  ;;  %v832_v39 = vrot.slane %v829_v33, 4  ;;  %v1330_v40 = vcombine.low %v927_v60, %v927_v60  ;;  %v1312_v47 = vcombine.low %v1622_v10, %v1655_v41  ;;  %v1482_v10 = vld [vmem:[%s1783_s3 + $0x58] sm:$0xff]  }
  0x33   : > { %v694_v42 = vor.u32 %v693_v44, %v690_v31  ;;  %1421 = vmatprep.mubr.msk.bf16.mxu0 %vm1502_vm0, %v1501_v2  ;;  %v836_v48 = vmul.bf16 %v827_v27, %v820_v32  ;;  %v1329_v0 = vcombine.low %v925_v36, %v926_v13  ;;  %v831_v50 = vsel %vm825_vm7, %v828_v28, %v830_v12  ;;  %v1490_v31 = vld [vmem:[%s1783_s3 + $0x80] sm:$0xff]  }
  0x34   : > { %1420 = vmatpush3.bf16.msra.mxu0 %v1481_v25  ;;  %v838_v51 = vmul.bf16 %v832_v39, %v822_v35  ;;  %v950_v38 = vshrl.u32 %v1330_v40, 16  ;;  %v953_v46 = vshll.u32 %v1330_v40, 16  ;;  %v837_v41 = vmul.bf16 %v831_v50, %v1669_v6 }
  0x35   : > { %1412 = vmatpush3.bf16.msra.mxu1 %v1480_v37  ;;  %v695_v53 = vsel %vm678_vm6, %v686_v45, %v694_v42  ;;  %1433 = vmatprep.subr.bf16.mxu0 %v1501_v2  ;;  %v942_v54 = vshrl.u32 %v1329_v0, 16  ;;  %v945_v56 = vshll.u32 %v1329_v0, 16  ;;  %v1092_v7 = vmul.bf16 %v1714_v52, %v1607_v61 }
  0x36   : > { %1425 = vmatprep.subr.bf16.mxu1 %v1501_v2  ;;  %v1321_v58 = vcombine.low %v838_v51, %v838_v51  ;;  %v952_v59 = vrot.slane %v950_v38, 1  ;;  %v955_v60 = vrot.slane %v953_v46, 2  ;;  %v1320_v1 = vcombine.low %v836_v48, %v837_v41 }
  0x37   : > { %1422 = vmatmul.mubr.msk.bf16.vlgmr.msra.gmra.mxu0 %vm385_vm14, %v1312_v47  ;;  %v944_v3 = vrot.slane %v942_v54, 1  ;;  %v947_v5 = vrot.slane %v945_v56, 2  ;;  %v1094_v13 = vmul.bf16 %v1091_v57, %v549_v4  ;;  %v1347_v15 = vcombine.low %v1092_v7, %v1093_v34 }
  0x38   : > { %1414 = vmatmul.mubr.msk.bf16.vlgmr.msra.gmra.mxu1 %vm385_vm14, %v695_v53  ;;  %1434 = vmatpush3.bf16.msra.mxu0 %v1484_v49  ;;  %v861_v9 = vshll.u32 %v1321_v58, 16  ;;  %v956_v11 = vor.u32 %v955_v60, %v952_v59  ;;  %v854_v61 = vshrl.u32 %v1320_v1, 16  ;;  %v856_v55 = vshll.u32 %v1320_v1, 16 }
  0x39   : > { %1426 = vmatpush3.bf16.msra.mxu1 %v1482_v10  ;;  %1435 = vmatprep.subr.bf16.mxu0 %v1501_v2  ;;  %v948_v63 = vor.u32 %v947_v5, %v944_v3  ;;  %v1339_v62 = vcombine.low %v1647_v30, %v1647_v30  ;;  %v1348_v4 = vcombine.low %v1094_v13, %v1094_v13  ;;  %v1109_v18 = vshrl.u32 %v1347_v15, 16 }
  0x3a   : > { %1427 = vmatprep.subr.bf16.mxu1 %v1501_v2  ;;  %1429 = vmatprep.mubr.msk.bf16.mxu1 %vm1502_vm0, %v1501_v2  ;;  %v858_v16 = vrot.slane %v856_v55, 1  ;;  %v863_v17 = vrot.slane %v861_v9, 1  ;;  %v1112_v19 = vshll.u32 %v1347_v15, 16  ;;  %vm852_vm8 = vsmask.f32 7424 }
  0x3b   : > { %1437 = vmatprep.mubr.msk.bf16.mxu0 %vm1502_vm0, %v1501_v2  ;;  %v957_v20 = vsel %vm438_vm3, %v948_v63, %v956_v11  ;;  %v1117_v22 = vshrl.u32 %v1348_v4, 16  ;;  %v1120_v23 = vshll.u32 %v1348_v4, 16  ;;  %v1338_v25 = vcombine.low %v1714_v52, %v1669_v6  ;;  %v1489_v6 = vld [vmem:[%s1783_s3 + $0x70] sm:$0xff]  }
  0x3c   : > { %1436 = vmatpush3.bf16.msra.mxu0 %v1486_v8  ;;  %v859_v30 = vor.u32 %v858_v16, %v854_v61  ;;  %v1111_v26 = vrot.slane %v1109_v18, 2  ;;  %v1114_v27 = vrot.slane %v1112_v19, 3  ;;  %v1031_v37 = vrot.slane %v1339_v62, 2 }
  0x3d   : > { %1428 = vmatpush3.bf16.msra.mxu1 %v1485_v14  ;;  %1449 = vmatprep.subr.bf16.mxu0 %v1501_v2  ;;  %v1119_v28 = vrot.slane %v1117_v22, 2  ;;  %v1122_v43 = vrot.slane %v1120_v23, 3  ;;  %v1030_v34 = vrot.slane %v1338_v25, 2 }
  0x3e   : > { %1441 = vmatprep.subr.bf16.mxu1 %v1501_v2  ;;  %v864_v29 = vsel %vm852_vm8, %v859_v30, %v863_v17  ;;  %v1115_v32 = vor.u32 %v1114_v27, %v1111_v26 }
  0x3f   : > { %1438 = vmatmul.mubr.msk.bf16.vlgmr.msra.gmra.mxu0 %vm385_vm14, %v957_v20  ;;  %v1123_v33 = vor.u32 %v1122_v43, %v1119_v28  ;;  %v1032_v35 = vsel %vm369_vm9, %v1030_v34, %v1031_v37 }
  0x40   : > { %1430 = vmatmul.mubr.msk.bf16.vlgmr.msra.gmra.mxu1 %vm385_vm14, %v864_v29  ;;  %1450 = vmatpush3.bf16.msra.mxu0 %v1488_v21 }
  0x41   : > { %1442 = vmatpush3.bf16.msra.mxu1 %v1487_v24  ;;  %1451 = vmatprep.subr.bf16.mxu0 %v1501_v2  ;;  %v1124_v44 = vsel %vm569_vm2, %v1115_v32, %v1123_v33 }
  0x42   : > { %1443 = vmatprep.subr.bf16.mxu1 %v1501_v2  ;;  %1445 = vmatprep.mubr.msk.bf16.mxu1 %vm1502_vm0, %v1501_v2 }
  0x43   : > { %1453 = vmatprep.mubr.msk.bf16.mxu0 %vm1502_vm0, %v1501_v2  ;;  %vm1183_vm0 = vcmask 392192  }
  0x44   : > { %1452 = vmatpush3.bf16.msra.mxu0 %v1490_v31 }
  0x45   : > { %1444 = vmatpush3.bf16.msra.mxu1 %v1489_v6 }
  0x47   : > { %1454 = vmatmul.mubr.msk.bf16.vlgmr.msra.gmra.mxu0 %vm385_vm14, %v1124_v44 }
  0x48   : > { %1446 = vmatmul.mubr.msk.bf16.vlgmr.msra.gmra.mxu1 %vm385_vm14, %v1032_v35 }
  0xe7   : > { %v423_v36 = vpop.f32.mrf.mxu0 }
  0xe9   : > { %v1391_v45 = vpop.f32.mrf.mxu0 }
  0xeb   : > { %v426_v12 = vpop.f32.mrf.mxu0 }
  0xed   : > { %v1392_v39 = vpop.f32.mrf.mxu0 }
  0xef   : > { %v636_v40 = vpop.f32.mrf.mxu0 }
  0xf0   : > { %v505_v42 = vpop.f32.mrf.mxu1 }
  0xf1   : > { %v1407_v47 = vpop.f32.mrf.mxu0  ;;  %v506_v51 = vadd.f32 %v505_v42, %v423_v36 }
  0xf2   : > { %v1399_v48 = vpop.f32.mrf.mxu1 }
  0xf3   : > { %v639_v0 = vpop.f32.mrf.mxu0  ;;  %v643_v10 = vadd.f32 %v636_v40, %v506_v51 }
  0xf4   : > { %v508_v2 = vpop.f32.mrf.mxu1 }
  0xf5   : > { %v1408_v49 = vpop.f32.mrf.mxu0  ;;  %v509_v41 = vadd.f32 %v508_v2, %v426_v12 }
  0xf6   : > { %v1400_v50 = vpop.f32.mrf.mxu1 }
  0xf7   : > { %v811_v38 = vpop.f32.mrf.mxu0  ;;  %v644_v60 = vadd.f32 %v639_v0, %v509_v41 }
  0xf8   : > { %v745_v46 = vpop.f32.mrf.mxu1 }
  0xf9   : > { %v1423_v52 = vpop.f32.mrf.mxu0  ;;  %v752_v57 = vadd.f32 %v745_v46, %v643_v10 }
  0xfa   : > { %v1415_v53 = vpop.f32.mrf.mxu1 }
  0xfb   : > { %v814_v54 = vpop.f32.mrf.mxu0  ;;  %v818_v5 = vadd.f32 %v811_v38, %v752_v57 }
  0xfc   : > { %v748_v56 = vpop.f32.mrf.mxu1 }
  0xfd   : > { %v1424_v58 = vpop.f32.mrf.mxu0  ;;  %v753_v7 = vadd.f32 %v748_v56, %v644_v60 }
  0xfe   : > { %v1416_v59 = vpop.f32.mrf.mxu1 }
  0xff   : > { %v1007_v1 = vpop.f32.mrf.mxu0  ;;  %v819_v61 = vadd.f32 %v814_v54, %v753_v7 }
 0x100   : > { %v914_v3 = vpop.f32.mrf.mxu1 }
 0x101   : > { %v1439_v8 = vpop.f32.mrf.mxu0  ;;  %v921_v11 = vadd.f32 %v914_v3, %v818_v5 }
 0x102   : > { %v1431_v9 = vpop.f32.mrf.mxu1 }
 0x103   : > { %v1010_v13 = vpop.f32.mrf.mxu0  ;;  %v1014_v15 = vadd.f32 %v1007_v1, %v921_v11 }
 0x104   : > { %v917_v14 = vpop.f32.mrf.mxu1 }
 0x105   : > { %v1440_v55 = vpop.f32.mrf.mxu0  ;;  %v922_v62 = vadd.f32 %v917_v14, %v819_v61 }
 0x106   : > { %v1432_v63 = vpop.f32.mrf.mxu1 }
 0x107   : > { %v1174_v4 = vpop.f32.mrf.mxu0  ;;  %v1015_v20 = vadd.f32 %v1010_v13, %v922_v62 }
 0x108   : > { %v1082_v16 = vpop.f32.mrf.mxu1 }
 0x109   : > { %v1089_v17 = vadd.f32 %v1082_v16, %v1014_v15  ;;  %v1455_v18 = vpop.f32.mrf.mxu0 }
 0x10a   : > { %v1447_v19 = vpop.f32.mrf.mxu1 }
 0x10b   : > { %v1181_v21 = vadd.f32 %v1174_v4, %v1089_v17  ;;  %v1177_v22 = vpop.f32.mrf.mxu0 }
 0x10c   : > { %v1085_v23 = vpop.f32.mrf.mxu1 }
 0x10d   : > { %1184 = vst.msk [vmem:[%s225_s18] sm:$0xff] %vm1183_vm0, %v1181_v21  ;;  %v1090_v30 = vadd.f32 %v1085_v23, %v1015_v20  ;;  %v1456_v24 = vpop.f32.mrf.mxu0 }
 0x10e   : > { %v1448_v25 = vpop.f32.mrf.mxu1 }
 0x10f   : > { %v1182_v26 = vadd.f32 %v1177_v22, %v1090_v30 }
 0x111   : > { %1185 = vst.msk [vmem:[%s225_s18 + $0x8] sm:$0xff] %vm1183_vm0, %v1182_v26 }
 0x112 PF: > { %s14_s15 = sadd.s32 1, %s1499_s15  }
 0x113   : > { %p11_p4 = scmp.ge.s32.totalorder %s14_s15, 4  }
 0x115   :  { %13 = sbr.rel (!%p11_p4) target bundleno = 1 (0x1), region = 80 }

// kernel: ecn_pose_forward.22
= control target key start
LH: loop header
LB: loop body
LE: loop exit
PB: predicated region body
PF: predicated region fallthrough
CT: control target
= control target key end

     0   :  { %s2713_s15 = smov 0   ;;  %s3394_s0 = inlined_call_operand.vmem [shape: f32[2,64,32], index: 0, kind: input, shape index: {}]   ;;  %s3395_s1 = inlined_call_operand.vmem [shape: f32[2,1,32], index: 1, kind: input, shape index: {}]   ;;  %s3396_s2 = inlined_call_operand.vmem [shape: f32[2,1,32], index: 2, kind: input, shape index: {}]   ;;  %s3397_s3 = inlined_call_operand.vmem [shape: bf16[9,32,32], index: 3, kind: input, shape index: {}]   ;;  %s3398_s4 = inlined_call_operand.vmem [shape: f32[2,64,32], index: 4, kind: output, shape index: {}]  }
   0x1 LB: > { %s2298_s16 = sadd.s32 4294967295, %s2682_s15   ;;  %p2302_p0 = scmp.ge.s32.totalorder %s2682_s15, 1  ;;  %s2682_s15 = sphi %s2713_s15, %s14_s15  }
   0x2   : > { %p178_p1 = scmp.lt.s32.totalorder %s2682_s15, 3 }
   0x4   : > { %p179_p2 = pnand %p2302_p0, %p178_p1 }
   0x6   : > { %182 = sbr.rel (%p179_p2) target bundleno = 357 (0x165), region = 36 }
   0xb   : > { %v2651_v0 = vld [vmem:[%s3397_s3 + $0x18] sm:$0xff]   ;;  %p210_p3 = scmp.lt.s32.totalorder %s2298_s16, 1  ;;  %v326_v1 = vlaneseq  ;;  %v2652_v2 = vld [vmem:[%s3397_s3 + $0x10] sm:$0xff]   ;;  %vm227_vm0 = vcmask 257024   ;;  %v2684_v4 = vmov 0   ;;  %v2757_v11 = vld [vmem:[%s3397_s3 + $0x8] sm:$0xff]  }
   0xc   : > { %2527 = vmatprep.subr.bf16.mxu0 %v2651_v0  ;;  %2635 = vmatprep.subr.bf16.mxu1 %v2651_v0  ;;  %228 = vst.msk [vmem:[#allocation2] sm:$0xf] %vm227_vm0, %v2684_v4  ;;  %229 = vst.msk [vmem:[#allocation2 + $0x4] sm:$0xf] %vm227_vm0, %v2684_v4  ;;  %v2685_v5 = vmov 839922192  }
   0xd   : > { %s3419_s16 = smov (!%p210_p3, %s2298_s16), 1  ;;  %v2729_v3 = vshrl.u32 %v326_v1, 7  ;;  %2528 = vmatpush3.bf16.msra.mxu0 %v2651_v0  ;;  %2637 = vmatpush3.bf16.msra.mxu1 %v2651_v0  ;;  %230 = vst.msk [vmem:[#allocation2 + $0x8] sm:$0xf] %vm227_vm0, %v2684_v4  ;;  %231 = vst.msk [vmem:[#allocation2 + $0xc] sm:$0xf] %vm227_vm0, %v2684_v4  ;;  %v2737_v6 = vunpack.c.l.s4 %v2685_v5 }
   0xe   : > { %232 = vst.msk [vmem:[#allocation2 + $0x10] sm:$0xf] %vm227_vm0, %v2684_v4  ;;  %233 = vst.msk [vmem:[#allocation2 + $0x14] sm:$0xf] %vm227_vm0, %v2684_v4  ;;  %2529 = vmatprep.subr.bf16.mxu0 %v2652_v2  ;;  %2636 = vmatprep.subr.bf16.mxu1 %v2652_v2  ;;  %s2463_s21 = sshll.u32 %s3419_s16, 6  ;;  %s217_s24 = scalar_lea.vmem %s3395_s1, %s3419_s16  ;;  %v2776_v14 = vld [vmem:[%s3397_s3 + $0x28] sm:$0xff]  }
   0xf   : > { %234 = vst.msk [vmem:[#allocation2 + $0x18] sm:$0xf] %vm227_vm0, %v2684_v4  ;;  %235 = vst.msk [vmem:[#allocation2 + $0x1c] sm:$0xf] %vm227_vm0, %v2684_v4  ;;  %v328_v7 = vadd.s32 8, %v2729_v3  ;;  %v329_v8 = vadd.s32 16, %v2729_v3  ;;  %s2764_s29 = scalar_lea.vmem %s3394_s0, %s2463_s21  ;;  %s220_s6 = scalar_lea.vmem %s3396_s2, %s3419_s16  ;;  %v502_v13 = vunpack.c.0.s8 %v2737_v6 }
  0x10   : > { %236 = vst.msk [vmem:[#allocation2 + $0x20] sm:$0xf] %vm227_vm0, %v2684_v4  ;;  %237 = vst.msk [vmem:[#allocation2 + $0x24] sm:$0xf] %vm227_vm0, %v2684_v4  ;;  %v330_v9 = vadd.s32 24, %v2729_v3  ;;  %v339_v10 = vand.u32 7, %v2729_v3  ;;  %s3372_s18 = scalar_lea.vmem %s3398_s4, %s2463_s21 }
  0x11   : > { %238 = vst.msk [vmem:[#allocation2 + $0x28] sm:$0xf] %vm227_vm0, %v2684_v4  ;;  %239 = vst.msk [vmem:[#allocation2 + $0x2c] sm:$0xf] %vm227_vm0, %v2684_v4  ;;  %v2770_v12 = vld [vmem:[%s217_s24] ss:$0 sm:$0xff]  ;;  %2530 = vmatpush3.bf16.msra.mxu0 %v2652_v2  ;;  %2638 = vmatpush3.bf16.msra.mxu1 %v2652_v2  ;;  %v2804_v50 = vsub.s32 %v502_v13, %v2729_v3 }
  0x12   : > { %v240_v15 = vld [vmem:[%s2764_s29] sm:$0xff]  ;;  %v241_v16 = vld [vmem:[%s2764_s29 + $0x8] sm:$0xff]  ;;  %v242_v17 = vld [vmem:[%s2764_s29 + $0x10] sm:$0xff]  ;;  %v346_v18 = vand.u32 7, %v328_v7  ;;  %v353_v19 = vand.u32 7, %v329_v8  ;;  %v360_v20 = vand.u32 7, %v330_v9  ;;  %2539 = vmatprep.subr.bf16.mxu1 %v2757_v11  ;;  %2551 = vmatprep.subr.bf16.mxu0 %v2776_v14 }
  0x13   : > { %v2686_v21 = vmov 1985246804   ;;  %v243_v23 = vld [vmem:[%s2764_s29 + $0x18] sm:$0xff]  ;;  %v255_v24 = vmul.f32 %v2770_v12, %v240_v15  ;;  %v256_v25 = vmul.f32 %v2770_v12, %v241_v16  ;;  %v257_v26 = vmul.f32 %v2770_v12, %v242_v17  ;;  %v2785_v27 = vld [vmem:[%s220_s6] ss:$0 sm:$0xff]  ;;  %v245_v5 = vld [vmem:[%s2764_s29 + $0x28] sm:$0xff] }
  0x14   : > { %v508_v22 = vunpack.c.l.s4 %v2686_v21  ;;  %vm431_vm1 = vcmp.ne.s32.totalorder %v339_v10, 0  ;;  %v258_v28 = vmul.f32 %v2770_v12, %v243_v23  ;;  %vm432_vm2 = vcmp.ne.s32.totalorder %v346_v18, 0  ;;  %v244_v58 = vld [vmem:[%s2764_s29 + $0x20] sm:$0xff] }
  0x15   : > { %vm433_vm3 = vcmp.ne.s32.totalorder %v353_v19, 0  ;;  %vm434_vm4 = vcmp.ne.s32.totalorder %v360_v20, 0  ;;  %v270_v29 = vadd.f32 %v2785_v27, %v255_v24  ;;  %v271_v30 = vadd.f32 %v2785_v27, %v256_v25  ;;  %v488_v59 = vld [vmem:[#allocation2 + $0x4] sm:$0xf] }
  0x16   : > { %v272_v31 = vadd.f32 %v2785_v27, %v257_v26  ;;  %v2687_v32 = vmov 0.0   ;;  %v273_v34 = vadd.f32 %v2785_v27, %v258_v28  ;;  %vm459_vm5 = vcmp.ne.s32.totalorder %v339_v10, 7 }
  0x17   : > { %v2317_v33 = vsel %vm431_vm1, 1.0, %v2687_v32  ;;  %v2318_v35 = vsel %vm432_vm2, 1.0, %v2687_v32  ;;  %v2319_v36 = vsel %vm433_vm3, 1.0, %v2687_v32  ;;  %v2320_v37 = vsel %vm434_vm4, 1.0, %v2687_v32 }
  0x18   : > { %v278_v38 = vmax.f32 %v270_v29, 0.0  ;;  %v279_v39 = vmax.f32 %v271_v30, 0.0  ;;  %v280_v40 = vmax.f32 %v272_v31, 0.0  ;;  %v455_v41 = vpack.c.bf16 %v2318_v35, %v2317_v33  ;;  %v247_v33 = vld [vmem:[%s2764_s29 + $0x38] sm:$0xff] }
  0x19   : > { %v281_v42 = vmax.f32 %v273_v34, 0.0  ;;  %v456_v43 = vpack.c.bf16 %v2320_v37, %v2319_v36  ;;  %vm460_vm6 = vcmp.ne.s32.totalorder %v346_v18, 7  ;;  %vm461_vm7 = vcmp.ne.s32.totalorder %v353_v19, 7 }
  0x1a   : > { %v2465_v44 = vpack.c.bf16 %v278_v38, %v278_v38  ;;  %v2466_v45 = vpack.c.bf16 %v279_v39, %v279_v39  ;;  %v2467_v46 = vpack.c.bf16 %v280_v40, %v280_v40  ;;  %vm462_vm8 = vcmp.ne.s32.totalorder %v360_v20, 7  ;;  %v246_v20 = vld [vmem:[%s2764_s29 + $0x30] sm:$0xff] }
  0x1b   : > { %v2468_v47 = vpack.c.bf16 %v281_v42, %v281_v42  ;;  %v2325_v48 = vsel %vm459_vm5, 1.0, %v2687_v32  ;;  %v2326_v49 = vsel %vm460_vm6, 1.0, %v2687_v32  ;;  %vm556_vm9 = vsmask.f32 3328 }
  0x1c   : > { %318 = vst.msk [vmem:[#allocation2 + $0x8] sm:$0xf] %vm227_vm0, %v2465_v44  ;;  %319 = vst.msk [vmem:[#allocation2 + $0xc] sm:$0xf] %vm227_vm0, %v2466_v45  ;;  %v483_v51 = vpack.c.bf16 %v2326_v49, %v2325_v48  ;;  %v509_v52 = vunpack.c.0.s8 %v508_v22  ;;  %vm557_vm10 = vsmask.f32 7440  ;;  %v506_v55 = vrot.slane %v455_v41, %v2804_v50 }
  0x1d   : > { %320 = vst.msk [vmem:[#allocation2 + $0x10] sm:$0xf] %vm227_vm0, %v2467_v46  ;;  %321 = vst.msk [vmem:[#allocation2 + $0x14] sm:$0xf] %vm227_vm0, %v2468_v47  ;;  %vm697_vm11 = vcmask 261120   ;;  %v2327_v53 = vsel %vm461_vm7, 1.0, %v2687_v32  ;;  %v520_v56 = vrot.slane %v456_v43, %v2804_v50  ;;  %v259_v21 = vmul.f32 %v2770_v12, %v244_v58 }
  0x1e   : > { %v2328_v54 = vsel %vm462_vm8, 1.0, %v2687_v32  ;;  %v2812_v57 = vsub.s32 %v509_v52, %v2729_v3  ;;  %v560_v60 = vshll.u32 %v506_v55, 16  ;;  %v563_v61 = vshrl.u32 %v506_v55, 16  ;;  %v487_v22 = vld [vmem:[#allocation2] sm:$0x8]  ;;  %vm2836_vm14 = vmor %vm556_vm9, %vm557_vm10 }
  0x1f   : > { %v579_v62 = vshll.u32 %v520_v56, 16  ;;  %v583_v63 = vshrl.u32 %v520_v56, 16  ;;  %v2820_v2 = vrot.slane %v483_v51, %v2804_v50  ;;  %vm1001_vm12 = vsmask.f32 256  ;;  %v1255_v44 = vld [vmem:[#allocation2 + $0x4] sm:$0x8] }
  0x20   : > { %v513_v0 = vrot.slane %v455_v41, %v2812_v57  ;;  %v2817_v1 = vrot.slane %v456_v43, %v2812_v57  ;;  %v958_v4 = vrot.slane %v483_v51, %v2812_v57  ;;  %v2824_v6 = vrot.slane %v560_v60, 5 }
  0x21   : > { %v565_v7 = vrot.slane %v563_v61, 4  ;;  %v581_v8 = vrot.slane %v579_v62, 5  ;;  %v585_v9 = vrot.slane %v583_v63, 4  ;;  %v2826_v10 = vpack.c.bf16 %v2328_v54, %v2327_v53 }
  0x22   : > { %v569_v15 = vshll.u32 %v513_v0, 16  ;;  %v573_v16 = vshrl.u32 %v513_v0, 16  ;;  %vm1002_vm13 = vsmask.f32 4368  ;;  %v589_v19 = vshll.u32 %v2817_v1, 16 }
  0x23   : > { %v2828_v13 = vld [vmem:[#allocation2 + $0x8] sm:$0xf]  ;;  %v566_v17 = vor.u32 %v565_v7, %v2824_v6  ;;  %v586_v18 = vor.u32 %v585_v9, %v581_v8  ;;  %v1005_v28 = vshrl.u32 %v2820_v2, 16  ;;  %v1013_v31 = vshrl.u32 %v958_v4, 16  ;;  %v2848_v39 = vld [vmem:[#allocation2 + $0xc] sm:$0xf]  ;;  %vm2887_vm15 = vmor %vm1001_vm12, %vm1002_vm13 }
  0x24   : > { %v571_v24 = vrot.slane %v569_v15, 5  ;;  %v575_v25 = vrot.slane %v573_v16, 4  ;;  %v2337_v26 = vcombine.low %v488_v59, %v2828_v13  ;;  %v260_v34 = vmul.f32 %v2770_v12, %v245_v5  ;;  %v2860_v47 = vld [vmem:[#allocation2 + $0x8] sm:$0xf]  ;;  %v2863_v49 = vld [vmem:[#allocation2 + $0xc] sm:$0xf] }
  0x25   : > { %v567_v29 = vrot.slane %v566_v17, 4  ;;  %v587_v30 = vrot.slane %v586_v18, 4  ;;  %v2845_v36 = vrot.slane %v1005_v28, 7  ;;  %v1016_v37 = vshll.u32 %v958_v4, 16  ;;  %v2865_v51 = vld [vmem:[#allocation2 + $0x14] sm:$0xf] }
  0x26   : > { %v576_v35 = vor.u32 %v575_v25, %v571_v24  ;;  %2531 = vmatprep.mubr.msk.bf16.mxu0 %vm697_vm11, %v2337_v26  ;;  %v261_v38 = vmul.f32 %v2770_v12, %v246_v20  ;;  %v2854_v41 = vrot.slane %v589_v19, 5  ;;  %v647_v42 = vmul.bf16 %v2824_v6, %v487_v22  ;;  %v2867_v52 = vld [vmem:[#allocation2 + $0x8] sm:$0x8]  ;;  %v2896_v4 = vld [vmem:[#allocation2 + $0x10] sm:$0xf] }
  0x27   : > { %v2852_v40 = vsel %vm2836_vm14, %v567_v29, %v571_v24  ;;  %v2857_v43 = vrot.slane %v1013_v31, 7  ;;  %v1011_v48 = vrot.slane %v2845_v36, 4  ;;  %v262_v53 = vmul.f32 %v2770_v12, %v247_v33  ;;  %v2913_v18 = vld [vmem:[#allocation2 + $0xc] sm:$0xf]  ;;  %v2663_v12 = vld [vmem:[%s3397_s3 + $0x40] sm:$0xff]  }
  0x28   : > { %v577_v45 = vrot.slane %v576_v35, 4  ;;  %v648_v46 = vmul.bf16 %v2852_v40, %v488_v59  ;;  %v2873_v54 = vsel %vm2836_vm14, %v587_v30, %v2854_v41  ;;  %v274_v56 = vadd.f32 %v2785_v27, %v259_v21 }
  0x29   : > { %v1018_v55 = vor.u32 %v1016_v37, %v2857_v43  ;;  %v275_v58 = vadd.f32 %v2785_v27, %v260_v34  ;;  %v276_v59 = vadd.f32 %v2785_v27, %v261_v38  ;;  %v1257_v62 = vmul.bf16 %v1255_v44, %v2824_v6 }
  0x2a   : > { %v2881_v60 = vsel %vm2836_vm14, %v577_v45, %v581_v8  ;;  %v2883_v61 = vcombine.low %v647_v42, %v648_v46  ;;  %v1258_v63 = vmul.bf16 %v2860_v47, %v2852_v40  ;;  %v650_v0 = vmul.bf16 %v2873_v54, %v2848_v39 }
  0x2b   : > { %v2900_v5 = vrot.slane %v2826_v10, %v2812_v57  ;;  %v277_v7 = vadd.f32 %v2785_v27, %v262_v53  ;;  %v1260_v8 = vmul.bf16 %v2896_v4, %v2873_v54  ;;  %v1738_v9 = vmul.bf16 %v2867_v52, %v2824_v6  ;;  %v2940_v53 = vld [vmem:[#allocation2 + $0x10] sm:$0xf] }
  0x2c   : > { %v1739_v15 = vmul.bf16 %v2863_v49, %v2852_v40  ;;  %v649_v17 = vmul.bf16 %v2881_v60, %v2828_v13  ;;  %v2917_v27 = vsel %vm2887_vm15, %v1011_v48, %v1018_v55  ;;  %v282_v19 = vmax.f32 %v274_v56, 0.0 }
  0x2d   : > { %v283_v20 = vmax.f32 %v275_v58, 0.0  ;;  %v800_v21 = vshrl.u32 %v2883_v61, 16  ;;  %v1259_v22 = vmul.bf16 %v2913_v18, %v2881_v60  ;;  %v2922_v24 = vcombine.low %v1257_v62, %v1258_v63 }
  0x2e   : > { %v284_v25 = vmax.f32 %v276_v59, 0.0  ;;  %v285_v26 = vmax.f32 %v277_v7, 0.0  ;;  %v2469_v28 = vpack.c.bf16 %v282_v19, %v282_v19  ;;  %v331_v13 = vadd.s32 32, %v2729_v3 }
  0x2f   : > { %v2470_v29 = vpack.c.bf16 %v283_v20, %v283_v20  ;;  %v803_v30 = vshll.u32 %v2883_v61, 16  ;;  %v332_v34 = vadd.s32 40, %v2729_v3  ;;  %v333_v37 = vadd.s32 48, %v2729_v3 }
  0x30   : > { %v2471_v33 = vpack.c.bf16 %v284_v25, %v284_v25  ;;  %v2472_v35 = vpack.c.bf16 %v285_v26, %v285_v26  ;;  %322 = vst.msk [vmem:[#allocation2 + $0x18] sm:$0xf] %vm227_vm0, %v2469_v28  ;;  %v334_v38 = vadd.s32 56, %v2729_v3  ;;  %v367_v42 = vand.u32 7, %v331_v13 }
  0x31   : > { %323 = vst.msk [vmem:[#allocation2 + $0x1c] sm:$0xf] %vm227_vm0, %v2470_v29  ;;  %v2933_v44 = vcombine.low %v649_v17, %v650_v0  ;;  %v2935_v45 = vcombine.low %v1259_v22, %v1260_v8  ;;  %v374_v48 = vand.u32 7, %v332_v34  ;;  %v381_v55 = vand.u32 7, %v333_v37  ;;  %v2951_v17 = vld [vmem:[#allocation2 + $0x14] sm:$0xf] }
  0x32   : > { %324 = vst.msk [vmem:[#allocation2 + $0x20] sm:$0xf] %vm227_vm0, %v2471_v33  ;;  %325 = vst.msk [vmem:[#allocation2 + $0x24] sm:$0xf] %vm227_vm0, %v2472_v35  ;;  %v388_v56 = vand.u32 7, %v334_v38  ;;  %vm435_vm1 = vcmp.ne.s32.totalorder %v367_v42, 0 }
  0x33   : > { %vm463_vm2 = vcmp.ne.s32.totalorder %v367_v42, 7  ;;  %vm436_vm3 = vcmp.ne.s32.totalorder %v374_v48, 0  ;;  %v2321_v3 = vsel %vm435_vm1, 1.0, %v2687_v32  ;;  %vm464_vm4 = vcmp.ne.s32.totalorder %v374_v48, 7 }
  0x34   : > { %v593_v58 = vshrl.u32 %v2817_v1, 16  ;;  %vm437_vm5 = vcmp.ne.s32.totalorder %v381_v55, 0  ;;  %vm438_vm6 = vcmp.ne.s32.totalorder %v388_v56, 0  ;;  %v2322_v59 = vsel %vm436_vm3, 1.0, %v2687_v32 }
  0x35   : > { %v2329_v62 = vsel %vm463_vm2, 1.0, %v2687_v32  ;;  %v2323_v0 = vsel %vm437_vm5, 1.0, %v2687_v32  ;;  %v2324_v7 = vsel %vm438_vm6, 1.0, %v2687_v32  ;;  %v457_v8 = vpack.c.bf16 %v2322_v59, %v2321_v3 }
  0x36   : > { %v2953_v19 = vrot.slane %v800_v21, 3  ;;  %v458_v20 = vpack.c.bf16 %v2324_v7, %v2323_v0  ;;  %v2330_v22 = vsel %vm464_vm4, 1.0, %v2687_v32  ;;  %v595_v21 = vrot.slane %v593_v58, 4 }
  0x37   : > { %v485_v26 = vpack.c.bf16 %v2330_v22, %v2329_v62  ;;  %v493_v28 = vld [vmem:[#allocation2 + $0x18] sm:$0xf]  ;;  %v534_v29 = vrot.slane %v457_v8, %v2804_v50  ;;  %v541_v13 = vrot.slane %v457_v8, %v2812_v57  ;;  %v1031_v63 = vshrl.u32 %v2900_v5, 16 }
  0x38   : > { %v548_v33 = vrot.slane %v458_v20, %v2804_v50  ;;  %v2962_v34 = vrot.slane %v458_v20, %v2812_v57  ;;  %v2339_v35 = vcombine.low %v2951_v17, %v493_v28  ;;  %v596_v3 = vor.u32 %v595_v21, %v2854_v41 }
  0x39   : > { %v599_v37 = vshll.u32 %v534_v29, 16  ;;  %v603_v38 = vshrl.u32 %v534_v29, 16  ;;  %v609_v42 = vshll.u32 %v541_v13, 16  ;;  %v613_v48 = vshrl.u32 %v541_v13, 16  ;;  %v2969_v29 = vld [vmem:[#allocation2 + $0x10] sm:$0xf] }
  0x3a   : > { %v619_v59 = vshll.u32 %v548_v33, 16  ;;  %v623_v62 = vshrl.u32 %v548_v33, 16  ;;  %v629_v0 = vshll.u32 %v2962_v34, 16  ;;  %2535 = vmatprep.mubr.msk.bf16.mxu1 %vm697_vm11, %v2339_v35  ;;  %v597_v46 = vrot.slane %v596_v3, 4 }
  0x3b   : > { %v601_v7 = vrot.slane %v599_v37, 5  ;;  %v605_v8 = vrot.slane %v603_v38, 4  ;;  %v611_v22 = vrot.slane %v609_v42, 5  ;;  %v615_v20 = vrot.slane %v613_v48, 4 }
  0x3c   : > { %v621_v58 = vrot.slane %v619_v59, 5  ;;  %v625_v31 = vrot.slane %v623_v62, 4  ;;  %v979_v41 = vrot.slane %v485_v26, %v2804_v50  ;;  %v986_v33 = vrot.slane %v485_v26, %v2812_v57 }
  0x3d   : > { %v606_v13 = vor.u32 %v605_v8, %v601_v7  ;;  %v616_v16 = vor.u32 %v615_v20, %v611_v22  ;;  %vm2973_vm0 = vcmp.ne.s32.totalorder %v381_v55, 7  ;;  %vm2977_vm7 = vcmp.ne.s32.totalorder %v388_v56, 7 }
  0x3e   : > { %v2983_v37 = vsel %vm2836_vm14, %v597_v46, %v601_v7  ;;  %v626_v38 = vor.u32 %v625_v31, %v621_v58  ;;  %v2985_v3 = vrot.slane %v629_v0, 5  ;;  %v1040_v59 = vshrl.u32 %v979_v41, 16 }
  0x3f   : > { %v607_v42 = vrot.slane %v606_v13, 4  ;;  %v617_v48 = vrot.slane %v616_v16, 4  ;;  %v651_v55 = vmul.bf16 %v2983_v37, %v2969_v29  ;;  %v1043_v26 = vshll.u32 %v979_v41, 16  ;;  %v2997_v16 = vld [vmem:[#allocation2 + $0x1c] sm:$0xf] }
  0x40   : > { %v627_v62 = vrot.slane %v626_v38, 4  ;;  %v1049_v8 = vshrl.u32 %v986_v33, 16  ;;  %v1042_v31 = vrot.slane %v1040_v59, 7  ;;  %v1052_v7 = vshll.u32 %v986_v33, 16  ;;  %v3013_v33 = vld [vmem:[#allocation2 + $0x18] sm:$0xf] }
  0x41   : > { %v2991_v56 = vsel %vm2836_vm14, %v607_v42, %v611_v22  ;;  %v2995_v46 = vsel %vm2836_vm14, %v617_v48, %v621_v58  ;;  %v3007_v22 = vld [vmem:[#allocation2 + $0x14] sm:$0xf]  ;;  %v3015_v38 = vrot.slane %v1031_v63, 7  ;;  %v3037_v21 = vcombine.low %v1738_v9, %v1739_v15 }
  0x42   : > { %v3002_v0 = vsel %vm2836_vm14, %v627_v62, %v2985_v3  ;;  %v652_v20 = vmul.bf16 %v2991_v56, %v2951_v17  ;;  %v653_v13 = vmul.bf16 %v2995_v46, %v493_v28  ;;  %v3009_v41 = vrot.slane %v1049_v8, 7  ;;  %v3028_v8 = vld [vmem:[#allocation2 + $0x1c] sm:$0xf] }
  0x43   : > { %v654_v58 = vmul.bf16 %v3002_v0, %v2997_v16  ;;  %v1047_v42 = vrot.slane %v1042_v31, 4  ;;  %v1261_v23 = vmul.bf16 %v3007_v22, %v2983_v37  ;;  %v2331_v17 = vsel %vm2973_vm0, 1.0, %v2687_v32 }
  0x44   : > { %v2349_v28 = vcombine.low %v651_v55, %v652_v20  ;;  %v1054_v48 = vor.u32 %v1052_v7, %v3009_v41  ;;  %v1262_v59 = vmul.bf16 %v3013_v33, %v2991_v56  ;;  %v2332_v62 = vsel %vm2977_vm7, 1.0, %v2687_v32  ;;  %v3039_v20 = vld [vmem:[#allocation2 + $0x20] sm:$0xf]  ;;  %v3043_v32 = vld [vmem:[#allocation2 + $0x18] sm:$0xf] }
  0x45   : > { %v2350_v63 = vcombine.low %v653_v13, %v654_v58  ;;  %v1038_v25 = vrot.slane %v3015_v38, 4  ;;  %v1045_v1 = vor.u32 %v1043_v26, %v1042_v31  ;;  %v1263_v40 = vmul.bf16 %v3028_v8, %v2995_v46 }
  0x46   : > { %v817_v55 = vshrl.u32 %v2349_v28, 16  ;;  %v820_v7 = vshll.u32 %v2349_v28, 16  ;;  %v3041_v35 = vcombine.low %v1261_v23, %v1262_v59  ;;  %v3047_v26 = vsel %vm2887_vm15, %v1047_v42, %v1054_v48 }
  0x47   : > { %v826_v13 = vshrl.u32 %v2350_v63, 16  ;;  %3408 = vst [vmem:[#allocation3_spill] sm:$0xff] %v3047_v26  ;;  %v1264_v6 = vmul.bf16 %v3039_v20, %v3002_v0  ;;  %v805_v52 = vrot.slane %v803_v30, 4  ;;  %v3409_v9 = vshrl.u32 %v2933_v44, 16 }
  0x48   : > { %v3410_v31 = vshll.u32 %v2933_v44, 16  ;;  %v3411_v23 = vmul.bf16 %v2865_v51, %v2873_v54  ;;  %v3412_v42 = vmul.bf16 %v2940_v53, %v2881_v60  ;;  %v3067_v48 = vpack.c.bf16 %v2332_v62, %v2331_v17  ;;  %v495_v44 = vld [vmem:[#allocation2 + $0x20] sm:$0xf]  ;;  %v3081_v62 = vld [vmem:[#allocation2 + $0x1c] sm:$0xf] }
  0x49   : > { %v810_v15 = vrot.slane %v3409_v9, 3  ;;  %v829_v59 = vshll.u32 %v2350_v63, 16  ;;  %v3071_v61 = vsel %vm2887_vm15, %v1038_v25, %v1045_v1  ;;  %v819_v9 = vrot.slane %v817_v55, 3 }
  0x4a   : > { %v813_v58 = vrot.slane %v3410_v31, 4  ;;  %v3065_v28 = vcombine.low %v3412_v42, %v3411_v23  ;;  %v822_v31 = vrot.slane %v820_v7, 4  ;;  %v1089_v54 = vmul.bf16 %v3047_v26, %v3013_v33 }
  0x4b   : > { %v1312_v60 = vshrl.u32 %v3041_v35, 16  ;;  %v828_v23 = vrot.slane %v826_v13, 3  ;;  %v3078_v42 = vcombine.low %v1263_v40, %v1264_v6  ;;  %v1315_v17 = vshll.u32 %v3041_v35, 16  ;;  %v2658_v13 = vld [vmem:[%s3397_s3] sm:$0xff]  }
  0x4c   : > { %v1570_v1 = vmul.bf16 %v3043_v32, %v3071_v61  ;;  %v1571_v25 = vmul.bf16 %v3081_v62, %v3047_v26  ;;  %v2338_v63 = vcombine.low %v2848_v39, %v2969_v29  ;;  %v633_v55 = vshrl.u32 %v2962_v34, 16  ;;  %v2659_v35 = vld [vmem:[%s3397_s3 + $0x20] sm:$0xff]  }
  0x4d   : > { %v2340_v7 = vcombine.low %v2997_v16, %v495_v44  ;;  %v831_v40 = vrot.slane %v829_v59, 4  ;;  %v3097_v6 = vld [vmem:[#allocation2 + $0x20] sm:$0xf]  ;;  %vm798_vm8 = vsmask.f32 4352  ;;  %v806_v30 = vor.u32 %v805_v52, %v2953_v19 }
  0x4e   : > { %v814_v26 = vor.u32 %v813_v58, %v810_v15  ;;  %v823_v39 = vor.u32 %v822_v31, %v819_v9  ;;  %v3100_v29 = vrot.slane %v1312_v60, 3  ;;  %2532 = vmatmul.mubr.msk.bf16.vlgmr.msra.gmra.mxu0 %vm697_vm11, %v2338_v63  ;;  %v635_v34 = vrot.slane %v633_v55, 4  ;;  %v932_v31 = vld [vmem:[#allocation2 + $0x4] sm:$0xf] }
  0x4f   : > { %2536 = vmatmul.mubr.msk.bf16.vlgmr.msra.gmra.mxu1 %vm697_vm11, %v2340_v7  ;;  %v965_v16 = vrot.slane %v2826_v10, %v2804_v50  ;;  %v1743_v59 = vmul.bf16 %v3081_v62, %v2991_v56  ;;  %2552 = vmatpush3.bf16.msra.mxu0 %v2776_v14  ;;  %v1008_v52 = vshll.u32 %v2820_v2, 16  ;;  %v1034_v15 = vshll.u32 %v2900_v5, 16  ;;  %v3124_v14 = vld [vmem:[%s3397_s3 + $0x48] sm:$0xff]  }
  0x50   : > { %2540 = vmatpush3.bf16.msra.mxu1 %v2757_v11  ;;  %v815_v19 = vsel %vm798_vm8, %v806_v30, %v814_v26  ;;  %v3113_v58 = vcombine.low %v1570_v1, %v1571_v25  ;;  %v636_v10 = vor.u32 %v635_v34, %v2985_v3  ;;  %2553 = vmatprep.subr.bf16.mxu0 %v2659_v35  ;;  %v2660_v11 = vld [vmem:[%s3397_s3 + $0x38] sm:$0xff]   ;;  %v1020_v5 = vrot.slane %v2857_v43, 4 }
  0x51   : > { %2541 = vmatprep.subr.bf16.mxu1 %v2658_v13  ;;  %v1022_v60 = vshrl.u32 %v965_v16, 16  ;;  %2543 = vmatprep.mubr.msk.bf16.mxu1 %vm697_vm11, %v815_v19  ;;  %v3128_v2 = vor.u32 %v1008_v52, %v2845_v36  ;;  %v1025_v3 = vshll.u32 %v965_v16, 16  ;;  %v1036_v30 = vor.u32 %v1034_v15, %v3015_v38 }
  0x52   : > { %v3132_v1 = vrot.slane %v636_v10, 4  ;;  %v824_v63 = vsel %vm798_vm8, %v814_v26, %v823_v39  ;;  %v1088_v55 = vmul.bf16 %v3071_v61, %v3007_v22  ;;  %v3137_v7 = vrot.slane %v1315_v17, 4  ;;  %v2662_v17 = vld [vmem:[%s3397_s3 + $0x30] sm:$0xff]  }
  0x53   : > { %v1024_v25 = vrot.slane %v1022_v60, 7  ;;  %2554 = vmatpush3.bf16.msra.mxu0 %v2659_v35  ;;  %v1084_v36 = vmul.bf16 %v3128_v2, %v932_v31  ;;  %v3140_v34 = vor.u32 %v831_v40, %v828_v23  ;;  %v993_v43 = vrot.slane %v3067_v48, %v2804_v50 }
  0x54   : > { %2542 = vmatpush3.bf16.msra.mxu1 %v2658_v13  ;;  %v655_v38 = vmul.bf16 %v3132_v1, %v495_v44  ;;  %vm1121_vm9 = vsmask.f32 7424  ;;  %v3145_v26 = vcombine.low %v1088_v55, %v1089_v54  ;;  %2575 = vmatprep.subr.bf16.mxu0 %v3124_v14  ;;  %v3413_v23 = vmul.bf16 %v2917_v27, %v2860_v47 }
  0x55   : > { %v1027_v16 = vor.u32 %v1025_v3, %v1024_v25  ;;  %v1029_v19 = vrot.slane %v1024_v25, 4  ;;  %2563 = vmatprep.subr.bf16.mxu1 %v2660_v11  ;;  %v833_v50 = vsel %vm798_vm8, %v823_v39, %v3140_v34  ;;  %v1000_v44 = vrot.slane %v3067_v48, %v2812_v57 }
  0x56   : > { %v2362_v13 = vcombine.low %v1084_v36, %v3413_v23  ;;  %v1058_v35 = vshrl.u32 %v993_v43, 16  ;;  %v2351_v40 = vcombine.low %v655_v38, %v655_v38  ;;  %v1138_v15 = vshll.u32 %v3145_v26, 16 }
  0x57   : > { %v3160_v54 = vsel %vm2887_vm15, %v1020_v5, %v1027_v16  ;;  %v3164_v52 = vsel %vm2887_vm15, %v1029_v19, %v1036_v30  ;;  %2544 = vmatmul.mubr.msk.bf16.vlgmr.msra.gmra.mxu1 %vm697_vm11, %v824_v63  ;;  %v1056_v31 = vrot.slane %v3009_v41, 4  ;;  %v1061_v5 = vshll.u32 %v993_v43, 16  ;;  %v3177_v30 = vld [vmem:[%s3397_s3 + $0x58] sm:$0xff]  }
  0x58   : > { %v1086_v39 = vmul.bf16 %v3160_v54, %v2913_v18  ;;  %v1087_v57 = vmul.bf16 %v3164_v52, %v2896_v4  ;;  %v1123_v48 = vshrl.u32 %v2362_v13, 16  ;;  %v1125_v10 = vshll.u32 %v2362_v13, 16  ;;  %2564 = vmatpush3.bf16.msra.mxu1 %v2660_v11  ;;  %2547 = vmatprep.mubr.msk.bf16.mxu1 %vm697_vm11, %v833_v50 }
  0x59   : > { %v1060_v60 = vrot.slane %v1058_v35, 7  ;;  %v1067_v3 = vshrl.u32 %v1000_v44, 16  ;;  %2565 = vmatprep.subr.bf16.mxu1 %v2662_v17  ;;  %v1140_v55 = vrot.slane %v1138_v15, 1  ;;  %v1070_v36 = vshll.u32 %v1000_v44, 16 }
  0x5a   : > { %v2363_v25 = vcombine.low %v1086_v39, %v1087_v57  ;;  %v1127_v63 = vrot.slane %v1125_v10, 1  ;;  %v835_v19 = vshrl.u32 %v2351_v40, 16  ;;  %v1142_v43 = vshrl.u32 %v3145_v26, 16  ;;  %v940_v57 = vld [vmem:[#allocation2 + $0x24] sm:$0x1] }
  0x5b   : > { %v1063_v38 = vor.u32 %v1061_v5, %v1060_v60  ;;  %v1065_v16 = vrot.slane %v1060_v60, 4  ;;  %v1069_v11 = vrot.slane %v1067_v3, 7  ;;  %v838_v39 = vshll.u32 %v2351_v40, 16 }
  0x5c   : > { %v1128_v23 = vor.u32 %v1127_v63, %v1123_v48  ;;  %v1130_v13 = vshll.u32 %v2363_v25, 16  ;;  %v1134_v41 = vshrl.u32 %v2363_v25, 16  ;;  %2566 = vmatpush3.bf16.msra.mxu1 %v2662_v17  ;;  %v837_v9 = vrot.slane %v835_v19, 3 }
  0x5d   : > { %v3182_v50 = vsel %vm2887_vm15, %v1056_v31, %v1063_v38  ;;  %v1072_v35 = vor.u32 %v1070_v36, %v1069_v11  ;;  %2587 = vmatprep.subr.bf16.mxu1 %v3177_v30  ;;  %v3187_v48 = vrot.slane %v1069_v11, 4  ;;  %v1295_v10 = vshrl.u32 %v2922_v24, 16 }
  0x5e   : > { %v1132_v44 = vrot.slane %v1130_v13, 1  ;;  %v1090_v15 = vmul.bf16 %v3182_v50, %v3028_v8  ;;  %v840_v17 = vrot.slane %v838_v39, 4  ;;  %v1298_v31 = vshll.u32 %v2922_v24, 16 }
  0x5f   : > { %v3192_v26 = vsel %vm2887_vm15, %v1065_v16, %v1072_v35  ;;  %v1303_v40 = vshrl.u32 %v2935_v45, 16  ;;  %v1092_v25 = vmul.bf16 %v3187_v48, %v940_v57  ;;  %v1297_v36 = vrot.slane %v1295_v10, 3  ;;  %v3204_v16 = vld [vmem:[#allocation2 + $0x24] sm:$0xf] }
  0x60   : > { %v1133_v60 = vsel %vm1121_vm9, %v1128_v23, %v1132_v44  ;;  %v1136_v5 = vor.u32 %v1134_v41, %v1132_v44  ;;  %v1091_v3 = vmul.bf16 %v3192_v26, %v3039_v20  ;;  %v841_v63 = vor.u32 %v840_v17, %v837_v9  ;;  %v3208_v41 = vld [vmem:[#allocation2 + $0x24] sm:$0xf]  ;;  %v1557_v17 = vld [vmem:[#allocation2 + $0x8] sm:$0xf] }
  0x61   : > { %2555 = vmatprep.mubr.msk.bf16.mxu0 %vm697_vm11, %v1133_v60  ;;  %v1300_v38 = vrot.slane %v1298_v31, 4  ;;  %v1305_v24 = vrot.slane %v1303_v40, 3  ;;  %v2366_v23 = vcombine.low %v1092_v25, %v1092_v25  ;;  %v1306_v13 = vshll.u32 %v2935_v45, 16  ;;  %v3228_v60 = vld [vmem:[%s3397_s3 + $0x68] sm:$0xff]  }
  0x62   : > { %v1141_v11 = vsel %vm1121_vm9, %v1136_v5, %v1140_v55  ;;  %v2365_v19 = vcombine.low %v1090_v15, %v1091_v3  ;;  %v1144_v9 = vor.u32 %v1142_v43, %v1140_v55  ;;  %v842_v35 = vsel %vm798_vm8, %v3140_v34, %v841_v63 }
  0x63   : > { %2556 = vmatmul.mubr.msk.bf16.vlgmr.msra.gmra.mxu0 %vm697_vm11, %v1141_v11  ;;  %v1301_v39 = vor.u32 %v1300_v38, %v1297_v36  ;;  %v1318_v57 = vor.u32 %v3137_v7, %v3100_v29  ;;  %2548 = vmatmul.mubr.msk.bf16.gmra.mxu1 %vm697_vm11, %v842_v35  ;;  %v1154_v10 = vshll.u32 %v2366_v23, 16  ;;  %v1308_v45 = vrot.slane %v1306_v13, 4  ;;  %v2667_v13 = vld [vmem:[%s3397_s3 + $0x50] sm:$0xff]  }
  0x64   : > { %2576 = vmatpush3.bf16.msra.mxu0 %v3124_v14  ;;  %v1146_v44 = vshll.u32 %v2365_v19, 16  ;;  %v1150_v15 = vshrl.u32 %v2365_v19, 16  ;;  %v1745_v31 = vmul.bf16 %v3204_v16, %v3002_v0  ;;  %v1321_v55 = vshrl.u32 %v3078_v42, 16 }
  0x65   : > { %2577 = vmatprep.subr.bf16.mxu0 %v2663_v12  ;;  %v1324_v34 = vshll.u32 %v3078_v42, 16  ;;  %v1265_v29 = vmul.bf16 %v3208_v41, %v3132_v1  ;;  %v1156_v14 = vrot.slane %v1154_v10, 1  ;;  %v1309_v43 = vor.u32 %v1308_v45, %v1305_v24 }
  0x66   : > { %v1148_v7 = vrot.slane %v1146_v44, 1  ;;  %v2392_v40 = vcombine.low %v2860_v47, %v2913_v18  ;;  %v1323_v0 = vrot.slane %v1321_v55, 3  ;;  %v1566_v25 = vmul.bf16 %v1557_v17, %v3128_v2 }
  0x67   : > { %v1326_v5 = vrot.slane %v1324_v34, 4  ;;  %v2381_v3 = vcombine.low %v1265_v29, %v1265_v29  ;;  %v1310_v36 = vsel %vm798_vm8, %v1301_v39, %v1309_v43  ;;  %v1319_v38 = vsel %vm798_vm8, %v1309_v43, %v1318_v57  ;;  %v3271_v43 = vld [vmem:[%s3397_s3 + $0x78] sm:$0xff]  }
  0x68   : > { %v1149_v42 = vsel %vm1121_vm9, %v1144_v9, %v1148_v7  ;;  %v1152_v63 = vor.u32 %v1150_v15, %v1148_v7  ;;  %2578 = vmatpush3.bf16.msra.mxu0 %v2663_v12  ;;  %2567 = vmatprep.mubr.msk.bf16.mxu1 %vm697_vm11, %v1310_v36  ;;  %v1568_v11 = vmul.bf16 %v2940_v53, %v3160_v54  ;;  %v1776_v44 = vshrl.u32 %v3037_v21, 16 }
  0x69   : > { %2559 = vmatprep.mubr.msk.bf16.mxu0 %vm697_vm11, %v1149_v42  ;;  %v1327_v47 = vor.u32 %v1326_v5, %v1323_v0  ;;  %v1330_v18 = vshrl.u32 %v2381_v3, 16  ;;  %v1333_v24 = vshll.u32 %v2381_v3, 16  ;;  %v3414_v12 = vmul.bf16 %v3043_v32, %v2983_v37  ;;  %2599 = vmatprep.subr.bf16.mxu0 %v3228_v60 }
  0x6a   : > { %v1157_v23 = vsel %vm1121_vm9, %v1152_v63, %v1156_v14  ;;  %v1569_v9 = vmul.bf16 %v2865_v51, %v3164_v52  ;;  %v3415_v35 = vmul.bf16 %v2863_v49, %v2917_v27  ;;  %v1779_v17 = vshll.u32 %v3037_v21, 16 }
  0x6b   : > { %v3244_v19 = vcombine.low %v3414_v12, %v1743_v59  ;;  %2560 = vmatmul.mubr.msk.bf16.gmra.mxu0 %vm697_vm11, %v1157_v23  ;;  %v1328_v37 = vsel %vm798_vm8, %v1318_v57, %v1327_v47  ;;  %v1332_v59 = vrot.slane %v1330_v18, 3  ;;  %v1335_v39 = vrot.slane %v1333_v24, 4  ;;  %2568 = vmatmul.mubr.msk.bf16.vlgmr.msra.gmra.mxu1 %vm697_vm11, %v1319_v38  ;;  %v3290_v18 = vld [vmem:[#allocation2 + $0x28] sm:$0xf] }
  0x6c   : > { %v2406_v56 = vcombine.low %v1566_v25, %v3415_v35  ;;  %2579 = vmatprep.mubr.msk.bf16.mxu0 %vm697_vm11, %v2392_v40  ;;  %v2407_v15 = vcombine.low %v1568_v11, %v1569_v9  ;;  %2588 = vmatpush3.bf16.msra.mxu1 %v3177_v30  ;;  %v1784_v55 = vshrl.u32 %v3065_v28, 16  ;;  %v1787_v57 = vshll.u32 %v3065_v28, 16  ;;  %v2669_v25 = vld [vmem:[%s3397_s3 + $0x60] sm:$0xff]   ;;  %v2039_v9 = vld [vmem:[#allocation2 + $0x10] sm:$0xf] }
  0x6d   : > { %2571 = vmatprep.mubr.msk.bf16.mxu1 %vm697_vm11, %v1328_v37  ;;  %v2393_v34 = vcombine.low %v2896_v4, %v3007_v22  ;;  %2589 = vmatprep.subr.bf16.mxu1 %v2667_v13  ;;  %v1336_v29 = vor.u32 %v1335_v39, %v1332_v59  ;;  %v3416_v21 = vmul.bf16 %v3097_v6, %v2995_v46  ;;  %v1793_v40 = vshrl.u32 %v3244_v19, 16 }
  0x6e   : > { %v1604_v10 = vshrl.u32 %v2406_v56, 16  ;;  %v1606_v45 = vshll.u32 %v2406_v56, 16  ;;  %v1611_v14 = vshll.u32 %v2407_v15, 16  ;;  %v2394_v28 = vcombine.low %v3013_v33, %v3028_v8  ;;  %v1565_v33 = vld [vmem:[#allocation2 + $0x28] sm:$0x1] }
  0x6f   : > { %v2424_v30 = vcombine.low %v3416_v21, %v1745_v31  ;;  %v1778_v0 = vrot.slane %v1776_v44, 3  ;;  %v1781_v5 = vrot.slane %v1779_v17, 4  ;;  %v1619_v3 = vshll.u32 %v3113_v58, 16 }
  0x70   : > { %v1608_v7 = vrot.slane %v1606_v45, 1  ;;  %v1613_v22 = vrot.slane %v1611_v14, 1  ;;  %2590 = vmatpush3.bf16.msra.mxu1 %v2667_v13  ;;  %v1786_v42 = vrot.slane %v1784_v55, 3  ;;  %v1789_v63 = vrot.slane %v1787_v57, 4  ;;  %v2038_v13 = vld [vmem:[#allocation2 + $0xc] sm:$0xf] }
  0x71   : > { %v1572_v46 = vmul.bf16 %v3097_v6, %v3182_v50  ;;  %v1573_v31 = vmul.bf16 %v3204_v16, %v3192_v26  ;;  %v1796_v8 = vshll.u32 %v3244_v19, 16  ;;  %v1337_v36 = vsel %vm798_vm8, %v1327_v47, %v1336_v29  ;;  %2611 = vmatprep.subr.bf16.mxu1 %v3271_v43  ;;  %v2041_v45 = vld [vmem:[#allocation2 + $0x18] sm:$0xf] }
  0x72   : > { %v1609_v4 = vor.u32 %v1608_v7, %v1604_v10  ;;  %v1615_v38 = vshrl.u32 %v2407_v15, 16  ;;  %v1795_v24 = vrot.slane %v1793_v40, 3  ;;  %v1623_v23 = vshrl.u32 %v3113_v58, 16  ;;  %v3302_v58 = vld [vmem:[%s3397_s3 + $0x88] sm:$0xff]   ;;  %v2040_v10 = vld [vmem:[#allocation2 + $0x14] sm:$0xf] }
  0x73   : > { %2580 = vmatmul.mubr.msk.bf16.vlgmr.msra.gmra.mxu0 %vm697_vm11, %v2393_v34  ;;  %v2409_v12 = vcombine.low %v1572_v46, %v1573_v31  ;;  %v1782_v47 = vor.u32 %v1781_v5, %v1778_v0  ;;  %v1802_v19 = vshrl.u32 %v2424_v30, 16  ;;  %v1805_v35 = vshll.u32 %v2424_v30, 16  ;;  %2572 = vmatmul.mubr.msk.bf16.gmra.mxu1 %vm697_vm11, %v1337_v36  ;;  %v2043_v5 = vld [vmem:[#allocation2 + $0x20] sm:$0xf]  ;;  %v3417_v36 = vld [vmem:[#allocation3_spill] sm:$0xff] }
  0x74   : > { %v1614_v11 = vsel %vm1121_vm9, %v1609_v4, %v1613_v22  ;;  %2600 = vmatpush3.bf16.msra.mxu0 %v3228_v60  ;;  %2583 = vmatprep.mubr.msk.bf16.mxu0 %vm697_vm11, %v2394_v28  ;;  %v1574_v56 = vmul.bf16 %v1565_v33, %v3187_v48  ;;  %v1790_v37 = vor.u32 %v1789_v63, %v1786_v42  ;;  %v1621_v59 = vrot.slane %v1619_v3, 1  ;;  %v2044_v33 = vld [vmem:[#allocation2 + $0x24] sm:$0xf] }
  0x75   : > { %2601 = vmatprep.subr.bf16.mxu0 %v2669_v25  ;;  %v1627_v39 = vshll.u32 %v2409_v12, 16  ;;  %v1746_v60 = vmul.bf16 %v3290_v18, %v3132_v1  ;;  %v1617_v44 = vor.u32 %v1615_v38, %v1613_v22  ;;  %2591 = vmatprep.mubr.msk.bf16.mxu1 %vm697_vm11, %v1614_v11  ;;  %v2047_v17 = vmul.bf16 %v2038_v13, %v3128_v2  ;;  %v2672_v22 = vld [vmem:[%s3397_s3 + $0x70] sm:$0xff]  }
  0x76   : > { %v2410_v15 = vcombine.low %v1574_v56, %v1574_v56  ;;  %v2048_v55 = vmul.bf16 %v2039_v9, %v2917_v27  ;;  %v1798_v57 = vrot.slane %v1796_v8, 4  ;;  %v2395_v34 = vcombine.low %v3039_v20, %v3208_v41  ;;  %v2045_v8 = vld [vmem:[#allocation2 + $0x28] sm:$0xf] }
  0x77   : > { %v1625_v29 = vor.u32 %v1623_v23, %v1621_v59  ;;  %v1629_v7 = vrot.slane %v1627_v39, 1  ;;  %v1804_v14 = vrot.slane %v1802_v19, 3  ;;  %v1807_v21 = vrot.slane %v1805_v35, 4 }
  0x78   : > { %2602 = vmatpush3.bf16.msra.mxu0 %v2669_v25  ;;  %v2425_v1 = vcombine.low %v1746_v60, %v1746_v60  ;;  %v1791_v30 = vsel %vm798_vm8, %v1782_v47, %v1790_v37  ;;  %v2049_v40 = vmul.bf16 %v2040_v10, %v3160_v54  ;;  %v2050_v2 = vmul.bf16 %v2041_v45, %v3164_v52  ;;  %v2042_v25 = vld [vmem:[#allocation2 + $0x1c] sm:$0xf] }
  0x79   : > { %2623 = vmatprep.subr.bf16.mxu0 %v3302_v58  ;;  %v2450_v28 = vcombine.low %v2047_v17, %v2048_v55  ;;  %v1622_v27 = vsel %vm1121_vm9, %v1617_v44, %v1621_v59  ;;  %v1631_v0 = vshrl.u32 %v2409_v12, 16  ;;  %v1635_v4 = vshll.u32 %v2410_v15, 16  ;;  %v2046_v44 = vld [vmem:[#allocation2 + $0x2c] sm:$0x1] }
  0x7a   : > { %v1799_v20 = vor.u32 %v1798_v57, %v1795_v24  ;;  %v1630_v41 = vsel %vm1121_vm9, %v1625_v29, %v1629_v7  ;;  %v1808_v54 = vor.u32 %v1807_v21, %v1804_v14  ;;  %v1811_v3 = vshrl.u32 %v2425_v1, 16 }
  0x7b   : > { %2584 = vmatmul.mubr.msk.bf16.gmra.mxu0 %vm697_vm11, %v2395_v34  ;;  %v1814_v52 = vshll.u32 %v2425_v1, 16  ;;  %2592 = vmatmul.mubr.msk.bf16.vlgmr.msra.gmra.mxu1 %vm697_vm11, %v1622_v27  ;;  %v2451_v42 = vcombine.low %v2049_v40, %v2050_v2  ;;  %v2087_v63 = vshll.u32 %v2450_v28, 16  ;;  %v1633_v46 = vor.u32 %v1631_v0, %v1629_v7 }
  0x7c   : > { %2603 = vmatprep.mubr.msk.bf16.mxu0 %vm697_vm11, %v1791_v30  ;;  %2612 = vmatpush3.bf16.msra.mxu1 %v3271_v43  ;;  %v1637_v31 = vrot.slane %v1635_v4, 1  ;;  %v2052_v38 = vmul.bf16 %v2043_v5, %v3417_v36  ;;  %v1800_v24 = vsel %vm798_vm8, %v1790_v37, %v1799_v20  ;;  %v2051_v11 = vmul.bf16 %v2042_v25, %v3071_v61  ;;  %v2673_v43 = vld [vmem:[%s3397_s3 + $0x80] sm:$0xff]  }
  0x7d   : > { %2595 = vmatprep.mubr.msk.bf16.mxu1 %vm697_vm11, %v1630_v41  ;;  %2613 = vmatprep.subr.bf16.mxu1 %v2672_v22  ;;  %v1809_v12 = vsel %vm798_vm8, %v1799_v20, %v1808_v54  ;;  %v1813_v23 = vrot.slane %v1811_v3, 3  ;;  %v1816_v13 = vrot.slane %v1814_v52, 4  ;;  %v2085_v9 = vshrl.u32 %v2450_v28, 16 }
  0x7e   : > { %v2089_v47 = vrot.slane %v2087_v63, 1  ;;  %v2092_v19 = vshll.u32 %v2451_v42, 16  ;;  %v2053_v35 = vmul.bf16 %v2044_v33, %v3182_v50  ;;  %v2054_v56 = vmul.bf16 %v2045_v8, %v3192_v26 }
  0x7f   : > { %v1638_v37 = vsel %vm1121_vm9, %v1633_v46, %v1637_v31  ;;  %v2436_v61 = vcombine.low %v2863_v49, %v2940_v53  ;;  %v2452_v59 = vcombine.low %v2051_v11, %v2052_v38  ;;  %v1817_v39 = vor.u32 %v1816_v13, %v1813_v23 }
  0x80   : > { %2614 = vmatpush3.bf16.msra.mxu1 %v2672_v22  ;;  %v2090_v50 = vor.u32 %v2089_v47, %v2085_v9  ;;  %v2094_v60 = vrot.slane %v2092_v19, 1  ;;  %v2453_v26 = vcombine.low %v2053_v35, %v2054_v56  ;;  %v2096_v53 = vshrl.u32 %v2451_v42, 16 }
  0x81   : > { %v2100_v15 = vshll.u32 %v2452_v59, 16  ;;  %v1818_v49 = vsel %vm798_vm8, %v1808_v54, %v1817_v39  ;;  %v2055_v10 = vmul.bf16 %v2046_v44, %v3187_v48  ;;  %v2104_v17 = vshrl.u32 %v2452_v59, 16 }
  0x82   : > { %v2095_v45 = vsel %vm1121_vm9, %v2090_v50, %v2094_v60  ;;  %v2108_v55 = vshll.u32 %v2453_v26, 16  ;;  %v2438_v57 = vcombine.low %v3081_v62, %v3097_v6  ;;  %v2098_v29 = vor.u32 %v2096_v53, %v2094_v60 }
  0x83   : > { %2604 = vmatmul.mubr.msk.bf16.vlgmr.msra.gmra.mxu0 %vm697_vm11, %v1800_v24  ;;  %2596 = vmatmul.mubr.msk.bf16.gmra.mxu1 %vm697_vm11, %v1638_v37  ;;  %v2102_v34 = vrot.slane %v2100_v15, 1  ;;  %v2454_v7 = vcombine.low %v2055_v10, %v2055_v10  ;;  %v2439_v62 = vcombine.low %v3204_v16, %v3290_v18 }
  0x84   : > { %2624 = vmatpush3.bf16.msra.mxu0 %v3302_v58  ;;  %2607 = vmatprep.mubr.msk.bf16.mxu0 %vm697_vm11, %v1809_v12  ;;  %v2437_v58 = vcombine.low %v2865_v51, %v3043_v32  ;;  %v2110_v14 = vrot.slane %v2108_v55, 1  ;;  %v2112_v32 = vshrl.u32 %v2453_v26, 16 }
  0x85   : > { %2625 = vmatprep.subr.bf16.mxu0 %v2673_v43  ;;  %2615 = vmatprep.mubr.msk.bf16.mxu1 %vm697_vm11, %v2436_v61  ;;  %v2106_v48 = vor.u32 %v2104_v17, %v2102_v34  ;;  %v2103_v51 = vsel %vm1121_vm9, %v2098_v29, %v2102_v34  ;;  %v2116_v21 = vshll.u32 %v2454_v7, 16 }
  0x86   : > { %v2114_v6 = vor.u32 %v2112_v32, %v2110_v14 }
  0x87   : > { %v2111_v1 = vsel %vm1121_vm9, %v2106_v48, %v2110_v14  ;;  %v2118_v30 = vrot.slane %v2116_v21, 1 }
  0x88   : > { %2626 = vmatpush3.bf16.msra.mxu0 %v2673_v43 }
  0x89   : > { %v2119_v40 = vsel %vm1121_vm9, %v2114_v6, %v2118_v30 }
  0x8b   : > { %2608 = vmatmul.mubr.msk.bf16.gmra.mxu0 %vm697_vm11, %v1818_v49  ;;  %2616 = vmatmul.mubr.msk.bf16.vlgmr.msra.gmra.mxu1 %vm697_vm11, %v2437_v58 }
  0x8c   : > { %2627 = vmatprep.mubr.msk.bf16.mxu0 %vm697_vm11, %v2095_v45  ;;  %2619 = vmatprep.mubr.msk.bf16.mxu1 %vm697_vm11, %v2438_v57 }
  0x93   : > { %2628 = vmatmul.mubr.msk.bf16.vlgmr.msra.gmra.mxu0 %vm697_vm11, %v2103_v51  ;;  %2620 = vmatmul.mubr.msk.bf16.gmra.mxu1 %vm697_vm11, %v2439_v62 }
  0x94   : > { %2631 = vmatprep.mubr.msk.bf16.mxu0 %vm697_vm11, %v2111_v1 }
  0x9b   : > { %2632 = vmatmul.mubr.msk.bf16.gmra.mxu0 %vm697_vm11, %v2119_v40 }
 0x10e   : > { %v2533_v27 = vpop.f32.mrf.mxu0 }
 0x10f   : > { %v2537_v2 = vpop.f32.mrf.mxu1 }
 0x110   : > { %v744_v20 = vpop.f32.mrf.mxu0 }
 0x111   : > { %v760_v28 = vpop.f32.mrf.mxu1 }
 0x112   : > { %v2534_v41 = vpop.f32.mrf.mxu0 }
 0x113   : > { %v2538_v0 = vpop.f32.mrf.mxu1 }
 0x114   : > { %v747_v5 = vpop.f32.mrf.mxu0 }
 0x115   : > { %v3362_v4 = vpop.f32.mrf.mxu1 }
 0x117   : > { %v2545_v16 = vpop.f32.mrf.mxu1 }
 0x118   : > { %v910_v60 = vadd.f32 %v2545_v16, %v2533_v27 }
 0x119   : > { %v901_v18 = vpop.f32.mrf.mxu1 }
 0x11a   : > { %v902_v15 = vadd.f32 %v901_v18, %v744_v20 }
 0x11b   : > { %v2546_v22 = vpop.f32.mrf.mxu1 }
 0x11c   : > { %v913_v58 = vadd.f32 %v2546_v22, %v2534_v41 }
 0x11d   : > { %v904_v54 = vpop.f32.mrf.mxu1 }
 0x11e   : > { %v905_v57 = vadd.f32 %v904_v54, %v747_v5 }
 0x123   : > { %v2557_v3 = vpop.f32.mrf.mxu0  ;;  %v2549_v52 = vpop.f32.mrf.mxu1 }
 0x124   : > { %v1249_v10 = vadd.f32 %v2557_v3, %v910_v60  ;;  %v926_v14 = vadd.f32 %v2549_v52, %v2537_v2 }
 0x125   : > { %v1216_v25 = vpop.f32.mrf.mxu0  ;;  %v917_v42 = vpop.f32.mrf.mxu1 }
 0x126   : > { %v1247_v55 = vadd.f32 %v1216_v25, %v902_v15  ;;  %v918_v62 = vadd.f32 %v917_v42, %v760_v28 }
 0x127   : > { %v2558_v63 = vpop.f32.mrf.mxu0  ;;  %v2550_v46 = vpop.f32.mrf.mxu1 }
 0x128   : > { %v1250_v48 = vadd.f32 %v2558_v63, %v913_v58  ;;  %v929_v40 = vadd.f32 %v2550_v46, %v2538_v0 }
 0x129   : > { %v1219_v31 = vpop.f32.mrf.mxu0  ;;  %v920_v33 = vpop.f32.mrf.mxu1 }
 0x12a   : > { %v1248_v1 = vadd.f32 %v1219_v31, %v905_v57  ;;  %v921_v5 = vadd.f32 %v920_v33, %v3362_v4 }
 0x12b   : > { %v2561_v8 = vpop.f32.mrf.mxu0  ;;  %v2569_v36 = vpop.f32.mrf.mxu1 }
 0x12c   : > { %v1429_v34 = vadd.f32 %v2569_v36, %v1249_v10  ;;  %v1253_v16 = vadd.f32 %v2561_v8, %v926_v14 }
 0x12d   : > { %v1232_v38 = vpop.f32.mrf.mxu0  ;;  %v1396_v24 = vpop.f32.mrf.mxu1 }
 0x12e   : > { %v1427_v51 = vadd.f32 %v1396_v24, %v1247_v55  ;;  %v1251_v25 = vadd.f32 %v1232_v38, %v918_v62 }
 0x12f   : > { %v2562_v11 = vpop.f32.mrf.mxu0  ;;  %v2570_v12 = vpop.f32.mrf.mxu1 }
 0x130   : > { %v1430_v30 = vadd.f32 %v2570_v12, %v1250_v48  ;;  %v1254_v36 = vadd.f32 %v2562_v11, %v929_v40 }
 0x131   : > { %v1235_v23 = vpop.f32.mrf.mxu0  ;;  %v1399_v13 = vpop.f32.mrf.mxu1 }
 0x132   : > { %v1428_v41 = vadd.f32 %v1399_v13, %v1248_v1  ;;  %v1252_v12 = vadd.f32 %v1235_v23, %v921_v5 }
 0x133   : > { %v2581_v9 = vpop.f32.mrf.mxu0  ;;  %v2573_v47 = vpop.f32.mrf.mxu1 }
 0x134   : > { %v1551_v6 = vadd.f32 %v2581_v9, %v1429_v34  ;;  %v1433_v52 = vadd.f32 %v2573_v47, %v1253_v16 }
 0x135   : > { %v1518_v43 = vpop.f32.mrf.mxu0  ;;  %v1412_v35 = vpop.f32.mrf.mxu1 }
 0x136   : > { %v1549_v18 = vadd.f32 %v1518_v43, %v1427_v51  ;;  %v1431_v24 = vadd.f32 %v1412_v35, %v1251_v25 }
 0x137   : > { %v2582_v19 = vpop.f32.mrf.mxu0  ;;  %v2574_v37 = vpop.f32.mrf.mxu1 }
 0x138   : > { %v1552_v2 = vadd.f32 %v2582_v19, %v1430_v30  ;;  %v1434_v8 = vadd.f32 %v2574_v37, %v1254_v36 }
 0x139   : > { %v1521_v56 = vpop.f32.mrf.mxu0  ;;  %v1415_v59 = vpop.f32.mrf.mxu1 }
 0x13a   : > { %v1550_v42 = vadd.f32 %v1521_v56, %v1428_v41  ;;  %v1432_v38 = vadd.f32 %v1415_v59, %v1252_v12 }
 0x13b   : > { %v2585_v61 = vpop.f32.mrf.mxu0  ;;  %v2593_v50 = vpop.f32.mrf.mxu1 }
 0x13c   : > { %v1730_v22 = vadd.f32 %v2593_v50, %v1551_v6  ;;  %v1555_v43 = vadd.f32 %v2585_v61, %v1433_v52 }
 0x13d   : > { %v1534_v39 = vpop.f32.mrf.mxu0  ;;  %v1697_v44 = vpop.f32.mrf.mxu1 }
 0x13e   : > { %v1728_v63 = vadd.f32 %v1697_v44, %v1549_v18  ;;  %v1553_v60 = vadd.f32 %v1534_v39, %v1431_v24 }
 0x13f   : > { %v2586_v26 = vpop.f32.mrf.mxu0  ;;  %v2594_v53 = vpop.f32.mrf.mxu1 }
 0x140   : > { %v1731_v46 = vadd.f32 %v2594_v53, %v1552_v2  ;;  %v1556_v56 = vadd.f32 %v2586_v26, %v1434_v8 }
 0x141   : > { %v3364_v49 = vpop.f32.mrf.mxu0  ;;  %v1700_v17 = vpop.f32.mrf.mxu1 }
 0x142   : > { %v1729_v33 = vadd.f32 %v1700_v17, %v1550_v42  ;;  %v1554_v39 = vadd.f32 %v3364_v49, %v1432_v38 }
 0x143   : > { %v2605_v45 = vpop.f32.mrf.mxu0  ;;  %v2597_v7 = vpop.f32.mrf.mxu1 }
 0x144   : > { %v1910_v0 = vadd.f32 %v2605_v45, %v1730_v22  ;;  %v1734_v44 = vadd.f32 %v2597_v7, %v1555_v43 }
 0x145   : > { %v1877_v29 = vpop.f32.mrf.mxu0  ;;  %v1713_v21 = vpop.f32.mrf.mxu1 }
 0x146   : > { %v1908_v4 = vadd.f32 %v1877_v29, %v1728_v63  ;;  %v1732_v61 = vadd.f32 %v1713_v21, %v1553_v60 }
 0x147   : > { %v2606_v32 = vpop.f32.mrf.mxu0  ;;  %v2598_v20 = vpop.f32.mrf.mxu1 }
 0x148   : > { %v1911_v11 = vadd.f32 %v2606_v32, %v1731_v46  ;;  %v1735_v45 = vadd.f32 %v2598_v20, %v1556_v56 }
 0x149   : > { %v1880_v27 = vpop.f32.mrf.mxu0  ;;  %v1716_v3 = vpop.f32.mrf.mxu1 }
 0x14a   : > { %v1909_v37 = vadd.f32 %v1880_v27, %v1729_v33  ;;  %v1733_v7 = vadd.f32 %v1716_v3, %v1554_v39 }
 0x14b   : > { %v2609_v54 = vpop.f32.mrf.mxu0  ;;  %v2617_v28 = vpop.f32.mrf.mxu1 }
 0x14c   : > { %v2032_v50 = vadd.f32 %v2617_v28, %v1910_v0  ;;  %v1914_v26 = vadd.f32 %v2609_v54, %v1734_v44 }
 0x14d   : > { %v1893_v31 = vpop.f32.mrf.mxu0  ;;  %v1999_v9 = vpop.f32.mrf.mxu1 }
 0x14e   : > { %v2030_v15 = vadd.f32 %v1999_v9, %v1908_v4  ;;  %v1912_v29 = vadd.f32 %v1893_v31, %v1732_v61 }
 0x14f   : > { %v2610_v13 = vpop.f32.mrf.mxu0  ;;  %v2618_v47 = vpop.f32.mrf.mxu1 }
 0x150   : > { %v2033_v53 = vadd.f32 %v2618_v47, %v1911_v11  ;;  %v1915_v32 = vadd.f32 %v2610_v13, %v1735_v45 }
 0x151   : > { %v1896_v19 = vpop.f32.mrf.mxu0  ;;  %v2002_v35 = vpop.f32.mrf.mxu1 }
 0x152   : > { %v2031_v55 = vadd.f32 %v2002_v35, %v1909_v37  ;;  %v1913_v30 = vadd.f32 %v1896_v19, %v1733_v7 }
 0x153   : > { %v2629_v23 = vpop.f32.mrf.mxu0  ;;  %v2621_v58 = vpop.f32.mrf.mxu1 }
 0x154   : > { %v2211_v59 = vadd.f32 %v2629_v23, %v2032_v50  ;;  %v2036_v14 = vadd.f32 %v2621_v58, %v1914_v26 }
 0x155   : > { %v2178_v10 = vpop.f32.mrf.mxu0  ;;  %v2015_v34 = vpop.f32.mrf.mxu1 }
 0x156   : > { %2219 = vst.msk [vmem:[%s3372_s18 + $0x10] sm:$0xff] %vm697_vm11, %v2211_v59  ;;  %v2209_v17 = vadd.f32 %v2178_v10, %v2030_v15  ;;  %v2034_v1 = vadd.f32 %v2015_v34, %v1912_v29 }
 0x157   : > { %v2630_v57 = vpop.f32.mrf.mxu0  ;;  %v2622_v51 = vpop.f32.mrf.mxu1 }
 0x158   : > { %2217 = vst.msk [vmem:[%s3372_s18] sm:$0xff] %vm697_vm11, %v2209_v17  ;;  %v2212_v48 = vadd.f32 %v2630_v57, %v2033_v53  ;;  %v2037_v27 = vadd.f32 %v2622_v51, %v1915_v32 }
 0x159   : > { %v2181_v49 = vpop.f32.mrf.mxu0  ;;  %v2018_v6 = vpop.f32.mrf.mxu1 }
 0x15a   : > { %2220 = vst.msk [vmem:[%s3372_s18 + $0x18] sm:$0xff] %vm697_vm11, %v2212_v48  ;;  %v2210_v21 = vadd.f32 %v2181_v49, %v2031_v55  ;;  %v2035_v18 = vadd.f32 %v2018_v6, %v1913_v30 }
 0x15b   : > { %v2633_v62 = vpop.f32.mrf.mxu0 }
 0x15c   : > { %2218 = vst.msk [vmem:[%s3372_s18 + $0x8] sm:$0xff] %vm697_vm11, %v2210_v21  ;;  %v2215_v40 = vadd.f32 %v2633_v62, %v2036_v14 }
 0x15d   : > { %v2194_v20 = vpop.f32.mrf.mxu0 }
 0x15e   : > { %2223 = vst.msk [vmem:[%s3372_s18 + $0x30] sm:$0xff] %vm697_vm11, %v2215_v40  ;;  %v2213_v16 = vadd.f32 %v2194_v20, %v2034_v1 }
 0x15f   : > { %v2634_v41 = vpop.f32.mrf.mxu0 }
 0x160   : > { %2221 = vst.msk [vmem:[%s3372_s18 + $0x20] sm:$0xff] %vm697_vm11, %v2213_v16  ;;  %v2216_v22 = vadd.f32 %v2634_v41, %v2037_v27 }
 0x161   : > { %v2197_v5 = vpop.f32.mrf.mxu0 }
 0x162   : > { %2224 = vst.msk [vmem:[%s3372_s18 + $0x38] sm:$0xff] %vm697_vm11, %v2216_v22  ;;  %v2214_v54 = vadd.f32 %v2197_v5, %v2035_v18 }
 0x164   : > { %2222 = vst.msk [vmem:[%s3372_s18 + $0x28] sm:$0xff] %vm697_vm11, %v2214_v54 }
 0x165 PF: > { %s14_s15 = sadd.s32 1, %s2682_s15  }
 0x166   : > { %p11_p4 = scmp.ge.s32.totalorder %s14_s15, 4  }
 0x168   :  { %13 = sbr.rel (!%p11_p4) target bundleno = 1 (0x1), region = 80 }

// kernel: ecn_pose_forward.28
= control target key start
LH: loop header
LB: loop body
LE: loop exit
PB: predicated region body
PF: predicated region fallthrough
CT: control target
= control target key end

     0   :  { %s326_s9 = smov 0   ;;  %s352_s0 = inlined_call_operand.vmem [shape: f32[2,2,2,2,96], index: 0, kind: input, shape index: {}]   ;;  %s353_s1 = inlined_call_operand.vmem [shape: f32[2,2,2,2,64], index: 1, kind: input, shape index: {}]   ;;  %s354_s2 = inlined_call_operand.vmem [shape: f32[2,2,2,48], index: 2, kind: output, shape index: {}]  }
   0x1 LB: > { %s275_s10 = sadd.s32 4294967295, %s307_s9   ;;  %p279_p0 = scmp.ge.s32.totalorder %s307_s9, 1  ;;  %s307_s9 = sphi %s326_s9, %s12_s9  }
   0x2   : > { %p122_p1 = scmp.lt.s32.totalorder %s307_s9, 3 }
   0x4   : > { %p123_p2 = pnand %p279_p0, %p122_p1 }
   0x5   : > { %p149_p3 = scmp.lt.s32.totalorder (!%p123_p2), %s275_s10, 1  ;;  %s309_s18 = smov (!%p123_p2), 96  }
   0x6   : > { %126 = sbr.rel (%p123_p2) target bundleno = 144 (0x90), region = 28  ;;  %s310_s19 = smov (!%p123_p2), 80  }
   0xb   : > { %s356_s10 = smov (!%p149_p3, %s275_s10), 1  ;;  %vm200_vm0 = vcmask 261120   ;;  %vm205_vm1 = vcmask 386048  }
   0xc   : > { %s288_s11 = sshll.u32 %s356_s10, 3  ;;  %s290_s20 = sshll.u32 %s356_s10, 2 }
   0xd   : > { %s158_s14 = scalar_lea.vmem %s353_s1, %s288_s11  ;;  %s153_s17 = scalar_lea.vmem %s352_s0, %s288_s11 }
   0xe   : > { %v168_v0 = vld [vmem:[%s158_s14] sm:$0x3]  ;;  %v169_v1 = vld [vmem:[%s158_s14 + $0x2] sm:$0x3]  ;;  %v170_v5 = vld [vmem:[%s158_s14 + $0x4] sm:$0x3]  ;;  %s163_s23 = scalar_lea.vmem %s354_s2, %s290_s20 }
   0xf   : > { %v164_v2 = vld [vmem:[%s153_s17] sm:$0x3]  ;;  %v174_v3 = vadd.f32 %v169_v1, %v168_v0  ;;  %v165_v4 = vld [vmem:[%s153_s17 + $0x2] sm:$0x3]  ;;  %v171_v6 = vld [vmem:[%s158_s14 + $0x6] sm:$0x3] }
  0x10   : > { %v172_v7 = vadd.f32 %v165_v4, %v164_v2  ;;  %v166_v8 = vld [vmem:[%s153_s17 + $0x4] sm:$0x3]  ;;  %v167_v9 = vld [vmem:[%s153_s17 + $0x6] sm:$0x3]  ;;  %v175_v10 = vadd.f32 %v171_v6, %v170_v5 }
  0x11   : > { %190 = vrot.lane.b32.xlu0 %v174_v3, %s309_s18  ;;  %v173_v11 = vadd.f32 %v167_v9, %v166_v8 }
  0x12   : > { %178 = vrot.lane.b32.xlu1 %v172_v7, %s310_s19 }
  0x15   : > { %192 = vrot.lane.b32.xlu0 %v175_v10, %s309_s18 }
  0x16   : > { %180 = vrot.lane.b32.xlu1 %v173_v11, %s310_s19 }
  0x83   : > { %v191_v12 = vpop.permute.xlu0 %190 }
  0x84   : > { %v196_v13 = vadd.f32 %v191_v12, %v174_v3  ;;  %v179_v14 = vpop.permute.xlu1 %178 }
  0x85   : > { %v184_v15 = vadd.f32 %v179_v14, %v172_v7 }
  0x86   : > { %v198_v16 = vmul.f32 0.25, %v196_v13 }
  0x87   : > { %v186_v17 = vmul.f32 0.25, %v184_v15  ;;  %v193_v18 = vpop.permute.xlu0 %192 }
  0x88   : > { %v201_v19 = vsel %vm200_vm0, %v198_v16, 0.0  ;;  %v197_v20 = vadd.f32 %v193_v18, %v175_v10  ;;  %v181_v21 = vpop.permute.xlu1 %180 }
  0x89   : > { %v203_v22 = vadd.f32 %v201_v19, %v186_v17  ;;  %v185_v23 = vadd.f32 %v181_v21, %v173_v11 }
  0x8a   : > { %v199_v24 = vmul.f32 0.25, %v197_v20 }
  0x8b   : > { %206 = vst.msk [vmem:[%s163_s23] sm:$0x3] %vm205_vm1, %v203_v22  ;;  %v187_v25 = vmul.f32 0.25, %v185_v23 }
  0x8c   : > { %v202_v26 = vsel %vm200_vm0, %v199_v24, 0.0 }
  0x8d   : > { %v204_v27 = vadd.f32 %v202_v26, %v187_v25 }
  0x8f   : > { %207 = vst.msk [vmem:[%s163_s23 + $0x2] sm:$0x3] %vm205_vm1, %v204_v27 }
  0x90 PF: > { %s12_s9 = sadd.s32 1, %s307_s9  }
  0x91   : > { %p9_p4 = scmp.ge.s32.totalorder %s12_s9, 4  }
  0x93   :  { %11 = sbr.rel (!%p9_p4) target bundleno = 1 (0x1), region = 61 }

// kernel: ecn_pose_forward.29
= control target key start
LH: loop header
LB: loop body
LE: loop exit
PB: predicated region body
PF: predicated region fallthrough
CT: control target
= control target key end

     0   :  { %s792_s21 = smov 0   ;;  %s873_s0 = inlined_call_operand.vmem [shape: f32[2,4,48], index: 0, kind: input, shape index: {}]   ;;  %s874_s1 = inlined_call_operand.vmem [shape: f32[48,16], index: 1, kind: input, shape index: {}]   ;;  %s875_s2 = inlined_call_operand.vmem [shape: f32[16,48], index: 2, kind: input, shape index: {}]   ;;  %s876_s3 = inlined_call_operand.vmem [shape: f32[1,48], index: 3, kind: input, shape index: {}]   ;;  %s877_s4 = inlined_call_operand.vmem [shape: f32[1,48], index: 4, kind: input, shape index: {}]   ;;  %s878_s5 = inlined_call_operand.vmem [shape: f32[2,1,48], index: 5, kind: output, shape index: {0}]   ;;  %s879_s6 = inlined_call_operand.vmem [shape: f32[2,1,48], index: 6, kind: output, shape index: {1}]  }
   0x1 LB: > { %s659_s22 = sadd.s32 4294967295, %s753_s21   ;;  %p663_p0 = scmp.ge.s32.totalorder %s753_s21, 1  ;;  %s753_s21 = sphi %s792_s21, %s17_s21  }
   0x2   : > { %p214_p1 = scmp.lt.s32.totalorder %s753_s21, 3 }
   0x4   : > { %p215_p2 = pnand %p663_p0, %p214_p1 }
   0x5   : > { %p244_p3 = scmp.lt.s32.totalorder (!%p215_p2), %s659_s22, 1 }
   0x6   : > { %218 = sbr.rel (%p215_p2) target bundleno = 445 (0x1bd), region = 40 }
   0xb   : > { %v276_v0 = vld [vmem:[%s874_s1 + $0x28] sm:$0xff]  ;;  %v755_v1 = vmov 0.0   ;;  %v275_v2 = vld [vmem:[%s874_s1 + $0x20] sm:$0xff]  ;;  %s881_s22 = smov (!%p244_p3, %s659_s22), 1  ;;  %v274_v3 = vld [vmem:[%s874_s1 + $0x18] sm:$0xff]  ;;  %vm255_vm0 = vcmask 388096  }
   0xc   : > { %691 = vmatprep.subr.mxu0 %v755_v1  ;;  %706 = vmatprep.subr.mxu1 %v755_v1  ;;  %s664_s29 = sshll.u32 %s881_s22, 2  ;;  %v273_v4 = vld [vmem:[%s874_s1 + $0x10] sm:$0xff]  ;;  %v272_v6 = vld [vmem:[%s874_s1 + $0x8] sm:$0xff]  ;;  %v271_v10 = vld [vmem:[%s874_s1] sm:$0xff]  ;;  %vm756_vm1 = vmmov 0   ;;  %vm277_vm2 = vcmask 392192   ;;  %s250_s25 = scalar_lea.vmem %s878_s5, %s881_s22 }
   0xd   : > { %692 = vmatpush3.msra.mxu0 %v276_v0  ;;  %707 = vmatpush3.msra.mxu1 %v276_v0  ;;  %s247_s10 = scalar_lea.vmem %s873_s0, %s664_s29  ;;  %v430_v23 = vld [vmem:[%s875_s2 + $0x8] sm:$0xff]  ;;  %v429_v24 = vld [vmem:[%s875_s2] sm:$0xff]  ;;  %vm431_vm3 = vcmask 130048   ;;  %vm581_vm4 = vcmask 385024   ;;  %s253_s30 = scalar_lea.vmem %s879_s6, %s881_s22 }
   0xe   : > { %693 = vmatprep.subr.mxu0 %v755_v1  ;;  %708 = vmatprep.subr.mxu1 %v755_v1  ;;  %v254_v5 = vld [vmem:[%s247_s10] sm:$0xf] }
   0xf   : > { %694 = vmatpush3.msra.mxu0 %v275_v2  ;;  %709 = vmatpush3.msra.mxu1 %v275_v2  ;;  %v256_v7 = vsel %vm255_vm0, %v254_v5, 0.0  ;;  %v263_v8 = vmul.f32 %v254_v5, %v254_v5  ;;  %v579_v39 = vld [vmem:[%s876_s3] sm:$0x1] }
  0x10   : > { %695 = vmatprep.subr.mxu0 %v755_v1  ;;  %710 = vmatprep.subr.mxu1 %v755_v1  ;;  %v257_v9 = vrot.slane %v256_v7, 4  ;;  %v583_v42 = vld [vmem:[%s877_s4] sm:$0x1] }
  0x11   : > { %696 = vmatpush3.msra.mxu0 %v274_v3  ;;  %711 = vmatpush3.msra.mxu1 %v274_v3  ;;  %v264_v11 = vsel %vm255_vm0, %v263_v8, 0.0 }
  0x12   : > { %697 = vmatprep.subr.mxu0 %v755_v1  ;;  %712 = vmatprep.subr.mxu1 %v755_v1  ;;  %v258_v12 = vadd.f32 %v257_v9, %v256_v7  ;;  %v265_v13 = vrot.slane %v264_v11, 4 }
  0x13   : > { %698 = vmatpush3.msra.mxu0 %v273_v4  ;;  %713 = vmatpush3.msra.mxu1 %v273_v4 }
  0x14   : > { %699 = vmatprep.subr.mxu0 %v755_v1  ;;  %714 = vmatprep.subr.mxu1 %v755_v1  ;;  %v259_v14 = vrot.slane %v258_v12, 2  ;;  %v266_v15 = vadd.f32 %v265_v13, %v264_v11 }
  0x15   : > { %700 = vmatpush3.msra.mxu0 %v272_v6  ;;  %703 = vmatprep.mubr.msk.f32.mxu0 %vm756_vm1, %v755_v1 }
  0x16   : > { %701 = vmatprep.subr.mxu0 %v755_v1  ;;  %715 = vmatpush3.msra.mxu1 %v272_v6  ;;  %v260_v16 = vadd.f32 %v259_v14, %v258_v12  ;;  %v267_v17 = vrot.slane %v266_v15, 2 }
  0x17   : > { %702 = vmatpush3.msra.mxu0 %v271_v10  ;;  %716 = vmatprep.subr.mxu1 %v755_v1 }
  0x18   : > { %717 = vmatpush3.msra.mxu1 %v271_v10  ;;  %718 = vmatprep.mubr.msk.f32.mxu1 %vm756_vm1, %v755_v1  ;;  %v261_v18 = vrot.slane %v260_v16, 1  ;;  %v268_v19 = vadd.f32 %v267_v17, %v266_v15 }
  0x19   : > { %721 = vmatprep.subr.mxu0 %v755_v1  ;;  %728 = vmatprep.subr.mxu1 %v755_v1 }
  0x1a   : > { %v262_v20 = vadd.f32 %v261_v18, %v260_v16  ;;  %v269_v21 = vrot.slane %v268_v19, 1 }
  0x1c   : > { %704 = vmatmul.mubr.msk.f32.vlgmr.msra.gmra.mxu0 %vm277_vm2, %v262_v20  ;;  %v270_v22 = vadd.f32 %v269_v21, %v268_v19 }
  0x1d   : > { %725 = vmatprep.mubr.msk.f32.mxu0 %vm756_vm1, %v755_v1  ;;  %722 = vmatpush3.msra.mxu0 %v430_v23 }
  0x1e   : > { %719 = vmatmul.mubr.msk.f32.vlgmr.msra.gmra.mxu1 %vm277_vm2, %v270_v22  ;;  %723 = vmatprep.subr.mxu0 %v755_v1 }
  0x1f   : > { %732 = vmatprep.mubr.msk.f32.mxu1 %vm756_vm1, %v755_v1  ;;  %729 = vmatpush3.msra.mxu1 %v430_v23 }
  0x20   : > { %730 = vmatprep.subr.mxu1 %v755_v1  ;;  %724 = vmatpush3.msra.mxu0 %v429_v24 }
  0x21   : > { %731 = vmatpush3.msra.mxu1 %v429_v24 }
  0xdc   : > { %v347_v25 = vpop.f32.mrf.mxu0 }
  0xdd   : > { %v424_v26 = vmul.f32 0.083333336, %v347_v25 }
  0xde   : > { %v705_v27 = vpop.f32.mrf.mxu0  ;;  %v420_v28 = vpop.f32.mrf.mxu1 }
  0xdf   : > { %v426_v29 = vmul.f32 %v424_v26, %v424_v26  ;;  %v425_v30 = vmul.f32 0.083333336, %v420_v28  ;;  %726 = vmatmul.mubr.msk.f32.vlgmr.msra.gmra.mxu0 %vm431_vm3, %v424_v26 }
  0xe0   : > { %v720_v31 = vpop.f32.mrf.mxu1 }
  0xe1   : > { %v427_v32 = vsub.f32 %v425_v30, %v426_v29 }
  0xe3   : > { %v428_v33 = vmax.f32 %v427_v32, 0.0 }
  0xe5   : > { %733 = vmatmul.mubr.msk.f32.vlgmr.msra.gmra.mxu1 %vm431_vm3, %v428_v33 }
 0x19f   : > { %v501_v34 = vpop.f32.mrf.mxu0 }
 0x1a1   : > { %v727_v35 = vpop.f32.mrf.mxu0 }
 0x1a5   : > { %v574_v36 = vpop.f32.mrf.mxu1 }
 0x1a6   : > { %v575_v37 = vadd.f32 1e-05, %v574_v36 }
 0x1a7   : > { %v734_v38 = vpop.f32.mrf.mxu1 }
 0x1a8   : > { %745 = vrsqrt.f32 %v575_v37 }
 0x1b5   : > { %v746_v40 = vpop.eup %745 }
 0x1b6   : > { %v580_v41 = vmul.f32 %v746_v40, %v579_v39 }
 0x1b8   : > { %582 = vst.msk [vmem:[%s250_s25] sm:$0x1] %vm581_vm4, %v580_v41  ;;  %v584_v43 = vmul.f32 %v580_v41, %v501_v34 }
 0x1ba   : > { %v585_v44 = vsub.f32 %v583_v42, %v584_v43 }
 0x1bc   : > { %586 = vst.msk [vmem:[%s253_s30] sm:$0x1] %vm581_vm4, %v585_v44 }
 0x1bd PF: > { %s17_s21 = sadd.s32 1, %s753_s21  }
 0x1be   : > { %p14_p4 = scmp.ge.s32.totalorder %s17_s21, 4  }
 0x1c0   :  { %16 = sbr.rel (!%p14_p4) target bundleno = 1 (0x1), region = 82 }

// kernel: ecn_pose_forward.27
= control target key start
LH: loop header
LB: loop body
LE: loop exit
PB: predicated region body
PF: predicated region fallthrough
CT: control target
= control target key end

     0   :  { %s1663_s15 = smov 0   ;;  %s1973_s0 = inlined_call_operand.vmem [shape: f32[2,16,48], index: 0, kind: input, shape index: {}]   ;;  %s1974_s1 = inlined_call_operand.vmem [shape: f32[2,1,48], index: 1, kind: input, shape index: {}]   ;;  %s1975_s2 = inlined_call_operand.vmem [shape: f32[2,1,48], index: 2, kind: input, shape index: {}]   ;;  %s1976_s3 = inlined_call_operand.vmem [shape: bf16[9,48,48], index: 3, kind: input, shape index: {}]   ;;  %s1977_s4 = inlined_call_operand.vmem [shape: f32[2,16,48], index: 4, kind: output, shape index: {}]  }
   0x1 LB: > { %s1330_s16 = sadd.s32 4294967295, %s1631_s15   ;;  %p1334_p0 = scmp.ge.s32.totalorder %s1631_s15, 1  ;;  %s1631_s15 = sphi %s1663_s15, %s14_s15  }
   0x2   : > { %p178_p1 = scmp.lt.s32.totalorder %s1631_s15, 3 }
   0x4   : > { %p179_p2 = pnand %p1334_p0, %p178_p1 }
   0x5   : > { %p210_p3 = scmp.lt.s32.totalorder (!%p179_p2), %s1330_s16, 1 }
   0x6   : > { %182 = sbr.rel (%p179_p2) target bundleno = 286 (0x11e), region = 36 }
   0xb   : > { %v1593_v0 = vld [vmem:[%s1976_s3 + $0x28] sm:$0xff]   ;;  %v1633_v1 = vmov 0.0   ;;  %v1594_v2 = vld [vmem:[%s1976_s3 + $0x20] sm:$0xff]   ;;  %v264_v3 = vlaneseq  ;;  %v1595_v4 = vld [vmem:[%s1976_s3 + $0x10] sm:$0xff]   ;;  %vm1634_vm0 = vmmov 0   ;;  %vm227_vm1 = vcmask 388096  }
   0xc   : > { %1490 = vmatprep.subr.bf16.mxu0 %v1633_v1  ;;  %1500 = vmatprep.subr.bf16.mxu1 %v1633_v1  ;;  %v1597_v5 = vld [vmem:[%s1976_s3 + $0x8] sm:$0xff]   ;;  %s1985_s16 = smov (!%p210_p3, %s1330_s16), 1  ;;  %v1596_v7 = vld [vmem:[%s1976_s3 + $0x18] sm:$0xff]   ;;  %v1635_v8 = vmov 0   ;;  %v1636_v9 = vmov 839922192  }
   0xd   : > { %1491 = vmatpush3.bf16.msra.mxu0 %v1593_v0  ;;  %1496 = vmatprep.mubr.msk.bf16.mxu0 %vm1634_vm0, %v1633_v1  ;;  %v265_v6 = vshrl.u32 %v264_v3, 7  ;;  %s1450_s27 = sshll.u32 %s1985_s16, 4  ;;  %s217_s30 = scalar_lea.vmem %s1974_s1, %s1985_s16  ;;  %228 = vst.msk [vmem:[#allocation2] sm:$0xf] %vm227_vm1, %v1635_v8  ;;  %229 = vst.msk [vmem:[#allocation2 + $0x4] sm:$0xf] %vm227_vm1, %v1635_v8  ;;  %v310_v10 = vunpack.c.l.s4 %v1636_v9 }
   0xe   : > { %1492 = vmatprep.subr.bf16.mxu0 %v1633_v1  ;;  %1506 = vmatprep.mubr.msk.bf16.mxu1 %vm1634_vm0, %v1633_v1  ;;  %230 = vst.msk [vmem:[#allocation2 + $0x8] sm:$0xf] %vm227_vm1, %v1635_v8  ;;  %231 = vst.msk [vmem:[#allocation2 + $0xc] sm:$0xf] %vm227_vm1, %v1635_v8  ;;  %v1637_v11 = vmov 1985246804   ;;  %s214_s7 = scalar_lea.vmem %s1973_s0, %s1450_s27  ;;  %s220_s10 = scalar_lea.vmem %s1975_s2, %s1985_s16 }
   0xf   : > { %1501 = vmatpush3.bf16.msra.mxu1 %v1595_v4  ;;  %v317_v12 = vunpack.c.l.s4 %v1637_v11  ;;  %v1339_v13 = vld [vmem:[%s217_s30] ss:$0 sm:$0xff]  ;;  %v266_v14 = vadd.s32 8, %v265_v6  ;;  %v271_v15 = vand.u32 3, %v265_v6  ;;  %v233_v17 = vld [vmem:[%s214_s7 + $0x8] sm:$0xff]  ;;  %v311_v19 = vunpack.c.0.s8 %v310_v10  ;;  %s225_s11 = scalar_lea.vmem %s1977_s4, %s1450_s27 }
  0x10   : > { %1502 = vmatprep.subr.bf16.mxu1 %v1633_v1  ;;  %v232_v16 = vld [vmem:[%s214_s7] sm:$0xff]  ;;  %v242_v22 = vmul.f32 %v1339_v13, %v233_v17  ;;  %vm544_vm6 = vsmask.f32 2304  ;;  %vm545_vm7 = vsmask.f32 6416  ;;  %vm373_vm10 = vcmask 1045504  }
  0x11   : > { %1493 = vmatpush3.bf16.msra.mxu0 %v1594_v2  ;;  %v1340_v18 = vld [vmem:[%s220_s10] ss:$0 sm:$0xff]  ;;  %v318_v20 = vunpack.c.0.s8 %v317_v12  ;;  %v241_v21 = vmul.f32 %v1339_v13, %v232_v16  ;;  %v278_v23 = vand.u32 3, %v266_v14  ;;  %vm291_vm2 = vcmp.ne.s32.totalorder %v271_v15, 0  ;;  %vm1745_vm12 = vmor %vm544_vm6, %vm545_vm7 }
  0x12   : > { %1494 = vmatprep.subr.bf16.mxu0 %v1633_v1  ;;  %v1343_v24 = vsel %vm291_vm2, 1.0, %v1633_v1  ;;  %vm298_vm3 = vcmp.ne.s32.totalorder %v271_v15, 3  ;;  %v314_v25 = vsub.s32 %v311_v19, %v265_v6  ;;  %v1601_v27 = vld [vmem:[%s1976_s3] sm:$0xff]   ;;  %v251_v29 = vadd.f32 %v1340_v18, %v242_v22 }
  0x13   : > { %1503 = vmatpush3.bf16.msra.mxu1 %v1597_v5  ;;  %v321_v26 = vsub.s32 %v318_v20, %v265_v6  ;;  %v250_v28 = vadd.f32 %v1340_v18, %v241_v21  ;;  %vm292_vm4 = vcmp.ne.s32.totalorder %v278_v23, 0  ;;  %vm299_vm5 = vcmp.ne.s32.totalorder %v278_v23, 3 }
  0x14   : > { %1504 = vmatprep.subr.bf16.mxu1 %v1633_v1  ;;  %v1344_v30 = vsel %vm292_vm4, 1.0, %v1633_v1  ;;  %v1345_v31 = vsel %vm298_vm3, 1.0, %v1633_v1  ;;  %v1346_v32 = vsel %vm299_vm5, 1.0, %v1633_v1  ;;  %v253_v34 = vmax.f32 %v251_v29, 0.0  ;;  %v305_v61 = vld [vmem:[#allocation2] sm:$0xe] }
  0x15   : > { %1495 = vmatpush3.bf16.msra.mxu0 %v1596_v7  ;;  %v252_v33 = vmax.f32 %v250_v28, 0.0  ;;  %v297_v35 = vpack.c.bf16 %v1344_v30, %v1343_v24  ;;  %v304_v36 = vpack.c.bf16 %v1346_v32, %v1345_v31  ;;  %vm323_vm8 = vsmask.f32 1280  ;;  %v357_v63 = vld [vmem:[#allocation2] sm:$0xc]  ;;  %v1602_v29 = vld [vmem:[%s1976_s3 + $0x38] sm:$0xff]  }
  0x16   : > { %1510 = vmatprep.subr.bf16.mxu0 %v1633_v1  ;;  %v1453_v38 = vpack.c.bf16 %v253_v34, %v253_v34  ;;  %vm324_vm9 = vsmask.f32 5392  ;;  %vm395_vm11 = vcmask 392192   ;;  %vm671_vm14 = vsmask.f32 3328  ;;  %v1600_v24 = vld [vmem:[%s1976_s3 + $0x40] sm:$0xff]  }
  0x17   : > { %1505 = vmatpush3.bf16.msra.mxu1 %v1601_v27  ;;  %v1452_v37 = vpack.c.bf16 %v252_v33, %v252_v33  ;;  %v315_v39 = vrot.slane %v297_v35, %v314_v25  ;;  %v1725_v40 = vrot.slane %v297_v35, %v321_v26  ;;  %v1727_v41 = vrot.slane %v304_v36, %v314_v25  ;;  %vm325_vm13 = vmor %vm323_vm8, %vm324_vm9 }
  0x18   : > { %1520 = vmatprep.subr.bf16.mxu1 %v1633_v1  ;;  %v1729_v42 = vrot.slane %v304_v36, %v321_v26  ;;  %263 = vst.msk [vmem:[#allocation2 + $0x8] sm:$0xf] %vm227_vm1, %v1453_v38  ;;  %vm448_vm15 = vsmask.f32 6400  ;;  %vm587_vm3 = vsmask.f32 5376 }
  0x19   : > { %262 = vst.msk [vmem:[#allocation2 + $0x4] sm:$0xf] %vm227_vm1, %v1452_v37  ;;  %v336_v43 = vshrl.u32 %v1725_v40, 16  ;;  %v339_v44 = vshll.u32 %v1725_v40, 16  ;;  %v327_v45 = vshrl.u32 %v315_v39, 16  ;;  %v330_v46 = vshll.u32 %v315_v39, 16 }
  0x1a   : > { %v548_v47 = vshrl.u32 %v1727_v41, 16  ;;  %v551_v48 = vshll.u32 %v1727_v41, 16  ;;  %v557_v49 = vshrl.u32 %v1729_v42, 16  ;;  %v560_v50 = vshll.u32 %v1729_v42, 16  ;;  %v862_v42 = vld [vmem:[#allocation2 + $0xc] sm:$0x1] }
  0x1b   : > { %v338_v51 = vrot.slane %v336_v43, 6  ;;  %v341_v52 = vrot.slane %v339_v44, 7  ;;  %v329_v53 = vrot.slane %v327_v45, 6  ;;  %v332_v54 = vrot.slane %v330_v46, 7 }
  0x1c   : > { %v550_v56 = vrot.slane %v548_v47, 5  ;;  %v553_v57 = vrot.slane %v551_v48, 6  ;;  %v559_v58 = vrot.slane %v557_v49, 5  ;;  %v562_v59 = vrot.slane %v560_v50, 6 }
  0x1d   : > { %v1757_v60 = vor.u32 %v341_v52, %v338_v51  ;;  %v1759_v62 = vor.u32 %v332_v54, %v329_v53  ;;  %v1769_v5 = vrot.slane %v330_v46, 5  ;;  %v675_v6 = vrot.slane %v327_v45, 4  ;;  %v669_v54 = vld [vmem:[#allocation2] sm:$0x8] }
  0x1e   : > { %v1761_v0 = vor.u32 %v553_v57, %v550_v56  ;;  %v1763_v2 = vor.u32 %v562_v59, %v559_v58  ;;  %vm672_vm1 = vsmask.f32 7440  ;;  %v1806_v56 = vld [vmem:[#allocation2 + $0xc] sm:$0x3]  ;;  %vm863_vm4 = vsmask.f32 256 }
  0x1f   : > { %v344_v3 = vrot.slane %v1757_v60, 4  ;;  %v334_v4 = vrot.slane %v1759_v62, 4  ;;  %v307_v8 = vld [vmem:[#allocation2 + $0x8] sm:$0x3]  ;;  %v348_v10 = vmul.bf16 %v1759_v62, %v305_v61  ;;  %v676_v55 = vor.u32 %v675_v6, %v1769_v5  ;;  %vm1810_vm2 = vmor %vm671_vm14, %vm672_vm1  ;;  %v1604_v6 = vld [vmem:[%s1976_s3 + $0x30] sm:$0xff]  }
  0x20   : > { %v1771_v7 = vld [vmem:[#allocation2 + $0x4] sm:$0xf]  ;;  %v555_v9 = vrot.slane %v1761_v0, 4  ;;  %v565_v11 = vrot.slane %v1763_v2, 4  ;;  %v1354_v14 = vcombine.low %v307_v8, %v307_v8  ;;  %v569_v15 = vmul.bf16 %v1761_v0, %v357_v63  ;;  %v528_v16 = vld [vmem:[#allocation2 + $0x8] sm:$0x7] }
  0x21   : > { %v350_v12 = vmul.bf16 %v344_v3, %v307_v8  ;;  %v1353_v13 = vcombine.low %v357_v63, %v1771_v7  ;;  %v1786_v18 = vsel %vm325_vm13, %v334_v4, %v1757_v60  ;;  %v678_v63 = vrot.slane %v339_v44, 5  ;;  %v1603_v4 = vld [vmem:[%s1976_s3 + $0x58] sm:$0xff]   ;;  %v1825_v44 = vld [vmem:[#allocation2 + $0x8] sm:$0xf] }
  0x22   : > { %v1783_v17 = vsel %vm1745_vm12, %v555_v9, %v1763_v2  ;;  %v571_v19 = vmul.bf16 %v565_v11, %v528_v16  ;;  %v375_v21 = vrot.slane %v1354_v14, 2  ;;  %v349_v25 = vmul.bf16 %v1786_v18, %v1771_v7  ;;  %v1833_v40 = vld [vmem:[#allocation2 + $0x8] sm:$0xf] }
  0x23   : > { %v374_v20 = vrot.slane %v1353_v13, 2  ;;  %v1360_v22 = vcombine.low %v350_v12, %v350_v12  ;;  %v570_v23 = vmul.bf16 %v1783_v17, %v1771_v7  ;;  %v680_v12 = vrot.slane %v336_v43, 4 }
  0x24   : > { %v1372_v26 = vcombine.low %v571_v19, %v571_v19  ;;  %v1359_v32 = vcombine.low %v348_v10, %v349_v25  ;;  %v677_v10 = vrot.slane %v676_v55, 4  ;;  %v686_v14 = vmul.bf16 %v1769_v5, %v669_v54  ;;  %v860_v25 = vld [vmem:[#allocation2 + $0x4] sm:$0xf] }
  0x25   : > { %v376_v27 = vsel %vm373_vm10, %v374_v20, %v375_v21  ;;  %v1371_v28 = vcombine.low %v569_v15, %v570_v23  ;;  %v458_v30 = vshrl.u32 %v1360_v22, 16  ;;  %v461_v31 = vshll.u32 %v1360_v22, 16  ;;  %v1606_v15 = vld [vmem:[%s1976_s3 + $0x70] sm:$0xff]  }
  0x26   : > { %1497 = vmatmul.mubr.msk.bf16.vlgmr.msra.gmra.mxu0 %vm395_vm11, %v376_v27  ;;  %v597_v33 = vshrl.u32 %v1372_v26, 16  ;;  %v600_v34 = vshll.u32 %v1372_v26, 16  ;;  %v450_v39 = vshrl.u32 %v1359_v32, 16  ;;  %v453_v45 = vshll.u32 %v1359_v32, 16 }
  0x27   : > { %1511 = vmatpush3.bf16.msra.mxu0 %v1600_v24  ;;  %v460_v35 = vrot.slane %v458_v30, 1  ;;  %v463_v36 = vrot.slane %v461_v31, 2  ;;  %1516 = vmatprep.mubr.msk.bf16.mxu0 %vm1634_vm0, %v1633_v1  ;;  %v589_v37 = vshrl.u32 %v1371_v28, 16  ;;  %v592_v38 = vshll.u32 %v1371_v28, 16  ;;  %v971_v28 = vld [vmem:[#allocation2 + $0x4] sm:$0xe] }
  0x28   : > { %1512 = vmatprep.subr.bf16.mxu0 %v1633_v1  ;;  %v599_v46 = vrot.slane %v597_v33, 2  ;;  %v602_v51 = vrot.slane %v600_v34, 3  ;;  %v452_v57 = vrot.slane %v450_v39, 1  ;;  %v455_v58 = vrot.slane %v453_v45, 2 }
  0x29   : > { %v591_v52 = vrot.slane %v589_v37, 2  ;;  %v594_v53 = vrot.slane %v592_v38, 3  ;;  %v464_v59 = vor.u32 %v463_v36, %v460_v35  ;;  %v679_v16 = vsel %vm1810_vm2, %v677_v10, %v678_v63  ;;  %v1607_v35 = vld [vmem:[%s1976_s3 + $0x48] sm:$0xff]  }
  0x2a   : > { %v603_v9 = vor.u32 %v602_v51, %v599_v46  ;;  %v456_v13 = vor.u32 %v455_v58, %v452_v57  ;;  %v681_v19 = vor.u32 %v680_v12, %v678_v63  ;;  %vm864_vm5 = vsmask.f32 4368  ;;  %v1610_v57 = vld [vmem:[%s1976_s3 + $0x60] sm:$0xff]  }
  0x2b   : > { %1513 = vmatpush3.bf16.msra.mxu0 %v1602_v29  ;;  %v595_v8 = vor.u32 %v594_v53, %v591_v52  ;;  %v687_v20 = vmul.bf16 %v679_v16, %v1771_v7  ;;  %v866_v21 = vrot.slane %v548_v47, 7  ;;  %v869_v5 = vrot.slane %v557_v49, 7  ;;  %vm1847_vm6 = vmor %vm863_vm4, %vm864_vm5  ;;  %v1605_v47 = vld [vmem:[%s1976_s3 + $0x50] sm:$0xff]  }
  0x2c   : > { %1514 = vmatprep.subr.bf16.mxu0 %v1633_v1  ;;  %v465_v43 = vsel %vm448_vm15, %v456_v13, %v464_v59  ;;  %v975_v22 = vmul.bf16 %v1806_v56, %v344_v3  ;;  %v682_v24 = vrot.slane %v681_v19, 4  ;;  %v974_v29 = vmul.bf16 %v1833_v40, %v1786_v18  ;;  %v1608_v18 = vld [vmem:[%s1976_s3 + $0x68] sm:$0xff]   ;;  %v1613_v13 = vld [vmem:[%s1976_s3 + $0xa0] sm:$0xff]  }
  0x2d   : > { %1507 = vmatmul.mubr.msk.bf16.vlgmr.msra.gmra.mxu1 %vm395_vm11, %v465_v43  ;;  %v604_v23 = vsel %vm587_vm3, %v595_v8, %v603_v9  ;;  %v1383_v49 = vcombine.low %v686_v14, %v687_v20  ;;  %v867_v60 = vor.u32 %v866_v21, %v551_v48  ;;  %v868_v3 = vrot.slane %v866_v21, 4  ;;  %v1609_v59 = vld [vmem:[%s1976_s3 + $0x88] sm:$0xff]   ;;  %v1895_v14 = vld [vmem:[#allocation2 + $0x4] sm:$0xc] }
  0x2e   : > { %1521 = vmatpush3.bf16.msra.mxu1 %v1603_v4  ;;  %v870_v27 = vor.u32 %v869_v5, %v560_v50  ;;  %1526 = vmatprep.mubr.msk.bf16.mxu1 %vm1634_vm0, %v1633_v1  ;;  %v688_v30 = vmul.bf16 %v682_v24, %v1825_v44  ;;  %v872_v31 = vrot.slane %v869_v5, 4  ;;  %v973_v32 = vmul.bf16 %v971_v28, %v1759_v62 }
  0x2f   : > { %1515 = vmatpush3.bf16.msra.mxu0 %v1604_v6  ;;  %1522 = vmatprep.subr.bf16.mxu1 %v1633_v1  ;;  %v706_v41 = vshrl.u32 %v1383_v49, 16  ;;  %v709_v48 = vshll.u32 %v1383_v49, 16  ;;  %v876_v33 = vmul.bf16 %v867_v60, %v860_v25  ;;  %v1419_v52 = vcombine.low %v975_v22, %v975_v22 }
  0x30   : > { %1530 = vmatprep.subr.bf16.mxu0 %v1633_v1  ;;  %v871_v50 = vsel %vm1847_vm6, %v868_v3, %v870_v27  ;;  %v1384_v34 = vcombine.low %v688_v30, %v688_v30  ;;  %v878_v45 = vmul.bf16 %v872_v31, %v862_v42  ;;  %v1418_v51 = vcombine.low %v973_v32, %v974_v29  ;;  %v1616_v27 = vld [vmem:[%s1976_s3 + $0xb8] sm:$0xff]   ;;  %v1619_v29 = vld [vmem:[%s1976_s3 + $0xd0] sm:$0xff]  }
  0x31   : > { %v877_v62 = vmul.bf16 %v871_v50, %v1833_v40  ;;  %v708_v36 = vrot.slane %v706_v41, 3  ;;  %v711_v37 = vrot.slane %v709_v48, 4  ;;  %vm704_vm7 = vsmask.f32 4352  ;;  %v1618_v48 = vld [vmem:[%s1976_s3 + $0xb0] sm:$0xff]  }
  0x32   : > { %1517 = vmatmul.mubr.msk.bf16.vlgmr.msra.gmra.mxu0 %vm395_vm11, %v604_v23  ;;  %1523 = vmatpush3.bf16.msra.mxu1 %v1605_v47  ;;  %v714_v38 = vshrl.u32 %v1384_v34, 16  ;;  %v717_v39 = vshll.u32 %v1384_v34, 16  ;;  %v1395_v61 = vcombine.low %v1771_v7, %v1825_v44  ;;  %v1407_v63 = vcombine.low %v878_v45, %v878_v45  ;;  %v1611_v7 = vld [vmem:[%s1976_s3 + $0x80] sm:$0xff]   ;;  %v1615_v23 = vld [vmem:[%s1976_s3 + $0x98] sm:$0xff]  }
  0x33   : > { %1531 = vmatpush3.bf16.msra.mxu0 %v1606_v15  ;;  %1536 = vmatprep.mubr.msk.bf16.mxu0 %vm1634_vm0, %v1633_v1  ;;  %v1406_v46 = vcombine.low %v876_v33, %v877_v62  ;;  %v712_v53 = vor.u32 %v711_v37, %v708_v36  ;;  %v992_v6 = vshrl.u32 %v1418_v51, 16  ;;  %v995_v8 = vshll.u32 %v1418_v51, 16  ;;  %v1155_v15 = vld [vmem:[#allocation2 + $0xc] sm:$0x7]  ;;  %v1624_v37 = vld [vmem:[%s1976_s3 + $0xc0] sm:$0xff]  }
  0x34   : > { %1532 = vmatprep.subr.bf16.mxu0 %v1633_v1  ;;  %1524 = vmatprep.subr.bf16.mxu1 %v1633_v1  ;;  %v716_v54 = vrot.slane %v714_v38, 3  ;;  %v719_v55 = vrot.slane %v717_v39, 4  ;;  %v1000_v9 = vshrl.u32 %v1419_v52, 16  ;;  %v1003_v10 = vshll.u32 %v1419_v52, 16  ;;  %v1621_v33 = vld [vmem:[%s1976_s3 + $0xc8] sm:$0xff]  }
  0x35   : > { %v898_v4 = vshll.u32 %v1406_v46, 16  ;;  %v896_v44 = vshrl.u32 %v1406_v46, 16  ;;  %v903_v19 = vshll.u32 %v1407_v63, 16  ;;  %v994_v43 = vrot.slane %v992_v6, 1 }
  0x36   : > { %1525 = vmatpush3.bf16.msra.mxu1 %v1607_v35  ;;  %v720_v58 = vor.u32 %v719_v55, %v716_v54  ;;  %v997_v20 = vrot.slane %v995_v8, 2  ;;  %v1002_v21 = vrot.slane %v1000_v9, 1  ;;  %v1005_v5 = vrot.slane %v1003_v10, 2 }
  0x37   : > { %1533 = vmatpush3.bf16.msra.mxu0 %v1608_v18  ;;  %1540 = vmatprep.subr.bf16.mxu1 %v1633_v1  ;;  %v900_v16 = vrot.slane %v898_v4, 1  ;;  %v1157_v22 = vmul.bf16 %v1833_v40, %v1783_v17  ;;  %v1156_v24 = vmul.bf16 %v1895_v14, %v1761_v0  ;;  %v1158_v25 = vmul.bf16 %v1155_v15, %v565_v11  ;;  %v1614_v17 = vld [vmem:[%s1976_s3 + $0x78] sm:$0xff]   ;;  %v1617_v0 = vld [vmem:[%s1976_s3 + $0x90] sm:$0xff]  }
  0x38   : > { %1534 = vmatprep.subr.bf16.mxu0 %v1633_v1  ;;  %v721_v12 = vsel %vm704_vm7, %v712_v53, %v720_v58  ;;  %v905_v47 = vrot.slane %v903_v19, 1  ;;  %vm894_vm8 = vsmask.f32 7424  ;;  %v998_v49 = vor.u32 %v997_v20, %v994_v43 }
  0x39   : > { %1527 = vmatmul.mubr.msk.bf16.vlgmr.msra.gmra.mxu1 %vm395_vm11, %v721_v12  ;;  %v901_v26 = vor.u32 %v900_v16, %v896_v44  ;;  %v1006_v60 = vor.u32 %v1005_v5, %v1002_v21  ;;  %v1442_v2 = vcombine.low %v1156_v24, %v1157_v22  ;;  %v1443_v11 = vcombine.low %v1158_v25, %v1158_v25 }
  0x3a   : > { %1541 = vmatpush3.bf16.msra.mxu1 %v1609_v59  ;;  %1546 = vmatprep.mubr.msk.bf16.mxu1 %vm1634_vm0, %v1633_v1  ;;  %v1430_v42 = vcombine.low %v1895_v14, %v1833_v40  ;;  %v1431_v50 = vcombine.low %v1806_v56, %v1806_v56  ;;  %v1620_v56 = vld [vmem:[%s1976_s3 + $0xa8] sm:$0xff]  }
  0x3b   : > { %1535 = vmatpush3.bf16.msra.mxu0 %v1610_v57  ;;  %1542 = vmatprep.subr.bf16.mxu1 %v1633_v1  ;;  %v906_v3 = vsel %vm894_vm8, %v901_v26, %v905_v47  ;;  %v1007_v28 = vsel %vm448_vm15, %v998_v49, %v1006_v60  ;;  %v1175_v30 = vshrl.u32 %v1442_v2, 16  ;;  %v1178_v31 = vshll.u32 %v1442_v2, 16 }
  0x3c   : > { %1550 = vmatprep.subr.bf16.mxu0 %v1633_v1  ;;  %v1183_v32 = vshrl.u32 %v1443_v11, 16  ;;  %v1186_v41 = vshll.u32 %v1443_v11, 16  ;;  %v1088_v40 = vrot.slane %v1430_v42, 2  ;;  %v1089_v36 = vrot.slane %v1431_v50, 2 }
  0x3d   : > { %v1177_v18 = vrot.slane %v1175_v30, 2  ;;  %v1180_v34 = vrot.slane %v1178_v31, 3 }
  0x3e   : > { %1537 = vmatmul.mubr.msk.bf16.vlgmr.msra.gmra.mxu0 %vm395_vm11, %v1395_v61  ;;  %1543 = vmatpush3.bf16.msra.mxu1 %v1611_v7  ;;  %v1185_v62 = vrot.slane %v1183_v32, 2  ;;  %v1188_v35 = vrot.slane %v1186_v41, 3  ;;  %v1090_v45 = vsel %vm373_vm10, %v1088_v40, %v1089_v36 }
  0x3f   : > { %1551 = vmatpush3.bf16.msra.mxu0 %v1613_v13  ;;  %1556 = vmatprep.mubr.msk.bf16.mxu0 %vm1634_vm0, %v1633_v1  ;;  %v1181_v38 = vor.u32 %v1180_v34, %v1177_v18 }
  0x40   : > { %1552 = vmatprep.subr.bf16.mxu0 %v1633_v1  ;;  %1544 = vmatprep.subr.bf16.mxu1 %v1633_v1  ;;  %v1189_v39 = vor.u32 %v1188_v35, %v1185_v62 }
  0x42   : > { %1545 = vmatpush3.bf16.msra.mxu1 %v1614_v17  ;;  %v1190_v46 = vsel %vm587_vm3, %v1181_v38, %v1189_v39 }
  0x43   : > { %1553 = vmatpush3.bf16.msra.mxu0 %v1615_v23  ;;  %1560 = vmatprep.subr.bf16.mxu1 %v1633_v1 }
  0x44   : > { %1554 = vmatprep.subr.bf16.mxu0 %v1633_v1 }
  0x45   : > { %1547 = vmatmul.mubr.msk.bf16.vlgmr.msra.gmra.mxu1 %vm395_vm11, %v906_v3 }
  0x46   : > { %1561 = vmatpush3.bf16.msra.mxu1 %v1616_v27  ;;  %1566 = vmatprep.mubr.msk.bf16.mxu1 %vm1634_vm0, %v1633_v1 }
  0x47   : > { %1555 = vmatpush3.bf16.msra.mxu0 %v1617_v0  ;;  %1562 = vmatprep.subr.bf16.mxu1 %v1633_v1 }
  0x48   : > { %1570 = vmatprep.subr.bf16.mxu0 %v1633_v1 }
  0x4a   : > { %1557 = vmatmul.mubr.msk.bf16.vlgmr.msra.gmra.mxu0 %vm395_vm11, %v1007_v28  ;;  %1563 = vmatpush3.bf16.msra.mxu1 %v1618_v48 }
  0x4b   : > { %1571 = vmatpush3.bf16.msra.mxu0 %v1619_v29  ;;  %1576 = vmatprep.mubr.msk.bf16.mxu0 %vm1634_vm0, %v1633_v1 }
  0x4c   : > { %1572 = vmatprep.subr.bf16.mxu0 %v1633_v1  ;;  %1564 = vmatprep.subr.bf16.mxu1 %v1633_v1 }
  0x4e   : > { %1565 = vmatpush3.bf16.msra.mxu1 %v1620_v56 }
  0x4f   : > { %1573 = vmatpush3.bf16.msra.mxu0 %v1621_v33 }
  0x50   : > { %1574 = vmatprep.subr.bf16.mxu0 %v1633_v1 }
  0x51   : > { %1567 = vmatmul.mubr.msk.bf16.vlgmr.msra.gmra.mxu1 %vm395_vm11, %v1090_v45 }
  0x53   : > { %1575 = vmatpush3.bf16.msra.mxu0 %v1624_v37 }
  0x56   : > { %1577 = vmatmul.mubr.msk.bf16.vlgmr.msra.gmra.mxu0 %vm395_vm11, %v1190_v46 }
  0xe6   : > { %v433_v51 = vpop.f32.mrf.mxu0 }
  0xe8   : > { %v1498_v52 = vpop.f32.mrf.mxu0 }
  0xea   : > { %v436_v53 = vpop.f32.mrf.mxu0 }
  0xec   : > { %v1499_v54 = vpop.f32.mrf.mxu0 }
  0xed   : > { %v521_v55 = vpop.f32.mrf.mxu1 }
  0xee   : > { %v522_v44 = vadd.f32 %v521_v55, %v433_v51 }
  0xef   : > { %v1508_v57 = vpop.f32.mrf.mxu1 }
  0xf1   : > { %v524_v59 = vpop.f32.mrf.mxu1 }
  0xf2   : > { %v660_v58 = vpop.f32.mrf.mxu0  ;;  %v525_v5 = vadd.f32 %v524_v59, %v436_v53 }
  0xf3   : > { %v1509_v1 = vpop.f32.mrf.mxu1  ;;  %v667_v43 = vadd.f32 %v660_v58, %v522_v44 }
  0xf4   : > { %v1518_v61 = vpop.f32.mrf.mxu0 }
  0xf6   : > { %v663_v63 = vpop.f32.mrf.mxu0 }
  0xf7   : > { %v668_v25 = vadd.f32 %v663_v63, %v525_v5 }
  0xf8   : > { %v1519_v4 = vpop.f32.mrf.mxu0 }
  0xf9   : > { %v777_v6 = vpop.f32.mrf.mxu1 }
  0xfa   : > { %v784_v22 = vadd.f32 %v777_v6, %v667_v43 }
  0xfb   : > { %v1528_v8 = vpop.f32.mrf.mxu1 }
  0xfd   : > { %v780_v10 = vpop.f32.mrf.mxu1 }
  0xfe   : > { %v851_v9 = vpop.f32.mrf.mxu0  ;;  %v785_v47 = vadd.f32 %v780_v10, %v668_v25 }
  0xff   : > { %v1529_v13 = vpop.f32.mrf.mxu1  ;;  %v858_v17 = vadd.f32 %v851_v9, %v784_v22 }
 0x100   : > { %v1538_v12 = vpop.f32.mrf.mxu0 }
 0x102   : > { %v854_v14 = vpop.f32.mrf.mxu0 }
 0x103   : > { %v859_v60 = vadd.f32 %v854_v14, %v785_v47 }
 0x104   : > { %v1539_v15 = vpop.f32.mrf.mxu0 }
 0x105   : > { %v962_v7 = vpop.f32.mrf.mxu1 }
 0x106   : > { %v969_v49 = vadd.f32 %v962_v7, %v858_v17 }
 0x107   : > { %v1548_v16 = vpop.f32.mrf.mxu1 }
 0x109   : > { %v965_v20 = vpop.f32.mrf.mxu1 }
 0x10a   : > { %v1063_v19 = vpop.f32.mrf.mxu0  ;;  %v970_v11 = vadd.f32 %v965_v20, %v859_v60 }
 0x10b   : > { %v1549_v23 = vpop.f32.mrf.mxu1  ;;  %v1070_v0 = vadd.f32 %v1063_v19, %v969_v49 }
 0x10c   : > { %v1558_v21 = vpop.f32.mrf.mxu0 }
 0x10e   : > { %v1066_v24 = vpop.f32.mrf.mxu0 }
 0x10f   : > { %v1071_v29 = vadd.f32 %v1066_v24, %v970_v11 }
 0x110   : > { %v1559_v26 = vpop.f32.mrf.mxu0 }
 0x111   : > { %v1146_v2 = vpop.f32.mrf.mxu1 }
 0x112   : > { %v1153_v3 = vadd.f32 %v1146_v2, %v1070_v0 }
 0x113   : > { %v1568_v27 = vpop.f32.mrf.mxu1 }
 0x115   : > { %v1149_v31 = vpop.f32.mrf.mxu1 }
 0x116   : > { %v1246_v28 = vpop.f32.mrf.mxu0  ;;  %v1154_v41 = vadd.f32 %v1149_v31, %v1071_v29 }
 0x117   : > { %v1253_v30 = vadd.f32 %v1246_v28, %v1153_v3  ;;  %v1569_v48 = vpop.f32.mrf.mxu1 }
 0x118   : > { %v1578_v32 = vpop.f32.mrf.mxu0 }
 0x119   : > { %1255 = vst.msk [vmem:[%s225_s11] sm:$0xff] %vm395_vm11, %v1253_v30 }
 0x11a   : > { %v1249_v42 = vpop.f32.mrf.mxu0 }
 0x11b   : > { %v1254_v50 = vadd.f32 %v1249_v42, %v1154_v41 }
 0x11c   : > { %v1579_v33 = vpop.f32.mrf.mxu0 }
 0x11d   : > { %1256 = vst.msk [vmem:[%s225_s11 + $0x8] sm:$0xff] %vm395_vm11, %v1254_v50 }
 0x11e PF: > { %s14_s15 = sadd.s32 1, %s1631_s15  }
 0x11f   : > { %p11_p4 = scmp.ge.s32.totalorder %s14_s15, 4  }
 0x121   :  { %13 = sbr.rel (!%p11_p4) target bundleno = 1 (0x1), region = 80 }

// kernel: ecn_pose_forward.30
= control target key start
LH: loop header
LB: loop body
LE: loop exit
PB: predicated region body
PF: predicated region fallthrough
CT: control target
= control target key end

     0   :  { %s1419_s15 = smov 0   ;;  %s1613_s0 = inlined_call_operand.vmem [shape: f32[2,4,48], index: 0, kind: input, shape index: {}]   ;;  %s1614_s1 = inlined_call_operand.vmem [shape: f32[2,1,48], index: 1, kind: input, shape index: {}]   ;;  %s1615_s2 = inlined_call_operand.vmem [shape: f32[2,1,48], index: 2, kind: input, shape index: {}]   ;;  %s1616_s3 = inlined_call_operand.vmem [shape: bf16[9,48,64], index: 3, kind: input, shape index: {}]   ;;  %s1617_s4 = inlined_call_operand.vmem [shape: f32[2,4,64], index: 4, kind: output, shape index: {}]  }
   0x1 LB: > { %s1110_s16 = sadd.s32 4294967295, %s1388_s15   ;;  %p1114_p0 = scmp.ge.s32.totalorder %s1388_s15, 1  ;;  %s1388_s15 = sphi %s1419_s15, %s14_s15  }
   0x2   : > { %p177_p1 = scmp.lt.s32.totalorder %s1388_s15, 3 }
   0x4   : > { %p178_p2 = pnand %p1114_p0, %p177_p1 }
   0x5   : > { %p207_p3 = scmp.lt.s32.totalorder (!%p178_p2), %s1110_s16, 1 }
   0x6   : > { %181 = sbr.rel (%p178_p2) target bundleno = 284 (0x11c), region = 36 }
   0xb   : > { %v1353_v0 = vld [vmem:[%s1616_s3 + $0x28] sm:$0xff]   ;;  %v1390_v1 = vmov 0.0   ;;  %v1354_v2 = vld [vmem:[%s1616_s3 + $0x20] sm:$0xff]   ;;  %v246_v3 = vlaneseq  ;;  %v1355_v4 = vld [vmem:[%s1616_s3 + $0x10] sm:$0xff]   ;;  %vm1391_vm0 = vmmov 0   ;;  %vm222_vm1 = vcmask 388096  }
   0xc   : > { %1251 = vmatprep.subr.bf16.mxu0 %v1390_v1  ;;  %1261 = vmatprep.subr.bf16.mxu1 %v1390_v1  ;;  %v1357_v5 = vld [vmem:[%s1616_s3 + $0x8] sm:$0xff]   ;;  %s1619_s16 = smov (!%p207_p3, %s1110_s16), 1  ;;  %v1356_v7 = vld [vmem:[%s1616_s3 + $0x18] sm:$0xff]   ;;  %v1392_v8 = vmov 0   ;;  %v1393_v9 = vmov 839922192  }
   0xd   : > { %1252 = vmatpush3.bf16.msra.mxu0 %v1353_v0  ;;  %1257 = vmatprep.mubr.msk.bf16.mxu0 %vm1391_vm0, %v1390_v1  ;;  %v247_v6 = vshrl.u32 %v246_v3, 7  ;;  %s1115_s27 = sshll.u32 %s1619_s16, 2  ;;  %s213_s30 = scalar_lea.vmem %s1614_s1, %s1619_s16  ;;  %223 = vst.msk [vmem:[#allocation2] sm:$0xf] %vm222_vm1, %v1392_v8  ;;  %224 = vst.msk [vmem:[#allocation2 + $0x4] sm:$0xf] %vm222_vm1, %v1392_v8  ;;  %v272_v10 = vunpack.c.l.s4 %v1393_v9 }
   0xe   : > { %1253 = vmatprep.subr.bf16.mxu0 %v1390_v1  ;;  %1267 = vmatprep.mubr.msk.bf16.mxu1 %vm1391_vm0, %v1390_v1  ;;  %s210_s7 = scalar_lea.vmem %s1613_s0, %s1115_s27  ;;  %s216_s10 = scalar_lea.vmem %s1615_s2, %s1619_s16  ;;  %v1117_v11 = vld [vmem:[%s213_s30] ss:$0 sm:$0xff]  ;;  %vm244_vm4 = vcmask 386048   ;;  %vm329_vm5 = vcmask 392192   ;;  %v1361_v63 = vld [vmem:[%s1616_s3 + $0x38] sm:$0xff]   ;;  %v1363_v9 = vld [vmem:[%s1616_s3 + $0x30] sm:$0xff]  }
   0xf   : > { %1262 = vmatpush3.bf16.msra.mxu1 %v1355_v4  ;;  %v252_v12 = vand.u32 1, %v247_v6  ;;  %v1360_v13 = vld [vmem:[%s1616_s3] sm:$0xff]   ;;  %v273_v16 = vunpack.c.0.s8 %v272_v10  ;;  %s220_s11 = scalar_lea.vmem %s1617_s4, %s1115_s27  ;;  %vm1037_vm6 = vcmask 519168  }
  0x10   : > { %1263 = vmatprep.subr.bf16.mxu1 %v1390_v1  ;;  %v225_v14 = vld [vmem:[%s210_s7] sm:$0xf] }
  0x11   : > { %1254 = vmatpush3.bf16.msra.mxu0 %v1354_v2  ;;  %v1118_v15 = vld [vmem:[%s216_s10] ss:$0 sm:$0xff]  ;;  %v233_v17 = vmul.f32 %v1117_v11, %v225_v14  ;;  %vm260_vm2 = vcmp.ne.s32.totalorder %v252_v12, 0  ;;  %vm264_vm3 = vcmp.ne.s32.totalorder %v252_v12, 1  ;;  %v276_v20 = vsub.s32 %v273_v16, %v247_v6 }
  0x12   : > { %1255 = vmatprep.subr.bf16.mxu0 %v1390_v1  ;;  %v1119_v18 = vsel %vm260_vm2, 1.0, %v1390_v1  ;;  %v1120_v19 = vsel %vm264_vm3, 1.0, %v1390_v1  ;;  %v1359_v54 = vld [vmem:[%s1616_s3 + $0x40] sm:$0xff]  }
  0x13   : > { %1264 = vmatpush3.bf16.msra.mxu1 %v1357_v5  ;;  %v241_v21 = vadd.f32 %v1118_v15, %v233_v17  ;;  %v263_v22 = vpack.c.bf16 %v1119_v18, %v1119_v18  ;;  %v267_v23 = vpack.c.bf16 %v1120_v19, %v1120_v19  ;;  %v1362_v5 = vld [vmem:[%s1616_s3 + $0x58] sm:$0xff]   ;;  %v1365_v17 = vld [vmem:[%s1616_s3 + $0x70] sm:$0xff]  }
  0x14   : > { %1265 = vmatprep.subr.bf16.mxu1 %v1390_v1  ;;  %v297_v39 = vld [vmem:[#allocation2] sm:$0x8] }
  0x15   : > { %1256 = vmatpush3.bf16.msra.mxu0 %v1356_v7  ;;  %v242_v24 = vmax.f32 %v241_v21, 0.0  ;;  %v277_v25 = vrot.slane %v263_v22, %v276_v20  ;;  %v455_v26 = vrot.slane %v267_v23, %v276_v20  ;;  %v268_v41 = vld [vmem:[#allocation2] sm:$0xc]  ;;  %v1366_v21 = vld [vmem:[%s1616_s3 + $0x48] sm:$0xff]  }
  0x16   : > { %1271 = vmatprep.subr.bf16.mxu0 %v1390_v1  ;;  %v1367_v23 = vld [vmem:[%s1616_s3 + $0x68] sm:$0xff]  }
  0x17   : > { %1266 = vmatpush3.bf16.msra.mxu1 %v1360_v13  ;;  %v243_v27 = vpack.c.bf16 %v242_v24, %v242_v24  ;;  %v1475_v28 = vshrl.u32 %v277_v25, 16  ;;  %v1477_v29 = vshll.u32 %v277_v25, 16  ;;  %v1479_v30 = vshll.u32 %v455_v26, 16  ;;  %v1364_v13 = vld [vmem:[%s1616_s3 + $0x50] sm:$0xff]  }
  0x18   : > { %1281 = vmatprep.subr.bf16.mxu1 %v1390_v1  ;;  %v1481_v31 = vshrl.u32 %v455_v26, 16  ;;  %v1368_v26 = vld [vmem:[%s1616_s3 + $0x88] sm:$0xff]  }
  0x19   : > { %245 = vst.msk [vmem:[#allocation2 + $0x4] sm:$0x3] %vm244_vm4, %v243_v27  ;;  %v281_v32 = vrot.slane %v1475_v28, 5  ;;  %v459_v33 = vrot.slane %v1479_v30, 5  ;;  %v551_v34 = vrot.slane %v1477_v29, 5  ;;  %v552_v35 = vrot.slane %v1475_v28, 4 }
  0x1a   : > { %v462_v36 = vrot.slane %v1481_v31, 4  ;;  %v284_v37 = vrot.slane %v1477_v29, 6  ;;  %v711_v4 = vrot.slane %v1481_v31, 7  ;;  %v794_v16 = vrot.slane %v1475_v28, 7  ;;  %v1369_v28 = vld [vmem:[%s1616_s3 + $0x60] sm:$0xff]  }
  0x1b   : > { %v553_v38 = vor.u32 %v552_v35, %v551_v34  ;;  %v286_v43 = vrot.slane %v281_v32, 4  ;;  %v467_v45 = vmul.bf16 %v459_v33, %v297_v39  ;;  %v557_v53 = vmul.bf16 %v551_v34, %v297_v39 }
  0x1c   : > { %v463_v40 = vor.u32 %v462_v36, %v459_v33  ;;  %v285_v42 = vor.u32 %v284_v37, %v281_v32  ;;  %v712_v12 = vor.u32 %v711_v4, %v1479_v30  ;;  %v795_v22 = vor.u32 %v794_v16, %v1477_v29  ;;  %v1370_v32 = vld [vmem:[%s1616_s3 + $0x80] sm:$0xff]  }
  0x1d   : > { %v554_v46 = vrot.slane %v553_v38, 4  ;;  %v952_v34 = vrot.slane %v1481_v31, 6  ;;  %v953_v35 = vrot.slane %v1479_v30, 7  ;;  %v1371_v36 = vld [vmem:[%s1616_s3 + $0xa0] sm:$0xff]  }
  0x1e   : > { %v464_v44 = vrot.slane %v463_v40, 4  ;;  %v289_v47 = vmul.bf16 %v285_v42, %v268_v41  ;;  %v1373_v40 = vld [vmem:[%s1616_s3 + $0x98] sm:$0xff]  }
  0x1f   : > { %v954_v31 = vor.u32 %v953_v35, %v952_v34 }
  0x20   : > { %v269_v48 = vld [vmem:[#allocation2 + $0x4] sm:$0x1]  ;;  %v951_v41 = vld [vmem:[#allocation2 + $0x4] sm:$0xe] }
  0x21   : > { %v1489_v49 = vld [vmem:[#allocation2 + $0x4] sm:$0x3]  ;;  %v290_v50 = vmul.bf16 %v286_v43, %v269_v48  ;;  %v1127_v51 = vcombine.low %v297_v39, %v269_v48  ;;  %v1372_v39 = vld [vmem:[%s1616_s3 + $0x78] sm:$0xff]   ;;  %v1376_v48 = vld [vmem:[%s1616_s3 + $0xb0] sm:$0xff]  }
  0x22   : > { %v468_v52 = vmul.bf16 %v464_v44, %v1489_v49  ;;  %v558_v57 = vmul.bf16 %v554_v46, %v1489_v49  ;;  %v710_v14 = vld [vmem:[#allocation2 + $0x4] sm:$0x7]  ;;  %v1374_v43 = vld [vmem:[%s1616_s3 + $0xb8] sm:$0xff]   ;;  %v956_v46 = vmul.bf16 %v954_v31, %v951_v41 }
  0x23   : > { %v310_v55 = vrot.slane %v1127_v51, 3  ;;  %v1132_v58 = vcombine.low %v289_v47, %v290_v50  ;;  %v714_v20 = vmul.bf16 %v712_v12, %v710_v14  ;;  %v797_v27 = vmul.bf16 %v795_v22, %v710_v14  ;;  %v1375_v47 = vld [vmem:[%s1616_s3 + $0x90] sm:$0xff]  }
  0x24   : > { %v1143_v56 = vcombine.low %v467_v45, %v468_v52  ;;  %v1154_v0 = vcombine.low %v557_v53, %v558_v57  ;;  %v1208_v50 = vcombine.low %v956_v46, %v956_v46  ;;  %v1377_v51 = vld [vmem:[%s1616_s3 + $0xd0] sm:$0xff]   ;;  %v1380_v52 = vld [vmem:[#allocation2 + $0x4] ss:$0 sps:$4 sm:$0x66]   ;;  %v1378_v53 = vld [vmem:[%s1616_s3 + $0xa8] sm:$0xff]  }
  0x25   : > { %1258 = vmatmul.mubr.msk.bf16.vlgmr.msra.gmra.mxu0 %vm329_vm5, %v310_v55  ;;  %v379_v59 = vshrl.u32 %v1132_v58, 16  ;;  %v382_v60 = vshll.u32 %v1132_v58, 16  ;;  %v1175_v25 = vcombine.low %v714_v20, %v714_v20  ;;  %v1186_v33 = vcombine.low %v797_v27, %v797_v27 }
  0x26   : > { %v482_v61 = vshrl.u32 %v1143_v56, 16  ;;  %v485_v62 = vshll.u32 %v1143_v56, 16  ;;  %1272 = vmatpush3.bf16.msra.mxu0 %v1359_v54  ;;  %1277 = vmatprep.mubr.msk.bf16.mxu0 %vm1391_vm0, %v1390_v1  ;;  %v572_v10 = vshrl.u32 %v1154_v0, 16  ;;  %v575_v11 = vshll.u32 %v1154_v0, 16  ;;  %v1379_v56 = vld [vmem:[%s1616_s3 + $0xc8] sm:$0xff]  }
  0x27   : > { %1273 = vmatprep.subr.bf16.mxu0 %v1390_v1  ;;  %v381_v2 = vrot.slane %v379_v59, 2  ;;  %v384_v3 = vrot.slane %v382_v60, 3  ;;  %v728_v29 = vshll.u32 %v1175_v25, 16  ;;  %v726_v37 = vshrl.u32 %v1175_v25, 16  ;;  %v1381_v60 = vld [vmem:[%s1616_s3 + $0xc0] sm:$0xff]  }
  0x28   : > { %v484_v6 = vrot.slane %v482_v61, 3  ;;  %v487_v7 = vrot.slane %v485_v62, 4  ;;  %v574_v18 = vrot.slane %v572_v10, 3  ;;  %v577_v19 = vrot.slane %v575_v11, 4 }
  0x29   : > { %v385_v8 = vor.u32 %v384_v3, %v381_v2  ;;  %v730_v38 = vrot.slane %v728_v29, 1  ;;  %v811_v30 = vshll.u32 %v1186_v33, 16  ;;  %v809_v44 = vshrl.u32 %v1186_v33, 16 }
  0x2a   : > { %1274 = vmatpush3.bf16.msra.mxu0 %v1361_v63  ;;  %v488_v15 = vor.u32 %v487_v7, %v484_v6  ;;  %v578_v24 = vor.u32 %v577_v19, %v574_v18  ;;  %v968_v54 = vshrl.u32 %v1208_v50, 16  ;;  %v971_v55 = vshll.u32 %v1208_v50, 16 }
  0x2b   : > { %1268 = vmatmul.mubr.msk.bf16.vlgmr.msra.gmra.mxu1 %vm329_vm5, %v385_v8  ;;  %1275 = vmatprep.subr.bf16.mxu0 %v1390_v1  ;;  %v731_v42 = vor.u32 %v730_v38, %v726_v37  ;;  %v813_v45 = vrot.slane %v811_v30, 1  ;;  %v888_v57 = vrot.slane %v1380_v52, 1 }
  0x2c   : > { %1282 = vmatpush3.bf16.msra.mxu1 %v1362_v5  ;;  %1287 = vmatprep.mubr.msk.bf16.mxu1 %vm1391_vm0, %v1390_v1  ;;  %v970_v58 = vrot.slane %v968_v54, 1  ;;  %v973_v59 = vrot.slane %v971_v55, 2 }
  0x2d   : > { %1283 = vmatprep.subr.bf16.mxu1 %v1390_v1 }
  0x2e   : > { %1276 = vmatpush3.bf16.msra.mxu0 %v1363_v9  ;;  %v974_v61 = vor.u32 %v973_v59, %v970_v58 }
  0x2f   : > { %1291 = vmatprep.subr.bf16.mxu0 %v1390_v1 }
  0x30   : > { %1284 = vmatpush3.bf16.msra.mxu1 %v1364_v13 }
  0x31   : > { %1278 = vmatmul.mubr.msk.bf16.vlgmr.msra.gmra.mxu0 %vm329_vm5, %v488_v15  ;;  %1285 = vmatprep.subr.bf16.mxu1 %v1390_v1 }
  0x32   : > { %1292 = vmatpush3.bf16.msra.mxu0 %v1365_v17  ;;  %1297 = vmatprep.mubr.msk.bf16.mxu0 %vm1391_vm0, %v1390_v1 }
  0x33   : > { %1293 = vmatprep.subr.bf16.mxu0 %v1390_v1 }
  0x34   : > { %1286 = vmatpush3.bf16.msra.mxu1 %v1366_v21 }
  0x35   : > { %1301 = vmatprep.subr.bf16.mxu1 %v1390_v1 }
  0x36   : > { %1294 = vmatpush3.bf16.msra.mxu0 %v1367_v23 }
  0x37   : > { %1288 = vmatmul.mubr.msk.bf16.vlgmr.msra.gmra.mxu1 %vm329_vm5, %v578_v24  ;;  %1295 = vmatprep.subr.bf16.mxu0 %v1390_v1 }
  0x38   : > { %1302 = vmatpush3.bf16.msra.mxu1 %v1368_v26  ;;  %1307 = vmatprep.mubr.msk.bf16.mxu1 %vm1391_vm0, %v1390_v1 }
  0x39   : > { %1303 = vmatprep.subr.bf16.mxu1 %v1390_v1 }
  0x3a   : > { %1296 = vmatpush3.bf16.msra.mxu0 %v1369_v28 }
  0x3b   : > { %1311 = vmatprep.subr.bf16.mxu0 %v1390_v1 }
  0x3c   : > { %1304 = vmatpush3.bf16.msra.mxu1 %v1370_v32 }
  0x3d   : > { %1298 = vmatmul.mubr.msk.bf16.vlgmr.msra.gmra.mxu0 %vm329_vm5, %v1489_v49  ;;  %1305 = vmatprep.subr.bf16.mxu1 %v1390_v1  ;;  %v814_v49 = vor.u32 %v813_v45, %v809_v44 }
  0x3e   : > { %1312 = vmatpush3.bf16.msra.mxu0 %v1371_v36  ;;  %1317 = vmatprep.mubr.msk.bf16.mxu0 %vm1391_vm0, %v1390_v1 }
  0x3f   : > { %1313 = vmatprep.subr.bf16.mxu0 %v1390_v1 }
  0x40   : > { %1306 = vmatpush3.bf16.msra.mxu1 %v1372_v39 }
  0x41   : > { %1321 = vmatprep.subr.bf16.mxu1 %v1390_v1 }
  0x42   : > { %1314 = vmatpush3.bf16.msra.mxu0 %v1373_v40 }
  0x43   : > { %1308 = vmatmul.mubr.msk.bf16.vlgmr.msra.gmra.mxu1 %vm329_vm5, %v731_v42  ;;  %1315 = vmatprep.subr.bf16.mxu0 %v1390_v1 }
  0x44   : > { %1322 = vmatpush3.bf16.msra.mxu1 %v1374_v43  ;;  %1327 = vmatprep.mubr.msk.bf16.mxu1 %vm1391_vm0, %v1390_v1 }
  0x45   : > { %1323 = vmatprep.subr.bf16.mxu1 %v1390_v1 }
  0x46   : > { %1316 = vmatpush3.bf16.msra.mxu0 %v1375_v47 }
  0x47   : > { %1331 = vmatprep.subr.bf16.mxu0 %v1390_v1 }
  0x48   : > { %1324 = vmatpush3.bf16.msra.mxu1 %v1376_v48 }
  0x49   : > { %1318 = vmatmul.mubr.msk.bf16.vlgmr.msra.gmra.mxu0 %vm329_vm5, %v814_v49  ;;  %1325 = vmatprep.subr.bf16.mxu1 %v1390_v1 }
  0x4a   : > { %1332 = vmatpush3.bf16.msra.mxu0 %v1377_v51  ;;  %1337 = vmatprep.mubr.msk.bf16.mxu0 %vm1391_vm0, %v1390_v1 }
  0x4b   : > { %1333 = vmatprep.subr.bf16.mxu0 %v1390_v1 }
  0x4c   : > { %1326 = vmatpush3.bf16.msra.mxu1 %v1378_v53 }
  0x4e   : > { %1334 = vmatpush3.bf16.msra.mxu0 %v1379_v56 }
  0x4f   : > { %1328 = vmatmul.mubr.msk.bf16.vlgmr.msra.gmra.mxu1 %vm329_vm5, %v888_v57  ;;  %1335 = vmatprep.subr.bf16.mxu0 %v1390_v1 }
  0x52   : > { %1336 = vmatpush3.bf16.msra.mxu0 %v1381_v60 }
  0x55   : > { %1338 = vmatmul.mubr.msk.bf16.vlgmr.msra.gmra.mxu0 %vm329_vm5, %v974_v61 }
  0xe5   : > { %v367_v62 = vpop.f32.mrf.mxu0 }
  0xe7   : > { %v1259_v63 = vpop.f32.mrf.mxu0 }
  0xe9   : > { %v370_v0 = vpop.f32.mrf.mxu0 }
  0xeb   : > { %v1260_v2 = vpop.f32.mrf.mxu0  ;;  %v441_v3 = vpop.f32.mrf.mxu1 }
  0xec   : > { %v442_v21 = vadd.f32 %v441_v3, %v367_v62 }
  0xed   : > { %v1269_v4 = vpop.f32.mrf.mxu1 }
  0xef   : > { %v444_v5 = vpop.f32.mrf.mxu1 }
  0xf1   : > { %v544_v6 = vpop.f32.mrf.mxu0  ;;  %v1270_v7 = vpop.f32.mrf.mxu1 }
  0xf2   : > { %v550_v24 = vadd.f32 %v544_v6, %v442_v21 }
  0xf3   : > { %v1279_v8 = vpop.f32.mrf.mxu0 }
  0xf5   : > { %v547_v9 = vpop.f32.mrf.mxu0 }
  0xf7   : > { %v1280_v10 = vpop.f32.mrf.mxu0  ;;  %v634_v11 = vpop.f32.mrf.mxu1 }
  0xf8   : > { %v640_v26 = vadd.f32 %v634_v11, %v550_v24 }
  0xf9   : > { %v1289_v12 = vpop.f32.mrf.mxu1 }
  0xfb   : > { %v637_v13 = vpop.f32.mrf.mxu1 }
  0xfd   : > { %v703_v1 = vpop.f32.mrf.mxu0  ;;  %v1290_v14 = vpop.f32.mrf.mxu1 }
  0xfe   : > { %v709_v28 = vadd.f32 %v703_v1, %v640_v26 }
  0xff   : > { %v1299_v15 = vpop.f32.mrf.mxu0 }
 0x101   : > { %v706_v16 = vpop.f32.mrf.mxu0 }
 0x103   : > { %v1300_v17 = vpop.f32.mrf.mxu0  ;;  %v787_v18 = vpop.f32.mrf.mxu1 }
 0x104   : > { %v793_v33 = vadd.f32 %v787_v18, %v709_v28 }
 0x105   : > { %v1309_v19 = vpop.f32.mrf.mxu1 }
 0x107   : > { %v790_v20 = vpop.f32.mrf.mxu1 }
 0x109   : > { %v870_v22 = vpop.f32.mrf.mxu0  ;;  %v1310_v23 = vpop.f32.mrf.mxu1 }
 0x10a   : > { %v876_v35 = vadd.f32 %v870_v22, %v793_v33 }
 0x10b   : > { %v1319_v25 = vpop.f32.mrf.mxu0 }
 0x10d   : > { %v873_v27 = vpop.f32.mrf.mxu0 }
 0x10f   : > { %v1320_v29 = vpop.f32.mrf.mxu0  ;;  %v944_v32 = vpop.f32.mrf.mxu1 }
 0x110   : > { %v950_v37 = vadd.f32 %v944_v32, %v876_v35 }
 0x111   : > { %v1329_v34 = vpop.f32.mrf.mxu1 }
 0x113   : > { %v947_v36 = vpop.f32.mrf.mxu1 }
 0x115   : > { %v1330_v38 = vpop.f32.mrf.mxu1  ;;  %v1030_v39 = vpop.f32.mrf.mxu0 }
 0x116   : > { %v1036_v30 = vadd.f32 %v1030_v39, %v950_v37 }
 0x117   : > { %v1339_v31 = vpop.f32.mrf.mxu0 }
 0x118   : > { %1038 = vst.msk [vmem:[%s220_s11] sm:$0xf] %vm1037_vm6, %v1036_v30 }
 0x119   : > { %v1033_v40 = vpop.f32.mrf.mxu0 }
 0x11b   : > { %v1340_v41 = vpop.f32.mrf.mxu0 }
 0x11c PF: > { %s14_s15 = sadd.s32 1, %s1388_s15  }
 0x11d   : > { %p11_p4 = scmp.ge.s32.totalorder %s14_s15, 4  }
 0x11f   :  { %13 = sbr.rel (!%p11_p4) target bundleno = 1 (0x1), region = 80 }

// kernel: ecn_pose_forward.31
= control target key start
LH: loop header
LB: loop body
LE: loop exit
PB: predicated region body
PF: predicated region fallthrough
CT: control target
= control target key end

     0   :  { %s806_s21 = smov 0   ;;  %s897_s0 = inlined_call_operand.vmem [shape: f32[2,4,64], index: 0, kind: input, shape index: {}]   ;;  %s898_s1 = inlined_call_operand.vmem [shape: f32[64,16], index: 1, kind: input, shape index: {}]   ;;  %s899_s2 = inlined_call_operand.vmem [shape: f32[16,64], index: 2, kind: input, shape index: {}]   ;;  %s900_s3 = inlined_call_operand.vmem [shape: f32[1,64], index: 3, kind: input, shape index: {}]   ;;  %s901_s4 = inlined_call_operand.vmem [shape: f32[1,64], index: 4, kind: input, shape index: {}]   ;;  %s902_s5 = inlined_call_operand.vmem [shape: f32[2,1,64], index: 5, kind: output, shape index: {0}]   ;;  %s903_s6 = inlined_call_operand.vmem [shape: f32[2,1,64], index: 6, kind: output, shape index: {1}]  }
   0x1 LB: > { %s661_s22 = sadd.s32 4294967295, %s767_s21   ;;  %p665_p0 = scmp.ge.s32.totalorder %s767_s21, 1  ;;  %s767_s21 = sphi %s806_s21, %s17_s21  }
   0x2   : > { %p214_p1 = scmp.lt.s32.totalorder %s767_s21, 3 }
   0x4   : > { %p215_p2 = pnand %p665_p0, %p214_p1 }
   0x5   : > { %p244_p3 = scmp.lt.s32.totalorder (!%p215_p2), %s661_s22, 1 }
   0x6   : > { %218 = sbr.rel (%p215_p2) target bundleno = 447 (0x1bf), region = 40 }
   0xb   : > { %v278_v0 = vld [vmem:[%s898_s1 + $0x38] sm:$0xff]  ;;  %v769_v1 = vmov 0.0   ;;  %v277_v2 = vld [vmem:[%s898_s1 + $0x30] sm:$0xff]  ;;  %s905_s22 = smov (!%p244_p3, %s661_s22), 1  ;;  %v276_v3 = vld [vmem:[%s898_s1 + $0x28] sm:$0xff]  ;;  %vm255_vm0 = vcmask 519168  }
   0xc   : > { %697 = vmatprep.subr.mxu0 %v769_v1  ;;  %716 = vmatprep.subr.mxu1 %v769_v1  ;;  %s666_s29 = sshll.u32 %s905_s22, 2  ;;  %v275_v4 = vld [vmem:[%s898_s1 + $0x20] sm:$0xff]  ;;  %v274_v6 = vld [vmem:[%s898_s1 + $0x18] sm:$0xff]  ;;  %v273_v10 = vld [vmem:[%s898_s1 + $0x10] sm:$0xff]  ;;  %vm770_vm1 = vmmov 0   ;;  %vm279_vm2 = vcmask 523264  }
   0xd   : > { %698 = vmatpush3.msra.mxu0 %v278_v0  ;;  %717 = vmatpush3.msra.mxu1 %v278_v0  ;;  %s247_s10 = scalar_lea.vmem %s897_s0, %s666_s29  ;;  %v272_v14 = vld [vmem:[%s898_s1 + $0x8] sm:$0xff]  ;;  %v271_v17 = vld [vmem:[%s898_s1] sm:$0xff]  ;;  %vm433_vm3 = vcmask 130048   ;;  %s250_s29 = scalar_lea.vmem %s902_s5, %s905_s22  ;;  %vm583_vm4 = vcmask 516096  }
   0xe   : > { %699 = vmatprep.subr.mxu0 %v769_v1  ;;  %718 = vmatprep.subr.mxu1 %v769_v1  ;;  %v254_v5 = vld [vmem:[%s247_s10] sm:$0xf]  ;;  %v432_v25 = vld [vmem:[%s899_s2 + $0x8] sm:$0xff]  ;;  %s253_s10 = scalar_lea.vmem %s903_s6, %s905_s22 }
   0xf   : > { %700 = vmatpush3.msra.mxu0 %v277_v2  ;;  %719 = vmatpush3.msra.mxu1 %v277_v2  ;;  %v256_v7 = vsel %vm255_vm0, %v254_v5, 0.0  ;;  %v263_v8 = vmul.f32 %v254_v5, %v254_v5  ;;  %v431_v26 = vld [vmem:[%s899_s2] sm:$0xff] }
  0x10   : > { %701 = vmatprep.subr.mxu0 %v769_v1  ;;  %720 = vmatprep.subr.mxu1 %v769_v1  ;;  %v257_v9 = vrot.slane %v256_v7, 4  ;;  %v581_v41 = vld [vmem:[%s900_s3] sm:$0x1] }
  0x11   : > { %702 = vmatpush3.msra.mxu0 %v276_v3  ;;  %721 = vmatpush3.msra.mxu1 %v276_v3  ;;  %v264_v11 = vsel %vm255_vm0, %v263_v8, 0.0  ;;  %v585_v44 = vld [vmem:[%s901_s4] sm:$0x1] }
  0x12   : > { %703 = vmatprep.subr.mxu0 %v769_v1  ;;  %722 = vmatprep.subr.mxu1 %v769_v1  ;;  %v258_v12 = vadd.f32 %v257_v9, %v256_v7  ;;  %v265_v13 = vrot.slane %v264_v11, 4 }
  0x13   : > { %704 = vmatpush3.msra.mxu0 %v275_v4  ;;  %723 = vmatpush3.msra.mxu1 %v275_v4 }
  0x14   : > { %705 = vmatprep.subr.mxu0 %v769_v1  ;;  %724 = vmatprep.subr.mxu1 %v769_v1  ;;  %v259_v15 = vrot.slane %v258_v12, 2  ;;  %v266_v16 = vadd.f32 %v265_v13, %v264_v11 }
  0x15   : > { %706 = vmatpush3.msra.mxu0 %v274_v6  ;;  %725 = vmatpush3.msra.mxu1 %v274_v6 }
  0x16   : > { %707 = vmatprep.subr.mxu0 %v769_v1  ;;  %726 = vmatprep.subr.mxu1 %v769_v1  ;;  %v260_v18 = vadd.f32 %v259_v15, %v258_v12  ;;  %v267_v19 = vrot.slane %v266_v16, 2 }
  0x17   : > { %708 = vmatpush3.msra.mxu0 %v273_v10  ;;  %727 = vmatpush3.msra.mxu1 %v273_v10 }
  0x18   : > { %709 = vmatprep.subr.mxu0 %v769_v1  ;;  %728 = vmatprep.subr.mxu1 %v769_v1  ;;  %v261_v20 = vrot.slane %v260_v18, 1  ;;  %v268_v21 = vadd.f32 %v267_v19, %v266_v16 }
  0x19   : > { %710 = vmatpush3.msra.mxu0 %v272_v14  ;;  %713 = vmatprep.mubr.msk.f32.mxu0 %vm770_vm1, %v769_v1 }
  0x1a   : > { %711 = vmatprep.subr.mxu0 %v769_v1  ;;  %729 = vmatpush3.msra.mxu1 %v272_v14  ;;  %v262_v22 = vadd.f32 %v261_v20, %v260_v18  ;;  %v269_v23 = vrot.slane %v268_v21, 1 }
  0x1b   : > { %712 = vmatpush3.msra.mxu0 %v271_v17  ;;  %730 = vmatprep.subr.mxu1 %v769_v1 }
  0x1c   : > { %731 = vmatpush3.msra.mxu1 %v271_v17  ;;  %732 = vmatprep.mubr.msk.f32.mxu1 %vm770_vm1, %v769_v1  ;;  %v270_v24 = vadd.f32 %v269_v23, %v268_v21 }
  0x1d   : > { %735 = vmatprep.subr.mxu0 %v769_v1  ;;  %742 = vmatprep.subr.mxu1 %v769_v1 }
  0x1e   : > { %714 = vmatmul.mubr.msk.f32.vlgmr.msra.gmra.mxu0 %vm279_vm2, %v262_v22  ;;  %733 = vmatmul.mubr.msk.f32.vlgmr.msra.gmra.mxu1 %vm279_vm2, %v270_v24 }
  0x1f   : > { %739 = vmatprep.mubr.msk.f32.mxu0 %vm770_vm1, %v769_v1  ;;  %746 = vmatprep.mubr.msk.f32.mxu1 %vm770_vm1, %v769_v1 }
  0x20   : > { %736 = vmatpush3.msra.mxu0 %v432_v25  ;;  %743 = vmatpush3.msra.mxu1 %v432_v25 }
  0x21   : > { %737 = vmatprep.subr.mxu0 %v769_v1  ;;  %744 = vmatprep.subr.mxu1 %v769_v1 }
  0x22   : > { %738 = vmatpush3.msra.mxu0 %v431_v26  ;;  %745 = vmatpush3.msra.mxu1 %v431_v26 }
  0xde   : > { %v349_v27 = vpop.f32.mrf.mxu0  ;;  %v422_v30 = vpop.f32.mrf.mxu1 }
  0xdf   : > { %v426_v28 = vmul.f32 0.0625, %v349_v27  ;;  %v427_v32 = vmul.f32 0.0625, %v422_v30 }
  0xe0   : > { %v715_v29 = vpop.f32.mrf.mxu0  ;;  %v734_v33 = vpop.f32.mrf.mxu1 }
  0xe1   : > { %v428_v31 = vmul.f32 %v426_v28, %v426_v28  ;;  %740 = vmatmul.mubr.msk.f32.vlgmr.msra.gmra.mxu0 %vm433_vm3, %v426_v28 }
  0xe3   : > { %v429_v34 = vsub.f32 %v427_v32, %v428_v31 }
  0xe5   : > { %v430_v35 = vmax.f32 %v429_v34, 0.0 }
  0xe7   : > { %747 = vmatmul.mubr.msk.f32.vlgmr.msra.gmra.mxu1 %vm433_vm3, %v430_v35 }
 0x1a1   : > { %v503_v36 = vpop.f32.mrf.mxu0 }
 0x1a3   : > { %v741_v37 = vpop.f32.mrf.mxu0 }
 0x1a7   : > { %v576_v38 = vpop.f32.mrf.mxu1 }
 0x1a8   : > { %v577_v39 = vadd.f32 1e-05, %v576_v38 }
 0x1a9   : > { %v748_v40 = vpop.f32.mrf.mxu1 }
 0x1aa   : > { %759 = vrsqrt.f32 %v577_v39 }
 0x1b7   : > { %v760_v42 = vpop.eup %759 }
 0x1b8   : > { %v582_v43 = vmul.f32 %v760_v42, %v581_v41 }
 0x1ba   : > { %584 = vst.msk [vmem:[%s250_s29] sm:$0x1] %vm583_vm4, %v582_v43  ;;  %v586_v45 = vmul.f32 %v582_v43, %v503_v36 }
 0x1bc   : > { %v587_v46 = vsub.f32 %v585_v44, %v586_v45 }
 0x1be   : > { %588 = vst.msk [vmem:[%s253_s10] sm:$0x1] %vm583_vm4, %v587_v46 }
 0x1bf PF: > { %s17_s21 = sadd.s32 1, %s767_s21  }
 0x1c0   : > { %p14_p4 = scmp.ge.s32.totalorder %s17_s21, 4  }
 0x1c2   :  { %16 = sbr.rel (!%p14_p4) target bundleno = 1 (0x1), region = 82 }

// kernel: ecn_pose_forward.32
= control target key start
LH: loop header
LB: loop body
LE: loop exit
PB: predicated region body
PF: predicated region fallthrough
CT: control target
= control target key end

     0   :  { %s1551_s15 = smov 0   ;;  %s1784_s0 = inlined_call_operand.vmem [shape: f32[2,4,64], index: 0, kind: input, shape index: {}]   ;;  %s1785_s1 = inlined_call_operand.vmem [shape: f32[2,1,64], index: 1, kind: input, shape index: {}]   ;;  %s1786_s2 = inlined_call_operand.vmem [shape: f32[2,1,64], index: 2, kind: input, shape index: {}]   ;;  %s1787_s3 = inlined_call_operand.vmem [shape: bf16[9,64,64], index: 3, kind: input, shape index: {}]   ;;  %s1788_s4 = inlined_call_operand.vmem [shape: f32[2,4,64], index: 4, kind: output, shape index: {}]  }
   0x1 LB: > { %s1181_s16 = sadd.s32 4294967295, %s1520_s15   ;;  %p1185_p0 = scmp.ge.s32.totalorder %s1520_s15, 1  ;;  %s1520_s15 = sphi %s1551_s15, %s14_s15  }
   0x2   : > { %p177_p1 = scmp.lt.s32.totalorder %s1520_s15, 3 }
   0x4   : > { %p178_p2 = pnand %p1185_p0, %p177_p1 }
   0x5   : > { %p207_p3 = scmp.lt.s32.totalorder (!%p178_p2), %s1181_s16, 1 }
   0x6   : > { %181 = sbr.rel (%p178_p2) target bundleno = 298 (0x12a), region = 36 }
   0xb   : > { %v1476_v0 = vld [vmem:[%s1787_s3 + $0x38] sm:$0xff]   ;;  %v1522_v1 = vmov 0.0   ;;  %v1477_v2 = vld [vmem:[%s1787_s3 + $0x30] sm:$0xff]   ;;  %vm1523_vm0 = vmmov 0   ;;  %vm222_vm1 = vcmask 519168   ;;  %v246_v4 = vlaneseq  ;;  %s1790_s16 = smov (!%p207_p3, %s1181_s16), 1 }
   0xc   : > { %1356 = vmatprep.subr.bf16.mxu0 %v1522_v1  ;;  %1368 = vmatprep.subr.bf16.mxu1 %v1522_v1  ;;  %v1478_v3 = vld [vmem:[%s1787_s3 + $0x18] sm:$0xff]   ;;  %v1480_v5 = vld [vmem:[%s1787_s3 + $0x10] sm:$0xff]   ;;  %v1479_v6 = vld [vmem:[%s1787_s3 + $0x28] sm:$0xff]   ;;  %s1186_s27 = sshll.u32 %s1790_s16, 2  ;;  %s213_s30 = scalar_lea.vmem %s1785_s1, %s1790_s16  ;;  %v1524_v7 = vmov 0   ;;  %vm244_vm4 = vcmask 517120  }
   0xd   : > { %1357 = vmatpush3.bf16.msra.mxu0 %v1476_v0  ;;  %1364 = vmatprep.mubr.msk.bf16.mxu0 %vm1523_vm0, %v1522_v1  ;;  %223 = vst.msk [vmem:[#allocation2] sm:$0xf] %vm222_vm1, %v1524_v7  ;;  %224 = vst.msk [vmem:[#allocation2 + $0x4] sm:$0xf] %vm222_vm1, %v1524_v7  ;;  %s210_s7 = scalar_lea.vmem %s1784_s0, %s1186_s27  ;;  %s216_s10 = scalar_lea.vmem %s1786_s2, %s1790_s16  ;;  %v1188_v8 = vld [vmem:[%s213_s30] ss:$0 sm:$0xff] }
   0xe   : > { %1358 = vmatprep.subr.bf16.mxu0 %v1522_v1  ;;  %1376 = vmatprep.mubr.msk.bf16.mxu1 %vm1523_vm0, %v1522_v1  ;;  %v247_v9 = vshrl.u32 %v246_v4, 7  ;;  %v1482_v10 = vld [vmem:[%s1787_s3 + $0x8] sm:$0xff]   ;;  %v225_v11 = vld [vmem:[%s210_s7] sm:$0xf]  ;;  %v1525_v13 = vmov 839922192   ;;  %s220_s6 = scalar_lea.vmem %s1788_s4, %s1186_s27 }
   0xf   : > { %1369 = vmatpush3.bf16.msra.mxu1 %v1478_v3  ;;  %v1189_v12 = vld [vmem:[%s216_s10] ss:$0 sm:$0xff]  ;;  %v272_v14 = vunpack.c.l.s4 %v1525_v13  ;;  %v233_v16 = vmul.f32 %v1188_v8, %v225_v11  ;;  %vm339_vm5 = vcmask 523264   ;;  %v1484_v54 = vld [vmem:[%s1787_s3 + $0x58] sm:$0xff]   ;;  %v1486_v61 = vld [vmem:[%s1787_s3 + $0x50] sm:$0xff]  }
  0x10   : > { %1370 = vmatprep.subr.bf16.mxu1 %v1522_v1  ;;  %v1481_v15 = vld [vmem:[%s1787_s3 + $0x20] sm:$0xff]   ;;  %v252_v17 = vand.u32 1, %v247_v9  ;;  %v1487_v3 = vld [vmem:[%s1787_s3 + $0x78] sm:$0xff]   ;;  %v1488_v7 = vld [vmem:[%s1787_s3 + $0x48] sm:$0xff]  }
  0x11   : > { %1359 = vmatpush3.bf16.msra.mxu0 %v1477_v2  ;;  %v273_v18 = vunpack.c.0.s8 %v272_v14  ;;  %v241_v19 = vadd.f32 %v1189_v12, %v233_v16  ;;  %v1485_v20 = vld [vmem:[%s1787_s3] sm:$0xff]   ;;  %v1491_v16 = vld [vmem:[%s1787_s3 + $0x68] sm:$0xff]  }
  0x12   : > { %1360 = vmatprep.subr.bf16.mxu0 %v1522_v1  ;;  %vm260_vm2 = vcmp.ne.s32.totalorder %v252_v17, 0  ;;  %vm264_vm3 = vcmp.ne.s32.totalorder %v252_v17, 1  ;;  %v1490_v12 = vld [vmem:[%s1787_s3 + $0x40] sm:$0xff]  }
  0x13   : > { %1371 = vmatpush3.bf16.msra.mxu1 %v1480_v5  ;;  %v1190_v21 = vsel %vm260_vm2, 1.0, %v1522_v1  ;;  %v1191_v22 = vsel %vm264_vm3, 1.0, %v1522_v1  ;;  %v276_v23 = vsub.s32 %v273_v18, %v247_v9  ;;  %v242_v24 = vmax.f32 %v241_v19, 0.0  ;;  %v1489_v9 = vld [vmem:[%s1787_s3 + $0x70] sm:$0xff]   ;;  %v1492_v18 = vld [vmem:[%s1787_s3 + $0x98] sm:$0xff]  }
  0x14   : > { %1372 = vmatprep.subr.bf16.mxu1 %v1522_v1  ;;  %v263_v25 = vpack.c.bf16 %v1190_v21, %v1190_v21  ;;  %v267_v26 = vpack.c.bf16 %v1191_v22, %v1191_v22  ;;  %v268_v38 = vld [vmem:[#allocation2] sm:$0xc] }
  0x15   : > { %1361 = vmatpush3.bf16.msra.mxu0 %v1479_v6  ;;  %v243_v27 = vpack.c.bf16 %v242_v24, %v242_v24  ;;  %v299_v43 = vld [vmem:[#allocation2] sm:$0x8]  ;;  %v1494_v24 = vld [vmem:[%s1787_s3 + $0x90] sm:$0xff]  }
  0x16   : > { %1362 = vmatprep.subr.bf16.mxu0 %v1522_v1  ;;  %v277_v28 = vrot.slane %v263_v25, %v276_v23  ;;  %v471_v29 = vrot.slane %v267_v26, %v276_v23  ;;  %v1493_v22 = vld [vmem:[%s1787_s3 + $0x60] sm:$0xff]  }
  0x17   : > { %1373 = vmatpush3.bf16.msra.mxu1 %v1482_v10  ;;  %245 = vst.msk [vmem:[#allocation2 + $0x4] sm:$0x3] %vm244_vm4, %v243_v27  ;;  %v1495_v27 = vld [vmem:[%s1787_s3 + $0xb8] sm:$0xff]  }
  0x18   : > { %1374 = vmatprep.subr.bf16.mxu1 %v1522_v1  ;;  %v1616_v30 = vshrl.u32 %v277_v28, 16  ;;  %v1618_v31 = vshll.u32 %v277_v28, 16  ;;  %v1620_v32 = vshll.u32 %v471_v29, 16  ;;  %v1622_v33 = vshrl.u32 %v471_v29, 16  ;;  %v1496_v29 = vld [vmem:[%s1787_s3 + $0x88] sm:$0xff]  }
  0x19   : > { %1363 = vmatpush3.bf16.msra.mxu0 %v1481_v15 }
  0x1a   : > { %1380 = vmatprep.subr.bf16.mxu0 %v1522_v1  ;;  %v281_v34 = vrot.slane %v1616_v30, 5  ;;  %v475_v35 = vrot.slane %v1620_v32, 5  ;;  %v478_v36 = vrot.slane %v1622_v33, 4  ;;  %v575_v37 = vrot.slane %v1618_v31, 5 }
  0x1b   : > { %1375 = vmatpush3.bf16.msra.mxu1 %v1485_v20  ;;  %v576_v39 = vrot.slane %v1616_v30, 4  ;;  %v284_v40 = vrot.slane %v1618_v31, 6  ;;  %v751_v13 = vrot.slane %v1622_v33, 7  ;;  %v842_v28 = vrot.slane %v1616_v30, 7 }
  0x1c   : > { %1392 = vmatprep.subr.bf16.mxu1 %v1522_v1  ;;  %v286_v41 = vrot.slane %v281_v34, 4  ;;  %v479_v42 = vor.u32 %v478_v36, %v475_v35  ;;  %v483_v52 = vmul.bf16 %v475_v35, %v299_v43  ;;  %v581_v62 = vmul.bf16 %v575_v37, %v299_v43  ;;  %v1497_v35 = vld [vmem:[%s1787_s3 + $0xb0] sm:$0xff]   ;;  %v1498_v36 = vld [vmem:[%s1787_s3 + $0x80] sm:$0xff]  }
  0x1d   : > { %v285_v44 = vor.u32 %v284_v40, %v281_v34  ;;  %v577_v46 = vor.u32 %v576_v39, %v575_v37  ;;  %v752_v21 = vor.u32 %v751_v13, %v1620_v32  ;;  %v843_v30 = vor.u32 %v842_v28, %v1618_v31  ;;  %v1500_v31 = vld [vmem:[%s1787_s3 + $0xd8] sm:$0xff]  }
  0x1e   : > { %v480_v45 = vrot.slane %v479_v42, 4  ;;  %v269_v47 = vld [vmem:[#allocation2 + $0x4] sm:$0x1] }
  0x1f   : > { %v1631_v48 = vld [vmem:[#allocation2 + $0x4] sm:$0x3]  ;;  %v289_v49 = vmul.bf16 %v285_v44, %v268_v38  ;;  %v290_v50 = vmul.bf16 %v286_v41, %v269_v47  ;;  %v1200_v51 = vcombine.low %v299_v43, %v269_v47  ;;  %v578_v56 = vrot.slane %v577_v46, 4  ;;  %v1499_v38 = vld [vmem:[%s1787_s3 + $0xa8] sm:$0xff]   ;;  %v1502_v44 = vld [vmem:[%s1787_s3 + $0xd0] sm:$0xff]  }
  0x20   : > { %v484_v53 = vmul.bf16 %v480_v45, %v1631_v48  ;;  %v750_v23 = vld [vmem:[#allocation2 + $0x4] sm:$0x7]  ;;  %v1503_v46 = vld [vmem:[%s1787_s3 + $0xf8] sm:$0xff]  }
  0x21   : > { %v314_v55 = vrot.slane %v1200_v51, 3  ;;  %v1206_v57 = vcombine.low %v289_v49, %v290_v50  ;;  %v582_v63 = vmul.bf16 %v578_v56, %v1631_v48  ;;  %v754_v26 = vmul.bf16 %v752_v21, %v750_v23  ;;  %v1501_v42 = vld [vmem:[%s1787_s3 + $0xa0] sm:$0xff]   ;;  %v1504_v50 = vld [vmem:[%s1787_s3 + $0xc8] sm:$0xff]   ;;  %v1505_v51 = vld [vmem:[%s1787_s3 + $0xf0] sm:$0xff]  }
  0x22   : > { %v1220_v58 = vcombine.low %v483_v52, %v484_v53  ;;  %v845_v39 = vmul.bf16 %v843_v30, %v750_v23  ;;  %v1017_v49 = vrot.slane %v1620_v32, 7  ;;  %v1506_v53 = vld [vmem:[%s1787_s3 + $0xc0] sm:$0xff]  }
  0x23   : > { %1365 = vmatmul.mubr.msk.bf16.vlgmr.msra.gmra.mxu0 %vm339_vm5, %v314_v55  ;;  %v389_v59 = vshrl.u32 %v1206_v57, 16  ;;  %v392_v60 = vshll.u32 %v1206_v57, 16  ;;  %v1234_v8 = vcombine.low %v581_v62, %v582_v63  ;;  %v1261_v34 = vcombine.low %v754_v26, %v754_v26  ;;  %v1507_v55 = vld [vmem:[%s1787_s3 + $0xe8] sm:$0xff]   ;;  %v1510_v62 = vld [vmem:[%s1787_s3 + $0x110] sm:$0xff]  }
  0x24   : > { %1381 = vmatpush3.bf16.msra.mxu0 %v1484_v54  ;;  %1388 = vmatprep.mubr.msk.bf16.mxu0 %vm1523_vm0, %v1522_v1  ;;  %v500_v5 = vshrl.u32 %v1220_v58, 16  ;;  %v503_v6 = vshll.u32 %v1220_v58, 16  ;;  %v1275_v43 = vcombine.low %v845_v39, %v845_v39  ;;  %v1015_v54 = vld [vmem:[#allocation2 + $0x4] sm:$0xe]  ;;  %v1508_v58 = vld [vmem:[%s1787_s3 + $0x118] sm:$0xff]  }
  0x25   : > { %1382 = vmatprep.subr.bf16.mxu0 %v1522_v1  ;;  %v391_v0 = vrot.slane %v389_v59, 2  ;;  %v394_v2 = vrot.slane %v392_v60, 3  ;;  %v598_v14 = vshrl.u32 %v1234_v8, 16  ;;  %v601_v15 = vshll.u32 %v1234_v8, 16  ;;  %v1509_v60 = vld [vmem:[%s1787_s3 + $0xe0] sm:$0xff]  }
  0x26   : > { %v502_v10 = vrot.slane %v500_v5, 3  ;;  %v505_v11 = vrot.slane %v503_v6, 4  ;;  %v770_v37 = vshll.u32 %v1261_v34, 16  ;;  %v768_v40 = vshrl.u32 %v1261_v34, 16  ;;  %v1513_v6 = vld [vmem:[%s1787_s3 + $0x100] sm:$0xff]  }
  0x27   : > { %v395_v4 = vor.u32 %v394_v2, %v391_v0  ;;  %v600_v19 = vrot.slane %v598_v14, 3  ;;  %v603_v20 = vrot.slane %v601_v15, 4  ;;  %v861_v47 = vshll.u32 %v1275_v43, 16  ;;  %v1511_v59 = vld [vmem:[#allocation2 + $0x4] ss:$0 sps:$4 sm:$0x66]  }
  0x28   : > { %1383 = vmatpush3.bf16.msra.mxu0 %v1486_v61  ;;  %v506_v17 = vor.u32 %v505_v11, %v502_v10  ;;  %v772_v41 = vrot.slane %v770_v37, 1  ;;  %v859_v32 = vshrl.u32 %v1275_v43, 16  ;;  %v946_v63 = vrot.slane %v1511_v59, 1 }
  0x29   : > { %1377 = vmatmul.mubr.msk.bf16.vlgmr.msra.gmra.mxu1 %vm339_vm5, %v395_v4  ;;  %1384 = vmatprep.subr.bf16.mxu0 %v1522_v1  ;;  %v604_v25 = vor.u32 %v603_v20, %v600_v19 }
  0x2a   : > { %1393 = vmatpush3.bf16.msra.mxu1 %v1487_v3  ;;  %1400 = vmatprep.mubr.msk.bf16.mxu1 %vm1523_vm0, %v1522_v1  ;;  %v773_v45 = vor.u32 %v772_v41, %v768_v40  ;;  %v1512_v3 = vld [vmem:[%s1787_s3 + $0x108] sm:$0xff]  }
  0x2b   : > { %1394 = vmatprep.subr.bf16.mxu1 %v1522_v1 }
  0x2c   : > { %1385 = vmatpush3.bf16.msra.mxu0 %v1488_v7 }
  0x2d   : > { %1386 = vmatprep.subr.bf16.mxu0 %v1522_v1 }
  0x2e   : > { %1395 = vmatpush3.bf16.msra.mxu1 %v1489_v9 }
  0x2f   : > { %1396 = vmatprep.subr.bf16.mxu1 %v1522_v1 }
  0x30   : > { %1387 = vmatpush3.bf16.msra.mxu0 %v1490_v12 }
  0x31   : > { %1404 = vmatprep.subr.bf16.mxu0 %v1522_v1 }
  0x32   : > { %1397 = vmatpush3.bf16.msra.mxu1 %v1491_v16 }
  0x33   : > { %1389 = vmatmul.mubr.msk.bf16.vlgmr.msra.gmra.mxu0 %vm339_vm5, %v506_v17  ;;  %1398 = vmatprep.subr.bf16.mxu1 %v1522_v1 }
  0x34   : > { %1405 = vmatpush3.bf16.msra.mxu0 %v1492_v18  ;;  %1412 = vmatprep.mubr.msk.bf16.mxu0 %vm1523_vm0, %v1522_v1 }
  0x35   : > { %1406 = vmatprep.subr.bf16.mxu0 %v1522_v1 }
  0x36   : > { %1399 = vmatpush3.bf16.msra.mxu1 %v1493_v22 }
  0x37   : > { %1416 = vmatprep.subr.bf16.mxu1 %v1522_v1 }
  0x38   : > { %1407 = vmatpush3.bf16.msra.mxu0 %v1494_v24 }
  0x39   : > { %1401 = vmatmul.mubr.msk.bf16.vlgmr.msra.gmra.mxu1 %vm339_vm5, %v604_v25  ;;  %1408 = vmatprep.subr.bf16.mxu0 %v1522_v1 }
  0x3a   : > { %1417 = vmatpush3.bf16.msra.mxu1 %v1495_v27  ;;  %1424 = vmatprep.mubr.msk.bf16.mxu1 %vm1523_vm0, %v1522_v1 }
  0x3b   : > { %1418 = vmatprep.subr.bf16.mxu1 %v1522_v1 }
  0x3c   : > { %1409 = vmatpush3.bf16.msra.mxu0 %v1496_v29 }
  0x3d   : > { %1410 = vmatprep.subr.bf16.mxu0 %v1522_v1 }
  0x3e   : > { %1419 = vmatpush3.bf16.msra.mxu1 %v1497_v35 }
  0x3f   : > { %1420 = vmatprep.subr.bf16.mxu1 %v1522_v1 }
  0x40   : > { %1411 = vmatpush3.bf16.msra.mxu0 %v1498_v36 }
  0x41   : > { %1428 = vmatprep.subr.bf16.mxu0 %v1522_v1 }
  0x42   : > { %1421 = vmatpush3.bf16.msra.mxu1 %v1499_v38 }
  0x43   : > { %1413 = vmatmul.mubr.msk.bf16.vlgmr.msra.gmra.mxu0 %vm339_vm5, %v1631_v48  ;;  %1422 = vmatprep.subr.bf16.mxu1 %v1522_v1  ;;  %v1016_v48 = vrot.slane %v1622_v33, 6  ;;  %v863_v33 = vrot.slane %v861_v47, 1 }
  0x44   : > { %1429 = vmatpush3.bf16.msra.mxu0 %v1500_v31  ;;  %1436 = vmatprep.mubr.msk.bf16.mxu0 %vm1523_vm0, %v1522_v1 }
  0x45   : > { %1430 = vmatprep.subr.bf16.mxu0 %v1522_v1  ;;  %v1018_v52 = vor.u32 %v1017_v49, %v1016_v48  ;;  %v864_v56 = vor.u32 %v863_v33, %v859_v32 }
  0x46   : > { %1423 = vmatpush3.bf16.msra.mxu1 %v1501_v42 }
  0x47   : > { %1440 = vmatprep.subr.bf16.mxu1 %v1522_v1  ;;  %v1020_v57 = vmul.bf16 %v1018_v52, %v1015_v54 }
  0x48   : > { %1431 = vmatpush3.bf16.msra.mxu0 %v1502_v44 }
  0x49   : > { %1425 = vmatmul.mubr.msk.bf16.vlgmr.msra.gmra.mxu1 %vm339_vm5, %v773_v45  ;;  %1432 = vmatprep.subr.bf16.mxu0 %v1522_v1  ;;  %v1303_v61 = vcombine.low %v1020_v57, %v1020_v57 }
  0x4a   : > { %1441 = vmatpush3.bf16.msra.mxu1 %v1503_v46  ;;  %1448 = vmatprep.mubr.msk.bf16.mxu1 %vm1523_vm0, %v1522_v1 }
  0x4b   : > { %1442 = vmatprep.subr.bf16.mxu1 %v1522_v1  ;;  %v1034_v0 = vshrl.u32 %v1303_v61, 16  ;;  %v1037_v2 = vshll.u32 %v1303_v61, 16 }
  0x4c   : > { %1433 = vmatpush3.bf16.msra.mxu0 %v1504_v50 }
  0x4d   : > { %1434 = vmatprep.subr.bf16.mxu0 %v1522_v1  ;;  %v1036_v4 = vrot.slane %v1034_v0, 1  ;;  %v1039_v5 = vrot.slane %v1037_v2, 2 }
  0x4e   : > { %1443 = vmatpush3.bf16.msra.mxu1 %v1505_v51 }
  0x4f   : > { %1444 = vmatprep.subr.bf16.mxu1 %v1522_v1  ;;  %v1040_v7 = vor.u32 %v1039_v5, %v1036_v4 }
  0x50   : > { %1435 = vmatpush3.bf16.msra.mxu0 %v1506_v53 }
  0x51   : > { %1452 = vmatprep.subr.bf16.mxu0 %v1522_v1 }
  0x52   : > { %1445 = vmatpush3.bf16.msra.mxu1 %v1507_v55 }
  0x53   : > { %1437 = vmatmul.mubr.msk.bf16.vlgmr.msra.gmra.mxu0 %vm339_vm5, %v864_v56  ;;  %1446 = vmatprep.subr.bf16.mxu1 %v1522_v1 }
  0x54   : > { %1453 = vmatpush3.bf16.msra.mxu0 %v1508_v58  ;;  %1460 = vmatprep.mubr.msk.bf16.mxu0 %vm1523_vm0, %v1522_v1 }
  0x55   : > { %1454 = vmatprep.subr.bf16.mxu0 %v1522_v1 }
  0x56   : > { %1447 = vmatpush3.bf16.msra.mxu1 %v1509_v60 }
  0x58   : > { %1455 = vmatpush3.bf16.msra.mxu0 %v1510_v62 }
  0x59   : > { %1449 = vmatmul.mubr.msk.bf16.vlgmr.msra.gmra.mxu1 %vm339_vm5, %v946_v63  ;;  %1456 = vmatprep.subr.bf16.mxu0 %v1522_v1 }
  0x5c   : > { %1457 = vmatpush3.bf16.msra.mxu0 %v1512_v3 }
  0x5d   : > { %1458 = vmatprep.subr.bf16.mxu0 %v1522_v1 }
  0x60   : > { %1459 = vmatpush3.bf16.msra.mxu0 %v1513_v6 }
  0x63   : > { %1461 = vmatmul.mubr.msk.bf16.vlgmr.msra.gmra.mxu0 %vm339_vm5, %v1040_v7 }
  0xe3   : > { %v377_v8 = vpop.f32.mrf.mxu0 }
  0xe5   : > { %v1366_v9 = vpop.f32.mrf.mxu0 }
  0xe7   : > { %v380_v10 = vpop.f32.mrf.mxu0 }
  0xe9   : > { %v1367_v11 = vpop.f32.mrf.mxu0  ;;  %v457_v12 = vpop.f32.mrf.mxu1 }
  0xea   : > { %v458_v36 = vadd.f32 %v457_v12, %v377_v8 }
  0xeb   : > { %v1378_v13 = vpop.f32.mrf.mxu1 }
  0xed   : > { %v460_v14 = vpop.f32.mrf.mxu1 }
  0xef   : > { %v1379_v15 = vpop.f32.mrf.mxu1 }
  0xf3   : > { %v568_v16 = vpop.f32.mrf.mxu0 }
  0xf4   : > { %v574_v38 = vadd.f32 %v568_v16, %v458_v36 }
  0xf5   : > { %v1390_v17 = vpop.f32.mrf.mxu0 }
  0xf7   : > { %v571_v18 = vpop.f32.mrf.mxu0 }
  0xf9   : > { %v1391_v19 = vpop.f32.mrf.mxu0  ;;  %v666_v20 = vpop.f32.mrf.mxu1 }
  0xfa   : > { %v672_v40 = vadd.f32 %v666_v20, %v574_v38 }
  0xfb   : > { %v1402_v21 = vpop.f32.mrf.mxu1 }
  0xfd   : > { %v669_v22 = vpop.f32.mrf.mxu1 }
  0xff   : > { %v1403_v1 = vpop.f32.mrf.mxu1 }
 0x103   : > { %v743_v23 = vpop.f32.mrf.mxu0 }
 0x104   : > { %v749_v42 = vadd.f32 %v743_v23, %v672_v40 }
 0x105   : > { %v1414_v24 = vpop.f32.mrf.mxu0 }
 0x107   : > { %v746_v25 = vpop.f32.mrf.mxu0 }
 0x109   : > { %v1415_v26 = vpop.f32.mrf.mxu0  ;;  %v835_v27 = vpop.f32.mrf.mxu1 }
 0x10a   : > { %v841_v44 = vadd.f32 %v835_v27, %v749_v42 }
 0x10b   : > { %v1426_v28 = vpop.f32.mrf.mxu1 }
 0x10d   : > { %v838_v29 = vpop.f32.mrf.mxu1 }
 0x10f   : > { %v1427_v34 = vpop.f32.mrf.mxu1 }
 0x113   : > { %v926_v35 = vpop.f32.mrf.mxu0 }
 0x114   : > { %v932_v46 = vadd.f32 %v926_v35, %v841_v44 }
 0x115   : > { %v1438_v30 = vpop.f32.mrf.mxu0 }
 0x117   : > { %v929_v37 = vpop.f32.mrf.mxu0 }
 0x119   : > { %v1439_v39 = vpop.f32.mrf.mxu0  ;;  %v1008_v31 = vpop.f32.mrf.mxu1 }
 0x11a   : > { %v1014_v47 = vadd.f32 %v1008_v31, %v932_v46 }
 0x11b   : > { %v1450_v41 = vpop.f32.mrf.mxu1 }
 0x11d   : > { %v1011_v43 = vpop.f32.mrf.mxu1 }
 0x11f   : > { %v1451_v45 = vpop.f32.mrf.mxu1 }
 0x123   : > { %v1102_v48 = vpop.f32.mrf.mxu0 }
 0x124   : > { %v1108_v49 = vadd.f32 %v1102_v48, %v1014_v47 }
 0x125   : > { %v1462_v50 = vpop.f32.mrf.mxu0 }
 0x126   : > { %1109 = vst.msk [vmem:[%s220_s6] sm:$0xf] %vm222_vm1, %v1108_v49 }
 0x127   : > { %v1105_v51 = vpop.f32.mrf.mxu0 }
 0x129   : > { %v1463_v32 = vpop.f32.mrf.mxu0 }
 0x12a PF: > { %s14_s15 = sadd.s32 1, %s1520_s15  }
 0x12b   : > { %p11_p4 = scmp.ge.s32.totalorder %s14_s15, 4  }
 0x12d   :  { %13 = sbr.rel (!%p11_p4) target bundleno = 1 (0x1), region = 80 }

// kernel: ecn_pose_forward.33
= control target key start
LH: loop header
LB: loop body
LE: loop exit
PB: predicated region body
PF: predicated region fallthrough
CT: control target
= control target key end

     0   :  { %s280_s9 = smov 0   ;;  %s300_s0 = inlined_call_operand.vmem [shape: f32[2,1,2,1,128], index: 0, kind: input, shape index: {}]   ;;  %s301_s1 = inlined_call_operand.vmem [shape: f32[2,1,2,1,96], index: 1, kind: input, shape index: {}]   ;;  %s302_s2 = inlined_call_operand.vmem [shape: f32[2,1,1,64], index: 2, kind: output, shape index: {}]  }
   0x1 LB: > { %s236_s10 = sadd.s32 4294967295, %s261_s9   ;;  %p240_p0 = scmp.ge.s32.totalorder %s261_s9, 1  ;;  %s261_s9 = sphi %s280_s9, %s12_s9  }
   0x2   : > { %p120_p1 = scmp.lt.s32.totalorder %s261_s9, 3 }
   0x4   : > { %p121_p2 = pnand %p240_p0, %p120_p1 }
   0x5   : > { %p143_p3 = scmp.lt.s32.totalorder (!%p121_p2), %s236_s10, 1  ;;  %s263_s18 = smov (!%p121_p2), 80  }
   0x6   : > { %124 = sbr.rel (%p121_p2) target bundleno = 143 (0x8f), region = 28  ;;  %s264_s19 = smov (!%p121_p2), 64  }
   0xb   : > { %s304_s10 = smov (!%p143_p3, %s236_s10), 1  ;;  %vm172_vm0 = vcmask 392192   ;;  %vm175_vm1 = vcmask 516096  }
   0xc   : > { %s241_s11 = sshll.u32 %s304_s10, 1  ;;  %s153_s22 = scalar_lea.vmem %s302_s2, %s304_s10 }
   0xd   : > { %s150_s14 = scalar_lea.vmem %s301_s1, %s241_s11  ;;  %s146_s17 = scalar_lea.vmem %s300_s0, %s241_s11 }
   0xe   : > { %v156_v0 = vld [vmem:[%s150_s14] sm:$0x1]  ;;  %v157_v1 = vld [vmem:[%s150_s14 + $0x1] sm:$0x1] }
   0xf   : > { %v154_v2 = vld [vmem:[%s146_s17] sm:$0x1]  ;;  %v159_v3 = vadd.f32 %v157_v1, %v156_v0  ;;  %v155_v4 = vld [vmem:[%s146_s17 + $0x1] sm:$0x1] }
  0x10   : > { %v158_v5 = vadd.f32 %v155_v4, %v154_v2 }
  0x11   : > { %167 = vrot.lane.b32.xlu0 %v159_v3, %s263_s18 }
  0x15   : > { %161 = vrot.lane.b32.xlu0 %v158_v5, %s264_s19 }
  0x83   : > { %v168_v6 = vpop.permute.xlu0 %167 }
  0x84   : > { %v170_v7 = vadd.f32 %v168_v6, %v159_v3 }
  0x86   : > { %v171_v8 = vmul.f32 0.25, %v170_v7 }
  0x87   : > { %v162_v9 = vpop.permute.xlu0 %161 }
  0x88   : > { %v164_v10 = vadd.f32 %v162_v9, %v158_v5  ;;  %v173_v12 = vsel %vm172_vm0, %v171_v8, 0.0 }
  0x8a   : > { %v165_v11 = vmul.f32 0.25, %v164_v10 }
  0x8c   : > { %v174_v13 = vadd.f32 %v173_v12, %v165_v11 }
  0x8e   : > { %176 = vst.msk [vmem:[%s153_s22] sm:$0x1] %vm175_vm1, %v174_v13 }
  0x8f PF: > { %s12_s9 = sadd.s32 1, %s261_s9  }
  0x90   : > { %p9_p4 = scmp.ge.s32.totalorder %s12_s9, 4  }
  0x92   :  { %11 = sbr.rel (!%p9_p4) target bundleno = 1 (0x1), region = 61 }

// kernel: ecn_pose_forward.34
= control target key start
LH: loop header
LB: loop body
LE: loop exit
PB: predicated region body
PF: predicated region fallthrough
CT: control target
= control target key end

     0   :  { %s786_s21 = smov 0   ;;  %s847_s0 = inlined_call_operand.vmem [shape: f32[2,1,64], index: 0, kind: input, shape index: {}]   ;;  %s848_s1 = inlined_call_operand.vmem [shape: f32[64,16], index: 1, kind: input, shape index: {}]   ;;  %s849_s2 = inlined_call_operand.vmem [shape: f32[16,64], index: 2, kind: input, shape index: {}]   ;;  %s850_s3 = inlined_call_operand.vmem [shape: f32[1,64], index: 3, kind: input, shape index: {}]   ;;  %s851_s4 = inlined_call_operand.vmem [shape: f32[1,64], index: 4, kind: input, shape index: {}]   ;;  %s852_s5 = inlined_call_operand.vmem [shape: f32[2,1,64], index: 5, kind: output, shape index: {0}]   ;;  %s853_s6 = inlined_call_operand.vmem [shape: f32[2,1,64], index: 6, kind: output, shape index: {1}]  }
   0x1 LB: > { %s642_s22 = sadd.s32 4294967295, %s747_s21   ;;  %p646_p0 = scmp.ge.s32.totalorder %s747_s21, 1  ;;  %s747_s21 = sphi %s786_s21, %s17_s21  }
   0x2   : > { %p213_p1 = scmp.lt.s32.totalorder %s747_s21, 3 }
   0x4   : > { %p214_p2 = pnand %p646_p0, %p213_p1 }
   0x5   : > { %p242_p3 = scmp.lt.s32.totalorder (!%p214_p2), %s642_s22, 1 }
   0x6   : > { %217 = sbr.rel (%p214_p2) target bundleno = 446 (0x1be), region = 40 }
   0xb   : > { %v262_v0 = vld [vmem:[%s848_s1 + $0x38] sm:$0xff]  ;;  %v749_v1 = vmov 0.0   ;;  %v261_v2 = vld [vmem:[%s848_s1 + $0x30] sm:$0xff]  ;;  %v260_v3 = vld [vmem:[%s848_s1 + $0x28] sm:$0xff]  ;;  %s855_s22 = smov (!%p242_p3, %s642_s22), 1  ;;  %vm263_vm0 = vcmask 523264  }
   0xc   : > { %677 = vmatprep.subr.mxu0 %v749_v1  ;;  %696 = vmatprep.subr.mxu1 %v749_v1  ;;  %v259_v4 = vld [vmem:[%s848_s1 + $0x20] sm:$0xff]  ;;  %v258_v5 = vld [vmem:[%s848_s1 + $0x18] sm:$0xff]  ;;  %s244_s11 = scalar_lea.vmem %s847_s0, %s855_s22  ;;  %v257_v6 = vld [vmem:[%s848_s1 + $0x10] sm:$0xff]  ;;  %vm750_vm1 = vmmov 0   ;;  %vm417_vm2 = vcmask 130048   ;;  %s247_s28 = scalar_lea.vmem %s852_s5, %s855_s22  ;;  %vm567_vm3 = vcmask 516096  }
   0xd   : > { %678 = vmatpush3.msra.mxu0 %v262_v0  ;;  %697 = vmatpush3.msra.mxu1 %v262_v0  ;;  %v256_v7 = vld [vmem:[%s848_s1 + $0x8] sm:$0xff]  ;;  %v251_v8 = vld [vmem:[%s244_s11] sm:$0x1]  ;;  %s250_s9 = scalar_lea.vmem %s853_s6, %s855_s22 }
   0xe   : > { %679 = vmatprep.subr.mxu0 %v749_v1  ;;  %698 = vmatprep.subr.mxu1 %v749_v1  ;;  %v255_v9 = vld [vmem:[%s848_s1] sm:$0xff]  ;;  %v253_v10 = vmul.f32 %v251_v8, %v251_v8  ;;  %v416_v11 = vld [vmem:[%s849_s2 + $0x8] sm:$0xff] }
   0xf   : > { %680 = vmatpush3.msra.mxu0 %v261_v2  ;;  %699 = vmatpush3.msra.mxu1 %v261_v2  ;;  %v415_v12 = vld [vmem:[%s849_s2] sm:$0xff] }
  0x10   : > { %681 = vmatprep.subr.mxu0 %v749_v1  ;;  %700 = vmatprep.subr.mxu1 %v749_v1  ;;  %v565_v27 = vld [vmem:[%s850_s3] sm:$0x1] }
  0x11   : > { %682 = vmatpush3.msra.mxu0 %v260_v3  ;;  %701 = vmatpush3.msra.mxu1 %v260_v3  ;;  %v569_v30 = vld [vmem:[%s851_s4] sm:$0x1] }
  0x12   : > { %683 = vmatprep.subr.mxu0 %v749_v1  ;;  %702 = vmatprep.subr.mxu1 %v749_v1 }
  0x13   : > { %684 = vmatpush3.msra.mxu0 %v259_v4  ;;  %703 = vmatpush3.msra.mxu1 %v259_v4 }
  0x14   : > { %685 = vmatprep.subr.mxu0 %v749_v1  ;;  %704 = vmatprep.subr.mxu1 %v749_v1 }
  0x15   : > { %686 = vmatpush3.msra.mxu0 %v258_v5  ;;  %705 = vmatpush3.msra.mxu1 %v258_v5 }
  0x16   : > { %687 = vmatprep.subr.mxu0 %v749_v1  ;;  %706 = vmatprep.subr.mxu1 %v749_v1 }
  0x17   : > { %688 = vmatpush3.msra.mxu0 %v257_v6  ;;  %707 = vmatpush3.msra.mxu1 %v257_v6 }
  0x18   : > { %689 = vmatprep.subr.mxu0 %v749_v1  ;;  %708 = vmatprep.subr.mxu1 %v749_v1 }
  0x19   : > { %690 = vmatpush3.msra.mxu0 %v256_v7  ;;  %709 = vmatpush3.msra.mxu1 %v256_v7 }
  0x1a   : > { %691 = vmatprep.subr.mxu0 %v749_v1  ;;  %710 = vmatprep.subr.mxu1 %v749_v1 }
  0x1b   : > { %692 = vmatpush3.msra.mxu0 %v255_v9  ;;  %693 = vmatprep.mubr.msk.f32.mxu0 %vm750_vm1, %v749_v1 }
  0x1c   : > { %711 = vmatpush3.msra.mxu1 %v255_v9  ;;  %712 = vmatprep.mubr.msk.f32.mxu1 %vm750_vm1, %v749_v1 }
  0x1d   : > { %694 = vmatmul.mubr.msk.f32.vlgmr.msra.gmra.mxu0 %vm263_vm0, %v251_v8  ;;  %713 = vmatmul.mubr.msk.f32.vlgmr.msra.gmra.mxu1 %vm263_vm0, %v253_v10 }
  0x1e   : > { %715 = vmatprep.subr.mxu0 %v749_v1  ;;  %719 = vmatprep.mubr.msk.f32.mxu0 %vm750_vm1, %v749_v1 }
  0x1f   : > { %722 = vmatprep.subr.mxu1 %v749_v1  ;;  %726 = vmatprep.mubr.msk.f32.mxu1 %vm750_vm1, %v749_v1 }
  0x20   : > { %716 = vmatpush3.msra.mxu0 %v416_v11  ;;  %723 = vmatpush3.msra.mxu1 %v416_v11 }
  0x21   : > { %717 = vmatprep.subr.mxu0 %v749_v1  ;;  %724 = vmatprep.subr.mxu1 %v749_v1 }
  0x22   : > { %718 = vmatpush3.msra.mxu0 %v415_v12  ;;  %725 = vmatpush3.msra.mxu1 %v415_v12 }
  0xdd   : > { %v333_v13 = vpop.f32.mrf.mxu0  ;;  %v406_v14 = vpop.f32.mrf.mxu1 }
  0xde   : > { %v410_v15 = vmul.f32 0.25, %v333_v13  ;;  %v411_v16 = vmul.f32 0.25, %v406_v14 }
  0xdf   : > { %v695_v17 = vpop.f32.mrf.mxu0  ;;  %v714_v18 = vpop.f32.mrf.mxu1 }
  0xe0   : > { %v412_v19 = vmul.f32 %v410_v15, %v410_v15  ;;  %720 = vmatmul.mubr.msk.f32.vlgmr.msra.gmra.mxu0 %vm417_vm2, %v410_v15 }
  0xe2   : > { %v413_v20 = vsub.f32 %v411_v16, %v412_v19 }
  0xe4   : > { %v414_v21 = vmax.f32 %v413_v20, 0.0 }
  0xe6   : > { %727 = vmatmul.mubr.msk.f32.vlgmr.msra.gmra.mxu1 %vm417_vm2, %v414_v21 }
 0x1a0   : > { %v487_v22 = vpop.f32.mrf.mxu0 }
 0x1a2   : > { %v721_v23 = vpop.f32.mrf.mxu0 }
 0x1a6   : > { %v560_v24 = vpop.f32.mrf.mxu1 }
 0x1a7   : > { %v561_v25 = vadd.f32 1e-05, %v560_v24 }
 0x1a8   : > { %v728_v26 = vpop.f32.mrf.mxu1 }
 0x1a9   : > { %739 = vrsqrt.f32 %v561_v25 }
 0x1b6   : > { %v740_v28 = vpop.eup %739 }
 0x1b7   : > { %v566_v29 = vmul.f32 %v740_v28, %v565_v27 }
 0x1b9   : > { %568 = vst.msk [vmem:[%s247_s28] sm:$0x1] %vm567_vm3, %v566_v29  ;;  %v570_v31 = vmul.f32 %v566_v29, %v487_v22 }
 0x1bb   : > { %v571_v32 = vsub.f32 %v569_v30, %v570_v31 }
 0x1bd   : > { %572 = vst.msk [vmem:[%s250_s9] sm:$0x1] %vm567_vm3, %v571_v32 }
 0x1be PF: > { %s17_s21 = sadd.s32 1, %s747_s21  }
 0x1bf   : > { %p14_p4 = scmp.ge.s32.totalorder %s17_s21, 4  }
 0x1c1   :  { %16 = sbr.rel (!%p14_p4) target bundleno = 1 (0x1), region = 82 }

// kernel: ecn_pose_forward.35
= control target key start
LH: loop header
LB: loop body
LE: loop exit
PB: predicated region body
PF: predicated region fallthrough
CT: control target
= control target key end

     0   :  { %s444_s15 = smov 0   ;;  %s479_s0 = inlined_call_operand.vmem [shape: f32[2,1,64], index: 0, kind: input, shape index: {}]   ;;  %s480_s1 = inlined_call_operand.vmem [shape: f32[2,1,64], index: 1, kind: input, shape index: {}]   ;;  %s481_s2 = inlined_call_operand.vmem [shape: f32[2,1,64], index: 2, kind: input, shape index: {}]   ;;  %s482_s3 = inlined_call_operand.vmem [shape: bf16[64,12], index: 3, kind: input, shape index: {}]   ;;  %s483_s4 = inlined_call_operand.vmem [shape: f32[2,1,12], index: 4, kind: output, shape index: {}]  }
   0x1 LB: > { %s366_s16 = sadd.s32 4294967295, %s415_s15   ;;  %p370_p0 = scmp.ge.s32.totalorder %s415_s15, 1  ;;  %s415_s15 = sphi %s444_s15, %s14_s15  }
   0x2   : > { %p176_p1 = scmp.lt.s32.totalorder %s415_s15, 3 }
   0x4   : > { %p177_p2 = pnand %p370_p0, %p176_p1 }
   0x5   : > { %p204_p3 = scmp.lt.s32.totalorder (!%p177_p2), %s366_s16, 1 }
   0x6   : > { %180 = sbr.rel (%p177_p2) target bundleno = 227 (0xe3), region = 36 }
   0xb   : > { %v405_v0 = vld [vmem:[%s482_s3 + $0x18] sm:$0xff]   ;;  %v417_v1 = vmov 0.0   ;;  %v406_v2 = vld [vmem:[%s482_s3 + $0x10] sm:$0xff]   ;;  %vm418_vm0 = vmmov 0   ;;  %s485_s16 = smov (!%p204_p3, %s366_s16), 1  ;;  %v407_v3 = vld [vmem:[%s482_s3 + $0x8] sm:$0xff]  }
   0xc   : > { %383 = vmatprep.subr.bf16.mxu0 %v417_v1  ;;  %391 = vmatprep.mubr.msk.bf16.mxu0 %vm418_vm0, %v417_v1  ;;  %s206_s25 = scalar_lea.vmem %s479_s0, %s485_s16  ;;  %s209_s28 = scalar_lea.vmem %s480_s1, %s485_s16  ;;  %v408_v8 = vld [vmem:[%s482_s3] sm:$0xff]   ;;  %vm256_vm1 = vcmask 523264   ;;  %vm302_vm2 = vcmask 90112  }
   0xd   : > { %384 = vmatpush3.bf16.msra.mxu0 %v405_v0  ;;  %s212_s5 = scalar_lea.vmem %s481_s2, %s485_s16  ;;  %v217_v4 = vld [vmem:[%s206_s25] sm:$0x1]  ;;  %s215_s10 = scalar_lea.vmem %s483_s4, %s485_s16 }
   0xe   : > { %385 = vmatprep.subr.bf16.mxu0 %v417_v1  ;;  %v218_v5 = vld [vmem:[%s209_s28] sm:$0x1] }
   0xf   : > { %v219_v6 = vmul.f32 %v218_v5, %v217_v4  ;;  %v220_v7 = vld [vmem:[%s212_s5] sm:$0x1] }
  0x11   : > { %386 = vmatpush3.bf16.msra.mxu0 %v406_v2  ;;  %v221_v9 = vadd.f32 %v220_v7, %v219_v6 }
  0x12   : > { %387 = vmatprep.subr.bf16.mxu0 %v417_v1 }
  0x13   : > { %v222_v10 = vmax.f32 %v221_v9, 0.0 }
  0x15   : > { %388 = vmatpush3.bf16.msra.mxu0 %v407_v3  ;;  %v223_v11 = vpack.c.bf16 %v222_v10, %v222_v10 }
  0x16   : > { %389 = vmatprep.subr.bf16.mxu0 %v417_v1 }
  0x19   : > { %390 = vmatpush3.bf16.msra.mxu0 %v408_v8 }
  0x1c   : > { %392 = vmatmul.mubr.msk.bf16.vlgmr.msra.gmra.mxu0 %vm256_vm1, %v223_v11 }
  0xdc   : > { %v294_v12 = vpop.f32.mrf.mxu0 }
  0xdd   : > { %v301_v13 = vmul.f32 0.01, %v294_v12 }
  0xde   : > { %v393_v14 = vpop.f32.mrf.mxu0 }
  0xdf   : > { %303 = vst.msk [vmem:[%s215_s10] sm:$0x1] %vm302_vm2, %v301_v13 }
  0xe0   : > { %v297_v15 = vpop.f32.mrf.mxu0 }
  0xe2   : > { %v394_v16 = vpop.f32.mrf.mxu0 }
  0xe3 PF: > { %s14_s15 = sadd.s32 1, %s415_s15  }
  0xe4   : > { %p11_p4 = scmp.ge.s32.totalorder %s14_s15, 4  }
  0xe6   :  { %13 = sbr.rel (!%p11_p4) target bundleno = 1 (0x1), region = 72 }

</bundles_post_ra>
